<compile_context>
chip_gen: v7x
topology: tpu7x:2x2x1
jax: 0.10.0
libtpu: 0.0.40
codegen_flags: <defaults>
</compile_context>

<pallas_src>
import numpy as np
import jax
import jax.numpy as jnp
from jax import lax
from jax.experimental import pallas as pl
from jax.experimental.pallas import tpu as pltpu

NUMBER_F = 4
SCALE = 64

# (name, C_out, C_in) in forward order; concat inputs follow torch.cat order.
_LAYERS = [
    ("e_conv11", NUMBER_F, 1),
    ("e_conv21", NUMBER_F, NUMBER_F),
    ("e_conv31", NUMBER_F, NUMBER_F),
    ("e_conv42", NUMBER_F, NUMBER_F),
    ("e_conv52", NUMBER_F, 2 * NUMBER_F),
    ("e_conv62", NUMBER_F, 2 * NUMBER_F),
    ("e_conv72", 1, 2 * NUMBER_F),
    ("e_conv43", NUMBER_F, NUMBER_F),
    ("e_conv53", NUMBER_F, 2 * NUMBER_F),
    ("e_conv63", NUMBER_F, 2 * NUMBER_F),
    ("e_conv73", 1, 2 * NUMBER_F),
]
_W_ROWS = sum(c for _, c, _ in _LAYERS)    # 38 packed weight rows
_CIN_PAD = 2 * NUMBER_F                    # 8: sublane-aligned per-tap stripe
_W_COLS = 9 * _CIN_PAD                     # 72 packed weight cols (9 taps x 8)
_TN = (((0,), (0,)), ((), ()))             # lhs^T @ rhs dimension numbers


# ----------------------------------------------------------------------------
# Kernels
# ----------------------------------------------------------------------------
def _lumlog_down_kernel(x_ref, drT_ref, dc_ref, xd_ref):
    """Fused rgb2y + log + bilinear(1/64, align_corners=True) downsample.

    grid = (B, nH); the row-block axis is a reduction accumulated into the
    VMEM-resident output block (init under pl.when(i == 0)).  Do NOT reorder
    the grid or mark the nH axis 'parallel'."""
    i = pl.program_id(1)
    r = x_ref[0, 0]
    g = x_ref[0, 1]
    b = x_ref[0, 2]
    xl = jnp.log(0.2126 * r + 0.7152 * g + 0.0722 * b + 1e-5)       # (th, W)
    # bf16 operands (f32 accumulate): halves MXU passes on the K=W contraction.
    tmp = jnp.dot(xl.astype(jnp.bfloat16), dc_ref[...],
                  preferred_element_type=jnp.float32)               # (th, w)
    part = lax.dot_general(drT_ref[...], tmp, _TN,                  # (h, w)
                           preferred_element_type=jnp.float32)

    @pl.when(i == 0)
    def _():
        xd_ref[...] = jnp.zeros_like(xd_ref)

    xd_ref[0, 0] += part


def _make_backbone_kernel(h, w_img, w_full, meta):
    """11-layer 3x3 zero-padded conv backbone on the (1, hw) downsampled map,
    followed by sigmoid and the column (w -> W) half of the bilinear upsample.

    Shifts are static slices of a zero-padded VMEM buffer whose writable
    window starts at a lane-aligned column; the 9 taps occupy 8-row
    (sublane-aligned) stripes of the stacked-activation scratch so one matmul
    per layer consumes all taps of all (torch.cat'ed) input channels."""
    hw = h * w_img
    offs = [(dy - 1) * w_img + (dx - 1) for dy in range(3) for dx in range(3)]
    base = ((w_img + 1 + 127) // 128) * 128   # lane-aligned writable window

    def kernel(xd_ref, mask_ref, w_ref, b_ref, uc_ref,
               x72_ref, x73_ref, r23h_ref, pad_ref, stk_ref):
        pad_ref[...] = jnp.zeros_like(pad_ref)   # zero border, once
        stk_ref[...] = jnp.zeros_like(stk_ref)   # unused stripe rows stay 0
        w_all = w_ref[...]                       # (_W_ROWS, _W_COLS)
        b_all = b_ref[...]                       # (_W_ROWS, 1)

        def conv(parts, idx):
            r0, cout, cin = meta[idx]
            # write the (torch.cat'ed) input channels into the padded buffer
            row = 0
            for p in parts:
                c = p.shape[0]
                pad_ref[row:row + c, base:base + hw] = p
                row += c
            # 9 shifted + edge-masked copies, each in its own 8-row stripe
            for k in range(9):
                s = pad_ref[0:cin, base + offs[k]:base + offs[k] + hw]
                stk_ref[k * _CIN_PAD:k * _CIN_PAD + cin, :] = s * mask_ref[k:k + 1, :]
            # zero-padded weight columns kill the unused stripe rows
            out = jnp.dot(w_all[r0:r0 + cout, :], stk_ref[...],
                          preferred_element_type=jnp.float32)
            return out + b_all[r0:r0 + cout, :]

        relu = lambda t: jnp.maximum(t, 0.0)
        x0 = xd_ref[0]                                    # (1, hw)
        x11 = relu(conv([x0], 0))
        x21 = relu(conv([x11], 1))
        x31 = relu(conv([x21], 2))
        x42 = relu(conv([x31], 3))
        x52 = relu(conv([x31, x42], 4))
        x62 = relu(conv([x21, x52], 5))
        x72 = conv([x11, x62], 6)
        x43 = relu(conv([x31], 7))
        x53 = relu(conv([x31, x43], 8))
        x63 = relu(conv([x21, x53], 9))
        x73 = conv([x11, x63], 10)

        x72_ref[0] = x72
        x73_ref[0] = x73

        r2 = 1.0 / (1.0 + jnp.exp(-x72))                  # sigmoid, (1, hw)
        r3 = 1.0 / (1.0 + jnp.exp(-x73))
        uc = uc_ref[...]                                  # (w, W)
        # Column half of the bilinear upsample, fused here.  Row-by-row static
        # slices avoid an in-kernel (1, hw) -> (h, w) reshape; r2h/r3h are
        # packed side-by-side into one (h, 2W) slab for the tone-map kernel.
        for y in range(h):
            r2row = r2[:, y * w_img:(y + 1) * w_img]      # (1, w)
            r3row = r3[:, y * w_img:(y + 1) * w_img]
            r23h_ref[0, y:y + 1, 0:w_full] = jnp.dot(
                r2row, uc, preferred_element_type=jnp.float32)
            r23h_ref[0, y:y + 1, w_full:2 * w_full] = jnp.dot(
                r3row, uc, preferred_element_type=jnp.float32)

    return kernel


def _make_tonemap_kernel(w_full, compute_dtype):
    """Row upsample + tone-mapping; luminance recomputed from x (no HBM read).
    A single dot(ur, r23h) produces BOTH r2 and r3 upsampled row blocks."""
    ct = compute_dtype

    def kernel(x_ref, r23h_ref, ur_ref, ldr_ref, lum_ref):
        r = x_ref[0, 0]
        g = x_ref[0, 1]
        b = x_ref[0, 2]
        y = 0.2126 * r + 0.7152 * g + 0.0722 * b          # (th, W)
        lum_ref[0, 0] = y
        up = jnp.dot(ur_ref[...], r23h_ref[0],
                     preferred_element_type=jnp.float32)  # (th, 2W)
        r2u = up[:, 0:w_full]
        r3u = up[:, w_full:2 * w_full]
        l0 = y + 1e-5                                     # pow(lum + 1e-5, 1)
        l1 = r2u * pl.reciprocal(r2u + l0, approx=True)   # r2 / (r2 + l0)
        # 1 - (l1+eps)^(2*r3); exp/log chain in ct (bf16 on the small-VMEM chip)
        l2 = 1.0 - jnp.exp((2.0 * r3u.astype(ct)) * jnp.log(l1.astype(ct) + 1e-5))
        # One reciprocal shared by all 3 channels.
        # NOTE: matches torch: x / rgb2y(x) has no epsilon in the divisor, so
        # pure-black pixels still produce inf/NaN exactly like the reference.
        inv_y = pl.reciprocal(y, approx=True)
        ldr_ref[0, 0] = (jnp.sqrt((r * inv_y + 1e-5).astype(ct)) * l2).astype(jnp.float32)
        ldr_ref[0, 1] = (jnp.sqrt((g * inv_y + 1e-5).astype(ct)) * l2).astype(jnp.float32)
        ldr_ref[0, 2] = (jnp.sqrt((b * inv_y + 1e-5).astype(ct)) * l2).astype(jnp.float32)

    return kernel


# ----------------------------------------------------------------------------
# Host-side helpers (static tables, params, chip config, forward)
# ----------------------------------------------------------------------------
def _interp_matrix(out_size, in_size, transpose=False):
    """Bilinear (align_corners=True) interpolation matrix of shape (out, in)."""
    m = np.zeros((out_size, in_size), dtype=np.float32)
    for i in range(out_size):
        src = 0.0 if out_size == 1 else i * (in_size - 1) / (out_size - 1)
        i0 = int(np.floor(src))
        i1 = min(i0 + 1, in_size - 1)
        f = src - i0
        m[i, i0] += 1.0 - f
        m[i, i1] += f
    if transpose:
        m = m.T
    return jnp.asarray(m)


def _tap_masks(h, w):
    """(9, h*w) masks: 1 where the 3x3 tap (dy,dx) reads inside the image."""
    m = np.zeros((9, h * w), dtype=np.float32)
    for dy in range(3):
        for dx in range(3):
            k = dy * 3 + dx
            for y in range(h):
                for x in range(w):
                    if 0 <= y + dy - 1 < h and 0 <= x + dx - 1 < w:
                        m[k, y * w + x] = 1.0
    return jnp.asarray(m)


def _tpu_config():
    """(th_cap, vmem_limit_bytes, tone_compute_dtype) from VMEM capacity."""
    try:
        vmem = int(pltpu.get_tpu_info().vmem_capacity_bytes)
    except Exception:
        vmem = 128 << 20
    if vmem >= (100 << 20):
        # v5e / v6e: 128 MiB physical VMEM -> big tiles; keep f32 tone curve
        # (v5e has no bf16 VPU/EUP).
        return 256, 96 << 20, jnp.float32
    # v7x: 64 MiB VMEM per TensorCore -> cap th, bf16 tone-curve chain.
    return 128, 48 << 20, jnp.bfloat16


def _pick_th(H, cap):
    """Largest multiple-of-8 divisor of H that is <= cap."""
    best, t = 8, 8
    while t <= min(H, cap):
        if H % t == 0:
            best = t
        t += 8
    return best


def init_params(key):
    params = {}
    for name, cout, cin in _LAYERS:
        key, kw, kb = jax.random.split(key, 3)
        w = jax.random.normal(kw, (cout, cin, 3, 3), jnp.float32) / np.sqrt(9.0 * cin)
        b = jax.random.normal(kb, (cout,), jnp.float32) * 0.01
        params[name] = (w, b)
    return params


def tmonet_forward(x, params, th=None):
    B, C, H, W = x.shape
    th_cap, vmem_limit, tone_dtype = _tpu_config()
    if th is None:
        th = _pick_th(H, th_cap)
    assert C == 3 and W % 128 == 0 and H % th == 0 and th % 8 == 0
    h, w = int(np.floor(H / SCALE)), int(np.floor(W / SCALE))
    assert h >= 2 and w >= 2
    hw = h * w
    nH = H // th

    # static interpolation / mask tables (trace-time constants)
    drT = _interp_matrix(h, H, transpose=True)                        # (H, h)
    dc = _interp_matrix(w, W, transpose=True).astype(jnp.bfloat16)    # (W, w)
    ur = _interp_matrix(H, h)                                         # (H, h)
    uc = _interp_matrix(W, w, transpose=True)                         # (w, W)
    masks = _tap_masks(h, w)                                          # (9, hw)

    # pack conv weights/biases: W2[co, k*8 + ci] = w[co, ci, ky, kx], k=ky*3+kx
    # (each tap gets an 8-column stripe, matching the sublane-aligned stacking)
    wblk, bblk, meta = [], [], []
    r0 = 0
    for name, cout, cin in _LAYERS:
        wt, bs = params[name]
        w2 = jnp.transpose(wt, (0, 2, 3, 1))                          # (cout,3,3,cin)
        w2 = jnp.pad(w2, ((0, 0), (0, 0), (0, 0), (0, _CIN_PAD - cin)))
        wblk.append(w2.reshape(cout, _W_COLS))
        bblk.append(bs.reshape(cout, 1))
        meta.append((r0, cout, cin))
        r0 += cout
    w_all = jnp.concatenate(wblk, axis=0)                             # (38, 72)
    b_all = jnp.concatenate(bblk, axis=0)                             # (38, 1)
    meta = tuple(meta)

    # ---- kernel 1: fused luminance + log + 1/64 bilinear downsample ----
    x_down = pl.pallas_call(
        _lumlog_down_kernel,
        out_shape=jax.ShapeDtypeStruct((B, 1, h, w), jnp.float32),
        grid=(B, nH),
        in_specs=[pl.BlockSpec((1, 3, th, W), lambda b, i: (b, 0, i, 0)),
                  pl.BlockSpec((th, h), lambda b, i: (i, 0)),
                  pl.BlockSpec((W, w), lambda b, i: (0, 0))],
        out_specs=pl.BlockSpec((1, 1, h, w), lambda b, i: (b, 0, 0, 0)),
        compiler_params=pltpu.CompilerParams(
            dimension_semantics=("parallel", "arbitrary"),
            vmem_limit_bytes=vmem_limit),
    )(x, drT, dc)
    # TODO(synk): for B == 1 on v7x, split the nH reduction across the two
    # TensorCores (per-core partial (h, w) accumulators + a tiny combine).

    # ---- kernel 2: conv backbone + sigmoid + column upsample (fused) ----
    xd_flat = x_down.reshape(B, 1, hw)
    base = ((w + 1 + 127) // 128) * 128
    pad_w = base + hw + w + 1
    x72, x73, r23h = pl.pallas_call(
        _make_backbone_kernel(h, w, W, meta),
        out_shape=(jax.ShapeDtypeStruct((B, 1, hw), jnp.float32),
                   jax.ShapeDtypeStruct((B, 1, hw), jnp.float32),
                   jax.ShapeDtypeStruct((B, h, 2 * W), jnp.float32)),
        grid=(B,),
        in_specs=[pl.BlockSpec((1, 1, hw), lambda b: (b, 0, 0)),
                  pl.BlockSpec((9, hw), lambda b: (0, 0)),
                  pl.BlockSpec((_W_ROWS, _W_COLS), lambda b: (0, 0)),
                  pl.BlockSpec((_W_ROWS, 1), lambda b: (0, 0)),
                  pl.BlockSpec((w, W), lambda b: (0, 0))],
        out_specs=[pl.BlockSpec((1, 1, hw), lambda b: (b, 0, 0)),
                   pl.BlockSpec((1, 1, hw), lambda b: (b, 0, 0)),
                   pl.BlockSpec((1, h, 2 * W), lambda b: (b, 0, 0))],
        scratch_shapes=[pltpu.VMEM((_CIN_PAD, pad_w), jnp.float32),
                        pltpu.VMEM((_W_COLS, hw), jnp.float32)],
        compiler_params=pltpu.CompilerParams(dimension_semantics=("parallel",)),
    )(xd_flat, masks, w_all, b_all, uc)

    # ---- kernel 3: row upsample + tone-mapping (also emits lum) ----
    ldr, lum = pl.pallas_call(
        _make_tonemap_kernel(W, tone_dtype),
        out_shape=(jax.ShapeDtypeStruct((B, 3, H, W), jnp.float32),
                   jax.ShapeDtypeStruct((B, 1, H, W), jnp.float32)),
        grid=(B, nH),
        in_specs=[pl.BlockSpec((1, 3, th, W), lambda b, i: (b, 0, i, 0)),
                  pl.BlockSpec((1, h, 2 * W), lambda b, i: (b, 0, 0)),
                  pl.BlockSpec((th, h), lambda b, i: (i, 0))],
        out_specs=[pl.BlockSpec((1, 3, th, W), lambda b, i: (b, 0, i, 0)),
                   pl.BlockSpec((1, 1, th, W), lambda b, i: (b, 0, i, 0))],
        compiler_params=pltpu.CompilerParams(
            dimension_semantics=("parallel", "parallel"),
            vmem_limit_bytes=vmem_limit),
    )(x, r23h, ur)

    # TODO(synk): the torch forward's print(...) side effects are not reproduced.
    return (x, lum, ldr, x72.reshape(-1), x73.reshape(-1), x_down.reshape(-1))


if __name__ == "__main__":
    key = jax.random.PRNGKey(0)
    kx, kp = jax.random.split(key)
    B, H, W = 2, 128, 128                       # image-like positive inputs
    x = jax.random.uniform(kx, (B, 3, H, W), jnp.float32, minval=0.05, maxval=1.0)
    params = init_params(kp)

    fwd = jax.jit(tmonet_forward)
    outs = jax.block_until_ready(fwd(x, params))

    x_out, lum, ldr, ans, ans2, xdflat = outs
    hw = (H // SCALE) * (W // SCALE)
    assert x_out.shape == (B, 3, H, W)
    assert lum.shape == (B, 1, H, W)
    assert ldr.shape == (B, 3, H, W)
    assert ans.shape == (B * hw,)
    assert ans2.shape == (B * hw,)
    assert xdflat.shape == (B * hw,)
    assert bool(jnp.isfinite(ldr).all())
    assert bool(jnp.isfinite(lum).all())
    assert bool(jnp.isfinite(ans).all()) and bool(jnp.isfinite(ans2).all())
    assert bool(jnp.isfinite(xdflat).all())
    print("KERNEL_OK")
</pallas_src>

<mosaic_0001>
module attributes {stable_mosaic.version = 11 : i64} {
  func.func @_lumlog_down_kernel(%arg0: i32, %arg1: i32, %arg2: memref<1x3x128x128xf32, #tpu.memory_space<vmem>>, %arg3: memref<128x2xf32, #tpu.memory_space<vmem>>, %arg4: memref<128x2xbf16, #tpu.memory_space<vmem>>, %arg5: memref<1x1x2x2xf32, #tpu.memory_space<vmem>>) attributes {dimension_semantics = [#tpu.dimension_semantics<parallel>, #tpu.dimension_semantics<arbitrary>], iteration_bounds = array<i64: 2, 1>, scalar_prefetch = 0 : i64, scratch_operands = 0 : i64, tpu.core_type = #tpu.core_type<tc>, window_params = [{transform_indices = @transform_0, window_bounds = array<i64: 1, 3, 128, 128>}, {transform_indices = @transform_1, window_bounds = array<i64: 128, 2>}, {pipeline_mode = #tpu.pipeline_mode<synchronous>, transform_indices = @transform_2, window_bounds = array<i64: 128, 2>}, {transform_indices = @transform_3, window_bounds = array<i64: 1, 1, 2, 2>}]} {
    %c0 = arith.constant 0 : index
    %c0_0 = arith.constant 0 : index
    %c0_1 = arith.constant 0 : index
    %c0_2 = arith.constant 0 : index
    %0 = vector.load %arg2[%c0, %c0_0, %c0_1, %c0_2] : memref<1x3x128x128xf32, #tpu.memory_space<vmem>>, vector<1x1x128x128xf32>
    %1 = vector.shape_cast %0 : vector<1x1x128x128xf32> to vector<128x128xf32>
    %c0_3 = arith.constant 0 : index
    %c1 = arith.constant 1 : index
    %c0_4 = arith.constant 0 : index
    %c0_5 = arith.constant 0 : index
    %2 = vector.load %arg2[%c0_3, %c1, %c0_4, %c0_5] : memref<1x3x128x128xf32, #tpu.memory_space<vmem>>, vector<1x1x128x128xf32>
    %3 = vector.shape_cast %2 : vector<1x1x128x128xf32> to vector<128x128xf32>
    %c0_6 = arith.constant 0 : index
    %c2 = arith.constant 2 : index
    %c0_7 = arith.constant 0 : index
    %c0_8 = arith.constant 0 : index
    %4 = vector.load %arg2[%c0_6, %c2, %c0_7, %c0_8] : memref<1x3x128x128xf32, #tpu.memory_space<vmem>>, vector<1x1x128x128xf32>
    %5 = vector.shape_cast %4 : vector<1x1x128x128xf32> to vector<128x128xf32>
    %cst = arith.constant 2.126000e-01 : f32
    %6 = vector.broadcast %cst : f32 to vector<128x128xf32>
    %7 = arith.mulf %6, %1 : vector<128x128xf32>
    %cst_9 = arith.constant 7.152000e-01 : f32
    %8 = vector.broadcast %cst_9 : f32 to vector<128x128xf32>
    %9 = arith.mulf %8, %3 : vector<128x128xf32>
    %10 = arith.addf %7, %9 : vector<128x128xf32>
    %cst_10 = arith.constant 7.220000e-02 : f32
    %11 = vector.broadcast %cst_10 : f32 to vector<128x128xf32>
    %12 = arith.mulf %11, %5 : vector<128x128xf32>
    %13 = arith.addf %10, %12 : vector<128x128xf32>
    %cst_11 = arith.constant 9.99999974E-6 : f32
    %14 = vector.broadcast %cst_11 : f32 to vector<128x128xf32>
    %15 = arith.addf %13, %14 : vector<128x128xf32>
    %16 = math.log %15 : vector<128x128xf32>
    %17 = arith.truncf %16 : vector<128x128xf32> to vector<128x128xbf16>
    %c0_12 = arith.constant 0 : index
    %c0_13 = arith.constant 0 : index
    %18 = vector.load %arg4[%c0_12, %c0_13] : memref<128x2xbf16, #tpu.memory_space<vmem>>, vector<128x2xbf16>
    %cst_14 = arith.constant dense<0.000000e+00> : vector<128x2xf32>
    %19 = tpu.matmul %17, %18, %cst_14 {dimension_numbers = #tpu.dot_dimension_numbers<[1], [0], [0], [1], [0, 0, 1, 1], [], []>} : vector<128x128xbf16>, vector<128x2xbf16>, vector<128x2xf32> -> vector<128x2xf32>
    %c0_15 = arith.constant 0 : index
    %c0_16 = arith.constant 0 : index
    %20 = vector.load %arg3[%c0_15, %c0_16] : memref<128x2xf32, #tpu.memory_space<vmem>>, vector<128x2xf32>
    %cst_17 = arith.constant dense<0.000000e+00> : vector<2x2xf32>
    %21 = tpu.matmul %20, %19, %cst_17 {dimension_numbers = #tpu.dot_dimension_numbers<[0], [0], [1], [1], [0, 1, 1, 1], [], []>} : vector<128x2xf32>, vector<128x2xf32>, vector<2x2xf32> -> vector<2x2xf32>
    %c0_i32 = arith.constant 0 : i32
    %22 = arith.cmpi eq, %arg1, %c0_i32 : i32
    %23 = arith.extui %22 : i1 to i32
    %c0_i32_18 = arith.constant 0 : i32
    %24 = arith.cmpi ne, %23, %c0_i32_18 : i32
    scf.if %24 {
      %cst_27 = arith.constant 0.000000e+00 : f32
      %31 = vector.broadcast %cst_27 : f32 to vector<1x1x2x2xf32>
      %c0_28 = arith.constant 0 : index
      %c0_29 = arith.constant 0 : index
      %c0_30 = arith.constant 0 : index
      %c0_31 = arith.constant 0 : index
      %32 = vector.load %arg5[%c0_28, %c0_29, %c0_30, %c0_31] : memref<1x1x2x2xf32, #tpu.memory_space<vmem>>, vector<1x1x2x2xf32>
      tpu.vector_store %arg5[%c0_28, %c0_29, %c0_30, %c0_31], %31 {strides = array<i32>} : memref<1x1x2x2xf32, #tpu.memory_space<vmem>>, vector<1x1x2x2xf32>,
    } else {
    }
    %c0_19 = arith.constant 0 : index
    %c0_20 = arith.constant 0 : index
    %c0_21 = arith.constant 0 : index
    %c0_22 = arith.constant 0 : index
    %25 = vector.load %arg5[%c0_19, %c0_20, %c0_21, %c0_22] : memref<1x1x2x2xf32, #tpu.memory_space<vmem>>, vector<1x1x2x2xf32>
    %26 = vector.shape_cast %25 : vector<1x1x2x2xf32> to vector<2x2xf32>
    %27 = arith.addf %26, %21 : vector<2x2xf32>
    %c0_23 = arith.constant 0 : index
    %c0_24 = arith.constant 0 : index
    %c0_25 = arith.constant 0 : index
    %c0_26 = arith.constant 0 : index
    %28 = vector.load %arg5[%c0_23, %c0_24, %c0_25, %c0_26] : memref<1x1x2x2xf32, #tpu.memory_space<vmem>>, vector<1x1x2x2xf32>
    %29 = vector.shape_cast %28 : vector<1x1x2x2xf32> to vector<2x2xf32>
    %30 = vector.shape_cast %27 : vector<2x2xf32> to vector<1x1x2x2xf32>
    tpu.vector_store %arg5[%c0_23, %c0_24, %c0_25, %c0_26], %30 {strides = array<i32>} : memref<1x1x2x2xf32, #tpu.memory_space<vmem>>, vector<1x1x2x2xf32>,
    return
  }
  func.func @transform_0(%arg0: i32, %arg1: i32) -> (i32, i32, i32, i32) {
    %c0_i32 = arith.constant 0 : i32
    %c0_i32_0 = arith.constant 0 : i32
    %c0_i32_1 = arith.constant 0 : i32
    return %arg0, %c0_i32, %arg1, %c0_i32_0 : i32, i32, i32, i32
  }
  func.func @transform_1(%arg0: i32, %arg1: i32) -> (i32, i32) {
    %c0_i32 = arith.constant 0 : i32
    %c0_i32_0 = arith.constant 0 : i32
    return %arg1, %c0_i32 : i32, i32
  }
  func.func @transform_2(%arg0: i32, %arg1: i32) -> (i32, i32) {
    %c0_i32 = arith.constant 0 : i32
    %c0_i32_0 = arith.constant 0 : i32
    %c0_i32_1 = arith.constant 0 : i32
    return %c0_i32, %c0_i32_0 : i32, i32
  }
  func.func @transform_3(%arg0: i32, %arg1: i32) -> (i32, i32, i32, i32) {
    %c0_i32 = arith.constant 0 : i32
    %c0_i32_0 = arith.constant 0 : i32
    %c0_i32_1 = arith.constant 0 : i32
    %c0_i32_2 = arith.constant 0 : i32
    return %arg0, %c0_i32, %c0_i32_0, %c0_i32_1 : i32, i32, i32, i32
  }
}

module attributes {stable_mosaic.version = 11 : i64} {
  func.func @kernel(%arg0: i32, %arg1: i32, %arg2: memref<1x3x128x128xf32, #tpu.memory_space<vmem>>, %arg3: memref<1x2x256xf32, #tpu.memory_space<vmem>>, %arg4: memref<128x2xf32, #tpu.memory_space<vmem>>, %arg5: memref<1x3x128x128xf32, #tpu.memory_space<vmem>>, %arg6: memref<1x1x128x128xf32, #tpu.memory_space<vmem>>) attributes {dimension_semantics = [#tpu.dimension_semantics<parallel>, #tpu.dimension_semantics<parallel>], iteration_bounds = array<i64: 2, 1>, scalar_prefetch = 0 : i64, scratch_operands = 0 : i64, tpu.core_type = #tpu.core_type<tc>, window_params = [{transform_indices = @transform_0, window_bounds = array<i64: 1, 3, 128, 128>}, {transform_indices = @transform_1, window_bounds = array<i64: 1, 2, 256>}, {transform_indices = @transform_2, window_bounds = array<i64: 128, 2>}, {transform_indices = @transform_3, window_bounds = array<i64: 1, 3, 128, 128>}, {transform_indices = @transform_4, window_bounds = array<i64: 1, 1, 128, 128>}]} {
    %c0 = arith.constant 0 : index
    %c0_0 = arith.constant 0 : index
    %c0_1 = arith.constant 0 : index
    %c0_2 = arith.constant 0 : index
    %0 = vector.load %arg2[%c0, %c0_0, %c0_1, %c0_2] : memref<1x3x128x128xf32, #tpu.memory_space<vmem>>, vector<1x1x128x128xf32>
    %1 = vector.shape_cast %0 : vector<1x1x128x128xf32> to vector<128x128xf32>
    %c0_3 = arith.constant 0 : index
    %c1 = arith.constant 1 : index
    %c0_4 = arith.constant 0 : index
    %c0_5 = arith.constant 0 : index
    %2 = vector.load %arg2[%c0_3, %c1, %c0_4, %c0_5] : memref<1x3x128x128xf32, #tpu.memory_space<vmem>>, vector<1x1x128x128xf32>
    %3 = vector.shape_cast %2 : vector<1x1x128x128xf32> to vector<128x128xf32>
    %c0_6 = arith.constant 0 : index
    %c2 = arith.constant 2 : index
    %c0_7 = arith.constant 0 : index
    %c0_8 = arith.constant 0 : index
    %4 = vector.load %arg2[%c0_6, %c2, %c0_7, %c0_8] : memref<1x3x128x128xf32, #tpu.memory_space<vmem>>, vector<1x1x128x128xf32>
    %5 = vector.shape_cast %4 : vector<1x1x128x128xf32> to vector<128x128xf32>
    %cst = arith.constant 2.126000e-01 : f32
    %6 = vector.broadcast %cst : f32 to vector<128x128xf32>
    %7 = arith.mulf %6, %1 : vector<128x128xf32>
    %cst_9 = arith.constant 7.152000e-01 : f32
    %8 = vector.broadcast %cst_9 : f32 to vector<128x128xf32>
    %9 = arith.mulf %8, %3 : vector<128x128xf32>
    %10 = arith.addf %7, %9 : vector<128x128xf32>
    %cst_10 = arith.constant 7.220000e-02 : f32
    %11 = vector.broadcast %cst_10 : f32 to vector<128x128xf32>
    %12 = arith.mulf %11, %5 : vector<128x128xf32>
    %13 = arith.addf %10, %12 : vector<128x128xf32>
    %c0_11 = arith.constant 0 : index
    %c0_12 = arith.constant 0 : index
    %c0_13 = arith.constant 0 : index
    %c0_14 = arith.constant 0 : index
    %14 = vector.load %arg6[%c0_11, %c0_12, %c0_13, %c0_14] : memref<1x1x128x128xf32, #tpu.memory_space<vmem>>, vector<1x1x128x128xf32>
    %15 = vector.shape_cast %14 : vector<1x1x128x128xf32> to vector<128x128xf32>
    %16 = vector.shape_cast %13 : vector<128x128xf32> to vector<1x1x128x128xf32>
    tpu.vector_store %arg6[%c0_11, %c0_12, %c0_13, %c0_14], %16 {strides = array<i32>} : memref<1x1x128x128xf32, #tpu.memory_space<vmem>>, vector<1x1x128x128xf32>,
    %c0_15 = arith.constant 0 : index
    %c0_16 = arith.constant 0 : index
    %17 = vector.load %arg4[%c0_15, %c0_16] : memref<128x2xf32, #tpu.memory_space<vmem>>, vector<128x2xf32>
    %c0_17 = arith.constant 0 : index
    %c0_18 = arith.constant 0 : index
    %c0_19 = arith.constant 0 : index
    %18 = vector.load %arg3[%c0_17, %c0_18, %c0_19] : memref<1x2x256xf32, #tpu.memory_space<vmem>>, vector<1x2x256xf32>
    %19 = vector.shape_cast %18 : vector<1x2x256xf32> to vector<2x256xf32>
    %cst_20 = arith.constant dense<0.000000e+00> : vector<128x256xf32>
    %20 = tpu.matmul %17, %19, %cst_20 {dimension_numbers = #tpu.dot_dimension_numbers<[1], [0], [0], [1], [0, 0, 1, 1], [], []>} : vector<128x2xf32>, vector<2x256xf32>, vector<128x256xf32> -> vector<128x256xf32>
    %21 = vector.extract_strided_slice %20 {offsets = [0, 0], sizes = [128, 128], strides = [1, 1]} : vector<128x256xf32> to vector<128x128xf32>
    %22 = vector.extract_strided_slice %20 {offsets = [0, 128], sizes = [128, 128], strides = [1, 1]} : vector<128x256xf32> to vector<128x128xf32>
    %cst_21 = arith.constant 9.99999974E-6 : f32
    %23 = vector.broadcast %cst_21 : f32 to vector<128x128xf32>
    %24 = arith.addf %13, %23 : vector<128x128xf32>
    %25 = arith.addf %21, %24 : vector<128x128xf32>
    %26 = tpu.reciprocal %25 {approx = true} : vector<128x128xf32> -> vector<128x128xf32>
    %27 = arith.mulf %21, %26 : vector<128x128xf32>
    %cst_22 = arith.constant 2.000000e+00 : f32
    %28 = vector.broadcast %cst_22 : f32 to vector<128x128xf32>
    %29 = arith.mulf %28, %22 : vector<128x128xf32>
    %cst_23 = arith.constant 9.99999974E-6 : f32
    %30 = vector.broadcast %cst_23 : f32 to vector<128x128xf32>
    %31 = arith.addf %27, %30 : vector<128x128xf32>
    %32 = math.log %31 : vector<128x128xf32>
    %33 = arith.mulf %29, %32 : vector<128x128xf32>
    %34 = math.exp %33 : vector<128x128xf32>
    %cst_24 = arith.constant 1.000000e+00 : f32
    %35 = vector.broadcast %cst_24 : f32 to vector<128x128xf32>
    %36 = arith.subf %35, %34 : vector<128x128xf32>
    %37 = tpu.reciprocal %13 {approx = true} : vector<128x128xf32> -> vector<128x128xf32>
    %38 = arith.mulf %1, %37 : vector<128x128xf32>
    %cst_25 = arith.constant 9.99999974E-6 : f32
    %39 = vector.broadcast %cst_25 : f32 to vector<128x128xf32>
    %40 = arith.addf %38, %39 : vector<128x128xf32>
    %41 = math.sqrt %40 : vector<128x128xf32>
    %42 = arith.mulf %41, %36 : vector<128x128xf32>
    %c0_26 = arith.constant 0 : index
    %c0_27 = arith.constant 0 : index
    %c0_28 = arith.constant 0 : index
    %c0_29 = arith.constant 0 : index
    %43 = vector.load %arg5[%c0_26, %c0_27, %c0_28, %c0_29] : memref<1x3x128x128xf32, #tpu.memory_space<vmem>>, vector<1x1x128x128xf32>
    %44 = vector.shape_cast %43 : vector<1x1x128x128xf32> to vector<128x128xf32>
    %45 = vector.shape_cast %42 : vector<128x128xf32> to vector<1x1x128x128xf32>
    tpu.vector_store %arg5[%c0_26, %c0_27, %c0_28, %c0_29], %45 {strides = array<i32>} : memref<1x3x128x128xf32, #tpu.memory_space<vmem>>, vector<1x1x128x128xf32>,
    %46 = arith.mulf %3, %37 : vector<128x128xf32>
    %cst_30 = arith.constant 9.99999974E-6 : f32
    %47 = vector.broadcast %cst_30 : f32 to vector<128x128xf32>
    %48 = arith.addf %46, %47 : vector<128x128xf32>
    %49 = math.sqrt %48 : vector<128x128xf32>
    %50 = arith.mulf %49, %36 : vector<128x128xf32>
    %c0_31 = arith.constant 0 : index
    %c1_32 = arith.constant 1 : index
    %c0_33 = arith.constant 0 : index
    %c0_34 = arith.constant 0 : index
    %51 = vector.load %arg5[%c0_31, %c1_32, %c0_33, %c0_34] : memref<1x3x128x128xf32, #tpu.memory_space<vmem>>, vector<1x1x128x128xf32>
    %52 = vector.shape_cast %51 : vector<1x1x128x128xf32> to vector<128x128xf32>
    %53 = vector.shape_cast %50 : vector<128x128xf32> to vector<1x1x128x128xf32>
    tpu.vector_store %arg5[%c0_31, %c1_32, %c0_33, %c0_34], %53 {strides = array<i32>} : memref<1x3x128x128xf32, #tpu.memory_space<vmem>>, vector<1x1x128x128xf32>,
    %54 = arith.mulf %5, %37 : vector<128x128xf32>
    %cst_35 = arith.constant 9.99999974E-6 : f32
    %55 = vector.broadcast %cst_35 : f32 to vector<128x128xf32>
    %56 = arith.addf %54, %55 : vector<128x128xf32>
    %57 = math.sqrt %56 : vector<128x128xf32>
    %58 = arith.mulf %57, %36 : vector<128x128xf32>
    %c0_36 = arith.constant 0 : index
    %c2_37 = arith.constant 2 : index
    %c0_38 = arith.constant 0 : index
    %c0_39 = arith.constant 0 : index
    %59 = vector.load %arg5[%c0_36, %c2_37, %c0_38, %c0_39] : memref<1x3x128x128xf32, #tpu.memory_space<vmem>>, vector<1x1x128x128xf32>
    %60 = vector.shape_cast %59 : vector<1x1x128x128xf32> to vector<128x128xf32>
    %61 = vector.shape_cast %58 : vector<128x128xf32> to vector<1x1x128x128xf32>
    tpu.vector_store %arg5[%c0_36, %c2_37, %c0_38, %c0_39], %61 {strides = array<i32>} : memref<1x3x128x128xf32, #tpu.memory_space<vmem>>, vector<1x1x128x128xf32>,
    return
  }
  func.func @transform_0(%arg0: i32, %arg1: i32) -> (i32, i32, i32, i32) {
    %c0_i32 = arith.constant 0 : i32
    %c0_i32_0 = arith.constant 0 : i32
    %c0_i32_1 = arith.constant 0 : i32
    return %arg0, %c0_i32, %arg1, %c0_i32_0 : i32, i32, i32, i32
  }
  func.func @transform_1(%arg0: i32, %arg1: i32) -> (i32, i32, i32) {
    %c0_i32 = arith.constant 0 : i32
    %c0_i32_0 = arith.constant 0 : i32
    %c0_i32_1 = arith.constant 0 : i32
    return %arg0, %c0_i32, %c0_i32_0 : i32, i32, i32
  }
  func.func @transform_2(%arg0: i32, %arg1: i32) -> (i32, i32) {
    %c0_i32 = arith.constant 0 : i32
    %c0_i32_0 = arith.constant 0 : i32
    return %arg1, %c0_i32 : i32, i32
  }
  func.func @transform_3(%arg0: i32, %arg1: i32) -> (i32, i32, i32, i32) {
    %c0_i32 = arith.constant 0 : i32
    %c0_i32_0 = arith.constant 0 : i32
    %c0_i32_1 = arith.constant 0 : i32
    return %arg0, %c0_i32, %arg1, %c0_i32_0 : i32, i32, i32, i32
  }
  func.func @transform_4(%arg0: i32, %arg1: i32) -> (i32, i32, i32, i32) {
    %c0_i32 = arith.constant 0 : i32
    %c0_i32_0 = arith.constant 0 : i32
    %c0_i32_1 = arith.constant 0 : i32
    return %arg0, %c0_i32, %arg1, %c0_i32_0 : i32, i32, i32, i32
  }
}

module attributes {stable_mosaic.version = 11 : i64} {
  func.func @kernel(%arg0: i32, %arg1: memref<1x1x4xf32, #tpu.memory_space<vmem>>, %arg2: memref<9x4xf32, #tpu.memory_space<vmem>>, %arg3: memref<38x72xf32, #tpu.memory_space<vmem>>, %arg4: memref<38x1xf32, #tpu.memory_space<vmem>>, %arg5: memref<2x128xf32, #tpu.memory_space<vmem>>, %arg6: memref<1x1x4xf32, #tpu.memory_space<vmem>>, %arg7: memref<1x1x4xf32, #tpu.memory_space<vmem>>, %arg8: memref<1x2x256xf32, #tpu.memory_space<vmem>>, %arg9: memref<8x135xf32, #tpu.memory_space<vmem>>, %arg10: memref<72x4xf32, #tpu.memory_space<vmem>>) attributes {dimension_semantics = [#tpu.dimension_semantics<parallel>], iteration_bounds = array<i64: 2>, scalar_prefetch = 0 : i64, scratch_operands = 2 : i64, tpu.core_type = #tpu.core_type<tc>, window_params = [{transform_indices = @transform_0, window_bounds = array<i64: 1, 1, 4>}, {pipeline_mode = #tpu.pipeline_mode<synchronous>, transform_indices = @transform_1, window_bounds = array<i64: 9, 4>}, {pipeline_mode = #tpu.pipeline_mode<synchronous>, transform_indices = @transform_2, window_bounds = array<i64: 38, 72>}, {pipeline_mode = #tpu.pipeline_mode<synchronous>, transform_indices = @transform_3, window_bounds = array<i64: 38, 1>}, {pipeline_mode = #tpu.pipeline_mode<synchronous>, transform_indices = @transform_4, window_bounds = array<i64: 2, 128>}, {transform_indices = @transform_5, window_bounds = array<i64: 1, 1, 4>}, {transform_indices = @transform_6, window_bounds = array<i64: 1, 1, 4>}, {transform_indices = @transform_7, window_bounds = array<i64: 1, 2, 256>}]} {
    %cst = arith.constant 0.000000e+00 : f32
    %0 = vector.broadcast %cst : f32 to vector<8x135xf32>
    %c0 = arith.constant 0 : index
    %c0_0 = arith.constant 0 : index
    %1 = vector.load %arg9[%c0, %c0_0] : memref<8x135xf32, #tpu.memory_space<vmem>>, vector<8x135xf32>
    tpu.vector_store %arg9[%c0, %c0_0], %0 {strides = array<i32>} : memref<8x135xf32, #tpu.memory_space<vmem>>, vector<8x135xf32>,
    %cst_1 = arith.constant 0.000000e+00 : f32
    %2 = vector.broadcast %cst_1 : f32 to vector<72x4xf32>
    %c0_2 = arith.constant 0 : index
    %c0_3 = arith.constant 0 : index
    %3 = vector.load %arg10[%c0_2, %c0_3] : memref<72x4xf32, #tpu.memory_space<vmem>>, vector<72x4xf32>
    tpu.vector_store %arg10[%c0_2, %c0_3], %2 {strides = array<i32>} : memref<72x4xf32, #tpu.memory_space<vmem>>, vector<72x4xf32>,
    %c0_4 = arith.constant 0 : index
    %c0_5 = arith.constant 0 : index
    %4 = vector.load %arg3[%c0_4, %c0_5] : memref<38x72xf32, #tpu.memory_space<vmem>>, vector<38x72xf32>
    %c0_6 = arith.constant 0 : index
    %c0_7 = arith.constant 0 : index
    %5 = vector.load %arg4[%c0_6, %c0_7] : memref<38x1xf32, #tpu.memory_space<vmem>>, vector<38x1xf32>
    %c0_8 = arith.constant 0 : index
    %c0_9 = arith.constant 0 : index
    %c0_10 = arith.constant 0 : index
    %6 = vector.load %arg1[%c0_8, %c0_9, %c0_10] : memref<1x1x4xf32, #tpu.memory_space<vmem>>, vector<1x1x4xf32>
    %7 = vector.shape_cast %6 : vector<1x1x4xf32> to vector<1x4xf32>
    %c0_11 = arith.constant 0 : index
    %c128 = arith.constant 128 : index
    %8 = vector.load %arg9[%c0_11, %c128] : memref<8x135xf32, #tpu.memory_space<vmem>>, vector<1x4xf32>
    tpu.vector_store %arg9[%c0_11, %c128], %7 {strides = array<i32>} : memref<8x135xf32, #tpu.memory_space<vmem>>, vector<1x4xf32>,
    %c0_12 = arith.constant 0 : index
    %c125 = arith.constant 125 : index
    %9 = vector.load %arg9[%c0_12, %c125] : memref<8x135xf32, #tpu.memory_space<vmem>>, vector<1x4xf32>
    %c0_13 = arith.constant 0 : index
    %c0_14 = arith.constant 0 : index
    %10 = vector.load %arg2[%c0_13, %c0_14] : memref<9x4xf32, #tpu.memory_space<vmem>>, vector<1x4xf32>
    %11 = arith.mulf %9, %10 : vector<1x4xf32>
    %c0_15 = arith.constant 0 : index
    %c0_16 = arith.constant 0 : index
    %12 = vector.load %arg10[%c0_15, %c0_16] : memref<72x4xf32, #tpu.memory_space<vmem>>, vector<1x4xf32>
    tpu.vector_store %arg10[%c0_15, %c0_16], %11 {strides = array<i32>} : memref<72x4xf32, #tpu.memory_space<vmem>>, vector<1x4xf32>,
    %c0_17 = arith.constant 0 : index
    %c126 = arith.constant 126 : index
    %13 = vector.load %arg9[%c0_17, %c126] : memref<8x135xf32, #tpu.memory_space<vmem>>, vector<1x4xf32>
    %c1 = arith.constant 1 : index
    %c0_18 = arith.constant 0 : index
    %14 = vector.load %arg2[%c1, %c0_18] : memref<9x4xf32, #tpu.memory_space<vmem>>, vector<1x4xf32>
    %15 = arith.mulf %13, %14 : vector<1x4xf32>
    %c8 = arith.constant 8 : index
    %c0_19 = arith.constant 0 : index
    %16 = vector.load %arg10[%c8, %c0_19] : memref<72x4xf32, #tpu.memory_space<vmem>>, vector<1x4xf32>
    tpu.vector_store %arg10[%c8, %c0_19], %15 {strides = array<i32>} : memref<72x4xf32, #tpu.memory_space<vmem>>, vector<1x4xf32>,
    %c0_20 = arith.constant 0 : index
    %c127 = arith.constant 127 : index
    %17 = vector.load %arg9[%c0_20, %c127] : memref<8x135xf32, #tpu.memory_space<vmem>>, vector<1x4xf32>
    %c2 = arith.constant 2 : index
    %c0_21 = arith.constant 0 : index
    %18 = vector.load %arg2[%c2, %c0_21] : memref<9x4xf32, #tpu.memory_space<vmem>>, vector<1x4xf32>
    %19 = arith.mulf %17, %18 : vector<1x4xf32>
    %c16 = arith.constant 16 : index
    %c0_22 = arith.constant 0 : index
    %20 = vector.load %arg10[%c16, %c0_22] : memref<72x4xf32, #tpu.memory_space<vmem>>, vector<1x4xf32>
    tpu.vector_store %arg10[%c16, %c0_22], %19 {strides = array<i32>} : memref<72x4xf32, #tpu.memory_space<vmem>>, vector<1x4xf32>,
    %c0_23 = arith.constant 0 : index
    %c127_24 = arith.constant 127 : index
    %21 = vector.load %arg9[%c0_23, %c127_24] : memref<8x135xf32, #tpu.memory_space<vmem>>, vector<1x4xf32>
    %c3 = arith.constant 3 : index
    %c0_25 = arith.constant 0 : index
    %22 = vector.load %arg2[%c3, %c0_25] : memref<9x4xf32, #tpu.memory_space<vmem>>, vector<1x4xf32>
    %23 = arith.mulf %21, %22 : vector<1x4xf32>
    %c24 = arith.constant 24 : index
    %c0_26 = arith.constant 0 : index
    %24 = vector.load %arg10[%c24, %c0_26] : memref<72x4xf32, #tpu.memory_space<vmem>>, vector<1x4xf32>
    tpu.vector_store %arg10[%c24, %c0_26], %23 {strides = array<i32>} : memref<72x4xf32, #tpu.memory_space<vmem>>, vector<1x4xf32>,
    %c0_27 = arith.constant 0 : index
    %c128_28 = arith.constant 128 : index
    %25 = vector.load %arg9[%c0_27, %c128_28] : memref<8x135xf32, #tpu.memory_space<vmem>>, vector<1x4xf32>
    %c4 = arith.constant 4 : index
    %c0_29 = arith.constant 0 : index
    %26 = vector.load %arg2[%c4, %c0_29] : memref<9x4xf32, #tpu.memory_space<vmem>>, vector<1x4xf32>
    %27 = arith.mulf %25, %26 : vector<1x4xf32>
    %c32 = arith.constant 32 : index
    %c0_30 = arith.constant 0 : index
    %28 = vector.load %arg10[%c32, %c0_30] : memref<72x4xf32, #tpu.memory_space<vmem>>, vector<1x4xf32>
    tpu.vector_store %arg10[%c32, %c0_30], %27 {strides = array<i32>} : memref<72x4xf32, #tpu.memory_space<vmem>>, vector<1x4xf32>,
    %c0_31 = arith.constant 0 : index
    %c129 = arith.constant 129 : index
    %29 = vector.load %arg9[%c0_31, %c129] : memref<8x135xf32, #tpu.memory_space<vmem>>, vector<1x4xf32>
    %c5 = arith.constant 5 : index
    %c0_32 = arith.constant 0 : index
    %30 = vector.load %arg2[%c5, %c0_32] : memref<9x4xf32, #tpu.memory_space<vmem>>, vector<1x4xf32>
    %31 = arith.mulf %29, %30 : vector<1x4xf32>
    %c40 = arith.constant 40 : index
    %c0_33 = arith.constant 0 : index
    %32 = vector.load %arg10[%c40, %c0_33] : memref<72x4xf32, #tpu.memory_space<vmem>>, vector<1x4xf32>
    tpu.vector_store %arg10[%c40, %c0_33], %31 {strides = array<i32>} : memref<72x4xf32, #tpu.memory_space<vmem>>, vector<1x4xf32>,
    %c0_34 = arith.constant 0 : index
    %c129_35 = arith.constant 129 : index
    %33 = vector.load %arg9[%c0_34, %c129_35] : memref<8x135xf32, #tpu.memory_space<vmem>>, vector<1x4xf32>
    %c6 = arith.constant 6 : index
    %c0_36 = arith.constant 0 : index
    %34 = vector.load %arg2[%c6, %c0_36] : memref<9x4xf32, #tpu.memory_space<vmem>>, vector<1x4xf32>
    %35 = arith.mulf %33, %34 : vector<1x4xf32>
    %c48 = arith.constant 48 : index
    %c0_37 = arith.constant 0 : index
    %36 = vector.load %arg10[%c48, %c0_37] : memref<72x4xf32, #tpu.memory_space<vmem>>, vector<1x4xf32>
    tpu.vector_store %arg10[%c48, %c0_37], %35 {strides = array<i32>} : memref<72x4xf32, #tpu.memory_space<vmem>>, vector<1x4xf32>,
    %c0_38 = arith.constant 0 : index
    %c130 = arith.constant 130 : index
    %37 = vector.load %arg9[%c0_38, %c130] : memref<8x135xf32, #tpu.memory_space<vmem>>, vector<1x4xf32>
    %c7 = arith.constant 7 : index
    %c0_39 = arith.constant 0 : index
    %38 = vector.load %arg2[%c7, %c0_39] : memref<9x4xf32, #tpu.memory_space<vmem>>, vector<1x4xf32>
    %39 = arith.mulf %37, %38 : vector<1x4xf32>
    %c56 = arith.constant 56 : index
    %c0_40 = arith.constant 0 : index
    %40 = vector.load %arg10[%c56, %c0_40] : memref<72x4xf32, #tpu.memory_space<vmem>>, vector<1x4xf32>
    tpu.vector_store %arg10[%c56, %c0_40], %39 {strides = array<i32>} : memref<72x4xf32, #tpu.memory_space<vmem>>, vector<1x4xf32>,
    %c0_41 = arith.constant 0 : index
    %c131 = arith.constant 131 : index
    %41 = vector.load %arg9[%c0_41, %c131] : memref<8x135xf32, #tpu.memory_space<vmem>>, vector<1x4xf32>
    %c8_42 = arith.constant 8 : index
    %c0_43 = arith.constant 0 : index
    %42 = vector.load %arg2[%c8_42, %c0_43] : memref<9x4xf32, #tpu.memory_space<vmem>>, vector<1x4xf32>
    %43 = arith.mulf %41, %42 : vector<1x4xf32>
    %c64 = arith.constant 64 : index
    %c0_44 = arith.constant 0 : index
    %44 = vector.load %arg10[%c64, %c0_44] : memref<72x4xf32, #tpu.memory_space<vmem>>, vector<1x4xf32>
    tpu.vector_store %arg10[%c64, %c0_44], %43 {strides = array<i32>} : memref<72x4xf32, #tpu.memory_space<vmem>>, vector<1x4xf32>,
    %45 = vector.extract_strided_slice %4 {offsets = [0, 0], sizes = [4, 72], strides = [1, 1]} : vector<38x72xf32> to vector<4x72xf32>
    %c0_45 = arith.constant 0 : index
    %c0_46 = arith.constant 0 : index
    %46 = vector.load %arg10[%c0_45, %c0_46] : memref<72x4xf32, #tpu.memory_space<vmem>>, vector<72x4xf32>
    %cst_47 = arith.constant dense<0.000000e+00> : vector<4x4xf32>
    %47 = tpu.matmul %45, %46, %cst_47 {dimension_numbers = #tpu.dot_dimension_numbers<[1], [0], [0], [1], [0, 0, 1, 1], [], []>} : vector<4x72xf32>, vector<72x4xf32>, vector<4x4xf32> -> vector<4x4xf32>
    %48 = vector.extract_strided_slice %5 {offsets = [0, 0], sizes = [4, 1], strides = [1, 1]} : vector<38x1xf32> to vector<4x1xf32>
    %49 = vector.broadcast %48 : vector<4x1xf32> to vector<4x4xf32>
    %50 = arith.addf %47, %49 : vector<4x4xf32>
    %cst_48 = arith.constant 0.000000e+00 : f32
    %51 = vector.broadcast %cst_48 : f32 to vector<4x4xf32>
    %52 = arith.maximumf %50, %51 : vector<4x4xf32>
    %c0_49 = arith.constant 0 : index
    %c128_50 = arith.constant 128 : index
    %53 = vector.load %arg9[%c0_49, %c128_50] : memref<8x135xf32, #tpu.memory_space<vmem>>, vector<4x4xf32>
    tpu.vector_store %arg9[%c0_49, %c128_50], %52 {strides = array<i32>} : memref<8x135xf32, #tpu.memory_space<vmem>>, vector<4x4xf32>,
    %c0_51 = arith.constant 0 : index
    %c125_52 = arith.constant 125 : index
    %54 = vector.load %arg9[%c0_51, %c125_52] : memref<8x135xf32, #tpu.memory_space<vmem>>, vector<4x4xf32>
    %c0_53 = arith.constant 0 : index
    %c0_54 = arith.constant 0 : index
    %55 = vector.load %arg2[%c0_53, %c0_54] : memref<9x4xf32, #tpu.memory_space<vmem>>, vector<1x4xf32>
    %56 = vector.broadcast %55 : vector<1x4xf32> to vector<4x4xf32>
    %57 = arith.mulf %54, %56 : vector<4x4xf32>
    %c0_55 = arith.constant 0 : index
    %c0_56 = arith.constant 0 : index
    %58 = vector.load %arg10[%c0_55, %c0_56] : memref<72x4xf32, #tpu.memory_space<vmem>>, vector<4x4xf32>
    tpu.vector_store %arg10[%c0_55, %c0_56], %57 {strides = array<i32>} : memref<72x4xf32, #tpu.memory_space<vmem>>, vector<4x4xf32>,
    %c0_57 = arith.constant 0 : index
    %c126_58 = arith.constant 126 : index
    %59 = vector.load %arg9[%c0_57, %c126_58] : memref<8x135xf32, #tpu.memory_space<vmem>>, vector<4x4xf32>
    %c1_59 = arith.constant 1 : index
    %c0_60 = arith.constant 0 : index
    %60 = vector.load %arg2[%c1_59, %c0_60] : memref<9x4xf32, #tpu.memory_space<vmem>>, vector<1x4xf32>
    %61 = vector.broadcast %60 : vector<1x4xf32> to vector<4x4xf32>
    %62 = arith.mulf %59, %61 : vector<4x4xf32>
    %c8_61 = arith.constant 8 : index
    %c0_62 = arith.constant 0 : index
    %63 = vector.load %arg10[%c8_61, %c0_62] : memref<72x4xf32, #tpu.memory_space<vmem>>, vector<4x4xf32>
    tpu.vector_store %arg10[%c8_61, %c0_62], %62 {strides = array<i32>} : memref<72x4xf32, #tpu.memory_space<vmem>>, vector<4x4xf32>,
    %c0_63 = arith.constant 0 : index
    %c127_64 = arith.constant 127 : index
    %64 = vector.load %arg9[%c0_63, %c127_64] : memref<8x135xf32, #tpu.memory_space<vmem>>, vector<4x4xf32>
    %c2_65 = arith.constant 2 : index
    %c0_66 = arith.constant 0 : index
    %65 = vector.load %arg2[%c2_65, %c0_66] : memref<9x4xf32, #tpu.memory_space<vmem>>, vector<1x4xf32>
    %66 = vector.broadcast %65 : vector<1x4xf32> to vector<4x4xf32>
    %67 = arith.mulf %64, %66 : vector<4x4xf32>
    %c16_67 = arith.constant 16 : index
    %c0_68 = arith.constant 0 : index
    %68 = vector.load %arg10[%c16_67, %c0_68] : memref<72x4xf32, #tpu.memory_space<vmem>>, vector<4x4xf32>
    tpu.vector_store %arg10[%c16_67, %c0_68], %67 {strides = array<i32>} : memref<72x4xf32, #tpu.memory_space<vmem>>, vector<4x4xf32>,
    %c0_69 = arith.constant 0 : index
    %c127_70 = arith.constant 127 : index
    %69 = vector.load %arg9[%c0_69, %c127_70] : memref<8x135xf32, #tpu.memory_space<vmem>>, vector<4x4xf32>
    %c3_71 = arith.constant 3 : index
    %c0_72 = arith.constant 0 : index
    %70 = vector.load %arg2[%c3_71, %c0_72] : memref<9x4xf32, #tpu.memory_space<vmem>>, vector<1x4xf32>
    %71 = vector.broadcast %70 : vector<1x4xf32> to vector<4x4xf32>
    %72 = arith.mulf %69, %71 : vector<4x4xf32>
    %c24_73 = arith.constant 24 : index
    %c0_74 = arith.constant 0 : index
    %73 = vector.load %arg10[%c24_73, %c0_74] : memref<72x4xf32, #tpu.memory_space<vmem>>, vector<4x4xf32>
    tpu.vector_store %arg10[%c24_73, %c0_74], %72 {strides = array<i32>} : memref<72x4xf32, #tpu.memory_space<vmem>>, vector<4x4xf32>,
    %c0_75 = arith.constant 0 : index
    %c128_76 = arith.constant 128 : index
    %74 = vector.load %arg9[%c0_75, %c128_76] : memref<8x135xf32, #tpu.memory_space<vmem>>, vector<4x4xf32>
    %c4_77 = arith.constant 4 : index
    %c0_78 = arith.constant 0 : index
    %75 = vector.load %arg2[%c4_77, %c0_78] : memref<9x4xf32, #tpu.memory_space<vmem>>, vector<1x4xf32>
    %76 = vector.broadcast %75 : vector<1x4xf32> to vector<4x4xf32>
    %77 = arith.mulf %74, %76 : vector<4x4xf32>
    %c32_79 = arith.constant 32 : index
    %c0_80 = arith.constant 0 : index
    %78 = vector.load %arg10[%c32_79, %c0_80] : memref<72x4xf32, #tpu.memory_space<vmem>>, vector<4x4xf32>
    tpu.vector_store %arg10[%c32_79, %c0_80], %77 {strides = array<i32>} : memref<72x4xf32, #tpu.memory_space<vmem>>, vector<4x4xf32>,
    %c0_81 = arith.constant 0 : index
    %c129_82 = arith.constant 129 : index
    %79 = vector.load %arg9[%c0_81, %c129_82] : memref<8x135xf32, #tpu.memory_space<vmem>>, vector<4x4xf32>
    %c5_83 = arith.constant 5 : index
    %c0_84 = arith.constant 0 : index
    %80 = vector.load %arg2[%c5_83, %c0_84] : memref<9x4xf32, #tpu.memory_space<vmem>>, vector<1x4xf32>
    %81 = vector.broadcast %80 : vector<1x4xf32> to vector<4x4xf32>
    %82 = arith.mulf %79, %81 : vector<4x4xf32>
    %c40_85 = arith.constant 40 : index
    %c0_86 = arith.constant 0 : index
    %83 = vector.load %arg10[%c40_85, %c0_86] : memref<72x4xf32, #tpu.memory_space<vmem>>, vector<4x4xf32>
    tpu.vector_store %arg10[%c40_85, %c0_86], %82 {strides = array<i32>} : memref<72x4xf32, #tpu.memory_space<vmem>>, vector<4x4xf32>,
    %c0_87 = arith.constant 0 : index
    %c129_88 = arith.constant 129 : index
    %84 = vector.load %arg9[%c0_87, %c129_88] : memref<8x135xf32, #tpu.memory_space<vmem>>, vector<4x4xf32>
    %c6_89 = arith.constant 6 : index
    %c0_90 = arith.constant 0 : index
    %85 = vector.load %arg2[%c6_89, %c0_90] : memref<9x4xf32, #tpu.memory_space<vmem>>, vector<1x4xf32>
    %86 = vector.broadcast %85 : vector<1x4xf32> to vector<4x4xf32>
    %87 = arith.mulf %84, %86 : vector<4x4xf32>
    %c48_91 = arith.constant 48 : index
    %c0_92 = arith.constant 0 : index
    %88 = vector.load %arg10[%c48_91, %c0_92] : memref<72x4xf32, #tpu.memory_space<vmem>>, vector<4x4xf32>
    tpu.vector_store %arg10[%c48_91, %c0_92], %87 {strides = array<i32>} : memref<72x4xf32, #tpu.memory_space<vmem>>, vector<4x4xf32>,
    %c0_93 = arith.constant 0 : index
    %c130_94 = arith.constant 130 : index
    %89 = vector.load %arg9[%c0_93, %c130_94] : memref<8x135xf32, #tpu.memory_space<vmem>>, vector<4x4xf32>
    %c7_95 = arith.constant 7 : index
    %c0_96 = arith.constant 0 : index
    %90 = vector.load %arg2[%c7_95, %c0_96] : memref<9x4xf32, #tpu.memory_space<vmem>>, vector<1x4xf32>
    %91 = vector.broadcast %90 : vector<1x4xf32> to vector<4x4xf32>
    %92 = arith.mulf %89, %91 : vector<4x4xf32>
    %c56_97 = arith.constant 56 : index
    %c0_98 = arith.constant 0 : index
    %93 = vector.load %arg10[%c56_97, %c0_98] : memref<72x4xf32, #tpu.memory_space<vmem>>, vector<4x4xf32>
    tpu.vector_store %arg10[%c56_97, %c0_98], %92 {strides = array<i32>} : memref<72x4xf32, #tpu.memory_space<vmem>>, vector<4x4xf32>,
    %c0_99 = arith.constant 0 : index
    %c131_100 = arith.constant 131 : index
    %94 = vector.load %arg9[%c0_99, %c131_100] : memref<8x135xf32, #tpu.memory_space<vmem>>, vector<4x4xf32>
    %c8_101 = arith.constant 8 : index
    %c0_102 = arith.constant 0 : index
    %95 = vector.load %arg2[%c8_101, %c0_102] : memref<9x4xf32, #tpu.memory_space<vmem>>, vector<1x4xf32>
    %96 = vector.broadcast %95 : vector<1x4xf32> to vector<4x4xf32>
    %97 = arith.mulf %94, %96 : vector<4x4xf32>
    %c64_103 = arith.constant 64 : index
    %c0_104 = arith.constant 0 : index
    %98 = vector.load %arg10[%c64_103, %c0_104] : memref<72x4xf32, #tpu.memory_space<vmem>>, vector<4x4xf32>
    tpu.vector_store %arg10[%c64_103, %c0_104], %97 {strides = array<i32>} : memref<72x4xf32, #tpu.memory_space<vmem>>, vector<4x4xf32>,
    %99 = vector.extract_strided_slice %4 {offsets = [4, 0], sizes = [4, 72], strides = [1, 1]} : vector<38x72xf32> to vector<4x72xf32>
    %c0_105 = arith.constant 0 : index
    %c0_106 = arith.constant 0 : index
    %100 = vector.load %arg10[%c0_105, %c0_106] : memref<72x4xf32, #tpu.memory_space<vmem>>, vector<72x4xf32>
    %cst_107 = arith.constant dense<0.000000e+00> : vector<4x4xf32>
    %101 = tpu.matmul %99, %100, %cst_107 {dimension_numbers = #tpu.dot_dimension_numbers<[1], [0], [0], [1], [0, 0, 1, 1], [], []>} : vector<4x72xf32>, vector<72x4xf32>, vector<4x4xf32> -> vector<4x4xf32>
    %102 = vector.extract_strided_slice %5 {offsets = [4, 0], sizes = [4, 1], strides = [1, 1]} : vector<38x1xf32> to vector<4x1xf32>
    %103 = vector.broadcast %102 : vector<4x1xf32> to vector<4x4xf32>
    %104 = arith.addf %101, %103 : vector<4x4xf32>
    %cst_108 = arith.constant 0.000000e+00 : f32
    %105 = vector.broadcast %cst_108 : f32 to vector<4x4xf32>
    %106 = arith.maximumf %104, %105 : vector<4x4xf32>
    %c0_109 = arith.constant 0 : index
    %c128_110 = arith.constant 128 : index
    %107 = vector.load %arg9[%c0_109, %c128_110] : memref<8x135xf32, #tpu.memory_space<vmem>>, vector<4x4xf32>
    tpu.vector_store %arg9[%c0_109, %c128_110], %106 {strides = array<i32>} : memref<8x135xf32, #tpu.memory_space<vmem>>, vector<4x4xf32>,
    %c0_111 = arith.constant 0 : index
    %c125_112 = arith.constant 125 : index
    %108 = vector.load %arg9[%c0_111, %c125_112] : memref<8x135xf32, #tpu.memory_space<vmem>>, vector<4x4xf32>
    %c0_113 = arith.constant 0 : index
    %c0_114 = arith.constant 0 : index
    %109 = vector.load %arg2[%c0_113, %c0_114] : memref<9x4xf32, #tpu.memory_space<vmem>>, vector<1x4xf32>
    %110 = vector.broadcast %109 : vector<1x4xf32> to vector<4x4xf32>
    %111 = arith.mulf %108, %110 : vector<4x4xf32>
    %c0_115 = arith.constant 0 : index
    %c0_116 = arith.constant 0 : index
    %112 = vector.load %arg10[%c0_115, %c0_116] : memref<72x4xf32, #tpu.memory_space<vmem>>, vector<4x4xf32>
    tpu.vector_store %arg10[%c0_115, %c0_116], %111 {strides = array<i32>} : memref<72x4xf32, #tpu.memory_space<vmem>>, vector<4x4xf32>,
    %c0_117 = arith.constant 0 : index
    %c126_118 = arith.constant 126 : index
    %113 = vector.load %arg9[%c0_117, %c126_118] : memref<8x135xf32, #tpu.memory_space<vmem>>, vector<4x4xf32>
    %c1_119 = arith.constant 1 : index
    %c0_120 = arith.constant 0 : index
    %114 = vector.load %arg2[%c1_119, %c0_120] : memref<9x4xf32, #tpu.memory_space<vmem>>, vector<1x4xf32>
    %115 = vector.broadcast %114 : vector<1x4xf32> to vector<4x4xf32>
    %116 = arith.mulf %113, %115 : vector<4x4xf32>
    %c8_121 = arith.constant 8 : index
    %c0_122 = arith.constant 0 : index
    %117 = vector.load %arg10[%c8_121, %c0_122] : memref<72x4xf32, #tpu.memory_space<vmem>>, vector<4x4xf32>
    tpu.vector_store %arg10[%c8_121, %c0_122], %116 {strides = array<i32>} : memref<72x4xf32, #tpu.memory_space<vmem>>, vector<4x4xf32>,
    %c0_123 = arith.constant 0 : index
    %c127_124 = arith.constant 127 : index
    %118 = vector.load %arg9[%c0_123, %c127_124] : memref<8x135xf32, #tpu.memory_space<vmem>>, vector<4x4xf32>
    %c2_125 = arith.constant 2 : index
    %c0_126 = arith.constant 0 : index
    %119 = vector.load %arg2[%c2_125, %c0_126] : memref<9x4xf32, #tpu.memory_space<vmem>>, vector<1x4xf32>
    %120 = vector.broadcast %119 : vector<1x4xf32> to vector<4x4xf32>
    %121 = arith.mulf %118, %120 : vector<4x4xf32>
    %c16_127 = arith.constant 16 : index
    %c0_128 = arith.constant 0 : index
    %122 = vector.load %arg10[%c16_127, %c0_128] : memref<72x4xf32, #tpu.memory_space<vmem>>, vector<4x4xf32>
    tpu.vector_store %arg10[%c16_127, %c0_128], %121 {strides = array<i32>} : memref<72x4xf32, #tpu.memory_space<vmem>>, vector<4x4xf32>,
    %c0_129 = arith.constant 0 : index
    %c127_130 = arith.constant 127 : index
    %123 = vector.load %arg9[%c0_129, %c127_130] : memref<8x135xf32, #tpu.memory_space<vmem>>, vector<4x4xf32>
    %c3_131 = arith.constant 3 : index
    %c0_132 = arith.constant 0 : index
    %124 = vector.load %arg2[%c3_131, %c0_132] : memref<9x4xf32, #tpu.memory_space<vmem>>, vector<1x4xf32>
    %125 = vector.broadcast %124 : vector<1x4xf32> to vector<4x4xf32>
    %126 = arith.mulf %123, %125 : vector<4x4xf32>
    %c24_133 = arith.constant 24 : index
    %c0_134 = arith.constant 0 : index
    %127 = vector.load %arg10[%c24_133, %c0_134] : memref<72x4xf32, #tpu.memory_space<vmem>>, vector<4x4xf32>
    tpu.vector_store %arg10[%c24_133, %c0_134], %126 {strides = array<i32>} : memref<72x4xf32, #tpu.memory_space<vmem>>, vector<4x4xf32>,
    %c0_135 = arith.constant 0 : index
    %c128_136 = arith.constant 128 : index
    %128 = vector.load %arg9[%c0_135, %c128_136] : memref<8x135xf32, #tpu.memory_space<vmem>>, vector<4x4xf32>
    %c4_137 = arith.constant 4 : index
    %c0_138 = arith.constant 0 : index
    %129 = vector.load %arg2[%c4_137, %c0_138] : memref<9x4xf32, #tpu.memory_space<vmem>>, vector<1x4xf32>
    %130 = vector.broadcast %129 : vector<1x4xf32> to vector<4x4xf32>
    %131 = arith.mulf %128, %130 : vector<4x4xf32>
    %c32_139 = arith.constant 32 : index
    %c0_140 = arith.constant 0 : index
    %132 = vector.load %arg10[%c32_139, %c0_140] : memref<72x4xf32, #tpu.memory_space<vmem>>, vector<4x4xf32>
    tpu.vector_store %arg10[%c32_139, %c0_140], %131 {strides = array<i32>} : memref<72x4xf32, #tpu.memory_space<vmem>>, vector<4x4xf32>,
    %c0_141 = arith.constant 0 : index
    %c129_142 = arith.constant 129 : index
    %133 = vector.load %arg9[%c0_141, %c129_142] : memref<8x135xf32, #tpu.memory_space<vmem>>, vector<4x4xf32>
    %c5_143 = arith.constant 5 : index
    %c0_144 = arith.constant 0 : index
    %134 = vector.load %arg2[%c5_143, %c0_144] : memref<9x4xf32, #tpu.memory_space<vmem>>, vector<1x4xf32>
    %135 = vector.broadcast %134 : vector<1x4xf32> to vector<4x4xf32>
    %136 = arith.mulf %133, %135 : vector<4x4xf32>
    %c40_145 = arith.constant 40 : index
    %c0_146 = arith.constant 0 : index
    %137 = vector.load %arg10[%c40_145, %c0_146] : memref<72x4xf32, #tpu.memory_space<vmem>>, vector<4x4xf32>
    tpu.vector_store %arg10[%c40_145, %c0_146], %136 {strides = array<i32>} : memref<72x4xf32, #tpu.memory_space<vmem>>, vector<4x4xf32>,
    %c0_147 = arith.constant 0 : index
    %c129_148 = arith.constant 129 : index
    %138 = vector.load %arg9[%c0_147, %c129_148] : memref<8x135xf32, #tpu.memory_space<vmem>>, vector<4x4xf32>
    %c6_149 = arith.constant 6 : index
    %c0_150 = arith.constant 0 : index
    %139 = vector.load %arg2[%c6_149, %c0_150] : memref<9x4xf32, #tpu.memory_space<vmem>>, vector<1x4xf32>
    %140 = vector.broadcast %139 : vector<1x4xf32> to vector<4x4xf32>
    %141 = arith.mulf %138, %140 : vector<4x4xf32>
    %c48_151 = arith.constant 48 : index
    %c0_152 = arith.constant 0 : index
    %142 = vector.load %arg10[%c48_151, %c0_152] : memref<72x4xf32, #tpu.memory_space<vmem>>, vector<4x4xf32>
    tpu.vector_store %arg10[%c48_151, %c0_152], %141 {strides = array<i32>} : memref<72x4xf32, #tpu.memory_space<vmem>>, vector<4x4xf32>,
    %c0_153 = arith.constant 0 : index
    %c130_154 = arith.constant 130 : index
    %143 = vector.load %arg9[%c0_153, %c130_154] : memref<8x135xf32, #tpu.memory_space<vmem>>, vector<4x4xf32>
    %c7_155 = arith.constant 7 : index
    %c0_156 = arith.constant 0 : index
    %144 = vector.load %arg2[%c7_155, %c0_156] : memref<9x4xf32, #tpu.memory_space<vmem>>, vector<1x4xf32>
    %145 = vector.broadcast %144 : vector<1x4xf32> to vector<4x4xf32>
    %146 = arith.mulf %143, %145 : vector<4x4xf32>
    %c56_157 = arith.constant 56 : index
    %c0_158 = arith.constant 0 : index
    %147 = vector.load %arg10[%c56_157, %c0_158] : memref<72x4xf32, #tpu.memory_space<vmem>>, vector<4x4xf32>
    tpu.vector_store %arg10[%c56_157, %c0_158], %146 {strides = array<i32>} : memref<72x4xf32, #tpu.memory_space<vmem>>, vector<4x4xf32>,
    %c0_159 = arith.constant 0 : index
    %c131_160 = arith.constant 131 : index
    %148 = vector.load %arg9[%c0_159, %c131_160] : memref<8x135xf32, #tpu.memory_space<vmem>>, vector<4x4xf32>
    %c8_161 = arith.constant 8 : index
    %c0_162 = arith.constant 0 : index
    %149 = vector.load %arg2[%c8_161, %c0_162] : memref<9x4xf32, #tpu.memory_space<vmem>>, vector<1x4xf32>
    %150 = vector.broadcast %149 : vector<1x4xf32> to vector<4x4xf32>
    %151 = arith.mulf %148, %150 : vector<4x4xf32>
    %c64_163 = arith.constant 64 : index
    %c0_164 = arith.constant 0 : index
    %152 = vector.load %arg10[%c64_163, %c0_164] : memref<72x4xf32, #tpu.memory_space<vmem>>, vector<4x4xf32>
    tpu.vector_store %arg10[%c64_163, %c0_164], %151 {strides = array<i32>} : memref<72x4xf32, #tpu.memory_space<vmem>>, vector<4x4xf32>,
    %153 = vector.extract_strided_slice %4 {offsets = [8, 0], sizes = [4, 72], strides = [1, 1]} : vector<38x72xf32> to vector<4x72xf32>
    %c0_165 = arith.constant 0 : index
    %c0_166 = arith.constant 0 : index
    %154 = vector.load %arg10[%c0_165, %c0_166] : memref<72x4xf32, #tpu.memory_space<vmem>>, vector<72x4xf32>
    %cst_167 = arith.constant dense<0.000000e+00> : vector<4x4xf32>
    %155 = tpu.matmul %153, %154, %cst_167 {dimension_numbers = #tpu.dot_dimension_numbers<[1], [0], [0], [1], [0, 0, 1, 1], [], []>} : vector<4x72xf32>, vector<72x4xf32>, vector<4x4xf32> -> vector<4x4xf32>
    %156 = vector.extract_strided_slice %5 {offsets = [8, 0], sizes = [4, 1], strides = [1, 1]} : vector<38x1xf32> to vector<4x1xf32>
    %157 = vector.broadcast %156 : vector<4x1xf32> to vector<4x4xf32>
    %158 = arith.addf %155, %157 : vector<4x4xf32>
    %cst_168 = arith.constant 0.000000e+00 : f32
    %159 = vector.broadcast %cst_168 : f32 to vector<4x4xf32>
    %160 = arith.maximumf %158, %159 : vector<4x4xf32>
    %c0_169 = arith.constant 0 : index
    %c128_170 = arith.constant 128 : index
    %161 = vector.load %arg9[%c0_169, %c128_170] : memref<8x135xf32, #tpu.memory_space<vmem>>, vector<4x4xf32>
    tpu.vector_store %arg9[%c0_169, %c128_170], %160 {strides = array<i32>} : memref<8x135xf32, #tpu.memory_space<vmem>>, vector<4x4xf32>,
    %c0_171 = arith.constant 0 : index
    %c125_172 = arith.constant 125 : index
    %162 = vector.load %arg9[%c0_171, %c125_172] : memref<8x135xf32, #tpu.memory_space<vmem>>, vector<4x4xf32>
    %c0_173 = arith.constant 0 : index
    %c0_174 = arith.constant 0 : index
    %163 = vector.load %arg2[%c0_173, %c0_174] : memref<9x4xf32, #tpu.memory_space<vmem>>, vector<1x4xf32>
    %164 = vector.broadcast %163 : vector<1x4xf32> to vector<4x4xf32>
    %165 = arith.mulf %162, %164 : vector<4x4xf32>
    %c0_175 = arith.constant 0 : index
    %c0_176 = arith.constant 0 : index
    %166 = vector.load %arg10[%c0_175, %c0_176] : memref<72x4xf32, #tpu.memory_space<vmem>>, vector<4x4xf32>
    tpu.vector_store %arg10[%c0_175, %c0_176], %165 {strides = array<i32>} : memref<72x4xf32, #tpu.memory_space<vmem>>, vector<4x4xf32>,
    %c0_177 = arith.constant 0 : index
    %c126_178 = arith.constant 126 : index
    %167 = vector.load %arg9[%c0_177, %c126_178] : memref<8x135xf32, #tpu.memory_space<vmem>>, vector<4x4xf32>
    %c1_179 = arith.constant 1 : index
    %c0_180 = arith.constant 0 : index
    %168 = vector.load %arg2[%c1_179, %c0_180] : memref<9x4xf32, #tpu.memory_space<vmem>>, vector<1x4xf32>
    %169 = vector.broadcast %168 : vector<1x4xf32> to vector<4x4xf32>
    %170 = arith.mulf %167, %169 : vector<4x4xf32>
    %c8_181 = arith.constant 8 : index
    %c0_182 = arith.constant 0 : index
    %171 = vector.load %arg10[%c8_181, %c0_182] : memref<72x4xf32, #tpu.memory_space<vmem>>, vector<4x4xf32>
    tpu.vector_store %arg10[%c8_181, %c0_182], %170 {strides = array<i32>} : memref<72x4xf32, #tpu.memory_space<vmem>>, vector<4x4xf32>,
    %c0_183 = arith.constant 0 : index
    %c127_184 = arith.constant 127 : index
    %172 = vector.load %arg9[%c0_183, %c127_184] : memref<8x135xf32, #tpu.memory_space<vmem>>, vector<4x4xf32>
    %c2_185 = arith.constant 2 : index
    %c0_186 = arith.constant 0 : index
    %173 = vector.load %arg2[%c2_185, %c0_186] : memref<9x4xf32, #tpu.memory_space<vmem>>, vector<1x4xf32>
    %174 = vector.broadcast %173 : vector<1x4xf32> to vector<4x4xf32>
    %175 = arith.mulf %172, %174 : vector<4x4xf32>
    %c16_187 = arith.constant 16 : index
    %c0_188 = arith.constant 0 : index
    %176 = vector.load %arg10[%c16_187, %c0_188] : memref<72x4xf32, #tpu.memory_space<vmem>>, vector<4x4xf32>
    tpu.vector_store %arg10[%c16_187, %c0_188], %175 {strides = array<i32>} : memref<72x4xf32, #tpu.memory_space<vmem>>, vector<4x4xf32>,
    %c0_189 = arith.constant 0 : index
    %c127_190 = arith.constant 127 : index
    %177 = vector.load %arg9[%c0_189, %c127_190] : memref<8x135xf32, #tpu.memory_space<vmem>>, vector<4x4xf32>
    %c3_191 = arith.constant 3 : index
    %c0_192 = arith.constant 0 : index
    %178 = vector.load %arg2[%c3_191, %c0_192] : memref<9x4xf32, #tpu.memory_space<vmem>>, vector<1x4xf32>
    %179 = vector.broadcast %178 : vector<1x4xf32> to vector<4x4xf32>
    %180 = arith.mulf %177, %179 : vector<4x4xf32>
    %c24_193 = arith.constant 24 : index
    %c0_194 = arith.constant 0 : index
    %181 = vector.load %arg10[%c24_193, %c0_194] : memref<72x4xf32, #tpu.memory_space<vmem>>, vector<4x4xf32>
    tpu.vector_store %arg10[%c24_193, %c0_194], %180 {strides = array<i32>} : memref<72x4xf32, #tpu.memory_space<vmem>>, vector<4x4xf32>,
    %c0_195 = arith.constant 0 : index
    %c128_196 = arith.constant 128 : index
    %182 = vector.load %arg9[%c0_195, %c128_196] : memref<8x135xf32, #tpu.memory_space<vmem>>, vector<4x4xf32>
    %c4_197 = arith.constant 4 : index
    %c0_198 = arith.constant 0 : index
    %183 = vector.load %arg2[%c4_197, %c0_198] : memref<9x4xf32, #tpu.memory_space<vmem>>, vector<1x4xf32>
    %184 = vector.broadcast %183 : vector<1x4xf32> to vector<4x4xf32>
    %185 = arith.mulf %182, %184 : vector<4x4xf32>
    %c32_199 = arith.constant 32 : index
    %c0_200 = arith.constant 0 : index
    %186 = vector.load %arg10[%c32_199, %c0_200] : memref<72x4xf32, #tpu.memory_space<vmem>>, vector<4x4xf32>
    tpu.vector_store %arg10[%c32_199, %c0_200], %185 {strides = array<i32>} : memref<72x4xf32, #tpu.memory_space<vmem>>, vector<4x4xf32>,
    %c0_201 = arith.constant 0 : index
    %c129_202 = arith.constant 129 : index
    %187 = vector.load %arg9[%c0_201, %c129_202] : memref<8x135xf32, #tpu.memory_space<vmem>>, vector<4x4xf32>
    %c5_203 = arith.constant 5 : index
    %c0_204 = arith.constant 0 : index
    %188 = vector.load %arg2[%c5_203, %c0_204] : memref<9x4xf32, #tpu.memory_space<vmem>>, vector<1x4xf32>
    %189 = vector.broadcast %188 : vector<1x4xf32> to vector<4x4xf32>
    %190 = arith.mulf %187, %189 : vector<4x4xf32>
    %c40_205 = arith.constant 40 : index
    %c0_206 = arith.constant 0 : index
    %191 = vector.load %arg10[%c40_205, %c0_206] : memref<72x4xf32, #tpu.memory_space<vmem>>, vector<4x4xf32>
    tpu.vector_store %arg10[%c40_205, %c0_206], %190 {strides = array<i32>} : memref<72x4xf32, #tpu.memory_space<vmem>>, vector<4x4xf32>,
    %c0_207 = arith.constant 0 : index
    %c129_208 = arith.constant 129 : index
    %192 = vector.load %arg9[%c0_207, %c129_208] : memref<8x135xf32, #tpu.memory_space<vmem>>, vector<4x4xf32>
    %c6_209 = arith.constant 6 : index
    %c0_210 = arith.constant 0 : index
    %193 = vector.load %arg2[%c6_209, %c0_210] : memref<9x4xf32, #tpu.memory_space<vmem>>, vector<1x4xf32>
    %194 = vector.broadcast %193 : vector<1x4xf32> to vector<4x4xf32>
    %195 = arith.mulf %192, %194 : vector<4x4xf32>
    %c48_211 = arith.constant 48 : index
    %c0_212 = arith.constant 0 : index
    %196 = vector.load %arg10[%c48_211, %c0_212] : memref<72x4xf32, #tpu.memory_space<vmem>>, vector<4x4xf32>
    tpu.vector_store %arg10[%c48_211, %c0_212], %195 {strides = array<i32>} : memref<72x4xf32, #tpu.memory_space<vmem>>, vector<4x4xf32>,
    %c0_213 = arith.constant 0 : index
    %c130_214 = arith.constant 130 : index
    %197 = vector.load %arg9[%c0_213, %c130_214] : memref<8x135xf32, #tpu.memory_space<vmem>>, vector<4x4xf32>
    %c7_215 = arith.constant 7 : index
    %c0_216 = arith.constant 0 : index
    %198 = vector.load %arg2[%c7_215, %c0_216] : memref<9x4xf32, #tpu.memory_space<vmem>>, vector<1x4xf32>
    %199 = vector.broadcast %198 : vector<1x4xf32> to vector<4x4xf32>
    %200 = arith.mulf %197, %199 : vector<4x4xf32>
    %c56_217 = arith.constant 56 : index
    %c0_218 = arith.constant 0 : index
    %201 = vector.load %arg10[%c56_217, %c0_218] : memref<72x4xf32, #tpu.memory_space<vmem>>, vector<4x4xf32>
    tpu.vector_store %arg10[%c56_217, %c0_218], %200 {strides = array<i32>} : memref<72x4xf32, #tpu.memory_space<vmem>>, vector<4x4xf32>,
    %c0_219 = arith.constant 0 : index
    %c131_220 = arith.constant 131 : index
    %202 = vector.load %arg9[%c0_219, %c131_220] : memref<8x135xf32, #tpu.memory_space<vmem>>, vector<4x4xf32>
    %c8_221 = arith.constant 8 : index
    %c0_222 = arith.constant 0 : index
    %203 = vector.load %arg2[%c8_221, %c0_222] : memref<9x4xf32, #tpu.memory_space<vmem>>, vector<1x4xf32>
    %204 = vector.broadcast %203 : vector<1x4xf32> to vector<4x4xf32>
    %205 = arith.mulf %202, %204 : vector<4x4xf32>
    %c64_223 = arith.constant 64 : index
    %c0_224 = arith.constant 0 : index
    %206 = vector.load %arg10[%c64_223, %c0_224] : memref<72x4xf32, #tpu.memory_space<vmem>>, vector<4x4xf32>
    tpu.vector_store %arg10[%c64_223, %c0_224], %205 {strides = array<i32>} : memref<72x4xf32, #tpu.memory_space<vmem>>, vector<4x4xf32>,
    %207 = vector.extract_strided_slice %4 {offsets = [12, 0], sizes = [4, 72], strides = [1, 1]} : vector<38x72xf32> to vector<4x72xf32>
    %c0_225 = arith.constant 0 : index
    %c0_226 = arith.constant 0 : index
    %208 = vector.load %arg10[%c0_225, %c0_226] : memref<72x4xf32, #tpu.memory_space<vmem>>, vector<72x4xf32>
    %cst_227 = arith.constant dense<0.000000e+00> : vector<4x4xf32>
    %209 = tpu.matmul %207, %208, %cst_227 {dimension_numbers = #tpu.dot_dimension_numbers<[1], [0], [0], [1], [0, 0, 1, 1], [], []>} : vector<4x72xf32>, vector<72x4xf32>, vector<4x4xf32> -> vector<4x4xf32>
    %210 = vector.extract_strided_slice %5 {offsets = [12, 0], sizes = [4, 1], strides = [1, 1]} : vector<38x1xf32> to vector<4x1xf32>
    %211 = vector.broadcast %210 : vector<4x1xf32> to vector<4x4xf32>
    %212 = arith.addf %209, %211 : vector<4x4xf32>
    %cst_228 = arith.constant 0.000000e+00 : f32
    %213 = vector.broadcast %cst_228 : f32 to vector<4x4xf32>
    %214 = arith.maximumf %212, %213 : vector<4x4xf32>
    %c0_229 = arith.constant 0 : index
    %c128_230 = arith.constant 128 : index
    %215 = vector.load %arg9[%c0_229, %c128_230] : memref<8x135xf32, #tpu.memory_space<vmem>>, vector<4x4xf32>
    tpu.vector_store %arg9[%c0_229, %c128_230], %160 {strides = array<i32>} : memref<8x135xf32, #tpu.memory_space<vmem>>, vector<4x4xf32>,
    %c4_231 = arith.constant 4 : index
    %c128_232 = arith.constant 128 : index
    %216 = vector.load %arg9[%c4_231, %c128_232] : memref<8x135xf32, #tpu.memory_space<vmem>>, vector<4x4xf32>
    tpu.vector_store %arg9[%c4_231, %c128_232], %214 {strides = array<i32>} : memref<8x135xf32, #tpu.memory_space<vmem>>, vector<4x4xf32>,
    %c0_233 = arith.constant 0 : index
    %c125_234 = arith.constant 125 : index
    %217 = vector.load %arg9[%c0_233, %c125_234] : memref<8x135xf32, #tpu.memory_space<vmem>>, vector<8x4xf32>
    %c0_235 = arith.constant 0 : index
    %c0_236 = arith.constant 0 : index
    %218 = vector.load %arg2[%c0_235, %c0_236] : memref<9x4xf32, #tpu.memory_space<vmem>>, vector<1x4xf32>
    %219 = vector.broadcast %218 : vector<1x4xf32> to vector<8x4xf32>
    %220 = arith.mulf %217, %219 : vector<8x4xf32>
    %c0_237 = arith.constant 0 : index
    %c0_238 = arith.constant 0 : index
    %221 = vector.load %arg10[%c0_237, %c0_238] : memref<72x4xf32, #tpu.memory_space<vmem>>, vector<8x4xf32>
    tpu.vector_store %arg10[%c0_237, %c0_238], %220 {strides = array<i32>} : memref<72x4xf32, #tpu.memory_space<vmem>>, vector<8x4xf32>,
    %c0_239 = arith.constant 0 : index
    %c126_240 = arith.constant 126 : index
    %222 = vector.load %arg9[%c0_239, %c126_240] : memref<8x135xf32, #tpu.memory_space<vmem>>, vector<8x4xf32>
    %c1_241 = arith.constant 1 : index
    %c0_242 = arith.constant 0 : index
    %223 = vector.load %arg2[%c1_241, %c0_242] : memref<9x4xf32, #tpu.memory_space<vmem>>, vector<1x4xf32>
    %224 = vector.broadcast %223 : vector<1x4xf32> to vector<8x4xf32>
    %225 = arith.mulf %222, %224 : vector<8x4xf32>
    %c8_243 = arith.constant 8 : index
    %c0_244 = arith.constant 0 : index
    %226 = vector.load %arg10[%c8_243, %c0_244] : memref<72x4xf32, #tpu.memory_space<vmem>>, vector<8x4xf32>
    tpu.vector_store %arg10[%c8_243, %c0_244], %225 {strides = array<i32>} : memref<72x4xf32, #tpu.memory_space<vmem>>, vector<8x4xf32>,
    %c0_245 = arith.constant 0 : index
    %c127_246 = arith.constant 127 : index
    %227 = vector.load %arg9[%c0_245, %c127_246] : memref<8x135xf32, #tpu.memory_space<vmem>>, vector<8x4xf32>
    %c2_247 = arith.constant 2 : index
    %c0_248 = arith.constant 0 : index
    %228 = vector.load %arg2[%c2_247, %c0_248] : memref<9x4xf32, #tpu.memory_space<vmem>>, vector<1x4xf32>
    %229 = vector.broadcast %228 : vector<1x4xf32> to vector<8x4xf32>
    %230 = arith.mulf %227, %229 : vector<8x4xf32>
    %c16_249 = arith.constant 16 : index
    %c0_250 = arith.constant 0 : index
    %231 = vector.load %arg10[%c16_249, %c0_250] : memref<72x4xf32, #tpu.memory_space<vmem>>, vector<8x4xf32>
    tpu.vector_store %arg10[%c16_249, %c0_250], %230 {strides = array<i32>} : memref<72x4xf32, #tpu.memory_space<vmem>>, vector<8x4xf32>,
    %c0_251 = arith.constant 0 : index
    %c127_252 = arith.constant 127 : index
    %232 = vector.load %arg9[%c0_251, %c127_252] : memref<8x135xf32, #tpu.memory_space<vmem>>, vector<8x4xf32>
    %c3_253 = arith.constant 3 : index
    %c0_254 = arith.constant 0 : index
    %233 = vector.load %arg2[%c3_253, %c0_254] : memref<9x4xf32, #tpu.memory_space<vmem>>, vector<1x4xf32>
    %234 = vector.broadcast %233 : vector<1x4xf32> to vector<8x4xf32>
    %235 = arith.mulf %232, %234 : vector<8x4xf32>
    %c24_255 = arith.constant 24 : index
    %c0_256 = arith.constant 0 : index
    %236 = vector.load %arg10[%c24_255, %c0_256] : memref<72x4xf32, #tpu.memory_space<vmem>>, vector<8x4xf32>
    tpu.vector_store %arg10[%c24_255, %c0_256], %235 {strides = array<i32>} : memref<72x4xf32, #tpu.memory_space<vmem>>, vector<8x4xf32>,
    %c0_257 = arith.constant 0 : index
    %c128_258 = arith.constant 128 : index
    %237 = vector.load %arg9[%c0_257, %c128_258] : memref<8x135xf32, #tpu.memory_space<vmem>>, vector<8x4xf32>
    %c4_259 = arith.constant 4 : index
    %c0_260 = arith.constant 0 : index
    %238 = vector.load %arg2[%c4_259, %c0_260] : memref<9x4xf32, #tpu.memory_space<vmem>>, vector<1x4xf32>
    %239 = vector.broadcast %238 : vector<1x4xf32> to vector<8x4xf32>
    %240 = arith.mulf %237, %239 : vector<8x4xf32>
    %c32_261 = arith.constant 32 : index
    %c0_262 = arith.constant 0 : index
    %241 = vector.load %arg10[%c32_261, %c0_262] : memref<72x4xf32, #tpu.memory_space<vmem>>, vector<8x4xf32>
    tpu.vector_store %arg10[%c32_261, %c0_262], %240 {strides = array<i32>} : memref<72x4xf32, #tpu.memory_space<vmem>>, vector<8x4xf32>,
    %c0_263 = arith.constant 0 : index
    %c129_264 = arith.constant 129 : index
    %242 = vector.load %arg9[%c0_263, %c129_264] : memref<8x135xf32, #tpu.memory_space<vmem>>, vector<8x4xf32>
    %c5_265 = arith.constant 5 : index
    %c0_266 = arith.constant 0 : index
    %243 = vector.load %arg2[%c5_265, %c0_266] : memref<9x4xf32, #tpu.memory_space<vmem>>, vector<1x4xf32>
    %244 = vector.broadcast %243 : vector<1x4xf32> to vector<8x4xf32>
    %245 = arith.mulf %242, %244 : vector<8x4xf32>
    %c40_267 = arith.constant 40 : index
    %c0_268 = arith.constant 0 : index
    %246 = vector.load %arg10[%c40_267, %c0_268] : memref<72x4xf32, #tpu.memory_space<vmem>>, vector<8x4xf32>
    tpu.vector_store %arg10[%c40_267, %c0_268], %245 {strides = array<i32>} : memref<72x4xf32, #tpu.memory_space<vmem>>, vector<8x4xf32>,
    %c0_269 = arith.constant 0 : index
    %c129_270 = arith.constant 129 : index
    %247 = vector.load %arg9[%c0_269, %c129_270] : memref<8x135xf32, #tpu.memory_space<vmem>>, vector<8x4xf32>
    %c6_271 = arith.constant 6 : index
    %c0_272 = arith.constant 0 : index
    %248 = vector.load %arg2[%c6_271, %c0_272] : memref<9x4xf32, #tpu.memory_space<vmem>>, vector<1x4xf32>
    %249 = vector.broadcast %248 : vector<1x4xf32> to vector<8x4xf32>
    %250 = arith.mulf %247, %249 : vector<8x4xf32>
    %c48_273 = arith.constant 48 : index
    %c0_274 = arith.constant 0 : index
    %251 = vector.load %arg10[%c48_273, %c0_274] : memref<72x4xf32, #tpu.memory_space<vmem>>, vector<8x4xf32>
    tpu.vector_store %arg10[%c48_273, %c0_274], %250 {strides = array<i32>} : memref<72x4xf32, #tpu.memory_space<vmem>>, vector<8x4xf32>,
    %c0_275 = arith.constant 0 : index
    %c130_276 = arith.constant 130 : index
    %252 = vector.load %arg9[%c0_275, %c130_276] : memref<8x135xf32, #tpu.memory_space<vmem>>, vector<8x4xf32>
    %c7_277 = arith.constant 7 : index
    %c0_278 = arith.constant 0 : index
    %253 = vector.load %arg2[%c7_277, %c0_278] : memref<9x4xf32, #tpu.memory_space<vmem>>, vector<1x4xf32>
    %254 = vector.broadcast %253 : vector<1x4xf32> to vector<8x4xf32>
    %255 = arith.mulf %252, %254 : vector<8x4xf32>
    %c56_279 = arith.constant 56 : index
    %c0_280 = arith.constant 0 : index
    %256 = vector.load %arg10[%c56_279, %c0_280] : memref<72x4xf32, #tpu.memory_space<vmem>>, vector<8x4xf32>
    tpu.vector_store %arg10[%c56_279, %c0_280], %255 {strides = array<i32>} : memref<72x4xf32, #tpu.memory_space<vmem>>, vector<8x4xf32>,
    %c0_281 = arith.constant 0 : index
    %c131_282 = arith.constant 131 : index
    %257 = vector.load %arg9[%c0_281, %c131_282] : memref<8x135xf32, #tpu.memory_space<vmem>>, vector<8x4xf32>
    %c8_283 = arith.constant 8 : index
    %c0_284 = arith.constant 0 : index
    %258 = vector.load %arg2[%c8_283, %c0_284] : memref<9x4xf32, #tpu.memory_space<vmem>>, vector<1x4xf32>
    %259 = vector.broadcast %258 : vector<1x4xf32> to vector<8x4xf32>
    %260 = arith.mulf %257, %259 : vector<8x4xf32>
    %c64_285 = arith.constant 64 : index
    %c0_286 = arith.constant 0 : index
    %261 = vector.load %arg10[%c64_285, %c0_286] : memref<72x4xf32, #tpu.memory_space<vmem>>, vector<8x4xf32>
    tpu.vector_store %arg10[%c64_285, %c0_286], %260 {strides = array<i32>} : memref<72x4xf32, #tpu.memory_space<vmem>>, vector<8x4xf32>,
    %262 = vector.extract_strided_slice %4 {offsets = [16, 0], sizes = [4, 72], strides = [1, 1]} : vector<38x72xf32> to vector<4x72xf32>
    %c0_287 = arith.constant 0 : index
    %c0_288 = arith.constant 0 : index
    %263 = vector.load %arg10[%c0_287, %c0_288] : memref<72x4xf32, #tpu.memory_space<vmem>>, vector<72x4xf32>
    %cst_289 = arith.constant dense<0.000000e+00> : vector<4x4xf32>
    %264 = tpu.matmul %262, %263, %cst_289 {dimension_numbers = #tpu.dot_dimension_numbers<[1], [0], [0], [1], [0, 0, 1, 1], [], []>} : vector<4x72xf32>, vector<72x4xf32>, vector<4x4xf32> -> vector<4x4xf32>
    %265 = vector.extract_strided_slice %5 {offsets = [16, 0], sizes = [4, 1], strides = [1, 1]} : vector<38x1xf32> to vector<4x1xf32>
    %266 = vector.broadcast %265 : vector<4x1xf32> to vector<4x4xf32>
    %267 = arith.addf %264, %266 : vector<4x4xf32>
    %cst_290 = arith.constant 0.000000e+00 : f32
    %268 = vector.broadcast %cst_290 : f32 to vector<4x4xf32>
    %269 = arith.maximumf %267, %268 : vector<4x4xf32>
    %c0_291 = arith.constant 0 : index
    %c128_292 = arith.constant 128 : index
    %270 = vector.load %arg9[%c0_291, %c128_292] : memref<8x135xf32, #tpu.memory_space<vmem>>, vector<4x4xf32>
    tpu.vector_store %arg9[%c0_291, %c128_292], %106 {strides = array<i32>} : memref<8x135xf32, #tpu.memory_space<vmem>>, vector<4x4xf32>,
    %c4_293 = arith.constant 4 : index
    %c128_294 = arith.constant 128 : index
    %271 = vector.load %arg9[%c4_293, %c128_294] : memref<8x135xf32, #tpu.memory_space<vmem>>, vector<4x4xf32>
    tpu.vector_store %arg9[%c4_293, %c128_294], %269 {strides = array<i32>} : memref<8x135xf32, #tpu.memory_space<vmem>>, vector<4x4xf32>,
    %c0_295 = arith.constant 0 : index
    %c125_296 = arith.constant 125 : index
    %272 = vector.load %arg9[%c0_295, %c125_296] : memref<8x135xf32, #tpu.memory_space<vmem>>, vector<8x4xf32>
    %c0_297 = arith.constant 0 : index
    %c0_298 = arith.constant 0 : index
    %273 = vector.load %arg2[%c0_297, %c0_298] : memref<9x4xf32, #tpu.memory_space<vmem>>, vector<1x4xf32>
    %274 = vector.broadcast %273 : vector<1x4xf32> to vector<8x4xf32>
    %275 = arith.mulf %272, %274 : vector<8x4xf32>
    %c0_299 = arith.constant 0 : index
    %c0_300 = arith.constant 0 : index
    %276 = vector.load %arg10[%c0_299, %c0_300] : memref<72x4xf32, #tpu.memory_space<vmem>>, vector<8x4xf32>
    tpu.vector_store %arg10[%c0_299, %c0_300], %275 {strides = array<i32>} : memref<72x4xf32, #tpu.memory_space<vmem>>, vector<8x4xf32>,
    %c0_301 = arith.constant 0 : index
    %c126_302 = arith.constant 126 : index
    %277 = vector.load %arg9[%c0_301, %c126_302] : memref<8x135xf32, #tpu.memory_space<vmem>>, vector<8x4xf32>
    %c1_303 = arith.constant 1 : index
    %c0_304 = arith.constant 0 : index
    %278 = vector.load %arg2[%c1_303, %c0_304] : memref<9x4xf32, #tpu.memory_space<vmem>>, vector<1x4xf32>
    %279 = vector.broadcast %278 : vector<1x4xf32> to vector<8x4xf32>
    %280 = arith.mulf %277, %279 : vector<8x4xf32>
    %c8_305 = arith.constant 8 : index
    %c0_306 = arith.constant 0 : index
    %281 = vector.load %arg10[%c8_305, %c0_306] : memref<72x4xf32, #tpu.memory_space<vmem>>, vector<8x4xf32>
    tpu.vector_store %arg10[%c8_305, %c0_306], %280 {strides = array<i32>} : memref<72x4xf32, #tpu.memory_space<vmem>>, vector<8x4xf32>,
    %c0_307 = arith.constant 0 : index
    %c127_308 = arith.constant 127 : index
    %282 = vector.load %arg9[%c0_307, %c127_308] : memref<8x135xf32, #tpu.memory_space<vmem>>, vector<8x4xf32>
    %c2_309 = arith.constant 2 : index
    %c0_310 = arith.constant 0 : index
    %283 = vector.load %arg2[%c2_309, %c0_310] : memref<9x4xf32, #tpu.memory_space<vmem>>, vector<1x4xf32>
    %284 = vector.broadcast %283 : vector<1x4xf32> to vector<8x4xf32>
    %285 = arith.mulf %282, %284 : vector<8x4xf32>
    %c16_311 = arith.constant 16 : index
    %c0_312 = arith.constant 0 : index
    %286 = vector.load %arg10[%c16_311, %c0_312] : memref<72x4xf32, #tpu.memory_space<vmem>>, vector<8x4xf32>
    tpu.vector_store %arg10[%c16_311, %c0_312], %285 {strides = array<i32>} : memref<72x4xf32, #tpu.memory_space<vmem>>, vector<8x4xf32>,
    %c0_313 = arith.constant 0 : index
    %c127_314 = arith.constant 127 : index
    %287 = vector.load %arg9[%c0_313, %c127_314] : memref<8x135xf32, #tpu.memory_space<vmem>>, vector<8x4xf32>
    %c3_315 = arith.constant 3 : index
    %c0_316 = arith.constant 0 : index
    %288 = vector.load %arg2[%c3_315, %c0_316] : memref<9x4xf32, #tpu.memory_space<vmem>>, vector<1x4xf32>
    %289 = vector.broadcast %288 : vector<1x4xf32> to vector<8x4xf32>
    %290 = arith.mulf %287, %289 : vector<8x4xf32>
    %c24_317 = arith.constant 24 : index
    %c0_318 = arith.constant 0 : index
    %291 = vector.load %arg10[%c24_317, %c0_318] : memref<72x4xf32, #tpu.memory_space<vmem>>, vector<8x4xf32>
    tpu.vector_store %arg10[%c24_317, %c0_318], %290 {strides = array<i32>} : memref<72x4xf32, #tpu.memory_space<vmem>>, vector<8x4xf32>,
    %c0_319 = arith.constant 0 : index
    %c128_320 = arith.constant 128 : index
    %292 = vector.load %arg9[%c0_319, %c128_320] : memref<8x135xf32, #tpu.memory_space<vmem>>, vector<8x4xf32>
    %c4_321 = arith.constant 4 : index
    %c0_322 = arith.constant 0 : index
    %293 = vector.load %arg2[%c4_321, %c0_322] : memref<9x4xf32, #tpu.memory_space<vmem>>, vector<1x4xf32>
    %294 = vector.broadcast %293 : vector<1x4xf32> to vector<8x4xf32>
    %295 = arith.mulf %292, %294 : vector<8x4xf32>
    %c32_323 = arith.constant 32 : index
    %c0_324 = arith.constant 0 : index
    %296 = vector.load %arg10[%c32_323, %c0_324] : memref<72x4xf32, #tpu.memory_space<vmem>>, vector<8x4xf32>
    tpu.vector_store %arg10[%c32_323, %c0_324], %295 {strides = array<i32>} : memref<72x4xf32, #tpu.memory_space<vmem>>, vector<8x4xf32>,
    %c0_325 = arith.constant 0 : index
    %c129_326 = arith.constant 129 : index
    %297 = vector.load %arg9[%c0_325, %c129_326] : memref<8x135xf32, #tpu.memory_space<vmem>>, vector<8x4xf32>
    %c5_327 = arith.constant 5 : index
    %c0_328 = arith.constant 0 : index
    %298 = vector.load %arg2[%c5_327, %c0_328] : memref<9x4xf32, #tpu.memory_space<vmem>>, vector<1x4xf32>
    %299 = vector.broadcast %298 : vector<1x4xf32> to vector<8x4xf32>
    %300 = arith.mulf %297, %299 : vector<8x4xf32>
    %c40_329 = arith.constant 40 : index
    %c0_330 = arith.constant 0 : index
    %301 = vector.load %arg10[%c40_329, %c0_330] : memref<72x4xf32, #tpu.memory_space<vmem>>, vector<8x4xf32>
    tpu.vector_store %arg10[%c40_329, %c0_330], %300 {strides = array<i32>} : memref<72x4xf32, #tpu.memory_space<vmem>>, vector<8x4xf32>,
    %c0_331 = arith.constant 0 : index
    %c129_332 = arith.constant 129 : index
    %302 = vector.load %arg9[%c0_331, %c129_332] : memref<8x135xf32, #tpu.memory_space<vmem>>, vector<8x4xf32>
    %c6_333 = arith.constant 6 : index
    %c0_334 = arith.constant 0 : index
    %303 = vector.load %arg2[%c6_333, %c0_334] : memref<9x4xf32, #tpu.memory_space<vmem>>, vector<1x4xf32>
    %304 = vector.broadcast %303 : vector<1x4xf32> to vector<8x4xf32>
    %305 = arith.mulf %302, %304 : vector<8x4xf32>
    %c48_335 = arith.constant 48 : index
    %c0_336 = arith.constant 0 : index
    %306 = vector.load %arg10[%c48_335, %c0_336] : memref<72x4xf32, #tpu.memory_space<vmem>>, vector<8x4xf32>
    tpu.vector_store %arg10[%c48_335, %c0_336], %305 {strides = array<i32>} : memref<72x4xf32, #tpu.memory_space<vmem>>, vector<8x4xf32>,
    %c0_337 = arith.constant 0 : index
    %c130_338 = arith.constant 130 : index
    %307 = vector.load %arg9[%c0_337, %c130_338] : memref<8x135xf32, #tpu.memory_space<vmem>>, vector<8x4xf32>
    %c7_339 = arith.constant 7 : index
    %c0_340 = arith.constant 0 : index
    %308 = vector.load %arg2[%c7_339, %c0_340] : memref<9x4xf32, #tpu.memory_space<vmem>>, vector<1x4xf32>
    %309 = vector.broadcast %308 : vector<1x4xf32> to vector<8x4xf32>
    %310 = arith.mulf %307, %309 : vector<8x4xf32>
    %c56_341 = arith.constant 56 : index
    %c0_342 = arith.constant 0 : index
    %311 = vector.load %arg10[%c56_341, %c0_342] : memref<72x4xf32, #tpu.memory_space<vmem>>, vector<8x4xf32>
    tpu.vector_store %arg10[%c56_341, %c0_342], %310 {strides = array<i32>} : memref<72x4xf32, #tpu.memory_space<vmem>>, vector<8x4xf32>,
    %c0_343 = arith.constant 0 : index
    %c131_344 = arith.constant 131 : index
    %312 = vector.load %arg9[%c0_343, %c131_344] : memref<8x135xf32, #tpu.memory_space<vmem>>, vector<8x4xf32>
    %c8_345 = arith.constant 8 : index
    %c0_346 = arith.constant 0 : index
    %313 = vector.load %arg2[%c8_345, %c0_346] : memref<9x4xf32, #tpu.memory_space<vmem>>, vector<1x4xf32>
    %314 = vector.broadcast %313 : vector<1x4xf32> to vector<8x4xf32>
    %315 = arith.mulf %312, %314 : vector<8x4xf32>
    %c64_347 = arith.constant 64 : index
    %c0_348 = arith.constant 0 : index
    %316 = vector.load %arg10[%c64_347, %c0_348] : memref<72x4xf32, #tpu.memory_space<vmem>>, vector<8x4xf32>
    tpu.vector_store %arg10[%c64_347, %c0_348], %315 {strides = array<i32>} : memref<72x4xf32, #tpu.memory_space<vmem>>, vector<8x4xf32>,
    %317 = vector.extract_strided_slice %4 {offsets = [20, 0], sizes = [4, 72], strides = [1, 1]} : vector<38x72xf32> to vector<4x72xf32>
    %c0_349 = arith.constant 0 : index
    %c0_350 = arith.constant 0 : index
    %318 = vector.load %arg10[%c0_349, %c0_350] : memref<72x4xf32, #tpu.memory_space<vmem>>, vector<72x4xf32>
    %cst_351 = arith.constant dense<0.000000e+00> : vector<4x4xf32>
    %319 = tpu.matmul %317, %318, %cst_351 {dimension_numbers = #tpu.dot_dimension_numbers<[1], [0], [0], [1], [0, 0, 1, 1], [], []>} : vector<4x72xf32>, vector<72x4xf32>, vector<4x4xf32> -> vector<4x4xf32>
    %320 = vector.extract_strided_slice %5 {offsets = [20, 0], sizes = [4, 1], strides = [1, 1]} : vector<38x1xf32> to vector<4x1xf32>
    %321 = vector.broadcast %320 : vector<4x1xf32> to vector<4x4xf32>
    %322 = arith.addf %319, %321 : vector<4x4xf32>
    %cst_352 = arith.constant 0.000000e+00 : f32
    %323 = vector.broadcast %cst_352 : f32 to vector<4x4xf32>
    %324 = arith.maximumf %322, %323 : vector<4x4xf32>
    %c0_353 = arith.constant 0 : index
    %c128_354 = arith.constant 128 : index
    %325 = vector.load %arg9[%c0_353, %c128_354] : memref<8x135xf32, #tpu.memory_space<vmem>>, vector<4x4xf32>
    tpu.vector_store %arg9[%c0_353, %c128_354], %52 {strides = array<i32>} : memref<8x135xf32, #tpu.memory_space<vmem>>, vector<4x4xf32>,
    %c4_355 = arith.constant 4 : index
    %c128_356 = arith.constant 128 : index
    %326 = vector.load %arg9[%c4_355, %c128_356] : memref<8x135xf32, #tpu.memory_space<vmem>>, vector<4x4xf32>
    tpu.vector_store %arg9[%c4_355, %c128_356], %324 {strides = array<i32>} : memref<8x135xf32, #tpu.memory_space<vmem>>, vector<4x4xf32>,
    %c0_357 = arith.constant 0 : index
    %c125_358 = arith.constant 125 : index
    %327 = vector.load %arg9[%c0_357, %c125_358] : memref<8x135xf32, #tpu.memory_space<vmem>>, vector<8x4xf32>
    %c0_359 = arith.constant 0 : index
    %c0_360 = arith.constant 0 : index
    %328 = vector.load %arg2[%c0_359, %c0_360] : memref<9x4xf32, #tpu.memory_space<vmem>>, vector<1x4xf32>
    %329 = vector.broadcast %328 : vector<1x4xf32> to vector<8x4xf32>
    %330 = arith.mulf %327, %329 : vector<8x4xf32>
    %c0_361 = arith.constant 0 : index
    %c0_362 = arith.constant 0 : index
    %331 = vector.load %arg10[%c0_361, %c0_362] : memref<72x4xf32, #tpu.memory_space<vmem>>, vector<8x4xf32>
    tpu.vector_store %arg10[%c0_361, %c0_362], %330 {strides = array<i32>} : memref<72x4xf32, #tpu.memory_space<vmem>>, vector<8x4xf32>,
    %c0_363 = arith.constant 0 : index
    %c126_364 = arith.constant 126 : index
    %332 = vector.load %arg9[%c0_363, %c126_364] : memref<8x135xf32, #tpu.memory_space<vmem>>, vector<8x4xf32>
    %c1_365 = arith.constant 1 : index
    %c0_366 = arith.constant 0 : index
    %333 = vector.load %arg2[%c1_365, %c0_366] : memref<9x4xf32, #tpu.memory_space<vmem>>, vector<1x4xf32>
    %334 = vector.broadcast %333 : vector<1x4xf32> to vector<8x4xf32>
    %335 = arith.mulf %332, %334 : vector<8x4xf32>
    %c8_367 = arith.constant 8 : index
    %c0_368 = arith.constant 0 : index
    %336 = vector.load %arg10[%c8_367, %c0_368] : memref<72x4xf32, #tpu.memory_space<vmem>>, vector<8x4xf32>
    tpu.vector_store %arg10[%c8_367, %c0_368], %335 {strides = array<i32>} : memref<72x4xf32, #tpu.memory_space<vmem>>, vector<8x4xf32>,
    %c0_369 = arith.constant 0 : index
    %c127_370 = arith.constant 127 : index
    %337 = vector.load %arg9[%c0_369, %c127_370] : memref<8x135xf32, #tpu.memory_space<vmem>>, vector<8x4xf32>
    %c2_371 = arith.constant 2 : index
    %c0_372 = arith.constant 0 : index
    %338 = vector.load %arg2[%c2_371, %c0_372] : memref<9x4xf32, #tpu.memory_space<vmem>>, vector<1x4xf32>
    %339 = vector.broadcast %338 : vector<1x4xf32> to vector<8x4xf32>
    %340 = arith.mulf %337, %339 : vector<8x4xf32>
    %c16_373 = arith.constant 16 : index
    %c0_374 = arith.constant 0 : index
    %341 = vector.load %arg10[%c16_373, %c0_374] : memref<72x4xf32, #tpu.memory_space<vmem>>, vector<8x4xf32>
    tpu.vector_store %arg10[%c16_373, %c0_374], %340 {strides = array<i32>} : memref<72x4xf32, #tpu.memory_space<vmem>>, vector<8x4xf32>,
    %c0_375 = arith.constant 0 : index
    %c127_376 = arith.constant 127 : index
    %342 = vector.load %arg9[%c0_375, %c127_376] : memref<8x135xf32, #tpu.memory_space<vmem>>, vector<8x4xf32>
    %c3_377 = arith.constant 3 : index
    %c0_378 = arith.constant 0 : index
    %343 = vector.load %arg2[%c3_377, %c0_378] : memref<9x4xf32, #tpu.memory_space<vmem>>, vector<1x4xf32>
    %344 = vector.broadcast %343 : vector<1x4xf32> to vector<8x4xf32>
    %345 = arith.mulf %342, %344 : vector<8x4xf32>
    %c24_379 = arith.constant 24 : index
    %c0_380 = arith.constant 0 : index
    %346 = vector.load %arg10[%c24_379, %c0_380] : memref<72x4xf32, #tpu.memory_space<vmem>>, vector<8x4xf32>
    tpu.vector_store %arg10[%c24_379, %c0_380], %345 {strides = array<i32>} : memref<72x4xf32, #tpu.memory_space<vmem>>, vector<8x4xf32>,
    %c0_381 = arith.constant 0 : index
    %c128_382 = arith.constant 128 : index
    %347 = vector.load %arg9[%c0_381, %c128_382] : memref<8x135xf32, #tpu.memory_space<vmem>>, vector<8x4xf32>
    %c4_383 = arith.constant 4 : index
    %c0_384 = arith.constant 0 : index
    %348 = vector.load %arg2[%c4_383, %c0_384] : memref<9x4xf32, #tpu.memory_space<vmem>>, vector<1x4xf32>
    %349 = vector.broadcast %348 : vector<1x4xf32> to vector<8x4xf32>
    %350 = arith.mulf %347, %349 : vector<8x4xf32>
    %c32_385 = arith.constant 32 : index
    %c0_386 = arith.constant 0 : index
    %351 = vector.load %arg10[%c32_385, %c0_386] : memref<72x4xf32, #tpu.memory_space<vmem>>, vector<8x4xf32>
    tpu.vector_store %arg10[%c32_385, %c0_386], %350 {strides = array<i32>} : memref<72x4xf32, #tpu.memory_space<vmem>>, vector<8x4xf32>,
    %c0_387 = arith.constant 0 : index
    %c129_388 = arith.constant 129 : index
    %352 = vector.load %arg9[%c0_387, %c129_388] : memref<8x135xf32, #tpu.memory_space<vmem>>, vector<8x4xf32>
    %c5_389 = arith.constant 5 : index
    %c0_390 = arith.constant 0 : index
    %353 = vector.load %arg2[%c5_389, %c0_390] : memref<9x4xf32, #tpu.memory_space<vmem>>, vector<1x4xf32>
    %354 = vector.broadcast %353 : vector<1x4xf32> to vector<8x4xf32>
    %355 = arith.mulf %352, %354 : vector<8x4xf32>
    %c40_391 = arith.constant 40 : index
    %c0_392 = arith.constant 0 : index
    %356 = vector.load %arg10[%c40_391, %c0_392] : memref<72x4xf32, #tpu.memory_space<vmem>>, vector<8x4xf32>
    tpu.vector_store %arg10[%c40_391, %c0_392], %355 {strides = array<i32>} : memref<72x4xf32, #tpu.memory_space<vmem>>, vector<8x4xf32>,
    %c0_393 = arith.constant 0 : index
    %c129_394 = arith.constant 129 : index
    %357 = vector.load %arg9[%c0_393, %c129_394] : memref<8x135xf32, #tpu.memory_space<vmem>>, vector<8x4xf32>
    %c6_395 = arith.constant 6 : index
    %c0_396 = arith.constant 0 : index
    %358 = vector.load %arg2[%c6_395, %c0_396] : memref<9x4xf32, #tpu.memory_space<vmem>>, vector<1x4xf32>
    %359 = vector.broadcast %358 : vector<1x4xf32> to vector<8x4xf32>
    %360 = arith.mulf %357, %359 : vector<8x4xf32>
    %c48_397 = arith.constant 48 : index
    %c0_398 = arith.constant 0 : index
    %361 = vector.load %arg10[%c48_397, %c0_398] : memref<72x4xf32, #tpu.memory_space<vmem>>, vector<8x4xf32>
    tpu.vector_store %arg10[%c48_397, %c0_398], %360 {strides = array<i32>} : memref<72x4xf32, #tpu.memory_space<vmem>>, vector<8x4xf32>,
    %c0_399 = arith.constant 0 : index
    %c130_400 = arith.constant 130 : index
    %362 = vector.load %arg9[%c0_399, %c130_400] : memref<8x135xf32, #tpu.memory_space<vmem>>, vector<8x4xf32>
    %c7_401 = arith.constant 7 : index
    %c0_402 = arith.constant 0 : index
    %363 = vector.load %arg2[%c7_401, %c0_402] : memref<9x4xf32, #tpu.memory_space<vmem>>, vector<1x4xf32>
    %364 = vector.broadcast %363 : vector<1x4xf32> to vector<8x4xf32>
    %365 = arith.mulf %362, %364 : vector<8x4xf32>
    %c56_403 = arith.constant 56 : index
    %c0_404 = arith.constant 0 : index
    %366 = vector.load %arg10[%c56_403, %c0_404] : memref<72x4xf32, #tpu.memory_space<vmem>>, vector<8x4xf32>
    tpu.vector_store %arg10[%c56_403, %c0_404], %365 {strides = array<i32>} : memref<72x4xf32, #tpu.memory_space<vmem>>, vector<8x4xf32>,
    %c0_405 = arith.constant 0 : index
    %c131_406 = arith.constant 131 : index
    %367 = vector.load %arg9[%c0_405, %c131_406] : memref<8x135xf32, #tpu.memory_space<vmem>>, vector<8x4xf32>
    %c8_407 = arith.constant 8 : index
    %c0_408 = arith.constant 0 : index
    %368 = vector.load %arg2[%c8_407, %c0_408] : memref<9x4xf32, #tpu.memory_space<vmem>>, vector<1x4xf32>
    %369 = vector.broadcast %368 : vector<1x4xf32> to vector<8x4xf32>
    %370 = arith.mulf %367, %369 : vector<8x4xf32>
    %c64_409 = arith.constant 64 : index
    %c0_410 = arith.constant 0 : index
    %371 = vector.load %arg10[%c64_409, %c0_410] : memref<72x4xf32, #tpu.memory_space<vmem>>, vector<8x4xf32>
    tpu.vector_store %arg10[%c64_409, %c0_410], %370 {strides = array<i32>} : memref<72x4xf32, #tpu.memory_space<vmem>>, vector<8x4xf32>,
    %372 = vector.extract_strided_slice %4 {offsets = [24, 0], sizes = [1, 72], strides = [1, 1]} : vector<38x72xf32> to vector<1x72xf32>
    %c0_411 = arith.constant 0 : index
    %c0_412 = arith.constant 0 : index
    %373 = vector.load %arg10[%c0_411, %c0_412] : memref<72x4xf32, #tpu.memory_space<vmem>>, vector<72x4xf32>
    %cst_413 = arith.constant dense<0.000000e+00> : vector<1x4xf32>
    %374 = tpu.matmul %372, %373, %cst_413 {dimension_numbers = #tpu.dot_dimension_numbers<[1], [0], [0], [1], [0, 0, 1, 1], [], []>} : vector<1x72xf32>, vector<72x4xf32>, vector<1x4xf32> -> vector<1x4xf32>
    %375 = vector.extract_strided_slice %5 {offsets = [24, 0], sizes = [1, 1], strides = [1, 1]} : vector<38x1xf32> to vector<1x1xf32>
    %376 = vector.broadcast %375 : vector<1x1xf32> to vector<1x4xf32>
    %377 = arith.addf %374, %376 : vector<1x4xf32>
    %c0_414 = arith.constant 0 : index
    %c128_415 = arith.constant 128 : index
    %378 = vector.load %arg9[%c0_414, %c128_415] : memref<8x135xf32, #tpu.memory_space<vmem>>, vector<4x4xf32>
    tpu.vector_store %arg9[%c0_414, %c128_415], %160 {strides = array<i32>} : memref<8x135xf32, #tpu.memory_space<vmem>>, vector<4x4xf32>,
    %c0_416 = arith.constant 0 : index
    %c125_417 = arith.constant 125 : index
    %379 = vector.load %arg9[%c0_416, %c125_417] : memref<8x135xf32, #tpu.memory_space<vmem>>, vector<4x4xf32>
    %c0_418 = arith.constant 0 : index
    %c0_419 = arith.constant 0 : index
    %380 = vector.load %arg2[%c0_418, %c0_419] : memref<9x4xf32, #tpu.memory_space<vmem>>, vector<1x4xf32>
    %381 = vector.broadcast %380 : vector<1x4xf32> to vector<4x4xf32>
    %382 = arith.mulf %379, %381 : vector<4x4xf32>
    %c0_420 = arith.constant 0 : index
    %c0_421 = arith.constant 0 : index
    %383 = vector.load %arg10[%c0_420, %c0_421] : memref<72x4xf32, #tpu.memory_space<vmem>>, vector<4x4xf32>
    tpu.vector_store %arg10[%c0_420, %c0_421], %382 {strides = array<i32>} : memref<72x4xf32, #tpu.memory_space<vmem>>, vector<4x4xf32>,
    %c0_422 = arith.constant 0 : index
    %c126_423 = arith.constant 126 : index
    %384 = vector.load %arg9[%c0_422, %c126_423] : memref<8x135xf32, #tpu.memory_space<vmem>>, vector<4x4xf32>
    %c1_424 = arith.constant 1 : index
    %c0_425 = arith.constant 0 : index
    %385 = vector.load %arg2[%c1_424, %c0_425] : memref<9x4xf32, #tpu.memory_space<vmem>>, vector<1x4xf32>
    %386 = vector.broadcast %385 : vector<1x4xf32> to vector<4x4xf32>
    %387 = arith.mulf %384, %386 : vector<4x4xf32>
    %c8_426 = arith.constant 8 : index
    %c0_427 = arith.constant 0 : index
    %388 = vector.load %arg10[%c8_426, %c0_427] : memref<72x4xf32, #tpu.memory_space<vmem>>, vector<4x4xf32>
    tpu.vector_store %arg10[%c8_426, %c0_427], %387 {strides = array<i32>} : memref<72x4xf32, #tpu.memory_space<vmem>>, vector<4x4xf32>,
    %c0_428 = arith.constant 0 : index
    %c127_429 = arith.constant 127 : index
    %389 = vector.load %arg9[%c0_428, %c127_429] : memref<8x135xf32, #tpu.memory_space<vmem>>, vector<4x4xf32>
    %c2_430 = arith.constant 2 : index
    %c0_431 = arith.constant 0 : index
    %390 = vector.load %arg2[%c2_430, %c0_431] : memref<9x4xf32, #tpu.memory_space<vmem>>, vector<1x4xf32>
    %391 = vector.broadcast %390 : vector<1x4xf32> to vector<4x4xf32>
    %392 = arith.mulf %389, %391 : vector<4x4xf32>
    %c16_432 = arith.constant 16 : index
    %c0_433 = arith.constant 0 : index
    %393 = vector.load %arg10[%c16_432, %c0_433] : memref<72x4xf32, #tpu.memory_space<vmem>>, vector<4x4xf32>
    tpu.vector_store %arg10[%c16_432, %c0_433], %392 {strides = array<i32>} : memref<72x4xf32, #tpu.memory_space<vmem>>, vector<4x4xf32>,
    %c0_434 = arith.constant 0 : index
    %c127_435 = arith.constant 127 : index
    %394 = vector.load %arg9[%c0_434, %c127_435] : memref<8x135xf32, #tpu.memory_space<vmem>>, vector<4x4xf32>
    %c3_436 = arith.constant 3 : index
    %c0_437 = arith.constant 0 : index
    %395 = vector.load %arg2[%c3_436, %c0_437] : memref<9x4xf32, #tpu.memory_space<vmem>>, vector<1x4xf32>
    %396 = vector.broadcast %395 : vector<1x4xf32> to vector<4x4xf32>
    %397 = arith.mulf %394, %396 : vector<4x4xf32>
    %c24_438 = arith.constant 24 : index
    %c0_439 = arith.constant 0 : index
    %398 = vector.load %arg10[%c24_438, %c0_439] : memref<72x4xf32, #tpu.memory_space<vmem>>, vector<4x4xf32>
    tpu.vector_store %arg10[%c24_438, %c0_439], %397 {strides = array<i32>} : memref<72x4xf32, #tpu.memory_space<vmem>>, vector<4x4xf32>,
    %c0_440 = arith.constant 0 : index
    %c128_441 = arith.constant 128 : index
    %399 = vector.load %arg9[%c0_440, %c128_441] : memref<8x135xf32, #tpu.memory_space<vmem>>, vector<4x4xf32>
    %c4_442 = arith.constant 4 : index
    %c0_443 = arith.constant 0 : index
    %400 = vector.load %arg2[%c4_442, %c0_443] : memref<9x4xf32, #tpu.memory_space<vmem>>, vector<1x4xf32>
    %401 = vector.broadcast %400 : vector<1x4xf32> to vector<4x4xf32>
    %402 = arith.mulf %399, %401 : vector<4x4xf32>
    %c32_444 = arith.constant 32 : index
    %c0_445 = arith.constant 0 : index
    %403 = vector.load %arg10[%c32_444, %c0_445] : memref<72x4xf32, #tpu.memory_space<vmem>>, vector<4x4xf32>
    tpu.vector_store %arg10[%c32_444, %c0_445], %402 {strides = array<i32>} : memref<72x4xf32, #tpu.memory_space<vmem>>, vector<4x4xf32>,
    %c0_446 = arith.constant 0 : index
    %c129_447 = arith.constant 129 : index
    %404 = vector.load %arg9[%c0_446, %c129_447] : memref<8x135xf32, #tpu.memory_space<vmem>>, vector<4x4xf32>
    %c5_448 = arith.constant 5 : index
    %c0_449 = arith.constant 0 : index
    %405 = vector.load %arg2[%c5_448, %c0_449] : memref<9x4xf32, #tpu.memory_space<vmem>>, vector<1x4xf32>
    %406 = vector.broadcast %405 : vector<1x4xf32> to vector<4x4xf32>
    %407 = arith.mulf %404, %406 : vector<4x4xf32>
    %c40_450 = arith.constant 40 : index
    %c0_451 = arith.constant 0 : index
    %408 = vector.load %arg10[%c40_450, %c0_451] : memref<72x4xf32, #tpu.memory_space<vmem>>, vector<4x4xf32>
    tpu.vector_store %arg10[%c40_450, %c0_451], %407 {strides = array<i32>} : memref<72x4xf32, #tpu.memory_space<vmem>>, vector<4x4xf32>,
    %c0_452 = arith.constant 0 : index
    %c129_453 = arith.constant 129 : index
    %409 = vector.load %arg9[%c0_452, %c129_453] : memref<8x135xf32, #tpu.memory_space<vmem>>, vector<4x4xf32>
    %c6_454 = arith.constant 6 : index
    %c0_455 = arith.constant 0 : index
    %410 = vector.load %arg2[%c6_454, %c0_455] : memref<9x4xf32, #tpu.memory_space<vmem>>, vector<1x4xf32>
    %411 = vector.broadcast %410 : vector<1x4xf32> to vector<4x4xf32>
    %412 = arith.mulf %409, %411 : vector<4x4xf32>
    %c48_456 = arith.constant 48 : index
    %c0_457 = arith.constant 0 : index
    %413 = vector.load %arg10[%c48_456, %c0_457] : memref<72x4xf32, #tpu.memory_space<vmem>>, vector<4x4xf32>
    tpu.vector_store %arg10[%c48_456, %c0_457], %412 {strides = array<i32>} : memref<72x4xf32, #tpu.memory_space<vmem>>, vector<4x4xf32>,
    %c0_458 = arith.constant 0 : index
    %c130_459 = arith.constant 130 : index
    %414 = vector.load %arg9[%c0_458, %c130_459] : memref<8x135xf32, #tpu.memory_space<vmem>>, vector<4x4xf32>
    %c7_460 = arith.constant 7 : index
    %c0_461 = arith.constant 0 : index
    %415 = vector.load %arg2[%c7_460, %c0_461] : memref<9x4xf32, #tpu.memory_space<vmem>>, vector<1x4xf32>
    %416 = vector.broadcast %415 : vector<1x4xf32> to vector<4x4xf32>
    %417 = arith.mulf %414, %416 : vector<4x4xf32>
    %c56_462 = arith.constant 56 : index
    %c0_463 = arith.constant 0 : index
    %418 = vector.load %arg10[%c56_462, %c0_463] : memref<72x4xf32, #tpu.memory_space<vmem>>, vector<4x4xf32>
    tpu.vector_store %arg10[%c56_462, %c0_463], %417 {strides = array<i32>} : memref<72x4xf32, #tpu.memory_space<vmem>>, vector<4x4xf32>,
    %c0_464 = arith.constant 0 : index
    %c131_465 = arith.constant 131 : index
    %419 = vector.load %arg9[%c0_464, %c131_465] : memref<8x135xf32, #tpu.memory_space<vmem>>, vector<4x4xf32>
    %c8_466 = arith.constant 8 : index
    %c0_467 = arith.constant 0 : index
    %420 = vector.load %arg2[%c8_466, %c0_467] : memref<9x4xf32, #tpu.memory_space<vmem>>, vector<1x4xf32>
    %421 = vector.broadcast %420 : vector<1x4xf32> to vector<4x4xf32>
    %422 = arith.mulf %419, %421 : vector<4x4xf32>
    %c64_468 = arith.constant 64 : index
    %c0_469 = arith.constant 0 : index
    %423 = vector.load %arg10[%c64_468, %c0_469] : memref<72x4xf32, #tpu.memory_space<vmem>>, vector<4x4xf32>
    tpu.vector_store %arg10[%c64_468, %c0_469], %422 {strides = array<i32>} : memref<72x4xf32, #tpu.memory_space<vmem>>, vector<4x4xf32>,
    %424 = vector.extract_strided_slice %4 {offsets = [25, 0], sizes = [4, 72], strides = [1, 1]} : vector<38x72xf32> to vector<4x72xf32>
    %c0_470 = arith.constant 0 : index
    %c0_471 = arith.constant 0 : index
    %425 = vector.load %arg10[%c0_470, %c0_471] : memref<72x4xf32, #tpu.memory_space<vmem>>, vector<72x4xf32>
    %cst_472 = arith.constant dense<0.000000e+00> : vector<4x4xf32>
    %426 = tpu.matmul %424, %425, %cst_472 {dimension_numbers = #tpu.dot_dimension_numbers<[1], [0], [0], [1], [0, 0, 1, 1], [], []>} : vector<4x72xf32>, vector<72x4xf32>, vector<4x4xf32> -> vector<4x4xf32>
    %427 = vector.extract_strided_slice %5 {offsets = [25, 0], sizes = [4, 1], strides = [1, 1]} : vector<38x1xf32> to vector<4x1xf32>
    %428 = vector.broadcast %427 : vector<4x1xf32> to vector<4x4xf32>
    %429 = arith.addf %426, %428 : vector<4x4xf32>
    %cst_473 = arith.constant 0.000000e+00 : f32
    %430 = vector.broadcast %cst_473 : f32 to vector<4x4xf32>
    %431 = arith.maximumf %429, %430 : vector<4x4xf32>
    %c0_474 = arith.constant 0 : index
    %c128_475 = arith.constant 128 : index
    %432 = vector.load %arg9[%c0_474, %c128_475] : memref<8x135xf32, #tpu.memory_space<vmem>>, vector<4x4xf32>
    tpu.vector_store %arg9[%c0_474, %c128_475], %160 {strides = array<i32>} : memref<8x135xf32, #tpu.memory_space<vmem>>, vector<4x4xf32>,
    %c4_476 = arith.constant 4 : index
    %c128_477 = arith.constant 128 : index
    %433 = vector.load %arg9[%c4_476, %c128_477] : memref<8x135xf32, #tpu.memory_space<vmem>>, vector<4x4xf32>
    tpu.vector_store %arg9[%c4_476, %c128_477], %431 {strides = array<i32>} : memref<8x135xf32, #tpu.memory_space<vmem>>, vector<4x4xf32>,
    %c0_478 = arith.constant 0 : index
    %c125_479 = arith.constant 125 : index
    %434 = vector.load %arg9[%c0_478, %c125_479] : memref<8x135xf32, #tpu.memory_space<vmem>>, vector<8x4xf32>
    %c0_480 = arith.constant 0 : index
    %c0_481 = arith.constant 0 : index
    %435 = vector.load %arg2[%c0_480, %c0_481] : memref<9x4xf32, #tpu.memory_space<vmem>>, vector<1x4xf32>
    %436 = vector.broadcast %435 : vector<1x4xf32> to vector<8x4xf32>
    %437 = arith.mulf %434, %436 : vector<8x4xf32>
    %c0_482 = arith.constant 0 : index
    %c0_483 = arith.constant 0 : index
    %438 = vector.load %arg10[%c0_482, %c0_483] : memref<72x4xf32, #tpu.memory_space<vmem>>, vector<8x4xf32>
    tpu.vector_store %arg10[%c0_482, %c0_483], %437 {strides = array<i32>} : memref<72x4xf32, #tpu.memory_space<vmem>>, vector<8x4xf32>,
    %c0_484 = arith.constant 0 : index
    %c126_485 = arith.constant 126 : index
    %439 = vector.load %arg9[%c0_484, %c126_485] : memref<8x135xf32, #tpu.memory_space<vmem>>, vector<8x4xf32>
    %c1_486 = arith.constant 1 : index
    %c0_487 = arith.constant 0 : index
    %440 = vector.load %arg2[%c1_486, %c0_487] : memref<9x4xf32, #tpu.memory_space<vmem>>, vector<1x4xf32>
    %441 = vector.broadcast %440 : vector<1x4xf32> to vector<8x4xf32>
    %442 = arith.mulf %439, %441 : vector<8x4xf32>
    %c8_488 = arith.constant 8 : index
    %c0_489 = arith.constant 0 : index
    %443 = vector.load %arg10[%c8_488, %c0_489] : memref<72x4xf32, #tpu.memory_space<vmem>>, vector<8x4xf32>
    tpu.vector_store %arg10[%c8_488, %c0_489], %442 {strides = array<i32>} : memref<72x4xf32, #tpu.memory_space<vmem>>, vector<8x4xf32>,
    %c0_490 = arith.constant 0 : index
    %c127_491 = arith.constant 127 : index
    %444 = vector.load %arg9[%c0_490, %c127_491] : memref<8x135xf32, #tpu.memory_space<vmem>>, vector<8x4xf32>
    %c2_492 = arith.constant 2 : index
    %c0_493 = arith.constant 0 : index
    %445 = vector.load %arg2[%c2_492, %c0_493] : memref<9x4xf32, #tpu.memory_space<vmem>>, vector<1x4xf32>
    %446 = vector.broadcast %445 : vector<1x4xf32> to vector<8x4xf32>
    %447 = arith.mulf %444, %446 : vector<8x4xf32>
    %c16_494 = arith.constant 16 : index
    %c0_495 = arith.constant 0 : index
    %448 = vector.load %arg10[%c16_494, %c0_495] : memref<72x4xf32, #tpu.memory_space<vmem>>, vector<8x4xf32>
    tpu.vector_store %arg10[%c16_494, %c0_495], %447 {strides = array<i32>} : memref<72x4xf32, #tpu.memory_space<vmem>>, vector<8x4xf32>,
    %c0_496 = arith.constant 0 : index
    %c127_497 = arith.constant 127 : index
    %449 = vector.load %arg9[%c0_496, %c127_497] : memref<8x135xf32, #tpu.memory_space<vmem>>, vector<8x4xf32>
    %c3_498 = arith.constant 3 : index
    %c0_499 = arith.constant 0 : index
    %450 = vector.load %arg2[%c3_498, %c0_499] : memref<9x4xf32, #tpu.memory_space<vmem>>, vector<1x4xf32>
    %451 = vector.broadcast %450 : vector<1x4xf32> to vector<8x4xf32>
    %452 = arith.mulf %449, %451 : vector<8x4xf32>
    %c24_500 = arith.constant 24 : index
    %c0_501 = arith.constant 0 : index
    %453 = vector.load %arg10[%c24_500, %c0_501] : memref<72x4xf32, #tpu.memory_space<vmem>>, vector<8x4xf32>
    tpu.vector_store %arg10[%c24_500, %c0_501], %452 {strides = array<i32>} : memref<72x4xf32, #tpu.memory_space<vmem>>, vector<8x4xf32>,
    %c0_502 = arith.constant 0 : index
    %c128_503 = arith.constant 128 : index
    %454 = vector.load %arg9[%c0_502, %c128_503] : memref<8x135xf32, #tpu.memory_space<vmem>>, vector<8x4xf32>
    %c4_504 = arith.constant 4 : index
    %c0_505 = arith.constant 0 : index
    %455 = vector.load %arg2[%c4_504, %c0_505] : memref<9x4xf32, #tpu.memory_space<vmem>>, vector<1x4xf32>
    %456 = vector.broadcast %455 : vector<1x4xf32> to vector<8x4xf32>
    %457 = arith.mulf %454, %456 : vector<8x4xf32>
    %c32_506 = arith.constant 32 : index
    %c0_507 = arith.constant 0 : index
    %458 = vector.load %arg10[%c32_506, %c0_507] : memref<72x4xf32, #tpu.memory_space<vmem>>, vector<8x4xf32>
    tpu.vector_store %arg10[%c32_506, %c0_507], %457 {strides = array<i32>} : memref<72x4xf32, #tpu.memory_space<vmem>>, vector<8x4xf32>,
    %c0_508 = arith.constant 0 : index
    %c129_509 = arith.constant 129 : index
    %459 = vector.load %arg9[%c0_508, %c129_509] : memref<8x135xf32, #tpu.memory_space<vmem>>, vector<8x4xf32>
    %c5_510 = arith.constant 5 : index
    %c0_511 = arith.constant 0 : index
    %460 = vector.load %arg2[%c5_510, %c0_511] : memref<9x4xf32, #tpu.memory_space<vmem>>, vector<1x4xf32>
    %461 = vector.broadcast %460 : vector<1x4xf32> to vector<8x4xf32>
    %462 = arith.mulf %459, %461 : vector<8x4xf32>
    %c40_512 = arith.constant 40 : index
    %c0_513 = arith.constant 0 : index
    %463 = vector.load %arg10[%c40_512, %c0_513] : memref<72x4xf32, #tpu.memory_space<vmem>>, vector<8x4xf32>
    tpu.vector_store %arg10[%c40_512, %c0_513], %462 {strides = array<i32>} : memref<72x4xf32, #tpu.memory_space<vmem>>, vector<8x4xf32>,
    %c0_514 = arith.constant 0 : index
    %c129_515 = arith.constant 129 : index
    %464 = vector.load %arg9[%c0_514, %c129_515] : memref<8x135xf32, #tpu.memory_space<vmem>>, vector<8x4xf32>
    %c6_516 = arith.constant 6 : index
    %c0_517 = arith.constant 0 : index
    %465 = vector.load %arg2[%c6_516, %c0_517] : memref<9x4xf32, #tpu.memory_space<vmem>>, vector<1x4xf32>
    %466 = vector.broadcast %465 : vector<1x4xf32> to vector<8x4xf32>
    %467 = arith.mulf %464, %466 : vector<8x4xf32>
    %c48_518 = arith.constant 48 : index
    %c0_519 = arith.constant 0 : index
    %468 = vector.load %arg10[%c48_518, %c0_519] : memref<72x4xf32, #tpu.memory_space<vmem>>, vector<8x4xf32>
    tpu.vector_store %arg10[%c48_518, %c0_519], %467 {strides = array<i32>} : memref<72x4xf32, #tpu.memory_space<vmem>>, vector<8x4xf32>,
    %c0_520 = arith.constant 0 : index
    %c130_521 = arith.constant 130 : index
    %469 = vector.load %arg9[%c0_520, %c130_521] : memref<8x135xf32, #tpu.memory_space<vmem>>, vector<8x4xf32>
    %c7_522 = arith.constant 7 : index
    %c0_523 = arith.constant 0 : index
    %470 = vector.load %arg2[%c7_522, %c0_523] : memref<9x4xf32, #tpu.memory_space<vmem>>, vector<1x4xf32>
    %471 = vector.broadcast %470 : vector<1x4xf32> to vector<8x4xf32>
    %472 = arith.mulf %469, %471 : vector<8x4xf32>
    %c56_524 = arith.constant 56 : index
    %c0_525 = arith.constant 0 : index
    %473 = vector.load %arg10[%c56_524, %c0_525] : memref<72x4xf32, #tpu.memory_space<vmem>>, vector<8x4xf32>
    tpu.vector_store %arg10[%c56_524, %c0_525], %472 {strides = array<i32>} : memref<72x4xf32, #tpu.memory_space<vmem>>, vector<8x4xf32>,
    %c0_526 = arith.constant 0 : index
    %c131_527 = arith.constant 131 : index
    %474 = vector.load %arg9[%c0_526, %c131_527] : memref<8x135xf32, #tpu.memory_space<vmem>>, vector<8x4xf32>
    %c8_528 = arith.constant 8 : index
    %c0_529 = arith.constant 0 : index
    %475 = vector.load %arg2[%c8_528, %c0_529] : memref<9x4xf32, #tpu.memory_space<vmem>>, vector<1x4xf32>
    %476 = vector.broadcast %475 : vector<1x4xf32> to vector<8x4xf32>
    %477 = arith.mulf %474, %476 : vector<8x4xf32>
    %c64_530 = arith.constant 64 : index
    %c0_531 = arith.constant 0 : index
    %478 = vector.load %arg10[%c64_530, %c0_531] : memref<72x4xf32, #tpu.memory_space<vmem>>, vector<8x4xf32>
    tpu.vector_store %arg10[%c64_530, %c0_531], %477 {strides = array<i32>} : memref<72x4xf32, #tpu.memory_space<vmem>>, vector<8x4xf32>,
    %479 = vector.extract_strided_slice %4 {offsets = [29, 0], sizes = [4, 72], strides = [1, 1]} : vector<38x72xf32> to vector<4x72xf32>
    %c0_532 = arith.constant 0 : index
    %c0_533 = arith.constant 0 : index
    %480 = vector.load %arg10[%c0_532, %c0_533] : memref<72x4xf32, #tpu.memory_space<vmem>>, vector<72x4xf32>
    %cst_534 = arith.constant dense<0.000000e+00> : vector<4x4xf32>
    %481 = tpu.matmul %479, %480, %cst_534 {dimension_numbers = #tpu.dot_dimension_numbers<[1], [0], [0], [1], [0, 0, 1, 1], [], []>} : vector<4x72xf32>, vector<72x4xf32>, vector<4x4xf32> -> vector<4x4xf32>
    %482 = vector.extract_strided_slice %5 {offsets = [29, 0], sizes = [4, 1], strides = [1, 1]} : vector<38x1xf32> to vector<4x1xf32>
    %483 = vector.broadcast %482 : vector<4x1xf32> to vector<4x4xf32>
    %484 = arith.addf %481, %483 : vector<4x4xf32>
    %cst_535 = arith.constant 0.000000e+00 : f32
    %485 = vector.broadcast %cst_535 : f32 to vector<4x4xf32>
    %486 = arith.maximumf %484, %485 : vector<4x4xf32>
    %c0_536 = arith.constant 0 : index
    %c128_537 = arith.constant 128 : index
    %487 = vector.load %arg9[%c0_536, %c128_537] : memref<8x135xf32, #tpu.memory_space<vmem>>, vector<4x4xf32>
    tpu.vector_store %arg9[%c0_536, %c128_537], %106 {strides = array<i32>} : memref<8x135xf32, #tpu.memory_space<vmem>>, vector<4x4xf32>,
    %c4_538 = arith.constant 4 : index
    %c128_539 = arith.constant 128 : index
    %488 = vector.load %arg9[%c4_538, %c128_539] : memref<8x135xf32, #tpu.memory_space<vmem>>, vector<4x4xf32>
    tpu.vector_store %arg9[%c4_538, %c128_539], %486 {strides = array<i32>} : memref<8x135xf32, #tpu.memory_space<vmem>>, vector<4x4xf32>,
    %c0_540 = arith.constant 0 : index
    %c125_541 = arith.constant 125 : index
    %489 = vector.load %arg9[%c0_540, %c125_541] : memref<8x135xf32, #tpu.memory_space<vmem>>, vector<8x4xf32>
    %c0_542 = arith.constant 0 : index
    %c0_543 = arith.constant 0 : index
    %490 = vector.load %arg2[%c0_542, %c0_543] : memref<9x4xf32, #tpu.memory_space<vmem>>, vector<1x4xf32>
    %491 = vector.broadcast %490 : vector<1x4xf32> to vector<8x4xf32>
    %492 = arith.mulf %489, %491 : vector<8x4xf32>
    %c0_544 = arith.constant 0 : index
    %c0_545 = arith.constant 0 : index
    %493 = vector.load %arg10[%c0_544, %c0_545] : memref<72x4xf32, #tpu.memory_space<vmem>>, vector<8x4xf32>
    tpu.vector_store %arg10[%c0_544, %c0_545], %492 {strides = array<i32>} : memref<72x4xf32, #tpu.memory_space<vmem>>, vector<8x4xf32>,
    %c0_546 = arith.constant 0 : index
    %c126_547 = arith.constant 126 : index
    %494 = vector.load %arg9[%c0_546, %c126_547] : memref<8x135xf32, #tpu.memory_space<vmem>>, vector<8x4xf32>
    %c1_548 = arith.constant 1 : index
    %c0_549 = arith.constant 0 : index
    %495 = vector.load %arg2[%c1_548, %c0_549] : memref<9x4xf32, #tpu.memory_space<vmem>>, vector<1x4xf32>
    %496 = vector.broadcast %495 : vector<1x4xf32> to vector<8x4xf32>
    %497 = arith.mulf %494, %496 : vector<8x4xf32>
    %c8_550 = arith.constant 8 : index
    %c0_551 = arith.constant 0 : index
    %498 = vector.load %arg10[%c8_550, %c0_551] : memref<72x4xf32, #tpu.memory_space<vmem>>, vector<8x4xf32>
    tpu.vector_store %arg10[%c8_550, %c0_551], %497 {strides = array<i32>} : memref<72x4xf32, #tpu.memory_space<vmem>>, vector<8x4xf32>,
    %c0_552 = arith.constant 0 : index
    %c127_553 = arith.constant 127 : index
    %499 = vector.load %arg9[%c0_552, %c127_553] : memref<8x135xf32, #tpu.memory_space<vmem>>, vector<8x4xf32>
    %c2_554 = arith.constant 2 : index
    %c0_555 = arith.constant 0 : index
    %500 = vector.load %arg2[%c2_554, %c0_555] : memref<9x4xf32, #tpu.memory_space<vmem>>, vector<1x4xf32>
    %501 = vector.broadcast %500 : vector<1x4xf32> to vector<8x4xf32>
    %502 = arith.mulf %499, %501 : vector<8x4xf32>
    %c16_556 = arith.constant 16 : index
    %c0_557 = arith.constant 0 : index
    %503 = vector.load %arg10[%c16_556, %c0_557] : memref<72x4xf32, #tpu.memory_space<vmem>>, vector<8x4xf32>
    tpu.vector_store %arg10[%c16_556, %c0_557], %502 {strides = array<i32>} : memref<72x4xf32, #tpu.memory_space<vmem>>, vector<8x4xf32>,
    %c0_558 = arith.constant 0 : index
    %c127_559 = arith.constant 127 : index
    %504 = vector.load %arg9[%c0_558, %c127_559] : memref<8x135xf32, #tpu.memory_space<vmem>>, vector<8x4xf32>
    %c3_560 = arith.constant 3 : index
    %c0_561 = arith.constant 0 : index
    %505 = vector.load %arg2[%c3_560, %c0_561] : memref<9x4xf32, #tpu.memory_space<vmem>>, vector<1x4xf32>
    %506 = vector.broadcast %505 : vector<1x4xf32> to vector<8x4xf32>
    %507 = arith.mulf %504, %506 : vector<8x4xf32>
    %c24_562 = arith.constant 24 : index
    %c0_563 = arith.constant 0 : index
    %508 = vector.load %arg10[%c24_562, %c0_563] : memref<72x4xf32, #tpu.memory_space<vmem>>, vector<8x4xf32>
    tpu.vector_store %arg10[%c24_562, %c0_563], %507 {strides = array<i32>} : memref<72x4xf32, #tpu.memory_space<vmem>>, vector<8x4xf32>,
    %c0_564 = arith.constant 0 : index
    %c128_565 = arith.constant 128 : index
    %509 = vector.load %arg9[%c0_564, %c128_565] : memref<8x135xf32, #tpu.memory_space<vmem>>, vector<8x4xf32>
    %c4_566 = arith.constant 4 : index
    %c0_567 = arith.constant 0 : index
    %510 = vector.load %arg2[%c4_566, %c0_567] : memref<9x4xf32, #tpu.memory_space<vmem>>, vector<1x4xf32>
    %511 = vector.broadcast %510 : vector<1x4xf32> to vector<8x4xf32>
    %512 = arith.mulf %509, %511 : vector<8x4xf32>
    %c32_568 = arith.constant 32 : index
    %c0_569 = arith.constant 0 : index
    %513 = vector.load %arg10[%c32_568, %c0_569] : memref<72x4xf32, #tpu.memory_space<vmem>>, vector<8x4xf32>
    tpu.vector_store %arg10[%c32_568, %c0_569], %512 {strides = array<i32>} : memref<72x4xf32, #tpu.memory_space<vmem>>, vector<8x4xf32>,
    %c0_570 = arith.constant 0 : index
    %c129_571 = arith.constant 129 : index
    %514 = vector.load %arg9[%c0_570, %c129_571] : memref<8x135xf32, #tpu.memory_space<vmem>>, vector<8x4xf32>
    %c5_572 = arith.constant 5 : index
    %c0_573 = arith.constant 0 : index
    %515 = vector.load %arg2[%c5_572, %c0_573] : memref<9x4xf32, #tpu.memory_space<vmem>>, vector<1x4xf32>
    %516 = vector.broadcast %515 : vector<1x4xf32> to vector<8x4xf32>
    %517 = arith.mulf %514, %516 : vector<8x4xf32>
    %c40_574 = arith.constant 40 : index
    %c0_575 = arith.constant 0 : index
    %518 = vector.load %arg10[%c40_574, %c0_575] : memref<72x4xf32, #tpu.memory_space<vmem>>, vector<8x4xf32>
    tpu.vector_store %arg10[%c40_574, %c0_575], %517 {strides = array<i32>} : memref<72x4xf32, #tpu.memory_space<vmem>>, vector<8x4xf32>,
    %c0_576 = arith.constant 0 : index
    %c129_577 = arith.constant 129 : index
    %519 = vector.load %arg9[%c0_576, %c129_577] : memref<8x135xf32, #tpu.memory_space<vmem>>, vector<8x4xf32>
    %c6_578 = arith.constant 6 : index
    %c0_579 = arith.constant 0 : index
    %520 = vector.load %arg2[%c6_578, %c0_579] : memref<9x4xf32, #tpu.memory_space<vmem>>, vector<1x4xf32>
    %521 = vector.broadcast %520 : vector<1x4xf32> to vector<8x4xf32>
    %522 = arith.mulf %519, %521 : vector<8x4xf32>
    %c48_580 = arith.constant 48 : index
    %c0_581 = arith.constant 0 : index
    %523 = vector.load %arg10[%c48_580, %c0_581] : memref<72x4xf32, #tpu.memory_space<vmem>>, vector<8x4xf32>
    tpu.vector_store %arg10[%c48_580, %c0_581], %522 {strides = array<i32>} : memref<72x4xf32, #tpu.memory_space<vmem>>, vector<8x4xf32>,
    %c0_582 = arith.constant 0 : index
    %c130_583 = arith.constant 130 : index
    %524 = vector.load %arg9[%c0_582, %c130_583] : memref<8x135xf32, #tpu.memory_space<vmem>>, vector<8x4xf32>
    %c7_584 = arith.constant 7 : index
    %c0_585 = arith.constant 0 : index
    %525 = vector.load %arg2[%c7_584, %c0_585] : memref<9x4xf32, #tpu.memory_space<vmem>>, vector<1x4xf32>
    %526 = vector.broadcast %525 : vector<1x4xf32> to vector<8x4xf32>
    %527 = arith.mulf %524, %526 : vector<8x4xf32>
    %c56_586 = arith.constant 56 : index
    %c0_587 = arith.constant 0 : index
    %528 = vector.load %arg10[%c56_586, %c0_587] : memref<72x4xf32, #tpu.memory_space<vmem>>, vector<8x4xf32>
    tpu.vector_store %arg10[%c56_586, %c0_587], %527 {strides = array<i32>} : memref<72x4xf32, #tpu.memory_space<vmem>>, vector<8x4xf32>,
    %c0_588 = arith.constant 0 : index
    %c131_589 = arith.constant 131 : index
    %529 = vector.load %arg9[%c0_588, %c131_589] : memref<8x135xf32, #tpu.memory_space<vmem>>, vector<8x4xf32>
    %c8_590 = arith.constant 8 : index
    %c0_591 = arith.constant 0 : index
    %530 = vector.load %arg2[%c8_590, %c0_591] : memref<9x4xf32, #tpu.memory_space<vmem>>, vector<1x4xf32>
    %531 = vector.broadcast %530 : vector<1x4xf32> to vector<8x4xf32>
    %532 = arith.mulf %529, %531 : vector<8x4xf32>
    %c64_592 = arith.constant 64 : index
    %c0_593 = arith.constant 0 : index
    %533 = vector.load %arg10[%c64_592, %c0_593] : memref<72x4xf32, #tpu.memory_space<vmem>>, vector<8x4xf32>
    tpu.vector_store %arg10[%c64_592, %c0_593], %532 {strides = array<i32>} : memref<72x4xf32, #tpu.memory_space<vmem>>, vector<8x4xf32>,
    %534 = vector.extract_strided_slice %4 {offsets = [33, 0], sizes = [4, 72], strides = [1, 1]} : vector<38x72xf32> to vector<4x72xf32>
    %c0_594 = arith.constant 0 : index
    %c0_595 = arith.constant 0 : index
    %535 = vector.load %arg10[%c0_594, %c0_595] : memref<72x4xf32, #tpu.memory_space<vmem>>, vector<72x4xf32>
    %cst_596 = arith.constant dense<0.000000e+00> : vector<4x4xf32>
    %536 = tpu.matmul %534, %535, %cst_596 {dimension_numbers = #tpu.dot_dimension_numbers<[1], [0], [0], [1], [0, 0, 1, 1], [], []>} : vector<4x72xf32>, vector<72x4xf32>, vector<4x4xf32> -> vector<4x4xf32>
    %537 = vector.extract_strided_slice %5 {offsets = [33, 0], sizes = [4, 1], strides = [1, 1]} : vector<38x1xf32> to vector<4x1xf32>
    %538 = vector.broadcast %537 : vector<4x1xf32> to vector<4x4xf32>
    %539 = arith.addf %536, %538 : vector<4x4xf32>
    %cst_597 = arith.constant 0.000000e+00 : f32
    %540 = vector.broadcast %cst_597 : f32 to vector<4x4xf32>
    %541 = arith.maximumf %539, %540 : vector<4x4xf32>
    %c0_598 = arith.constant 0 : index
    %c128_599 = arith.constant 128 : index
    %542 = vector.load %arg9[%c0_598, %c128_599] : memref<8x135xf32, #tpu.memory_space<vmem>>, vector<4x4xf32>
    tpu.vector_store %arg9[%c0_598, %c128_599], %52 {strides = array<i32>} : memref<8x135xf32, #tpu.memory_space<vmem>>, vector<4x4xf32>,
    %c4_600 = arith.constant 4 : index
    %c128_601 = arith.constant 128 : index
    %543 = vector.load %arg9[%c4_600, %c128_601] : memref<8x135xf32, #tpu.memory_space<vmem>>, vector<4x4xf32>
    tpu.vector_store %arg9[%c4_600, %c128_601], %541 {strides = array<i32>} : memref<8x135xf32, #tpu.memory_space<vmem>>, vector<4x4xf32>,
    %c0_602 = arith.constant 0 : index
    %c125_603 = arith.constant 125 : index
    %544 = vector.load %arg9[%c0_602, %c125_603] : memref<8x135xf32, #tpu.memory_space<vmem>>, vector<8x4xf32>
    %c0_604 = arith.constant 0 : index
    %c0_605 = arith.constant 0 : index
    %545 = vector.load %arg2[%c0_604, %c0_605] : memref<9x4xf32, #tpu.memory_space<vmem>>, vector<1x4xf32>
    %546 = vector.broadcast %545 : vector<1x4xf32> to vector<8x4xf32>
    %547 = arith.mulf %544, %546 : vector<8x4xf32>
    %c0_606 = arith.constant 0 : index
    %c0_607 = arith.constant 0 : index
    %548 = vector.load %arg10[%c0_606, %c0_607] : memref<72x4xf32, #tpu.memory_space<vmem>>, vector<8x4xf32>
    tpu.vector_store %arg10[%c0_606, %c0_607], %547 {strides = array<i32>} : memref<72x4xf32, #tpu.memory_space<vmem>>, vector<8x4xf32>,
    %c0_608 = arith.constant 0 : index
    %c126_609 = arith.constant 126 : index
    %549 = vector.load %arg9[%c0_608, %c126_609] : memref<8x135xf32, #tpu.memory_space<vmem>>, vector<8x4xf32>
    %c1_610 = arith.constant 1 : index
    %c0_611 = arith.constant 0 : index
    %550 = vector.load %arg2[%c1_610, %c0_611] : memref<9x4xf32, #tpu.memory_space<vmem>>, vector<1x4xf32>
    %551 = vector.broadcast %550 : vector<1x4xf32> to vector<8x4xf32>
    %552 = arith.mulf %549, %551 : vector<8x4xf32>
    %c8_612 = arith.constant 8 : index
    %c0_613 = arith.constant 0 : index
    %553 = vector.load %arg10[%c8_612, %c0_613] : memref<72x4xf32, #tpu.memory_space<vmem>>, vector<8x4xf32>
    tpu.vector_store %arg10[%c8_612, %c0_613], %552 {strides = array<i32>} : memref<72x4xf32, #tpu.memory_space<vmem>>, vector<8x4xf32>,
    %c0_614 = arith.constant 0 : index
    %c127_615 = arith.constant 127 : index
    %554 = vector.load %arg9[%c0_614, %c127_615] : memref<8x135xf32, #tpu.memory_space<vmem>>, vector<8x4xf32>
    %c2_616 = arith.constant 2 : index
    %c0_617 = arith.constant 0 : index
    %555 = vector.load %arg2[%c2_616, %c0_617] : memref<9x4xf32, #tpu.memory_space<vmem>>, vector<1x4xf32>
    %556 = vector.broadcast %555 : vector<1x4xf32> to vector<8x4xf32>
    %557 = arith.mulf %554, %556 : vector<8x4xf32>
    %c16_618 = arith.constant 16 : index
    %c0_619 = arith.constant 0 : index
    %558 = vector.load %arg10[%c16_618, %c0_619] : memref<72x4xf32, #tpu.memory_space<vmem>>, vector<8x4xf32>
    tpu.vector_store %arg10[%c16_618, %c0_619], %557 {strides = array<i32>} : memref<72x4xf32, #tpu.memory_space<vmem>>, vector<8x4xf32>,
    %c0_620 = arith.constant 0 : index
    %c127_621 = arith.constant 127 : index
    %559 = vector.load %arg9[%c0_620, %c127_621] : memref<8x135xf32, #tpu.memory_space<vmem>>, vector<8x4xf32>
    %c3_622 = arith.constant 3 : index
    %c0_623 = arith.constant 0 : index
    %560 = vector.load %arg2[%c3_622, %c0_623] : memref<9x4xf32, #tpu.memory_space<vmem>>, vector<1x4xf32>
    %561 = vector.broadcast %560 : vector<1x4xf32> to vector<8x4xf32>
    %562 = arith.mulf %559, %561 : vector<8x4xf32>
    %c24_624 = arith.constant 24 : index
    %c0_625 = arith.constant 0 : index
    %563 = vector.load %arg10[%c24_624, %c0_625] : memref<72x4xf32, #tpu.memory_space<vmem>>, vector<8x4xf32>
    tpu.vector_store %arg10[%c24_624, %c0_625], %562 {strides = array<i32>} : memref<72x4xf32, #tpu.memory_space<vmem>>, vector<8x4xf32>,
    %c0_626 = arith.constant 0 : index
    %c128_627 = arith.constant 128 : index
    %564 = vector.load %arg9[%c0_626, %c128_627] : memref<8x135xf32, #tpu.memory_space<vmem>>, vector<8x4xf32>
    %c4_628 = arith.constant 4 : index
    %c0_629 = arith.constant 0 : index
    %565 = vector.load %arg2[%c4_628, %c0_629] : memref<9x4xf32, #tpu.memory_space<vmem>>, vector<1x4xf32>
    %566 = vector.broadcast %565 : vector<1x4xf32> to vector<8x4xf32>
    %567 = arith.mulf %564, %566 : vector<8x4xf32>
    %c32_630 = arith.constant 32 : index
    %c0_631 = arith.constant 0 : index
    %568 = vector.load %arg10[%c32_630, %c0_631] : memref<72x4xf32, #tpu.memory_space<vmem>>, vector<8x4xf32>
    tpu.vector_store %arg10[%c32_630, %c0_631], %567 {strides = array<i32>} : memref<72x4xf32, #tpu.memory_space<vmem>>, vector<8x4xf32>,
    %c0_632 = arith.constant 0 : index
    %c129_633 = arith.constant 129 : index
    %569 = vector.load %arg9[%c0_632, %c129_633] : memref<8x135xf32, #tpu.memory_space<vmem>>, vector<8x4xf32>
    %c5_634 = arith.constant 5 : index
    %c0_635 = arith.constant 0 : index
    %570 = vector.load %arg2[%c5_634, %c0_635] : memref<9x4xf32, #tpu.memory_space<vmem>>, vector<1x4xf32>
    %571 = vector.broadcast %570 : vector<1x4xf32> to vector<8x4xf32>
    %572 = arith.mulf %569, %571 : vector<8x4xf32>
    %c40_636 = arith.constant 40 : index
    %c0_637 = arith.constant 0 : index
    %573 = vector.load %arg10[%c40_636, %c0_637] : memref<72x4xf32, #tpu.memory_space<vmem>>, vector<8x4xf32>
    tpu.vector_store %arg10[%c40_636, %c0_637], %572 {strides = array<i32>} : memref<72x4xf32, #tpu.memory_space<vmem>>, vector<8x4xf32>,
    %c0_638 = arith.constant 0 : index
    %c129_639 = arith.constant 129 : index
    %574 = vector.load %arg9[%c0_638, %c129_639] : memref<8x135xf32, #tpu.memory_space<vmem>>, vector<8x4xf32>
    %c6_640 = arith.constant 6 : index
    %c0_641 = arith.constant 0 : index
    %575 = vector.load %arg2[%c6_640, %c0_641] : memref<9x4xf32, #tpu.memory_space<vmem>>, vector<1x4xf32>
    %576 = vector.broadcast %575 : vector<1x4xf32> to vector<8x4xf32>
    %577 = arith.mulf %574, %576 : vector<8x4xf32>
    %c48_642 = arith.constant 48 : index
    %c0_643 = arith.constant 0 : index
    %578 = vector.load %arg10[%c48_642, %c0_643] : memref<72x4xf32, #tpu.memory_space<vmem>>, vector<8x4xf32>
    tpu.vector_store %arg10[%c48_642, %c0_643], %577 {strides = array<i32>} : memref<72x4xf32, #tpu.memory_space<vmem>>, vector<8x4xf32>,
    %c0_644 = arith.constant 0 : index
    %c130_645 = arith.constant 130 : index
    %579 = vector.load %arg9[%c0_644, %c130_645] : memref<8x135xf32, #tpu.memory_space<vmem>>, vector<8x4xf32>
    %c7_646 = arith.constant 7 : index
    %c0_647 = arith.constant 0 : index
    %580 = vector.load %arg2[%c7_646, %c0_647] : memref<9x4xf32, #tpu.memory_space<vmem>>, vector<1x4xf32>
    %581 = vector.broadcast %580 : vector<1x4xf32> to vector<8x4xf32>
    %582 = arith.mulf %579, %581 : vector<8x4xf32>
    %c56_648 = arith.constant 56 : index
    %c0_649 = arith.constant 0 : index
    %583 = vector.load %arg10[%c56_648, %c0_649] : memref<72x4xf32, #tpu.memory_space<vmem>>, vector<8x4xf32>
    tpu.vector_store %arg10[%c56_648, %c0_649], %582 {strides = array<i32>} : memref<72x4xf32, #tpu.memory_space<vmem>>, vector<8x4xf32>,
    %c0_650 = arith.constant 0 : index
    %c131_651 = arith.constant 131 : index
    %584 = vector.load %arg9[%c0_650, %c131_651] : memref<8x135xf32, #tpu.memory_space<vmem>>, vector<8x4xf32>
    %c8_652 = arith.constant 8 : index
    %c0_653 = arith.constant 0 : index
    %585 = vector.load %arg2[%c8_652, %c0_653] : memref<9x4xf32, #tpu.memory_space<vmem>>, vector<1x4xf32>
    %586 = vector.broadcast %585 : vector<1x4xf32> to vector<8x4xf32>
    %587 = arith.mulf %584, %586 : vector<8x4xf32>
    %c64_654 = arith.constant 64 : index
    %c0_655 = arith.constant 0 : index
    %588 = vector.load %arg10[%c64_654, %c0_655] : memref<72x4xf32, #tpu.memory_space<vmem>>, vector<8x4xf32>
    tpu.vector_store %arg10[%c64_654, %c0_655], %587 {strides = array<i32>} : memref<72x4xf32, #tpu.memory_space<vmem>>, vector<8x4xf32>,
    %589 = vector.extract_strided_slice %4 {offsets = [37, 0], sizes = [1, 72], strides = [1, 1]} : vector<38x72xf32> to vector<1x72xf32>
    %c0_656 = arith.constant 0 : index
    %c0_657 = arith.constant 0 : index
    %590 = vector.load %arg10[%c0_656, %c0_657] : memref<72x4xf32, #tpu.memory_space<vmem>>, vector<72x4xf32>
    %cst_658 = arith.constant dense<0.000000e+00> : vector<1x4xf32>
    %591 = tpu.matmul %589, %590, %cst_658 {dimension_numbers = #tpu.dot_dimension_numbers<[1], [0], [0], [1], [0, 0, 1, 1], [], []>} : vector<1x72xf32>, vector<72x4xf32>, vector<1x4xf32> -> vector<1x4xf32>
    %592 = vector.extract_strided_slice %5 {offsets = [37, 0], sizes = [1, 1], strides = [1, 1]} : vector<38x1xf32> to vector<1x1xf32>
    %593 = vector.broadcast %592 : vector<1x1xf32> to vector<1x4xf32>
    %594 = arith.addf %591, %593 : vector<1x4xf32>
    %c0_659 = arith.constant 0 : index
    %c0_660 = arith.constant 0 : index
    %c0_661 = arith.constant 0 : index
    %595 = vector.load %arg6[%c0_659, %c0_660, %c0_661] : memref<1x1x4xf32, #tpu.memory_space<vmem>>, vector<1x1x4xf32>
    %596 = vector.shape_cast %595 : vector<1x1x4xf32> to vector<1x4xf32>
    %597 = vector.shape_cast %377 : vector<1x4xf32> to vector<1x1x4xf32>
    tpu.vector_store %arg6[%c0_659, %c0_660, %c0_661], %597 {strides = array<i32>} : memref<1x1x4xf32, #tpu.memory_space<vmem>>, vector<1x1x4xf32>,
    %c0_662 = arith.constant 0 : index
    %c0_663 = arith.constant 0 : index
    %c0_664 = arith.constant 0 : index
    %598 = vector.load %arg7[%c0_662, %c0_663, %c0_664] : memref<1x1x4xf32, #tpu.memory_space<vmem>>, vector<1x1x4xf32>
    %599 = vector.shape_cast %598 : vector<1x1x4xf32> to vector<1x4xf32>
    %600 = vector.shape_cast %594 : vector<1x4xf32> to vector<1x1x4xf32>
    tpu.vector_store %arg7[%c0_662, %c0_663, %c0_664], %600 {strides = array<i32>} : memref<1x1x4xf32, #tpu.memory_space<vmem>>, vector<1x1x4xf32>,
    %cst_665 = arith.constant 0.000000e+00 : f32
    %601 = vector.broadcast %cst_665 : f32 to vector<1x4xf32>
    %602 = arith.subf %601, %377 : vector<1x4xf32>
    %603 = math.exp %602 : vector<1x4xf32>
    %cst_666 = arith.constant 1.000000e+00 : f32
    %604 = vector.broadcast %cst_666 : f32 to vector<1x4xf32>
    %605 = arith.addf %604, %603 : vector<1x4xf32>
    %cst_667 = arith.constant 1.000000e+00 : f32
    %606 = vector.broadcast %cst_667 : f32 to vector<1x4xf32>
    %607 = arith.divf %606, %605 : vector<1x4xf32>
    %cst_668 = arith.constant 0.000000e+00 : f32
    %608 = vector.broadcast %cst_668 : f32 to vector<1x4xf32>
    %609 = arith.subf %608, %594 : vector<1x4xf32>
    %610 = math.exp %609 : vector<1x4xf32>
    %cst_669 = arith.constant 1.000000e+00 : f32
    %611 = vector.broadcast %cst_669 : f32 to vector<1x4xf32>
    %612 = arith.addf %611, %610 : vector<1x4xf32>
    %cst_670 = arith.constant 1.000000e+00 : f32
    %613 = vector.broadcast %cst_670 : f32 to vector<1x4xf32>
    %614 = arith.divf %613, %612 : vector<1x4xf32>
    %c0_671 = arith.constant 0 : index
    %c0_672 = arith.constant 0 : index
    %615 = vector.load %arg5[%c0_671, %c0_672] : memref<2x128xf32, #tpu.memory_space<vmem>>, vector<2x128xf32>
    %616 = vector.extract_strided_slice %607 {offsets = [0, 0], sizes = [1, 2], strides = [1, 1]} : vector<1x4xf32> to vector<1x2xf32>
    %617 = vector.extract_strided_slice %614 {offsets = [0, 0], sizes = [1, 2], strides = [1, 1]} : vector<1x4xf32> to vector<1x2xf32>
    %cst_673 = arith.constant dense<0.000000e+00> : vector<1x128xf32>
    %618 = tpu.matmul %616, %615, %cst_673 {dimension_numbers = #tpu.dot_dimension_numbers<[1], [0], [0], [1], [0, 0, 1, 1], [], []>} : vector<1x2xf32>, vector<2x128xf32>, vector<1x128xf32> -> vector<1x128xf32>
    %c0_674 = arith.constant 0 : index
    %c0_675 = arith.constant 0 : index
    %c0_676 = arith.constant 0 : index
    %619 = vector.load %arg8[%c0_674, %c0_675, %c0_676] : memref<1x2x256xf32, #tpu.memory_space<vmem>>, vector<1x1x128xf32>
    %620 = vector.shape_cast %619 : vector<1x1x128xf32> to vector<1x128xf32>
    %621 = vector.shape_cast %618 : vector<1x128xf32> to vector<1x1x128xf32>
    tpu.vector_store %arg8[%c0_674, %c0_675, %c0_676], %621 {strides = array<i32>} : memref<1x2x256xf32, #tpu.memory_space<vmem>>, vector<1x1x128xf32>,
    %cst_677 = arith.constant dense<0.000000e+00> : vector<1x128xf32>
    %622 = tpu.matmul %617, %615, %cst_677 {dimension_numbers = #tpu.dot_dimension_numbers<[1], [0], [0], [1], [0, 0, 1, 1], [], []>} : vector<1x2xf32>, vector<2x128xf32>, vector<1x128xf32> -> vector<1x128xf32>
    %c0_678 = arith.constant 0 : index
    %c0_679 = arith.constant 0 : index
    %c128_680 = arith.constant 128 : index
    %623 = vector.load %arg8[%c0_678, %c0_679, %c128_680] : memref<1x2x256xf32, #tpu.memory_space<vmem>>, vector<1x1x128xf32>
    %624 = vector.shape_cast %623 : vector<1x1x128xf32> to vector<1x128xf32>
    %625 = vector.shape_cast %622 : vector<1x128xf32> to vector<1x1x128xf32>
    tpu.vector_store %arg8[%c0_678, %c0_679, %c128_680], %625 {strides = array<i32>} : memref<1x2x256xf32, #tpu.memory_space<vmem>>, vector<1x1x128xf32>,
    %626 = vector.extract_strided_slice %607 {offsets = [0, 2], sizes = [1, 2], strides = [1, 1]} : vector<1x4xf32> to vector<1x2xf32>
    %627 = vector.extract_strided_slice %614 {offsets = [0, 2], sizes = [1, 2], strides = [1, 1]} : vector<1x4xf32> to vector<1x2xf32>
    %cst_681 = arith.constant dense<0.000000e+00> : vector<1x128xf32>
    %628 = tpu.matmul %626, %615, %cst_681 {dimension_numbers = #tpu.dot_dimension_numbers<[1], [0], [0], [1], [0, 0, 1, 1], [], []>} : vector<1x2xf32>, vector<2x128xf32>, vector<1x128xf32> -> vector<1x128xf32>
    %c0_682 = arith.constant 0 : index
    %c1_683 = arith.constant 1 : index
    %c0_684 = arith.constant 0 : index
    %629 = vector.load %arg8[%c0_682, %c1_683, %c0_684] : memref<1x2x256xf32, #tpu.memory_space<vmem>>, vector<1x1x128xf32>
    %630 = vector.shape_cast %629 : vector<1x1x128xf32> to vector<1x128xf32>
    %631 = vector.shape_cast %628 : vector<1x128xf32> to vector<1x1x128xf32>
    tpu.vector_store %arg8[%c0_682, %c1_683, %c0_684], %631 {strides = array<i32>} : memref<1x2x256xf32, #tpu.memory_space<vmem>>, vector<1x1x128xf32>,
    %cst_685 = arith.constant dense<0.000000e+00> : vector<1x128xf32>
    %632 = tpu.matmul %627, %615, %cst_685 {dimension_numbers = #tpu.dot_dimension_numbers<[1], [0], [0], [1], [0, 0, 1, 1], [], []>} : vector<1x2xf32>, vector<2x128xf32>, vector<1x128xf32> -> vector<1x128xf32>
    %c0_686 = arith.constant 0 : index
    %c1_687 = arith.constant 1 : index
    %c128_688 = arith.constant 128 : index
    %633 = vector.load %arg8[%c0_686, %c1_687, %c128_688] : memref<1x2x256xf32, #tpu.memory_space<vmem>>, vector<1x1x128xf32>
    %634 = vector.shape_cast %633 : vector<1x1x128xf32> to vector<1x128xf32>
    %635 = vector.shape_cast %632 : vector<1x128xf32> to vector<1x1x128xf32>
    tpu.vector_store %arg8[%c0_686, %c1_687, %c128_688], %635 {strides = array<i32>} : memref<1x2x256xf32, #tpu.memory_space<vmem>>, vector<1x1x128xf32>,
    return
  }
  func.func @transform_0(%arg0: i32) -> (i32, i32, i32) {
    %c0_i32 = arith.constant 0 : i32
    %c0_i32_0 = arith.constant 0 : i32
    %c0_i32_1 = arith.constant 0 : i32
    return %arg0, %c0_i32, %c0_i32_0 : i32, i32, i32
  }
  func.func @transform_1(%arg0: i32) -> (i32, i32) {
    %c0_i32 = arith.constant 0 : i32
    %c0_i32_0 = arith.constant 0 : i32
    %c0_i32_1 = arith.constant 0 : i32
    return %c0_i32, %c0_i32_0 : i32, i32
  }
  func.func @transform_2(%arg0: i32) -> (i32, i32) {
    %c0_i32 = arith.constant 0 : i32
    %c0_i32_0 = arith.constant 0 : i32
    %c0_i32_1 = arith.constant 0 : i32
    return %c0_i32, %c0_i32_0 : i32, i32
  }
  func.func @transform_3(%arg0: i32) -> (i32, i32) {
    %c0_i32 = arith.constant 0 : i32
    %c0_i32_0 = arith.constant 0 : i32
    %c0_i32_1 = arith.constant 0 : i32
    return %c0_i32, %c0_i32_0 : i32, i32
  }
  func.func @transform_4(%arg0: i32) -> (i32, i32) {
    %c0_i32 = arith.constant 0 : i32
    %c0_i32_0 = arith.constant 0 : i32
    %c0_i32_1 = arith.constant 0 : i32
    return %c0_i32, %c0_i32_0 : i32, i32
  }
  func.func @transform_5(%arg0: i32) -> (i32, i32, i32) {
    %c0_i32 = arith.constant 0 : i32
    %c0_i32_0 = arith.constant 0 : i32
    %c0_i32_1 = arith.constant 0 : i32
    return %arg0, %c0_i32, %c0_i32_0 : i32, i32, i32
  }
  func.func @transform_6(%arg0: i32) -> (i32, i32, i32) {
    %c0_i32 = arith.constant 0 : i32
    %c0_i32_0 = arith.constant 0 : i32
    %c0_i32_1 = arith.constant 0 : i32
    return %arg0, %c0_i32, %c0_i32_0 : i32, i32, i32
  }
  func.func @transform_7(%arg0: i32) -> (i32, i32, i32) {
    %c0_i32 = arith.constant 0 : i32
    %c0_i32_0 = arith.constant 0 : i32
    %c0_i32_1 = arith.constant 0 : i32
    return %arg0, %c0_i32, %c0_i32_0 : i32, i32, i32
  }
}

</mosaic_0001>

<bundles_post_ra>
// kernel: tmonet_forward.3
= control target key start
LH: loop header
LB: loop body
LE: loop exit
PB: predicated region body
PF: predicated region fallthrough
CT: control target
= control target key end

     0   :  { %8 = vsyncpa [#allocation3], 0  ;;  %s1669_s0 = inlined_call_operand.hbm [shape: f32[2,3,128,128], index: 0, kind: input, shape index: {}]   ;;  %s1670_s1 = inlined_call_operand.hbm [shape: f32[128,2], index: 1, kind: input, shape index: {}]   ;;  %s1671_s2 = inlined_call_operand.hbm [shape: bf16[128,2], index: 2, kind: input, shape index: {}]   ;;  %s1672_s3 = inlined_call_operand.hbm [shape: f32[2,1,2,2], index: 3, kind: output, shape index: {}]  }
   0x1   :  { %10 = vsyncpa [#allocation3 + $0x1], 0 }
   0x2   :  { %11 = vsyncpa [#allocation6], 0 }
   0x3   :  { %12 = vsyncpa [#allocation4], 0 }
   0x4   :  { %14 = vsyncpa [#allocation4 + $0x1], 0  ;;  %s1353_s12 = smov 0   ;;  %s1355_s13 = smov 0  }
   0x5   :  { %s1357_s14 = smov 0   ;;  %s1359_s15 = smov 0  }
   0x6   :  { %s1361_s16 = smov 0   ;;  %s1363_s17 = smov 0  }
   0x7 LB: > { %s836_s18 = sadd.s32 4294967295, %s1320_s17   ;;  %s837_s19 = sadd.s32 4294967294, %s1320_s17   ;;  %s1320_s17 = sphi %s1363_s17, %s20_s17   ;;  %s1316_s16 = sphi %s1361_s16, %s1694_s16   ;;  %s1312_s15 = sphi %s1359_s15, %s1693_s15   ;;  %s1308_s14 = sphi %s1357_s14, %s1692_s14   ;;  %s1304_s13 = sphi %s1355_s13, %s1691_s13   ;;  %s1300_s12 = sphi %s1353_s12, %s1690_s12  }
   0x8   : > { %p54_p0 = scmp.ne.s32.totalorder %s1304_s13, %s1300_s12  ;;  %p1387_p1 = scmp.eq.s32.totalorder %s836_s18, 0 }
   0x9   : > { %p1391_p2 = scmp.eq.s32.totalorder %s836_s18, 1  ;;  %p131_p3 = scmp.eq.s32.totalorder %s837_s19, 1 }
   0xa   : > { %s1677_s20 = scalar_select %p1387_p1, 1, 0 }
   0xb   : > { %p1397_p4 = por %p1387_p1, %p54_p0  ;;  %p838_p5 = scmp.ge.s32.totalorder %s1320_s17, 1 }
   0xc   : > { %p1402_p6 = por %p131_p3, %p54_p0  ;;  %p138_p7 = scmp.lt.s32.totalorder %s1320_s17, 3 }
   0xd   : > { %s1679_s22 = scalar_select %p1397_p4, 1, 0 }
   0xe   : > { %s1680_s23 = scalar_select %p1402_p6, 1, 0 }
   0xf   : > { %p1407_p8 = pnand %p838_p5, %p138_p7  ;;  %s1322_s25 = smov [#allocation5]  }
  0x10   : > { %s153_s26 = sshll.u32 %s1322_s25, 4  ;;  %s1323_s28 = smov [#allocation7]   ;;  %s1411_s26 = int_to_ptr.vmem [resolvable:$true] %s153_s26 }
  0x11   : > { %p1030_p9 = pneg %p1407_p8  ;;  %s166_s29 = sshll.u32 %s1323_s28, 4  ;;  %s1422_s29 = int_to_ptr.vmem [resolvable:$true] %s166_s29 }
  0x12   : > { %s1148_s5 = scalar_lea.hbm %s1670_s1, 2048 }
  0x13   : > { %p1418_p11 = pnand %p1030_p9, %p1387_p1  ;;  %p1149_p12 = scmp.ne.s32.totalorder %s1670_s1, %s1148_s5 }
  0x14   : > { %p1155_p5 = scmp.lt.u32.totalorder %s1148_s5, %s1670_s1 }
  0x15   : > { %p1150_p13 = pneg %p1418_p11 }
  0x17   : > { %p1151_p0 = pnand %p1150_p13, %p1149_p12 }
  0x19   : > { %p1152_p3 = pneg %p1151_p0 }
  0x1b   : > { %p1157_p7 = pnand %p1155_p5, %p1152_p3 }
  0x1d   : > { %1160 = shalt.err (!%p1157_p7)
}
  0x1e   : > { %s1161_s10 = scalar_lea.vmem %s1411_s26, 2048  ;;  %p1169_p1 = scmp.lt.s32.totalorder %s1411_s26, %s1411_s26 }
  0x1f   : > { %p1162_p9 = scmp.ne.s32.totalorder %s1411_s26, %s1161_s10  ;;  %p1170_p12 = scmp.lt.s32.totalorder %s1161_s10, %s1161_s10 }
  0x21   : > { %p1164_p10 = pnand %p1162_p9, %p1150_p13  ;;  %p1171_p0 = por %p1170_p12, %p1169_p1 }
  0x23   : > { %p1165_p6 = pneg %p1164_p10 }
  0x25   : > { %p1172_p4 = pnand %p1171_p0, %p1165_p6 }
  0x27   : > { %1175 = shalt.err (!%p1172_p4)
}
  0x28   : > { %s1324_s11 = smov 128   ;;  %s1325_s18 = smov 8  }
  0x29   : > { %1033 = dma.hbm_to_vmem [thread:$0]  (!%p1418_p11), %s1670_s1, 2048, %s1411_s26, [#allocation6], %s1324_s11, %s1324_s11, %s1325_s18  }
  0x2a   : > { %s1176_s4 = scalar_lea.hbm %s1671_s2, 1024 }
  0x2b   : > { %p1177_p1 = scmp.ne.s32.totalorder %s1671_s2, %s1176_s4  ;;  %p1183_p10 = scmp.lt.u32.totalorder %s1176_s4, %s1671_s2 }
  0x2d   : > { %p1179_p4 = pnand %p1177_p1, %p1150_p13 }
  0x2f   : > { %p1180_p6 = pneg %p1179_p4 }
  0x31   : > { %p1185_p3 = pnand %p1183_p10, %p1180_p6 }
  0x33   : > { %1188 = shalt.err (!%p1185_p3)
}
  0x34   : > { %s1189_s26 = scalar_lea.vmem %s1422_s29, 1024  ;;  %p1197_p12 = scmp.lt.s32.totalorder %s1422_s29, %s1422_s29 }
  0x35   : > { %p1190_p5 = scmp.ne.s32.totalorder %s1422_s29, %s1189_s26  ;;  %p1198_p0 = scmp.lt.s32.totalorder %s1189_s26, %s1189_s26 }
  0x37   : > { %p1192_p7 = pnand %p1190_p5, %p1150_p13  ;;  %p1199_p1 = por %p1198_p0, %p1197_p12 }
  0x39   : > { %p1193_p9 = pneg %p1192_p7 }
  0x3b   : > { %p1200_p4 = pnand %p1199_p1, %p1193_p9 }
  0x3d   : > { %1203 = shalt.err (!%p1200_p4)
}
  0x3e   : > { %s1326_s9 = smov 64   ;;  %s1327_s10 = smov 4  }
  0x3f   : > { %1036 = dma.hbm_to_vmem [thread:$0]  (!%p1418_p11), %s1671_s2, 1024, %s1422_s29, [#allocation6], %s1326_s9, %s1326_s9, %s1327_s10  }
  0x40   : > { %s32_s28 = sadd.s32 1, %s1316_s16  ;;  %s41_s30 = sadd.s32 1, %s1308_s14 }
  0x41   : > { %p34_p13 = scmp.ge.s32.totalorder %s32_s28, 2  ;;  %p48_p6 = scmp.ne.s32.totalorder %s1308_s14, %s1304_s13 }
  0x42   : > { %p49_p10 = scmp.eq.s32.totalorder %s1320_s17, 0  ;;  %p1047_p3 = scmp.lt.s32.totalorder %s1320_s17, 2 }
  0x43   : > { %s1696_s28 = smov (%p34_p13, %s32_s28), 0  ;;  %p1489_p7 = por %p1391_p2, %p48_p6 }
  0x44   : > { %p50_p5 = por %p49_p10, %p48_p6  ;;  %s36_s27 = ssub.s32 %s1316_s16, %s1696_s28 }
  0x45   : > { %s1683_s4 = scalar_select %p1489_p7, 1, 0 }
  0x46   : > { %s180_s5 = sand.u32 1, %s1308_s14   ;;  %p39_p9 = scmp.eq.s32.totalorder %s36_s27, 0 }
  0x47   : > { %s1015_s29 = smul.u32 384, %s180_s5  ;;  %p1496_p11 = pnand %p1047_p3, %p50_p5 }
  0x48   : > { %s1501_s7 = scalar_select %p39_p9, %s1308_s14, %s41_s30  }
  0x49   : > { %s1016_s8 = smul.u32 6144, %s1316_s16  ;;  %s184_s26 = scalar_lea.vmem [#allocation2], %s1015_s29 }
  0x4a   : > { %s193_s9 = sshll.u32 %s184_s26, 4  ;;  %s1511_s25 = scalar_lea.sflag [#allocation3], %s180_s5  ;;  %s1509_s9 = int_to_ptr.vmem [resolvable:$true] %s193_s9 }
  0x4b   : > { %s1507_s19 = scalar_lea.hbm %s1669_s0, %s1016_s8  ;;  %p1206_p12 = pneg %p1496_p11 }
  0x4c   : > { %s1204_s27 = scalar_lea.hbm %s1507_s19, 6144  ;;  %s1209_s8 = scalar_lea.hbm %s1669_s0, 12288 }
  0x4d   : > { %p1205_p2 = scmp.ne.s32.totalorder %s1507_s19, %s1204_s27  ;;  %p1210_p4 = scmp.lt.u32.totalorder %s1507_s19, %s1669_s0 }
  0x4e   : > { %p1211_p13 = scmp.lt.u32.totalorder %s1209_s8, %s1204_s27  ;;  %p1213_p10 = scmp.lt.u32.totalorder %s1204_s27, %s1507_s19 }
  0x4f   : > { %p1207_p0 = pnand %p1206_p12, %p1205_p2 }
  0x50   : > { %p1212_p6 = por %p1211_p13, %p1210_p4 }
  0x51   : > { %p1208_p1 = pneg %p1207_p0 }
  0x52   : > { %p1214_p3 = por %p1213_p10, %p1212_p6 }
  0x54   : > { %p1215_p5 = pnand %p1214_p3, %p1208_p1 }
  0x56   : > { %1218 = shalt.err (!%p1215_p5)
}
  0x57   : > { %s1219_s5 = scalar_lea.vmem %s1509_s9, 6144  ;;  %s1328_s10 = smov [#allocation2]  }
  0x58   : > { %p1220_p9 = scmp.ne.s32.totalorder %s1509_s9, %s1219_s5  ;;  %s1224_s30 = sshll.u32 %s1328_s10, 4  ;;  %s1225_s30 = int_to_ptr.vmem [resolvable:$false] %s1224_s30 }
  0x59   : > { %s1226_s29 = scalar_lea.vmem %s1225_s30, 12288  ;;  %p1227_p7 = scmp.lt.s32.totalorder %s1509_s9, %s1225_s30 }
  0x5a   : > { %p1222_p2 = pnand %p1220_p9, %p1206_p12  ;;  %p1228_p4 = scmp.lt.s32.totalorder %s1226_s29, %s1219_s5 }
  0x5c   : > { %p1223_p0 = pneg %p1222_p2  ;;  %p1229_p13 = por %p1228_p4, %p1227_p7 }
  0x5e   : > { %p1230_p6 = pnand %p1229_p13, %p1223_p0 }
  0x60   : > { %1233 = shalt.err (!%p1230_p6)
}
  0x61   : > { %1040 = dma.hbm_to_vmem [thread:$0]  (!%p1496_p11), %s1507_s19, 6144, %s1509_s9, %s1511_s25, %s1324_s11, %s1324_s11, %s1325_s18  }
  0x62   : > { %205 = sbr.rel (%p1407_p8) target bundleno = 618 (0x26a), region = 32  ;;  %s1545_s27 = sand.u32 (!%p1407_p8), 1, %s1304_s13  }
  0x63   : > { %s1017_s8 = smul.u32 (!%p1407_p8), 384, %s1545_s27  ;;  %s208_s26 = scalar_lea.sflag (!%p1407_p8), [#allocation3], %s1545_s27 }
  0x64   : > { %p1685_p7 = scmp.ne.s32.totalorder (!%p1407_p8), %s1679_s22, 0 }
  0x65   : > { %s1549_s21 = scalar_lea.vmem (!%p1407_p8), [#allocation2], %s1017_s8 }
  0x69   : > { %1287 = dma.done.wait (%p1685_p7), %s208_s26, 6144  }
  0x6a   : > { %1289 = vsyncadd (%p1685_p7), %s208_s26, 4294961152  ;;  %p1686_p11 = scmp.ne.s32.totalorder %s1677_s20, 0 }
  0x6c   : > { %1291 = dma.done.wait (%p1686_p11), [#allocation6], 3072  }
  0x6d   : > { %1293 = vsyncadd (%p1686_p11), [#allocation6], 4294964224  ;;  %v1108_v0 = vld [vmem:[#allocation7] sm:$0xff]   ;;  %v1109_v1 = vld [vmem:[#allocation7 + $0x8] sm:$0xff]   ;;  %s846_s20 = sshll.u32 %s1545_s27, 1  ;;  %vm714_vm0 = vcmask 9216  }
  0x6e   : > { %924 = vmatprep.subr.bf16.mxu0 %v1108_v0  ;;  %v1110_v2 = vld [vmem:[#allocation7 + $0x10] sm:$0xff]   ;;  %v1111_v3 = vld [vmem:[#allocation7 + $0x18] sm:$0xff]   ;;  %v245_v4 = vld [vmem:[%s1549_s21] sm:$0xff]  ;;  %vm1330_vm1 = vmmov 0   ;;  %s1608_s22 = scalar_lea.vmem [#allocation8], %s846_s20  ;;  %s888_s24 = sshll.u32 %s1312_s15, 5 }
  0x6f   : > { %925 = vmatpush3.bf16.msra.mxu0 %v1108_v0  ;;  %v246_v5 = vld [vmem:[%s1549_s21 + $0x8] sm:$0xff]  ;;  %v847_v6 = vld [vmem:[%s1549_s21 + $0x80] sm:$0xff]  ;;  %v295_v10 = vmul.f32 0.2126, %v245_v4  ;;  %v247_v17 = vld [vmem:[%s1549_s21 + $0x10] sm:$0xff]  ;;  %s734_s11 = sshll.u32 %s1608_s22, 4  ;;  %s1618_s9 = scalar_lea.hbm %s1672_s3, %s888_s24  ;;  %s1620_s11 = int_to_ptr.vmem [resolvable:$true] %s734_s11 }
  0x70   : > { %926 = vmatprep.subr.bf16.mxu0 %v1109_v1  ;;  %v848_v7 = vld [vmem:[%s1549_s21 + $0x88] sm:$0xff]  ;;  %v863_v8 = vld [vmem:[%s1549_s21 + $0x100] sm:$0xff]  ;;  %v296_v12 = vmul.f32 0.2126, %v246_v5  ;;  %v311_v13 = vmul.f32 0.7152, %v847_v6 }
  0x71   : > { %v864_v9 = vld [vmem:[%s1549_s21 + $0x108] sm:$0xff]  ;;  %v1112_v11 = vld [vmem:[#allocation7 + $0x20] sm:$0xff]   ;;  %v312_v14 = vmul.f32 0.7152, %v848_v7  ;;  %v343_v15 = vmul.f32 0.0722, %v863_v8 }
  0x72   : > { %v344_v16 = vmul.f32 0.0722, %v864_v9  ;;  %v248_v18 = vld [vmem:[%s1549_s21 + $0x18] sm:$0xff]  ;;  %v327_v19 = vadd.f32 %v311_v13, %v295_v10  ;;  %v849_v21 = vld [vmem:[%s1549_s21 + $0x90] sm:$0xff]  ;;  %v297_v24 = vmul.f32 0.2126, %v247_v17 }
  0x73   : > { %927 = vmatpush3.bf16.msra.mxu0 %v1109_v1  ;;  %v328_v20 = vadd.f32 %v312_v14, %v296_v12  ;;  %v850_v22 = vld [vmem:[%s1549_s21 + $0x98] sm:$0xff]  ;;  %v865_v23 = vld [vmem:[%s1549_s21 + $0x110] sm:$0xff]  ;;  %v298_v26 = vmul.f32 0.2126, %v248_v18  ;;  %v313_v27 = vmul.f32 0.7152, %v849_v21 }
  0x74   : > { %928 = vmatprep.subr.bf16.mxu0 %v1110_v2  ;;  %v866_v25 = vld [vmem:[%s1549_s21 + $0x118] sm:$0xff]  ;;  %v249_v28 = vld [vmem:[%s1549_s21 + $0x20] sm:$0xff]  ;;  %v1113_v29 = vld [vmem:[#allocation7 + $0x28] sm:$0xff]   ;;  %v359_v30 = vadd.f32 %v343_v15, %v327_v19  ;;  %v314_v32 = vmul.f32 0.7152, %v850_v22  ;;  %s721_s19 = scalar_lea.sflag [#allocation4], %s1545_s27 }
  0x75   : > { %v360_v31 = vadd.f32 %v344_v16, %v328_v20  ;;  %v345_v33 = vmul.f32 0.0722, %v865_v23  ;;  %v250_v34 = vld [vmem:[%s1549_s21 + $0x28] sm:$0xff]  ;;  %v851_v35 = vld [vmem:[%s1549_s21 + $0xa0] sm:$0xff]  ;;  %v329_v36 = vadd.f32 %v313_v27, %v297_v24  ;;  %v346_v37 = vmul.f32 0.0722, %v866_v25 }
  0x76   : > { %v852_v38 = vld [vmem:[%s1549_s21 + $0xa8] sm:$0xff]  ;;  %v867_v39 = vld [vmem:[%s1549_s21 + $0x120] sm:$0xff]  ;;  %v375_v41 = vadd.f32 1e-05, %v359_v30  ;;  %v330_v43 = vadd.f32 %v314_v32, %v298_v26  ;;  %v299_v44 = vmul.f32 0.2126, %v249_v28 }
  0x77   : > { %929 = vmatpush3.bf16.msra.mxu0 %v1110_v2  ;;  %v868_v40 = vld [vmem:[%s1549_s21 + $0x128] sm:$0xff]  ;;  %v376_v42 = vadd.f32 1e-05, %v360_v31  ;;  %v361_v45 = vadd.f32 %v345_v33, %v329_v36  ;;  %v300_v46 = vmul.f32 0.2126, %v250_v34  ;;  %v1114_v49 = vld [vmem:[#allocation7 + $0x30] sm:$0xff]  }
  0x78   : > { %930 = vmatprep.subr.bf16.mxu0 %v1111_v3  ;;  %v315_v47 = vmul.f32 0.7152, %v851_v35  ;;  %v316_v48 = vmul.f32 0.7152, %v852_v38  ;;  %1116 = vlog2.f32 %v375_v41  ;;  %v362_v50 = vadd.f32 %v346_v37, %v330_v43  ;;  %v251_v53 = vld [vmem:[%s1549_s21 + $0x30] sm:$0xff]  ;;  %v252_v54 = vld [vmem:[%s1549_s21 + $0x38] sm:$0xff] }
  0x79   : > { %v347_v51 = vmul.f32 0.0722, %v867_v39  ;;  %v348_v52 = vmul.f32 0.0722, %v868_v40  ;;  %1118 = vlog2.f32 %v376_v42  ;;  %v377_v55 = vadd.f32 1e-05, %v361_v45 }
  0x7a   : > { %v331_v56 = vadd.f32 %v315_v47, %v299_v44  ;;  %v332_v57 = vadd.f32 %v316_v48, %v300_v46  ;;  %v853_v58 = vld [vmem:[%s1549_s21 + $0xb0] sm:$0xff]  ;;  %v854_v59 = vld [vmem:[%s1549_s21 + $0xb8] sm:$0xff]  ;;  %v378_v61 = vadd.f32 1e-05, %v362_v50  ;;  %v301_v63 = vmul.f32 0.2126, %v251_v53 }
  0x7b   : > { %931 = vmatpush3.bf16.msra.mxu0 %v1111_v3  ;;  %v869_v60 = vld [vmem:[%s1549_s21 + $0x130] sm:$0xff]  ;;  %v870_v62 = vld [vmem:[%s1549_s21 + $0x138] sm:$0xff]  ;;  %v253_v0 = vld [vmem:[%s1549_s21 + $0x40] sm:$0xff]  ;;  %1120 = vlog2.f32 %v377_v55  ;;  %v302_v3 = vmul.f32 0.2126, %v252_v54  ;;  %s1234_s25 = scalar_lea.vmem %s1620_s11, 32 }
  0x7c   : > { %932 = vmatprep.subr.bf16.mxu0 %v1112_v11  ;;  %v363_v1 = vadd.f32 %v347_v51, %v331_v56  ;;  %v364_v2 = vadd.f32 %v348_v52, %v332_v57  ;;  %v254_v4 = vld [vmem:[%s1549_s21 + $0x48] sm:$0xff]  ;;  %v855_v5 = vld [vmem:[%s1549_s21 + $0xc0] sm:$0xff]  ;;  %v1115_v7 = vld [vmem:[#allocation7 + $0x38] sm:$0xff]   ;;  %1122 = vlog2.f32 %v378_v61  ;;  %v317_v8 = vmul.f32 0.7152, %v853_v58  ;;  %p1235_p8 = scmp.ne.s32.totalorder %s1620_s11, %s1234_s25  ;;  %p1687_p12 = scmp.ne.s32.totalorder %s1683_s4, 0 }
  0x7d   : > { %v856_v6 = vld [vmem:[%s1549_s21 + $0xc8] sm:$0xff]  ;;  %v318_v9 = vmul.f32 0.7152, %v854_v59  ;;  %v349_v10 = vmul.f32 0.0722, %v869_v60  ;;  %v871_v16 = vld [vmem:[%s1549_s21 + $0x140] sm:$0xff] }
  0x7e   : > { %v380_v12 = vadd.f32 1e-05, %v364_v2  ;;  %v350_v13 = vmul.f32 0.0722, %v870_v62  ;;  %v333_v14 = vadd.f32 %v317_v8, %v301_v63  ;;  %v872_v17 = vld [vmem:[%s1549_s21 + $0x148] sm:$0xff]  ;;  %v255_v26 = vld [vmem:[%s1549_s21 + $0x50] sm:$0xff]  ;;  %p1236_p1 = pnand %p1235_p8, %p1687_p12 }
  0x7f   : > { %933 = vmatpush3.bf16.msra.mxu0 %v1112_v11  ;;  %v379_v11 = vadd.f32 1e-05, %v363_v1  ;;  %v334_v15 = vadd.f32 %v318_v9, %v302_v3  ;;  %v303_v18 = vmul.f32 0.2126, %v253_v0  ;;  %v304_v19 = vmul.f32 0.2126, %v254_v4 }
  0x80   : > { %934 = vmatprep.subr.bf16.mxu0 %v1113_v29  ;;  %v319_v20 = vmul.f32 0.7152, %v855_v5  ;;  %v320_v21 = vmul.f32 0.7152, %v856_v6  ;;  %v351_v22 = vmul.f32 0.0722, %v871_v16  ;;  %v365_v23 = vadd.f32 %v349_v10, %v333_v14  ;;  %p1237_p10 = pneg %p1236_p1 }
  0x81   : > { %1124 = vlog2.f32 %v379_v11  ;;  %v366_v24 = vadd.f32 %v350_v13, %v334_v15  ;;  %v352_v25 = vmul.f32 0.0722, %v872_v17  ;;  %v256_v27 = vld [vmem:[%s1549_s21 + $0x58] sm:$0xff]  ;;  %v857_v28 = vld [vmem:[%s1549_s21 + $0xd0] sm:$0xff]  ;;  %v305_v34 = vmul.f32 0.2126, %v255_v26 }
  0x82   : > { %1126 = vlog2.f32 %v380_v12  ;;  %v336_v30 = vadd.f32 %v320_v21, %v304_v19  ;;  %v858_v31 = vld [vmem:[%s1549_s21 + $0xd8] sm:$0xff]  ;;  %v873_v32 = vld [vmem:[%s1549_s21 + $0x150] sm:$0xff]  ;;  %v1117_v35 = vpop.eup %1116  ;;  %v381_v36 = vadd.f32 1e-05, %v365_v23  ;;  %v306_v38 = vmul.f32 0.2126, %v256_v27 }
  0x83   : > { %935 = vmatpush3.bf16.msra.mxu0 %v1113_v29  ;;  %v335_v29 = vadd.f32 %v319_v20, %v303_v18  ;;  %v874_v33 = vld [vmem:[%s1549_s21 + $0x158] sm:$0xff]  ;;  %v382_v37 = vadd.f32 1e-05, %v366_v24  ;;  %v1119_v39 = vpop.eup %1118  ;;  %v392_v40 = vmul.f32 0.6931472, %v1117_v35  ;;  %v257_v44 = vld [vmem:[%s1549_s21 + $0x60] sm:$0xff] }
  0x84   : > { %936 = vmatprep.subr.bf16.mxu0 %v1114_v49  ;;  %v368_v42 = vadd.f32 %v352_v25, %v336_v30  ;;  %v321_v43 = vmul.f32 0.7152, %v857_v28  ;;  %v258_v45 = vld [vmem:[%s1549_s21 + $0x68] sm:$0xff]  ;;  %v394_v46 = vmul.f32 0.6931472, %v1119_v39  ;;  %1128 = vlog2.f32 %v381_v36  ;;  %v859_v53 = vld [vmem:[%s1549_s21 + $0xe0] sm:$0xff] }
  0x85   : > { %v367_v41 = vadd.f32 %v351_v22, %v335_v29  ;;  %v322_v47 = vmul.f32 0.7152, %v858_v31  ;;  %v353_v48 = vmul.f32 0.0722, %v873_v32  ;;  %1130 = vlog2.f32 %v382_v37  ;;  %v860_v54 = vld [vmem:[%s1549_s21 + $0xe8] sm:$0xff]  ;;  %v875_v60 = vld [vmem:[%s1549_s21 + $0x160] sm:$0xff] }
  0x86   : > { %v384_v51 = vadd.f32 1e-05, %v368_v42  ;;  %v337_v52 = vadd.f32 %v321_v43, %v305_v34  ;;  %v423_v56 = vpack.c.bf16 %v394_v46, %v392_v40  ;;  %v354_v59 = vmul.f32 0.0722, %v874_v33  ;;  %v876_v61 = vld [vmem:[%s1549_s21 + $0x168] sm:$0xff]  ;;  %v259_v1 = vld [vmem:[%s1549_s21 + $0x70] sm:$0xff] }
  0x87   : > { %937 = vmatpush3.bf16.msra.mxu0 %v1114_v49  ;;  %v1121_v49 = vpop.eup %1120  ;;  %v383_v50 = vadd.f32 1e-05, %v367_v41  ;;  %v338_v58 = vadd.f32 %v322_v47, %v306_v38  ;;  %v307_v0 = vmul.f32 0.2126, %v257_v44  ;;  %v260_v2 = vld [vmem:[%s1549_s21 + $0x78] sm:$0xff]  ;;  %v861_v6 = vld [vmem:[%s1549_s21 + $0xf0] sm:$0xff] }
  0x88   : > { %938 = vmatprep.subr.bf16.mxu0 %v1115_v7  ;;  %v1123_v55 = vpop.eup %1122  ;;  %v396_v57 = vmul.f32 0.6931472, %v1121_v49  ;;  %v369_v63 = vadd.f32 %v353_v48, %v337_v52  ;;  %940 = vmatprep.mubr.bf16.mxu0 %v423_v56  ;;  %v308_v4 = vmul.f32 0.2126, %v258_v45  ;;  %v323_v5 = vmul.f32 0.7152, %v859_v53 }
  0x89   : > { %v398_v62 = vmul.f32 0.6931472, %v1123_v55  ;;  %1132 = vlog2.f32 %v383_v50  ;;  %v370_v3 = vadd.f32 %v354_v59, %v338_v58  ;;  %v324_v11 = vmul.f32 0.7152, %v860_v54  ;;  %v877_v20 = vld [vmem:[%s1549_s21 + $0x170] sm:$0xff]  ;;  %v878_v21 = vld [vmem:[%s1549_s21 + $0x178] sm:$0xff] }
  0x8a   : > { %1134 = vlog2.f32 %v384_v51  ;;  %v385_v10 = vadd.f32 1e-05, %v369_v63  ;;  %v355_v12 = vmul.f32 0.0722, %v875_v60  ;;  %v339_v16 = vadd.f32 %v323_v5, %v307_v0  ;;  %v592_v26 = vld [vmem:[#allocation5] sm:$0xff]  ;;  %v593_v35 = vld [vmem:[#allocation5 + $0x8] sm:$0xff] }
  0x8b   : > { %939 = vmatpush3.bf16.msra.mxu0 %v1115_v7  ;;  %v862_v7 = vld [vmem:[%s1549_s21 + $0xf8] sm:$0xff]  ;;  %v1125_v8 = vpop.eup %1124  ;;  %v424_v9 = vpack.c.bf16 %v398_v62, %v396_v57  ;;  %v386_v15 = vadd.f32 1e-05, %v370_v3  ;;  %v356_v17 = vmul.f32 0.0722, %v876_v61  ;;  %v340_v19 = vadd.f32 %v324_v11, %v308_v4  ;;  %608 = vxpose.xlu0.b32.start [1/16] (narrow) %v592_v26, 8 }
  0x8c   : > { %v1127_v13 = vpop.eup %1126  ;;  %v400_v14 = vmul.f32 0.6931472, %v1125_v8  ;;  %1136 = vlog2.f32 %v385_v10  ;;  %v309_v22 = vmul.f32 0.2126, %v259_v1  ;;  %v371_v23 = vadd.f32 %v355_v12, %v339_v16  ;;  %v594_v48 = vld [vmem:[#allocation5 + $0x10] sm:$0xff]  ;;  %v595_v55 = vld [vmem:[#allocation5 + $0x18] sm:$0xff] }
  0x8d   : > { %v402_v18 = vmul.f32 0.6931472, %v1127_v13  ;;  %1138 = vlog2.f32 %v386_v15  ;;  %v310_v24 = vmul.f32 0.2126, %v260_v2  ;;  %v325_v25 = vmul.f32 0.7152, %v861_v6 }
  0x8e   : > { %941 = vmatmul.mubr.bf16.vlgmr.msra.gmra.mrb[0].mxu0 %v424_v9  ;;  %v372_v28 = vadd.f32 %v356_v17, %v340_v19  ;;  %v326_v29 = vmul.f32 0.7152, %v862_v7  ;;  %v357_v30 = vmul.f32 0.0722, %v877_v20  ;;  %v1129_v31 = vpop.eup %1128  ;;  %v387_v32 = vadd.f32 1e-05, %v371_v23 }
  0x8f   : > { %v425_v27 = vpack.c.bf16 %v402_v18, %v400_v14  ;;  %v341_v33 = vadd.f32 %v325_v25, %v309_v22  ;;  %v358_v34 = vmul.f32 0.0722, %v878_v21  ;;  %v1131_v36 = vpop.eup %1130  ;;  %v404_v37 = vmul.f32 0.6931472, %v1129_v31  ;;  %609 = vxpose.xlu0.b32.cont [2/16] (narrow) %v593_v35, 8  ;;  %v596_v59 = vld [vmem:[#allocation5 + $0x20] sm:$0xff] }
  0x90   : > { %v388_v38 = vadd.f32 1e-05, %v372_v28  ;;  %v342_v39 = vadd.f32 %v326_v29, %v310_v24  ;;  %v406_v40 = vmul.f32 0.6931472, %v1131_v36  ;;  %1140 = vlog2.f32 %v387_v32  ;;  %v597_v1 = vld [vmem:[#allocation5 + $0x28] sm:$0xff]  ;;  %v598_v6 = vld [vmem:[#allocation5 + $0x30] sm:$0xff] }
  0x91   : > { %944 = vmatprep.mubr.bf16.mxu0 %v425_v27  ;;  %v373_v41 = vadd.f32 %v357_v30, %v341_v33  ;;  %v599_v7 = vld [vmem:[#allocation5 + $0x38] sm:$0xff]  ;;  %v600_v8 = vld [vmem:[#allocation5 + $0x40] sm:$0xff]  ;;  %v601_v9 = vld [vmem:[#allocation5 + $0x48] sm:$0xff]  ;;  %v1329_v16 = vmov 0.0|0.0   ;;  %v1331_v17 = vmov 0.0   ;;  %s1332_s15 = smov [#allocation8]  }
  0x92   : > { %1142 = vlog2.f32 %v388_v38  ;;  %v374_v43 = vadd.f32 %v358_v34, %v342_v39  ;;  %v426_v45 = vpack.c.bf16 %v406_v40, %v404_v37  ;;  %v602_v10 = vld [vmem:[#allocation5 + $0x50] sm:$0xff]  ;;  %v603_v11 = vld [vmem:[#allocation5 + $0x58] sm:$0xff]  ;;  %v604_v12 = vld [vmem:[#allocation5 + $0x60] sm:$0xff]  ;;  %991 = vmatprep.subr.bf16.mxu1 %v1329_v16  ;;  %988 = vmatprep.mubr.msk.f32.mxu1 %vm1330_vm1, %v1331_v17  ;;  %715 = vst.msk [vmem:[%s1608_s22] sm:$0x3] %vm714_vm0, %v1331_v17  ;;  %s1238_s5 = sshll.u32 %s1332_s15, 4  ;;  %s1239_s5 = int_to_ptr.vmem [resolvable:$false] %s1238_s5 }
  0x93   : > { %v1133_v42 = vpop.eup %1132  ;;  %v389_v47 = vadd.f32 1e-05, %v373_v41  ;;  %610 = vxpose.xlu0.b32.cont [3/16] (narrow) %v594_v48, 8  ;;  %v605_v13 = vld [vmem:[#allocation5 + $0x68] sm:$0xff]  ;;  %v606_v14 = vld [vmem:[#allocation5 + $0x70] sm:$0xff]  ;;  %v607_v15 = vld [vmem:[#allocation5 + $0x78] sm:$0xff]  ;;  %p1241_p3 = scmp.lt.s32.totalorder %s1620_s11, %s1239_s5 }
  0x94   : > { %v1135_v44 = vpop.eup %1134  ;;  %v408_v46 = vmul.f32 0.6931472, %v1133_v42  ;;  %v390_v50 = vadd.f32 1e-05, %v374_v43  ;;  %s1240_s10 = scalar_lea.vmem %s1239_s5, 64 }
  0x95   : > { %v410_v49 = vmul.f32 0.6931472, %v1135_v44  ;;  %1144 = vlog2.f32 %v389_v47  ;;  %p1242_p5 = scmp.lt.s32.totalorder %s1240_s10, %s1234_s25 }
  0x96   : > { %945 = vmatmul.mubr.bf16.gmra.mrb[4].mxu0 %v426_v45  ;;  %v1137_v51 = vpop.eup %1136  ;;  %1146 = vlog2.f32 %v390_v50 }
  0x97   : > { %v427_v52 = vpack.c.bf16 %v410_v49, %v408_v46  ;;  %v1139_v53 = vpop.eup %1138  ;;  %v412_v54 = vmul.f32 0.6931472, %v1137_v51  ;;  %611 = vxpose.xlu0.b32.cont [4/16] (narrow) %v595_v55, 8  ;;  %p1243_p9 = por %p1242_p5, %p1241_p3 }
  0x98   : > { %v414_v56 = vmul.f32 0.6931472, %v1139_v53 }
  0x99   : > { %948 = vmatprep.mubr.bf16.mxu0 %v427_v52  ;;  %v716_v43 = vld [vmem:[%s1608_s22] sm:$0x3]  ;;  %p1244_p2 = pnand %p1243_p9, %p1237_p10 }
  0x9a   : > { %v428_v57 = vpack.c.bf16 %v414_v56, %v412_v54  ;;  %v1141_v58 = vpop.eup %1140 }
  0x9b   : > { %v416_v61 = vmul.f32 0.6931472, %v1141_v58  ;;  %612 = vxpose.xlu0.b32.cont [5/16] (narrow) %v596_v59, 8 }
  0x9c   : > { %v1143_v60 = vpop.eup %1142 }
  0x9d   : > { %v418_v62 = vmul.f32 0.6931472, %v1143_v60 }
  0x9e   : > { %949 = vmatmul.mubr.bf16.gmra.mrb[8].mxu0 %v428_v57 }
  0x9f   : > { %v1145_v63 = vpop.eup %1144  ;;  %v429_v0 = vpack.c.bf16 %v418_v62, %v416_v61  ;;  %613 = vxpose.xlu0.b32.cont [6/16] (narrow) %v597_v1, 8 }
  0xa0   : > { %v1147_v2 = vpop.eup %1146  ;;  %v420_v3 = vmul.f32 0.6931472, %v1145_v63 }
  0xa1   : > { %952 = vmatprep.mubr.bf16.mxu0 %v429_v0  ;;  %v422_v4 = vmul.f32 0.6931472, %v1147_v2 }
  0xa3   : > { %v430_v5 = vpack.c.bf16 %v422_v4, %v420_v3  ;;  %614 = vxpose.xlu0.b32.cont [7/16] (narrow) %v598_v6, 8 }
  0xa6   : > { %953 = vmatmul.mubr.bf16.gmra.mrb[12].mxu0 %v430_v5 }
  0xa7   : > { %615 = vxpose.xlu0.b32.cont [8/16] (narrow) %v599_v7, 8 }
  0xab   : > { %616 = vxpose.xlu0.b32.cont [9/16] (narrow) %v600_v8, 8 }
  0xaf   : > { %617 = vxpose.xlu0.b32.cont [10/16] (narrow) %v601_v9, 8 }
  0xb3   : > { %618 = vxpose.xlu0.b32.cont [11/16] (narrow) %v602_v10, 8 }
  0xb7   : > { %619 = vxpose.xlu0.b32.cont [12/16] (narrow) %v603_v11, 8 }
  0xbb   : > { %620 = vxpose.xlu0.b32.cont [13/16] (narrow) %v604_v12, 8 }
  0xbf   : > { %621 = vxpose.xlu0.b32.cont [14/16] (narrow) %v605_v13, 8 }
  0xc3   : > { %622 = vxpose.xlu0.b32.cont [15/16] (narrow) %v606_v14, 8 }
  0xc7   : > { %623 = vxpose.xlu0.b32.end [16/16] (narrow) %v607_v15, 8 }
 0x10b   : > { %v624_v42 = vpop.trf.xlu0 }
 0x161   : > { %v942_v18 = vpop.f32.mrb[0].mxu0 }
 0x162   : > { %v529_v19 = vpop.f32.mrb[1].mxu0 }
 0x163   : > { %v943_v20 = vpop.f32.mrb[2].mxu0 }
 0x164   : > { %v995_v21 = vpack.c.bf16 %v943_v20, %v942_v18  ;;  %v532_v22 = vpop.f32.mrb[3].mxu0 }
 0x165   : > { %v992_v23 = vpack.c.bf16 %v532_v22, %v529_v19 }
 0x167   : > { %993 = vmatpush3.bf16.msra.mxu1 %v992_v23 }
 0x168   : > { %994 = vmatprep.subr.bf16.mxu1 %v1329_v16 }
 0x169   : > { %v946_v24 = vpop.f32.mrb[4].mxu0 }
 0x16a   : > { %v545_v25 = vpop.f32.mrb[5].mxu0 }
 0x16b   : > { %996 = vmatpush3.bf16.msra.mxu1 %v995_v21  ;;  %v947_v26 = vpop.f32.mrb[6].mxu0 }
 0x16c   : > { %997 = vmatprep.subr.bf16.mxu1 %v1329_v16  ;;  %v1001_v27 = vpack.c.bf16 %v947_v26, %v946_v24  ;;  %v548_v28 = vpop.f32.mrb[7].mxu0 }
 0x16d   : > { %v998_v29 = vpack.c.bf16 %v548_v28, %v545_v25 }
 0x16f   : > { %999 = vmatpush3.bf16.msra.mxu1 %v998_v29 }
 0x170   : > { %1000 = vmatprep.subr.bf16.mxu1 %v1329_v16 }
 0x171   : > { %v950_v30 = vpop.f32.mrb[8].mxu0 }
 0x172   : > { %v561_v31 = vpop.f32.mrb[9].mxu0 }
 0x173   : > { %v951_v32 = vpop.f32.mrb[10].mxu0  ;;  %1002 = vmatpush3.bf16.msra.mxu1 %v1001_v27 }
 0x174   : > { %v1007_v33 = vpack.c.bf16 %v951_v32, %v950_v30  ;;  %v564_v34 = vpop.f32.mrb[11].mxu0  ;;  %1003 = vmatprep.subr.bf16.mxu1 %v1329_v16 }
 0x175   : > { %v1004_v35 = vpack.c.bf16 %v564_v34, %v561_v31 }
 0x177   : > { %1005 = vmatpush3.bf16.msra.mxu1 %v1004_v35 }
 0x178   : > { %1006 = vmatprep.subr.bf16.mxu1 %v1329_v16 }
 0x179   : > { %v954_v36 = vpop.f32.mrb[12].mxu0 }
 0x17a   : > { %v577_v37 = vpop.f32.mrb[13].mxu0 }
 0x17b   : > { %v955_v38 = vpop.f32.mrb[14].mxu0  ;;  %1008 = vmatpush3.bf16.msra.mxu1 %v1007_v33 }
 0x17c   : > { %v1013_v39 = vpack.c.bf16 %v955_v38, %v954_v36  ;;  %v580_v40 = vpop.f32.mrb[15].mxu0  ;;  %1009 = vmatprep.subr.bf16.mxu1 %v1329_v16 }
 0x17d   : > { %v1010_v41 = vpack.c.bf16 %v580_v40, %v577_v37 }
 0x17f   : > { %1011 = vmatpush3.bf16.msra.mxu1 %v1010_v41 }
 0x180   : > { %1012 = vmatprep.subr.bf16.mxu1 %v1329_v16 }
 0x183   : > { %1014 = vmatpush3.bf16.msra.mxu1 %v1013_v39 }
 0x186   : > { %989 = vmatmul.mubr.f32.vlgmr.msra.gmra.mrb[0].mxu1 %v624_v42 }
 0x259   : > { %v706_v44 = vpop.f32.mrb[0].mxu1 }
 0x25a   : > { %v717_v45 = vadd.f32 %v716_v43, %v706_v44  ;;  %v990_v46 = vpop.f32.mrb[1].mxu1 }
 0x25c   : > { %719 = vst.msk [vmem:[%s1608_s22] sm:$0x3] %vm714_vm0, %v717_v45 }
 0x25d   : > { %1247 = shalt.err (!%p1244_p2)
}
 0x25e   : > { %s1248_s30 = scalar_lea.hbm %s1618_s9, 32  ;;  %s1252_s8 = scalar_lea.hbm %s1672_s3, 64 }
 0x25f   : > { %p1249_p0 = scmp.ne.s32.totalorder %s1618_s9, %s1248_s30  ;;  %p1253_p6 = scmp.lt.u32.totalorder %s1618_s9, %s1672_s3 }
 0x260   : > { %p1254_p7 = scmp.lt.u32.totalorder %s1252_s8, %s1248_s30  ;;  %p1256_p8 = scmp.lt.u32.totalorder %s1248_s30, %s1618_s9 }
 0x261   : > { %p1250_p4 = pnand %p1249_p0, %p1687_p12 }
 0x262   : > { %p1255_p11 = por %p1254_p7, %p1253_p6 }
 0x263   : > { %p1251_p13 = pneg %p1250_p4 }
 0x264   : > { %p1257_p1 = por %p1256_p8, %p1255_p11 }
 0x266   : > { %p1258_p10 = pnand %p1257_p1, %p1251_p13 }
 0x268   : > { %1261 = shalt.err (!%p1258_p10)
}
 0x269   : > { %1028 = dma.vmem_to_hbm [thread:$0]  (%p1687_p12), %s1620_s11, 32, %s1618_s9, %s721_s19  }
 0x26a PF: > { %s746_s20 = sand.u32 1, %s1300_s12   ;;  %p1688_p3 = scmp.ne.s32.totalorder %s1680_s23, 0 }
 0x26b   : > { %p1689_p5 = scmp.ge.s32.totalorder %s1320_s17, 2  ;;  %s747_s22 = scalar_lea.sflag [#allocation4], %s746_s20 }
 0x26d   : > { %p1042_p9 = pnand %p1689_p5, %p1688_p3 }
 0x26f   : > { %1295 = dma.done.wait (!%p1042_p9), %s747_s22, 32  }
 0x270   : > { %1297 = vsyncadd (!%p1042_p9), %s747_s22, 4294967264  ;;  %s20_s17 = sadd.s32 1, %s1320_s17   ;;  %s1690_s12 = smov %s1304_s13 }
 0x271   : > { %p17_p2 = scmp.ge.s32.totalorder %s20_s17, 4   ;;  %s1691_s13 = smov %s1308_s14 }
 0x272   : > { %s1692_s14 = smov %s1501_s7  ;;  %s1693_s15 = smov %s1316_s16 }
 0x273   : > { %s1694_s16 = smov %s1696_s28  ;;  %19 = sbr.rel (!%p17_p2) target bundleno = 7 (0x7), region = 92 }
 0x27a   :  { %752 = vsyncpa [#allocation3], 1 }
 0x27b   :  { %754 = vsyncpa [#allocation3 + $0x1], 1 }
 0x27c   :  { %755 = vsyncpa [#allocation6], 1 }
 0x27d   :  { %756 = vsyncpa [#allocation4], 1 }
 0x27e   :  { %758 = vsyncpa [#allocation4 + $0x1], 1 }

// kernel: tmonet_forward.5
= control target key start
LH: loop header
LB: loop body
LE: loop exit
PB: predicated region body
PF: predicated region fallthrough
CT: control target
= control target key end

     0   :  { %s3949_s0 = inlined_call_operand.hbm [shape: f32[2,3,128,128], index: 0, kind: input, shape index: {}]   ;;  %s3950_s1 = inlined_call_operand.hbm [shape: f32[2,2,256], index: 1, kind: input, shape index: {}]   ;;  %s3951_s2 = inlined_call_operand.hbm [shape: f32[128,2], index: 2, kind: input, shape index: {}]   ;;  %s3952_s3 = inlined_call_operand.hbm [shape: f32[2,3,128,128], index: 3, kind: output, shape index: {0}]   ;;  %s3953_s4 = inlined_call_operand.hbm [shape: f32[2,1,128,128], index: 4, kind: output, shape index: {1}]  }
   0x1   :  { %3973 = sst [smem:[#allocation53_spill]] %s3949_s0 }
   0x2   :  { %3974 = sst [smem:[#allocation54_spill]] %s3951_s2 }
   0x3   :  { %10 = vsyncpa [#allocation3], 0 }
   0x4   :  { %12 = vsyncpa [#allocation3 + $0x1], 0 }
   0x5   :  { %13 = vsyncpa [#allocation6], 0 }
   0x6   :  { %15 = vsyncpa [#allocation6 + $0x1], 0 }
   0x7   :  { %16 = vsyncpa [#allocation4], 0 }
   0x8   :  { %18 = vsyncpa [#allocation4 + $0x1], 0 }
   0x9   :  { %19 = vsyncpa [#allocation10], 0 }
   0xa   :  { %21 = vsyncpa [#allocation10 + $0x1], 0  ;;  %s2300_s15 = smov 0   ;;  %s2302_s16 = smov 0  }
   0xb   :  { %s2304_s17 = smov 0   ;;  %s2306_s18 = smov 0  }
   0xc   :  { %s2308_s19 = smov 0   ;;  %s2310_s20 = smov 0  }
   0xd LB: > { %s2331_s21 = sadd.s32 4294967295, %s2263_s20   ;;  %s1632_s22 = sadd.s32 4294967294, %s2263_s20   ;;  %s2263_s20 = sphi %s2310_s20, %s27_s20   ;;  %s2259_s19 = sphi %s2308_s19, %s4130_s19   ;;  %s2255_s18 = sphi %s2306_s18, %s4129_s18   ;;  %s2251_s17 = sphi %s2304_s17, %s4128_s17   ;;  %s2247_s16 = sphi %s2302_s16, %s4127_s16   ;;  %s2243_s15 = sphi %s2300_s15, %s4126_s15  }
   0xe   : > { %p61_p0 = scmp.ne.s32.totalorder %s2247_s16, %s2243_s15  ;;  %p3954_p1 = scmp.eq.s32.totalorder %s2331_s21, 0 }
   0xf   : > { %p145_p3 = scmp.eq.s32.totalorder %s1632_s22, 1  ;;  %p1633_p5 = scmp.ge.s32.totalorder %s2263_s20, 1 }
  0x10   : > { %p2340_p4 = por %p3954_p1, %p61_p0  ;;  %p180_p7 = scmp.lt.s32.totalorder %s2263_s20, 3 }
  0x11   : > { %p2345_p6 = por %p145_p3, %p61_p0  ;;  %s2265_s26 = smov [#allocation7]  }
  0x12   : > { %s3975_s23 = scalar_select %p2340_p4, 1, 0 }
  0x13   : > { %s3976_s24 = scalar_select %p2345_p6, 1, 0 }
  0x14   : > { %p2350_p8 = pnand %p1633_p5, %p180_p7  ;;  %s195_s27 = sshll.u32 %s2265_s26, 4  ;;  %s196_s27 = int_to_ptr.vmem [resolvable:$true] %s195_s27 }
  0x15   : > { %s39_s29 = sadd.s32 1, %s2259_s19  ;;  %s3979_s2 = sld [smem:[#allocation54_spill]] }
  0x16   : > { %s3977_s25 = scalar_select %p2350_p8, 1, 0 }
  0x17   : > { %p1753_p9 = pneg %p2350_p8 }
  0x19   : > { %p2359_p11 = pnand %p1753_p9, %p3954_p1 }
  0x1b   : > { %s2053_s6 = scalar_lea.hbm %s3979_s2, 2048  ;;  %p2055_p13 = pneg %p2359_p11 }
  0x1c   : > { %p2054_p12 = scmp.ne.s32.totalorder %s3979_s2, %s2053_s6  ;;  %p2060_p5 = scmp.lt.u32.totalorder %s2053_s6, %s3979_s2 }
  0x1e   : > { %p2056_p0 = pnand %p2055_p13, %p2054_p12 }
  0x20   : > { %p2057_p3 = pneg %p2056_p0 }
  0x22   : > { %p2062_p7 = pnand %p2060_p5, %p2057_p3 }
  0x24   : > { %2065 = shalt.err (!%p2062_p7)
}
  0x25   : > { %s2066_s11 = scalar_lea.vmem %s196_s27, 2048  ;;  %p2074_p2 = scmp.lt.s32.totalorder %s196_s27, %s196_s27 }
  0x26   : > { %p2067_p9 = scmp.ne.s32.totalorder %s196_s27, %s2066_s11  ;;  %p2075_p6 = scmp.lt.s32.totalorder %s2066_s11, %s2066_s11 }
  0x28   : > { %p2069_p10 = pnand %p2067_p9, %p2055_p13  ;;  %p2076_p4 = por %p2075_p6, %p2074_p2 }
  0x2a   : > { %p2070_p1 = pneg %p2069_p10 }
  0x2c   : > { %p2077_p8 = pnand %p2076_p4, %p2070_p1 }
  0x2e   : > { %2080 = shalt.err (!%p2077_p8)
}
  0x2f   : > { %s3957_s12 = smov 128   ;;  %s2267_s13 = smov 8  }
  0x30   : > { %1756 = dma.hbm_to_vmem [thread:$0]  (!%p2359_p11), %s3979_s2, 2048, %s196_s27, [#allocation6], %s3957_s12, %s3957_s12, %s2267_s13  }
  0x31   : > { %p41_p1 = scmp.ge.s32.totalorder %s39_s29, 2  ;;  %s48_s26 = sadd.s32 1, %s2251_s17 }
  0x32   : > { %p55_p2 = scmp.ne.s32.totalorder %s2251_s17, %s2247_s16  ;;  %p56_p4 = scmp.eq.s32.totalorder %s2263_s20, 0 }
  0x33   : > { %s4132_s29 = smov (%p41_p1, %s39_s29), 0  ;;  %p3981_p8 = scmp.eq.s32.totalorder %s2331_s21, 1 }
  0x34   : > { %3980 = sst [smem:[#allocation16_spill]] %s4132_s29  ;;  %p57_p6 = por %p56_p4, %p55_p2 }
  0x35   : > { %p2391_p10 = por %p3981_p8, %p55_p2  ;;  %s43_s28 = ssub.s32 %s2259_s19, %s4132_s29 }
  0x36   : > { %p1772_p12 = scmp.lt.s32.totalorder %s2263_s20, 2  ;;  %p46_p13 = scmp.eq.s32.totalorder %s43_s28, 0 }
  0x37   : > { %s3982_s30 = scalar_select %p2391_p10, 1, 0 }
  0x38   : > { %s2399_s5 = sand.u32 1, %s2251_s17   ;;  %s1738_s7 = smul.u32 6144, %s2259_s19 }
  0x39   : > { %s1737_s27 = smul.u32 384, %s2399_s5  ;;  %p2406_p11 = pnand %p1772_p12, %p57_p6 }
  0x3a   : > { %s2403_s6 = scalar_select %p46_p13, %s2251_s17, %s48_s26  }
  0x3b   : > { %s213_s8 = scalar_lea.vmem [#allocation2], %s1737_s27  ;;  %s3985_s0 = sld [smem:[#allocation53_spill]] }
  0x3c   : > { %3983 = sst [smem:[#allocation17_spill]] %s2403_s6  ;;  %s222_s9 = sshll.u32 %s213_s8, 4  ;;  %s2415_s9 = int_to_ptr.vmem [resolvable:$true] %s222_s9 }
  0x3d   : > { %s210_s28 = scalar_lea.sflag [#allocation3], %s2399_s5  ;;  %p2083_p3 = pneg %p2406_p11 }
  0x41   : > { %s2413_s22 = scalar_lea.hbm %s3985_s0, %s1738_s7  ;;  %s2086_s7 = scalar_lea.hbm %s3985_s0, 12288 }
  0x42   : > { %s2081_s27 = scalar_lea.hbm %s2413_s22, 6144  ;;  %p2087_p9 = scmp.lt.u32.totalorder %s2413_s22, %s3985_s0 }
  0x43   : > { %p2082_p0 = scmp.ne.s32.totalorder %s2413_s22, %s2081_s27  ;;  %p2088_p1 = scmp.lt.u32.totalorder %s2086_s7, %s2081_s27 }
  0x44   : > { %p2090_p4 = scmp.lt.u32.totalorder %s2081_s27, %s2413_s22 }
  0x45   : > { %p2084_p5 = pnand %p2083_p3, %p2082_p0  ;;  %p2089_p2 = por %p2088_p1, %p2087_p9 }
  0x47   : > { %p2085_p7 = pneg %p2084_p5  ;;  %p2091_p6 = por %p2090_p4, %p2089_p2 }
  0x49   : > { %p2092_p8 = pnand %p2091_p6, %p2085_p7 }
  0x4b   : > { %2095 = shalt.err (!%p2092_p8)
}
  0x4c   : > { %s2096_s26 = scalar_lea.vmem %s2415_s9, 6144  ;;  %s2268_s8 = smov [#allocation2]  }
  0x4d   : > { %p2097_p12 = scmp.ne.s32.totalorder %s2415_s9, %s2096_s26  ;;  %s2101_s11 = sshll.u32 %s2268_s8, 4  ;;  %s2102_s11 = int_to_ptr.vmem [resolvable:$false] %s2101_s11 }
  0x4e   : > { %s2103_s12 = scalar_lea.vmem %s2102_s11, 12288  ;;  %p2104_p5 = scmp.lt.s32.totalorder %s2415_s9, %s2102_s11 }
  0x4f   : > { %p2099_p13 = pnand %p2097_p12, %p2083_p3  ;;  %p2105_p9 = scmp.lt.s32.totalorder %s2103_s12, %s2096_s26 }
  0x51   : > { %p2100_p0 = pneg %p2099_p13  ;;  %p2106_p1 = por %p2105_p9, %p2104_p5 }
  0x53   : > { %p2107_p2 = pnand %p2106_p1, %p2100_p0 }
  0x55   : > { %2110 = shalt.err (!%p2107_p2)
}
  0x56   : > { %s3986_s27 = smov 128   ;;  %s1637_s7 = sshll.u32 %s2399_s5, 2 }
  0x57   : > { %1760 = dma.hbm_to_vmem [thread:$0]  (!%p2406_p11), %s2413_s22, 6144, %s2415_s9, %s210_s28, %s3986_s27, %s3986_s27, %s2267_s13  }
  0x58   : > { %s1733_s14 = sshll.u32 %s2259_s19, 6  ;;  %s236_s12 = scalar_lea.vmem [#allocation5], %s1637_s7 }
  0x59   : > { %s2454_s11 = scalar_lea.hbm %s3950_s1, %s1733_s14  ;;  %s244_s0 = sshll.u32 %s236_s12, 4  ;;  %s245_s0 = int_to_ptr.vmem [resolvable:$true] %s244_s0 }
  0x5a   : > { %s3987_s2 = sand.u32 1, %s2263_s20   ;;  %s2111_s6 = scalar_lea.hbm %s2454_s11, 64 }
  0x5b   : > { %s233_s29 = scalar_lea.sflag [#allocation6], %s3987_s2  ;;  %p2112_p7 = scmp.ne.s32.totalorder %s2454_s11, %s2111_s6 }
  0x5c   : > { %s2116_s9 = scalar_lea.hbm %s3950_s1, 128  ;;  %p2117_p8 = scmp.lt.u32.totalorder %s2454_s11, %s3950_s1 }
  0x5d   : > { %p2114_p4 = pnand %p2112_p7, %p2083_p3  ;;  %p2118_p12 = scmp.lt.u32.totalorder %s2116_s9, %s2111_s6 }
  0x5e   : > { %p2120_p0 = scmp.lt.u32.totalorder %s2111_s6, %s2454_s11 }
  0x5f   : > { %p2115_p6 = pneg %p2114_p4  ;;  %p2119_p13 = por %p2118_p12, %p2117_p8 }
  0x61   : > { %p2121_p5 = por %p2120_p0, %p2119_p13 }
  0x63   : > { %p2122_p9 = pnand %p2121_p5, %p2115_p6 }
  0x65   : > { %2125 = shalt.err (!%p2122_p9)
}
  0x66   : > { %s2126_s2 = scalar_lea.vmem %s245_s0, 64  ;;  %s2269_s27 = smov [#allocation5]  }
  0x67   : > { %p2127_p1 = scmp.ne.s32.totalorder %s245_s0, %s2126_s2  ;;  %s2131_s7 = sshll.u32 %s2269_s27, 4  ;;  %s2132_s7 = int_to_ptr.vmem [resolvable:$false] %s2131_s7 }
  0x68   : > { %s2133_s14 = scalar_lea.vmem %s2132_s7, 128  ;;  %p2134_p4 = scmp.lt.s32.totalorder %s245_s0, %s2132_s7 }
  0x69   : > { %p2129_p2 = pnand %p2127_p1, %p2083_p3  ;;  %p2135_p10 = scmp.lt.s32.totalorder %s2133_s14, %s2126_s2 }
  0x6b   : > { %p2130_p7 = pneg %p2129_p2  ;;  %p2136_p8 = por %p2135_p10, %p2134_p4 }
  0x6d   : > { %p2137_p12 = pnand %p2136_p8, %p2130_p7 }
  0x6f   : > { %2140 = shalt.err (!%p2137_p12)
}
  0x70   : > { %1763 = dma.hbm_to_vmem [thread:$0]  (!%p2406_p11), %s2454_s11, 64, %s245_s0, %s233_s29  }
  0x71   : > { %p3988_p6 = scmp.ne.s32.totalorder %s3977_s25, 0 }
  0x73   : > { %253 = sbr.rel (%p3988_p6) target bundleno = 466 (0x1d2), region = 32 }
  0x7a   : > { %s2480_s6 = sand.u32 1, %s2247_s16   ;;  %p3989_p10 = scmp.ne.s32.totalorder %s3975_s23, 0 }
  0x7b   : > { %s1739_s26 = smul.u32 384, %s2480_s6  ;;  %s256_s8 = scalar_lea.sflag [#allocation3], %s2480_s6 }
  0x7d   : > { %s2486_s12 = scalar_lea.vmem [#allocation2], %s1739_s26 }
  0x7e   : > { %2222 = dma.done.wait (%p3989_p10), %s256_s8, 6144  }
  0x7f   : > { %2224 = vsyncadd (%p3989_p10), %s256_s8, 4294961152  ;;  %s264_s0 = sand.u32 1, %s2331_s21   ;;  %s1641_s25 = sshll.u32 %s2480_s6, 2 }
  0x80   : > { %s265_s29 = scalar_lea.sflag [#allocation6], %s264_s0  ;;  %s268_s10 = scalar_lea.vmem [#allocation5], %s1641_s25 }
  0x81   : > { %2226 = dma.done.wait (%p3989_p10), %s265_s29, 64  }
  0x82   : > { %2228 = vsyncadd (%p3989_p10), %s265_s29, 4294967232  ;;  %p3990_p11 = scmp.eq.s32.totalorder %s2331_s21, 0 }
  0x84   : > { %2230 = dma.done.wait (%p3990_p11), [#allocation6], 2048   ;;  %p3991_p3 = pmov %p3990_p11 }
  0x85   : > { %v2270_v0 = vmov 0.0   ;;  %v1676_v1 = vld.sshfl [vmem:[%s268_s10] sm:$0x33 pattern:$0x76325410]  ;;  %vm532_vm0 = vcmask 1041408  }
  0x86   : > { %2232 = vsyncadd (%p3991_p3), [#allocation6], 4294965248  ;;  %601 = vmatprep.mubr.f32.mxu0 %v2270_v0  ;;  %649 = vmatprep.mubr.f32.mxu1 %v2270_v0  ;;  %v482_v2 = vcombine.high %v1676_v1, %v1676_v1  ;;  %v457_v3 = vld [vmem:[#allocation7] sm:$0xff]  ;;  %vm483_vm1 = vcmask 15360   ;;  %v458_v5 = vld [vmem:[#allocation7 + $0x8] sm:$0xff]  ;;  %s1643_s21 = sshll.u32 %s2480_s6, 7 }
  0x87   : > { %v465_v4 = vld [vmem:[#allocation7 + $0x40] sm:$0xff]  ;;  %v2505_v6 = vld [vmem:[%s2486_s12] sm:$0xff]  ;;  %v466_v7 = vld [vmem:[#allocation7 + $0x48] sm:$0xff]  ;;  %s2523_s23 = scalar_lea.vmem [#allocation9], %s1643_s21  ;;  %s1734_s11 = sshll.u32 %s2255_s18, 11 }
  0x88   : > { %1677 = vmatprep.subr.msk.mxu0 %vm532_vm0, %v482_v2  ;;  %1735 = vmatprep.subr.msk.mxu1 %vm532_vm0, %v482_v2  ;;  %v2508_v8 = vld [vmem:[%s2486_s12 + $0x80] sm:$0xff]  ;;  %v361_v10 = vmul.f32 0.2126, %v2505_v6  ;;  %v459_v14 = vld [vmem:[#allocation7 + $0x10] sm:$0xff]  ;;  %v461_v19 = vld [vmem:[#allocation7 + $0x20] sm:$0xff]  ;;  %s1475_s13 = sshll.u32 %s2523_s23, 4  ;;  %s3364_s22 = scalar_lea.hbm %s3953_s4, %s1734_s11  ;;  %s3366_s13 = int_to_ptr.vmem [resolvable:$true] %s1475_s13 }
  0x89   : > { %1678 = vmatpush1.msk.msra.mxu0 %vm532_vm0, %v1676_v1  ;;  %1736 = vmatpush1.msk.msra.mxu1 %vm532_vm0, %v1676_v1  ;;  %v2511_v9 = vld [vmem:[%s2486_s12 + $0x100] sm:$0xff]  ;;  %v377_v11 = vmul.f32 0.7152, %v2508_v8  ;;  %v467_v15 = vld [vmem:[#allocation7 + $0x50] sm:$0xff]  ;;  %v469_v20 = vld [vmem:[#allocation7 + $0x60] sm:$0xff]  ;;  %s1442_s28 = scalar_lea.sflag [#allocation10], %s2480_s6 }
  0x8a   : > { %1679 = vmatmul.mubr.msk.f32.vlgmr.msra.gmra.mrb[0].mxu0 %vm483_vm1, %v457_v3  ;;  %1687 = vmatmul.mubr.msk.f32.vlgmr.msra.gmra.mrb[0].mxu1 %vm483_vm1, %v465_v4  ;;  %v409_v12 = vmul.f32 0.0722, %v2511_v9  ;;  %v460_v17 = vld [vmem:[#allocation7 + $0x18] sm:$0xff]  ;;  %v462_v21 = vld [vmem:[#allocation7 + $0x28] sm:$0xff]  ;;  %v463_v23 = vld [vmem:[#allocation7 + $0x30] sm:$0xff]  ;;  %s2141_s2 = scalar_lea.vmem %s3366_s13, 2048 }
  0x8b   : > { %607 = vmatprep.mubr.f32.mxu0 %v2270_v0  ;;  %655 = vmatprep.mubr.f32.mxu1 %v2270_v0  ;;  %v393_v13 = vadd.f32 %v377_v11, %v361_v10  ;;  %v468_v18 = vld [vmem:[#allocation7 + $0x58] sm:$0xff]  ;;  %v470_v22 = vld [vmem:[#allocation7 + $0x68] sm:$0xff]  ;;  %v471_v24 = vld [vmem:[#allocation7 + $0x70] sm:$0xff]  ;;  %p2142_p13 = scmp.ne.s32.totalorder %s3366_s13, %s2141_s2  ;;  %p4044_p0 = scmp.ne.s32.totalorder %s3982_s30, 0 }
  0x8c   : > { %v464_v25 = vld [vmem:[#allocation7 + $0x38] sm:$0xff]  ;;  %v2552_v35 = vld [vmem:[%s2486_s12 + $0x8] sm:$0xff]  ;;  %v2578_v48 = vld [vmem:[%s2486_s12 + $0x10] sm:$0xff]  ;;  %s2271_s27 = smov [#allocation9]  }
  0x8d   : > { %v2519_v16 = vadd.f32 %v409_v12, %v393_v13  ;;  %v472_v26 = vld [vmem:[#allocation7 + $0x78] sm:$0xff]  ;;  %v2555_v36 = vld [vmem:[%s2486_s12 + $0x88] sm:$0xff]  ;;  %v362_v38 = vmul.f32 0.2126, %v2552_v35  ;;  %v2581_v49 = vld [vmem:[%s2486_s12 + $0x90] sm:$0xff]  ;;  %p2143_p5 = pnand %p2142_p13, %p4044_p0  ;;  %s2145_s7 = sshll.u32 %s2271_s27, 4  ;;  %s2146_s7 = int_to_ptr.vmem [resolvable:$false] %s2145_s7 }
  0x8e   : > { %1680 = vmatmul.mubr.msk.f32.gmra.mrb[2].mxu0 %vm483_vm1, %v458_v5  ;;  %1688 = vmatmul.mubr.msk.f32.gmra.mrb[2].mxu1 %vm483_vm1, %v466_v7  ;;  %v2538_v27 = vld [vmem:[%s2486_s12 + $0x40] sm:$0xff]  ;;  %v2558_v37 = vld [vmem:[%s2486_s12 + $0x48] sm:$0xff]  ;;  %v378_v39 = vmul.f32 0.7152, %v2555_v36  ;;  %v2584_v50 = vld [vmem:[%s2486_s12 + $0x50] sm:$0xff]  ;;  %s2147_s14 = scalar_lea.vmem %s2146_s7, 4096  ;;  %p2148_p1 = scmp.lt.s32.totalorder %s3366_s13, %s2146_s7 }
  0x8f   : > { %613 = vmatprep.mubr.f32.mxu0 %v2270_v0  ;;  %661 = vmatprep.mubr.f32.mxu1 %v2270_v0  ;;  %441 = vst [vmem:[%s2523_s23] sm:$0xff] %v2519_v16  ;;  %v2541_v28 = vld [vmem:[%s2486_s12 + $0xc0] sm:$0xff]  ;;  %v369_v29 = vmul.f32 0.2126, %v2538_v27  ;;  %v2563_v40 = vld [vmem:[%s2486_s12 + $0xc8] sm:$0xff]  ;;  %v370_v45 = vmul.f32 0.2126, %v2558_v37  ;;  %p2144_p9 = pneg %p2143_p5  ;;  %p2149_p2 = scmp.lt.s32.totalorder %s2147_s14, %s2141_s2 }
  0x90   : > { %v385_v30 = vmul.f32 0.7152, %v2541_v28  ;;  %v2546_v31 = vld [vmem:[%s2486_s12 + $0x140] sm:$0xff]  ;;  %v2568_v41 = vld [vmem:[%s2486_s12 + $0x108] sm:$0xff]  ;;  %v394_v43 = vadd.f32 %v378_v39, %v362_v38  ;;  %v386_v46 = vmul.f32 0.7152, %v2563_v40 }
  0x91   : > { %v417_v33 = vmul.f32 0.0722, %v2546_v31  ;;  %v2571_v42 = vld [vmem:[%s2486_s12 + $0x148] sm:$0xff]  ;;  %v410_v44 = vmul.f32 0.0722, %v2568_v41  ;;  %v2591_v55 = vld [vmem:[%s2486_s12 + $0xd0] sm:$0xff]  ;;  %p2150_p7 = por %p2149_p2, %p2148_p1 }
  0x92   : > { %1681 = vmatmul.mubr.msk.f32.gmra.mrb[4].mxu0 %vm483_vm1, %v459_v14  ;;  %1689 = vmatmul.mubr.msk.f32.gmra.mrb[4].mxu1 %vm483_vm1, %v467_v15  ;;  %v401_v32 = vadd.f32 %v385_v30, %v369_v29  ;;  %v418_v47 = vmul.f32 0.0722, %v2571_v42  ;;  %v402_v52 = vadd.f32 %v386_v46, %v370_v45  ;;  %v363_v53 = vmul.f32 0.2126, %v2578_v48  ;;  %v2594_v56 = vld [vmem:[%s2486_s12 + $0x110] sm:$0xff]  ;;  %v2608_v1 = vld [vmem:[%s2486_s12 + $0x18] sm:$0xff] }
  0x93   : > { %619 = vmatprep.mubr.f32.mxu0 %v2270_v0  ;;  %667 = vmatprep.mubr.f32.mxu1 %v2270_v0  ;;  %v2586_v51 = vadd.f32 %v410_v44, %v394_v43  ;;  %v379_v54 = vmul.f32 0.7152, %v2581_v49  ;;  %v2597_v57 = vld [vmem:[%s2486_s12 + $0x150] sm:$0xff]  ;;  %v371_v58 = vmul.f32 0.2126, %v2584_v50  ;;  %v2611_v2 = vld [vmem:[%s2486_s12 + $0x98] sm:$0xff]  ;;  %p2151_p4 = pnand %p2150_p7, %p2144_p9 }
  0x94   : > { %v2549_v34 = vadd.f32 %v417_v33, %v401_v32  ;;  %v387_v59 = vmul.f32 0.7152, %v2591_v55  ;;  %v2603_v60 = vadd.f32 %v418_v47, %v402_v52  ;;  %v411_v62 = vmul.f32 0.0722, %v2594_v56  ;;  %v2614_v3 = vld [vmem:[%s2486_s12 + $0x58] sm:$0xff]  ;;  %v2655_v29 = vld [vmem:[%s2486_s12 + $0x60] sm:$0xff] }
  0x95   : > { %442 = vst [vmem:[%s2523_s23 + $0x8] sm:$0xff] %v2586_v51  ;;  %v395_v61 = vadd.f32 %v379_v54, %v363_v53  ;;  %v364_v5 = vmul.f32 0.2126, %v2608_v1  ;;  %v380_v7 = vmul.f32 0.7152, %v2611_v2  ;;  %v2625_v11 = vld [vmem:[%s2486_s12 + $0x118] sm:$0xff] }
  0x96   : > { %1682 = vmatmul.mubr.msk.f32.gmra.mrb[6].mxu0 %vm483_vm1, %v460_v17  ;;  %1690 = vmatmul.mubr.msk.f32.gmra.mrb[6].mxu1 %vm483_vm1, %v468_v18  ;;  %449 = vst [vmem:[%s2523_s23 + $0x40] sm:$0xff] %v2549_v34  ;;  %v403_v63 = vadd.f32 %v387_v59, %v371_v58  ;;  %450 = vst [vmem:[%s2523_s23 + $0x48] sm:$0xff] %v2603_v60  ;;  %v2628_v12 = vld [vmem:[%s2486_s12 + $0xd8] sm:$0xff]  ;;  %v372_v14 = vmul.f32 0.2126, %v2614_v3  ;;  %v2658_v30 = vld [vmem:[%s2486_s12 + $0xe0] sm:$0xff]  ;;  %1829 = vrcp.f32 %v2549_v34 }
  0x97   : > { %625 = vmatprep.mubr.f32.mxu0 %v2270_v0  ;;  %673 = vmatprep.mubr.f32.mxu1 %v2270_v0  ;;  %v2618_v4 = vadd.f32 %v411_v62, %v395_v61  ;;  %v2631_v13 = vld [vmem:[%s2486_s12 + $0x158] sm:$0xff]  ;;  %v396_v15 = vadd.f32 %v380_v7, %v364_v5  ;;  %v412_v17 = vmul.f32 0.0722, %v2625_v11  ;;  %v388_v18 = vmul.f32 0.7152, %v2628_v12  ;;  %v2666_v39 = vld [vmem:[%s2486_s12 + $0x160] sm:$0xff] }
  0x98   : > { %v373_v43 = vmul.f32 0.2126, %v2655_v29  ;;  %v389_v44 = vmul.f32 0.7152, %v2658_v30  ;;  %v421_v46 = vmul.f32 0.0722, %v2666_v39  ;;  %1831 = vrcp.f32 %v2586_v51 }
  0x99   : > { %443 = vst [vmem:[%s2523_s23 + $0x10] sm:$0xff] %v2618_v4  ;;  %v2680_v53 = vld [vmem:[%s2486_s12 + $0x28] sm:$0xff]  ;;  %1833 = vrcp.f32 %v2603_v60 }
  0x9a   : > { %1683 = vmatmul.mubr.msk.f32.gmra.mrb[8].mxu0 %vm483_vm1, %v461_v19  ;;  %1691 = vmatmul.mubr.msk.f32.gmra.mrb[8].mxu1 %vm483_vm1, %v469_v20  ;;  %v420_v19 = vmul.f32 0.0722, %v2631_v13  ;;  %v2642_v20 = vld [vmem:[%s2486_s12 + $0x20] sm:$0xff]  ;;  %v405_v47 = vadd.f32 %v389_v44, %v373_v43  ;;  %v2683_v54 = vld [vmem:[%s2486_s12 + $0xa8] sm:$0xff]  ;;  %v366_v59 = vmul.f32 0.2126, %v2680_v53  ;;  %1835 = vrcp.f32 %v2618_v4 }
  0x9b   : > { %631 = vmatprep.mubr.f32.mxu0 %v2270_v0  ;;  %679 = vmatprep.mubr.f32.mxu1 %v2270_v0  ;;  %v2686_v58 = vld [vmem:[%s2486_s12 + $0x68] sm:$0xff]  ;;  %v382_v61 = vmul.f32 0.7152, %v2683_v54  ;;  %v2725_v43 = vld [vmem:[%s2486_s12 + $0xf0] sm:$0xff] }
  0x9c   : > { %v2677_v52 = vadd.f32 %v421_v46, %v405_v47  ;;  %v2691_v62 = vld [vmem:[%s2486_s12 + $0xe8] sm:$0xff]  ;;  %3995 = vst [vmem:[#allocation21_spill] sm:$0xff] %v2725_v43  ;;  %v2728_v44 = vld [vmem:[%s2486_s12 + $0x130] sm:$0xff] }
  0x9d   : > { %v398_v5 = vadd.f32 %v382_v61, %v366_v59  ;;  %3996 = vst [vmem:[#allocation22_spill] sm:$0xff] %v2728_v44  ;;  %v2732_v47 = vld [vmem:[%s2486_s12 + $0x170] sm:$0xff]  ;;  %v415_v61 = vmul.f32 0.0722, %v2728_v44 }
  0x9e   : > { %1684 = vmatmul.mubr.msk.f32.gmra.mrb[10].mxu0 %vm483_vm1, %v462_v21  ;;  %1692 = vmatmul.mubr.msk.f32.gmra.mrb[10].mxu1 %vm483_vm1, %v470_v22  ;;  %v2645_v21 = vld [vmem:[%s2486_s12 + $0xa0] sm:$0xff]  ;;  %v2647_v22 = vadd.f32 %v412_v17, %v396_v15  ;;  %453 = vst [vmem:[%s2523_s23 + $0x60] sm:$0xff] %v2677_v52  ;;  %v390_v15 = vmul.f32 0.7152, %v2691_v62  ;;  %3997 = vst [vmem:[#allocation23_spill] sm:$0xff] %v2732_v47 }
  0x9f   : > { %637 = vmatprep.mubr.f32.mxu0 %v2270_v0  ;;  %685 = vmatprep.mubr.f32.mxu1 %v2270_v0 }
  0xa0   : > { %444 = vst [vmem:[%s2523_s23 + $0x18] sm:$0xff] %v2647_v22 }
  0xa2   : > { %1685 = vmatmul.mubr.msk.f32.gmra.mrb[12].mxu0 %vm483_vm1, %v463_v23  ;;  %1693 = vmatmul.mubr.msk.f32.gmra.mrb[12].mxu1 %vm483_vm1, %v471_v24  ;;  %v404_v23 = vadd.f32 %v388_v18, %v372_v14  ;;  %v365_v24 = vmul.f32 0.2126, %v2642_v20  ;;  %v374_v14 = vmul.f32 0.2126, %v2686_v58 }
  0xa3   : > { %643 = vmatprep.mubr.f32.mxu0 %v2270_v0  ;;  %691 = vmatprep.mubr.f32.mxu1 %v2270_v0  ;;  %v419_v0 = vmul.f32 0.0722, %v2597_v57 }
  0xa4   : > { %v2662_v32 = vadd.f32 %v420_v19, %v404_v23  ;;  %v406_v19 = vadd.f32 %v390_v15, %v374_v14  ;;  %v2710_v23 = vld [vmem:[%s2486_s12 + $0x30] sm:$0xff]  ;;  %v423_v14 = vmul.f32 0.0722, %v2732_v47 }
  0xa5   : > { %v2622_v10 = vadd.f32 %v419_v0, %v403_v63  ;;  %v2697_v63 = vld [vmem:[%s2486_s12 + $0x128] sm:$0xff]  ;;  %3992 = vst [vmem:[#allocation18_spill] sm:$0xff] %v2710_v23 }
  0xa6   : > { %1686 = vmatmul.mubr.msk.f32.gmra.mrb[14].mxu0 %vm483_vm1, %v464_v25  ;;  %1694 = vmatmul.mubr.msk.f32.gmra.mrb[14].mxu1 %vm483_vm1, %v472_v26  ;;  %v381_v25 = vmul.f32 0.7152, %v2645_v21  ;;  %v2652_v26 = vld [vmem:[%s2486_s12 + $0x120] sm:$0xff]  ;;  %452 = vst [vmem:[%s2523_s23 + $0x58] sm:$0xff] %v2662_v32  ;;  %v2700_v0 = vld [vmem:[%s2486_s12 + $0x168] sm:$0xff] }
  0xa7   : > { %451 = vst [vmem:[%s2523_s23 + $0x50] sm:$0xff] %v2622_v10  ;;  %v413_v38 = vmul.f32 0.0722, %v2652_v26  ;;  %v414_v7 = vmul.f32 0.0722, %v2697_v63  ;;  %1837 = vrcp.f32 %v2622_v10 }
  0xa8   : > { %v397_v33 = vadd.f32 %v381_v25, %v365_v24  ;;  %v422_v17 = vmul.f32 0.0722, %v2700_v0  ;;  %v2713_v24 = vld [vmem:[%s2486_s12 + $0xb0] sm:$0xff]  ;;  %1839 = vrcp.f32 %v2519_v16 }
  0xa9   : > { %v2706_v18 = vadd.f32 %v414_v7, %v398_v5  ;;  %3993 = vst [vmem:[#allocation19_spill] sm:$0xff] %v2713_v24  ;;  %v2716_v25 = vld [vmem:[%s2486_s12 + $0x70] sm:$0xff]  ;;  %v383_v46 = vmul.f32 0.7152, %v2713_v24  ;;  %v391_v5 = vmul.f32 0.7152, %v2725_v43  ;;  %1841 = vrcp.f32 %v2647_v22 }
  0xaa   : > { %v2672_v45 = vadd.f32 %v413_v38, %v397_v33  ;;  %3994 = vst [vmem:[#allocation20_spill] sm:$0xff] %v2716_v25  ;;  %v2721_v33 = vadd.f32 %v422_v17, %v406_v19  ;;  %v367_v38 = vmul.f32 0.2126, %v2710_v23  ;;  %v375_v59 = vmul.f32 0.2126, %v2716_v25  ;;  %v1830_v17 = vpop.eup %1829 }
  0xab   : > { %446 = vst [vmem:[%s2523_s23 + $0x28] sm:$0xff] %v2706_v18  ;;  %v914_v25 = vmul.f32 %v1830_v17, %v2538_v27  ;;  %v1090_v44 = vmul.f32 %v1830_v17, %v2541_v28  ;;  %v1267_v43 = vmul.f32 %v1830_v17, %v2546_v31  ;;  %1843 = vrcp.f32 %v2662_v32 }
  0xac   : > { %445 = vst [vmem:[%s2523_s23 + $0x20] sm:$0xff] %v2672_v45  ;;  %454 = vst [vmem:[%s2523_s23 + $0x68] sm:$0xff] %v2721_v33  ;;  %v399_v7 = vadd.f32 %v383_v46, %v367_v38  ;;  %v407_v15 = vadd.f32 %v391_v5, %v375_v59  ;;  %v1832_v38 = vpop.eup %1831 }
  0xad   : > { %v1834_v46 = vpop.eup %1833  ;;  %v907_v59 = vmul.f32 %v1832_v38, %v2552_v35  ;;  %v1083_v27 = vmul.f32 %v1832_v38, %v2555_v36  ;;  %v1260_v28 = vmul.f32 %v1832_v38, %v2568_v41 }
  0xae   : > { %v2743_v19 = vadd.f32 %v415_v61, %v399_v7  ;;  %v2748_v24 = vadd.f32 %v423_v14, %v407_v15  ;;  %v915_v31 = vmul.f32 %v1834_v46, %v2558_v37  ;;  %v1091_v61 = vmul.f32 %v1834_v46, %v2563_v40  ;;  %v1836_v7 = vpop.eup %1835 }
  0xaf   : > { %v1268_v5 = vmul.f32 %v1834_v46, %v2571_v42  ;;  %v908_v15 = vmul.f32 %v1836_v7, %v2578_v48  ;;  %v1084_v17 = vmul.f32 %v1836_v7, %v2581_v49  ;;  %v1261_v47 = vmul.f32 %v1836_v7, %v2594_v56 }
  0xb0   : > { %447 = vst [vmem:[%s2523_s23 + $0x30] sm:$0xff] %v2743_v19  ;;  %455 = vst [vmem:[%s2523_s23 + $0x70] sm:$0xff] %v2748_v24 }
  0xb1   : > { %v1838_v14 = vpop.eup %1837 }
  0xb2   : > { %v1840_v23 = vpop.eup %1839  ;;  %v916_v35 = vmul.f32 %v1838_v14, %v2584_v50  ;;  %v1092_v36 = vmul.f32 %v1838_v14, %v2591_v55  ;;  %v1269_v41 = vmul.f32 %v1838_v14, %v2597_v57  ;;  %v2853_v14 = vadd.f32 1e-05, %v1268_v5 }
  0xb3   : > { %v1842_v37 = vpop.eup %1841  ;;  %v906_v40 = vmul.f32 %v1840_v23, %v2505_v6  ;;  %v1082_v49 = vmul.f32 %v1840_v23, %v2508_v8  ;;  %v1259_v57 = vmul.f32 %v1840_v23, %v2511_v9  ;;  %v2796_v8 = vadd.f32 1e-05, %v2519_v16 }
  0xb4   : > { %v909_v42 = vmul.f32 %v1842_v37, %v2608_v1  ;;  %v1085_v46 = vmul.f32 %v1842_v37, %v2611_v2  ;;  %v1262_v48 = vmul.f32 %v1842_v37, %v2625_v11  ;;  %v2787_v2 = vadd.f32 1e-05, %v914_v25 }
  0xb5   : > { %v1844_v38 = vpop.eup %1843  ;;  %v2781_v7 = vadd.f32 1e-05, %v906_v40  ;;  %v2783_v6 = vadd.f32 1e-05, %v1082_v49  ;;  %v2785_v1 = vadd.f32 1e-05, %v1259_v57 }
  0xb6   : > { %v917_v56 = vmul.f32 %v1844_v38, %v2614_v3  ;;  %v2775_v50 = vmul.f32 %v1844_v38, %v2628_v12  ;;  %v2778_v55 = vmul.f32 %v1844_v38, %v2631_v13  ;;  %v2789_v11 = vadd.f32 1e-05, %v1090_v44 }
  0xb7   : > { %1845 = vrsqrt.f32 %v2781_v7  ;;  %v2798_v9 = vadd.f32 1e-05, %v1267_v43  ;;  %v2802_v3 = vadd.f32 1e-05, %v2549_v34  ;;  %v2805_v12 = vadd.f32 1e-05, %v2586_v51 }
  0xb8   : > { %1847 = vrsqrt.f32 %v2783_v6  ;;  %v2807_v13 = vadd.f32 1e-05, %v907_v59  ;;  %v2809_v23 = vadd.f32 1e-05, %v1083_v27  ;;  %v2812_v25 = vadd.f32 1e-05, %v2603_v60 }
  0xb9   : > { %1849 = vrsqrt.f32 %v2785_v1  ;;  %3998 = vst [vmem:[#allocation24_spill] sm:$0xff] %v2802_v3  ;;  %3999 = vst [vmem:[#allocation25_spill] sm:$0xff] %v2805_v12  ;;  %v2815_v16 = vadd.f32 1e-05, %v2618_v4  ;;  %v2817_v43 = vadd.f32 1e-05, %v1260_v28 }
  0xba   : > { %1851 = vrsqrt.f32 %v2787_v2  ;;  %4000 = vst [vmem:[#allocation26_spill] sm:$0xff] %v2812_v25  ;;  %v2820_v44 = vadd.f32 1e-05, %v2622_v10  ;;  %v2823_v34 = vadd.f32 1e-05, %v2647_v22  ;;  %v2832_v60 = vld [vmem:[%s2486_s12 + $0x38] sm:$0xff] }
  0xbb   : > { %1853 = vrsqrt.f32 %v2789_v11  ;;  %4001 = vst [vmem:[#allocation27_spill] sm:$0xff] %v2815_v16  ;;  %v2826_v51 = vadd.f32 1e-05, %v915_v31  ;;  %v2829_v59 = vadd.f32 1e-05, %v2662_v32  ;;  %4005 = vst [vmem:[#allocation31_spill] sm:$0xff] %v2832_v60 }
  0xbc   : > { %4002 = vst [vmem:[#allocation28_spill] sm:$0xff] %v2820_v44  ;;  %4003 = vst [vmem:[#allocation29_spill] sm:$0xff] %v2823_v34  ;;  %1855 = vrsqrt.f32 %v2798_v9  ;;  %v2834_v27 = vadd.f32 1e-05, %v1091_v61  ;;  %v2838_v4 = vadd.f32 1e-05, %v2672_v45 }
  0xbd   : > { %4004 = vst [vmem:[#allocation30_spill] sm:$0xff] %v2829_v59  ;;  %1857 = vrsqrt.f32 %v2807_v13  ;;  %v2841_v10 = vadd.f32 1e-05, %v2677_v52  ;;  %v2845_v28 = vadd.f32 1e-05, %v2706_v18  ;;  %vm940_vm2 = vcmp.eq.f32.partialorder %v2781_v7, inf }
  0xbe   : > { %4006 = vst [vmem:[#allocation32_spill] sm:$0xff] %v2838_v4  ;;  %1859 = vrsqrt.f32 %v2809_v23  ;;  %v2848_v32 = vadd.f32 1e-05, %v2721_v33  ;;  %v2851_v31 = vadd.f32 1e-05, %v2743_v19  ;;  %vm942_vm3 = vcmp.eq.f32.partialorder %v2781_v7, 0.0 }
  0xbf   : > { %4007 = vst [vmem:[#allocation33_spill] sm:$0xff] %v2841_v10  ;;  %4008 = vst [vmem:[#allocation34_spill] sm:$0xff] %v2845_v28  ;;  %1861 = vrsqrt.f32 %v2817_v43  ;;  %v2857_v37 = vadd.f32 1e-05, %v2748_v24  ;;  %v2860_v38 = vmul.f32 0.2126, %v2832_v60 }
  0xc0   : > { %4009 = vst [vmem:[#allocation35_spill] sm:$0xff] %v2848_v32  ;;  %4010 = vst [vmem:[#allocation36_spill] sm:$0xff] %v2851_v31  ;;  %1863 = vrsqrt.f32 %v2826_v51  ;;  %v2863_v49 = vadd.f32 1e-05, %v908_v15  ;;  %v2865_v57 = vadd.f32 1e-05, %v1084_v17 }
  0xc1   : > { %v1846_v22 = vpop.eup %1845  ;;  %4011 = vst [vmem:[#allocation37_spill] sm:$0xff] %v2857_v37  ;;  %v2867_v32 = vadd.f32 1e-05, %v1261_v47  ;;  %1865 = vrsqrt.f32 %v2834_v27  ;;  %v2870_v5 = vadd.f32 1e-05, %v916_v35  ;;  %vm1116_vm4 = vcmp.eq.f32.partialorder %v2783_v6, inf }
  0xc2   : > { %v1848_v61 = vpop.eup %1847  ;;  %v2872_v28 = vadd.f32 1e-05, %v1092_v36  ;;  %v2874_v37 = vadd.f32 1e-05, %v1269_v41  ;;  %v939_v4 = vmul.f32 %v1846_v22, %v2781_v7  ;;  %v2877_v59 = vadd.f32 1e-05, %v909_v42 }
  0xc3   : > { %v1850_v40 = vpop.eup %1849  ;;  %v2879_v15 = vadd.f32 1e-05, %v1085_v46  ;;  %v2881_v17 = vadd.f32 1e-05, %v1262_v48  ;;  %v1115_v47 = vmul.f32 %v1848_v61, %v2783_v6  ;;  %1867 = vrsqrt.f32 %v2853_v14 }
  0xc4   : > { %v1852_v31 = vpop.eup %1851  ;;  %v2886_v35 = vadd.f32 1e-05, %v917_v56  ;;  %v1292_v36 = vmul.f32 %v1850_v40, %v2785_v1  ;;  %v943_v42 = vand.u32 2147483648, %v2781_v7  ;;  %vm1293_vm5 = vcmp.eq.f32.partialorder %v2785_v1, inf }
  0xc5   : > { %v1854_v10 = vpop.eup %1853  ;;  %v995_v41 = vmul.f32 %v1852_v31, %v2787_v2  ;;  %vm996_vm6 = vcmp.eq.f32.partialorder %v2787_v2, inf  ;;  %v941_v56 = vsel %vm940_vm2, %v2781_v7, %v939_v4  ;;  %vm1118_vm7 = vcmp.eq.f32.partialorder %v2783_v6, 0.0 }
  0xc6   : > { %v1171_v46 = vmul.f32 %v1854_v10, %v2789_v11  ;;  %v1856_v48 = vpop.eup %1855  ;;  %v1119_v22 = vand.u32 2147483648, %v2783_v6  ;;  %vm1172_vm8 = vcmp.eq.f32.partialorder %v2789_v11, inf  ;;  %v1117_v31 = vsel %vm1116_vm4, %v2783_v6, %v1115_v47 }
  0xc7   : > { %v1858_v61 = vpop.eup %1857  ;;  %vm1295_vm9 = vcmp.eq.f32.partialorder %v2785_v1, 0.0  ;;  %v1296_v40 = vand.u32 2147483648, %v2785_v1  ;;  %v999_v34 = vand.u32 2147483648, %v2787_v2  ;;  %v1294_v10 = vsel %vm1293_vm5, %v2785_v1, %v1292_v36 }
  0xc8   : > { %v1860_v44 = vpop.eup %1859  ;;  %v997_v4 = vsel %vm996_vm6, %v2787_v2, %v995_v41  ;;  %vm998_vm10 = vcmp.eq.f32.partialorder %v2787_v2, 0.0  ;;  %v1175_v16 = vand.u32 2147483648, %v2789_v11  ;;  %v1173_v12 = vsel %vm1172_vm8, %v2789_v11, %v1171_v46 }
  0xc9   : > { %v1862_v25 = vpop.eup %1861  ;;  %vm1174_vm11 = vcmp.eq.f32.partialorder %v2789_v11, 0.0  ;;  %v1348_v47 = vmul.f32 %v1856_v48, %v2798_v9  ;;  %v2912_v60 = vadd.f32 1e-05, %v2775_v50  ;;  %v2916_v36 = vsel %vm942_vm3, %v943_v42, %v941_v56 }
  0xca   : > { %v1864_v3 = vpop.eup %1863  ;;  %v2920_v2 = vsel %vm1118_vm7, %v1119_v22, %v1117_v31  ;;  %vm1349_vm12 = vcmp.eq.f32.partialorder %v2798_v9, inf  ;;  %v946_v41 = vmul.f32 %v1858_v61, %v2807_v13  ;;  %v2926_v11 = vsel %vm1295_vm9, %v1296_v40, %v1294_v10  ;;  %v2950_v61 = vld [vmem:[%s2486_s12 + $0xb8] sm:$0xff] }
  0xcb   : > { %v1866_v46 = vpop.eup %1865  ;;  %v2928_v50 = vsel %vm998_vm10, %v999_v34, %v997_v4  ;;  %vm947_vm13 = vcmp.eq.f32.partialorder %v2807_v13, inf  ;;  %v1122_v7 = vmul.f32 %v1860_v44, %v2809_v23  ;;  %v2932_v42 = vsel %vm1174_vm11, %v1175_v16, %v1173_v12 }
  0xcc   : > { %4012 = vst [vmem:[#allocation38_spill] sm:$0xff] %v2928_v50  ;;  %4013 = vst [vmem:[#allocation39_spill] sm:$0xff] %v2932_v42  ;;  %vm1351_vm14 = vcmp.eq.f32.partialorder %v2798_v9, 0.0  ;;  %v1352_v6 = vand.u32 2147483648, %v2798_v9  ;;  %vm1123_vm15 = vcmp.eq.f32.partialorder %v2809_v23, inf  ;;  %v1350_v1 = vsel %vm1349_vm12, %v2798_v9, %v1348_v47 }
  0xcd   : > { %v1868_v48 = vpop.eup %1867  ;;  %vm949_vm0 = vcmp.eq.f32.partialorder %v2807_v13, 0.0  ;;  %v950_v34 = vand.u32 2147483648, %v2807_v13  ;;  %v1299_v56 = vmul.f32 %v1862_v25, %v2817_v43  ;;  %v948_v44 = vsel %vm947_vm13, %v2807_v13, %v946_v41 }
  0xce   : > { %vm1125_vm1 = vcmp.eq.f32.partialorder %v2809_v23, 0.0  ;;  %v1126_v12 = vand.u32 2147483648, %v2809_v23  ;;  %vm1300_vm2 = vcmp.eq.f32.partialorder %v2817_v43, inf  ;;  %v1124_v16 = vsel %vm1123_vm15, %v2809_v23, %v1122_v7 }
  0xcf   : > { %vm1302_vm3 = vcmp.eq.f32.partialorder %v2817_v43, 0.0  ;;  %v1002_v22 = vmul.f32 %v1864_v3, %v2826_v51  ;;  %1869 = vrsqrt.f32 %v2863_v49  ;;  %v1303_v25 = vand.u32 2147483648, %v2817_v43  ;;  %v2964_v3 = vld [vmem:[%s2486_s12 + $0x138] sm:$0xff] }
  0xd0   : > { %vm1003_vm4 = vcmp.eq.f32.partialorder %v2826_v51, inf  ;;  %v1178_v31 = vmul.f32 %v1866_v46, %v2834_v27  ;;  %1871 = vrsqrt.f32 %v2865_v57  ;;  %v1301_v40 = vsel %vm1300_vm2, %v2817_v43, %v1299_v56 }
  0xd1   : > { %vm1179_vm5 = vcmp.eq.f32.partialorder %v2834_v27, inf  ;;  %v1355_v10 = vmul.f32 %v1868_v48, %v2853_v14  ;;  %1873 = vrsqrt.f32 %v2867_v32  ;;  %vm1005_vm6 = vcmp.eq.f32.partialorder %v2826_v51, 0.0 }
  0xd2   : > { %vm1356_vm7 = vcmp.eq.f32.partialorder %v2853_v14, inf  ;;  %1875 = vrsqrt.f32 %v2870_v5  ;;  %v384_v4 = vmul.f32 0.7152, %v2950_v61  ;;  %v1004_v47 = vsel %vm1003_vm4, %v2826_v51, %v1002_v22 }
  0xd3   : > { %v1006_v41 = vand.u32 2147483648, %v2826_v51  ;;  %vm1181_vm8 = vcmp.eq.f32.partialorder %v2834_v27, 0.0  ;;  %1877 = vrcp.f32 %v2672_v45  ;;  %v1180_v46 = vsel %vm1179_vm5, %v2834_v27, %v1178_v31 }
  0xd4   : > { %v1182_v7 = vand.u32 2147483648, %v2834_v27  ;;  %v1359_v48 = vand.u32 2147483648, %v2853_v14  ;;  %v400_v56 = vadd.f32 %v384_v4, %v2860_v38  ;;  %v1357_v42 = vsel %vm1356_vm7, %v2853_v14, %v1355_v10 }
  0xd5   : > { %vm1358_vm9 = vcmp.eq.f32.partialorder %v2853_v14, 0.0  ;;  %1879 = vrsqrt.f32 %v2872_v28  ;;  %v416_v22 = vmul.f32 0.0722, %v2964_v3  ;;  %v2981_v50 = vsel %vm1351_vm14, %v1352_v6, %v1350_v1 }
  0xd6   : > { %v2985_v45 = vsel %vm949_vm0, %v950_v34, %v948_v44  ;;  %v2989_v38 = vsel %vm1125_vm1, %v1126_v12, %v1124_v16  ;;  %1881 = vrsqrt.f32 %v2874_v37  ;;  %v2994_v14 = vsel %vm1302_vm3, %v1303_v25, %v1301_v40 }
  0xd7   : > { %v2998_v9 = vsel %vm1005_vm6, %v1006_v41, %v1004_v47  ;;  %1883 = vrcp.f32 %v2677_v52  ;;  %v3001_v13 = vadd.f32 %v416_v22, %v400_v56  ;;  %v3005_v23 = vsel %vm1181_vm8, %v1182_v7, %v1180_v46 }
  0xd8   : > { %v3007_v6 = vsel %vm1358_vm9, %v1359_v48, %v1357_v42  ;;  %vm954_vm10 = vcmp.eq.f32.partialorder %v2863_v49, inf  ;;  %1885 = vrsqrt.f32 %v2877_v59  ;;  %vm956_vm11 = vcmp.eq.f32.partialorder %v2863_v49, 0.0 }
  0xd9   : > { %v1870_v43 = vpop.eup %1869  ;;  %v957_v51 = vand.u32 2147483648, %v2863_v49  ;;  %v3014_v1 = vadd.f32 1e-05, %v2778_v55  ;;  %1887 = vrsqrt.f32 %v2879_v15  ;;  %448 = vst [vmem:[%s2523_s23 + $0x38] sm:$0xff] %v3001_v13  ;;  %vm1130_vm12 = vcmp.eq.f32.partialorder %v2865_v57, inf }
  0xda   : > { %v1872_v52 = vpop.eup %1871  ;;  %vm1132_vm13 = vcmp.eq.f32.partialorder %v2865_v57, 0.0  ;;  %v1133_v27 = vand.u32 2147483648, %v2865_v57  ;;  %1889 = vrsqrt.f32 %v2881_v17  ;;  %vm1307_vm14 = vcmp.eq.f32.partialorder %v2867_v32, inf }
  0xdb   : > { %v1874_v42 = vpop.eup %1873  ;;  %vm1309_vm15 = vcmp.eq.f32.partialorder %v2867_v32, 0.0  ;;  %v1310_v55 = vand.u32 2147483648, %v2867_v32  ;;  %1891 = vrsqrt.f32 %v2886_v35  ;;  %v953_v44 = vmul.f32 %v1870_v43, %v2863_v49 }
  0xdc   : > { %v1876_v34 = vpop.eup %1875  ;;  %vm1010_vm0 = vcmp.eq.f32.partialorder %v2870_v5, inf  ;;  %vm1012_vm1 = vcmp.eq.f32.partialorder %v2870_v5, 0.0  ;;  %1893 = vrsqrt.f32 %v2912_v60  ;;  %v1013_v16 = vand.u32 2147483648, %v2870_v5 }
  0xdd   : > { %v1878_v12 = vpop.eup %1877  ;;  %vm1186_vm2 = vcmp.eq.f32.partialorder %v2872_v28, inf  ;;  %v1189_v25 = vand.u32 2147483648, %v2872_v28  ;;  %1895 = vrsqrt.f32 %v3014_v1  ;;  %v1129_v31 = vmul.f32 %v1872_v52, %v2865_v57 }
  0xde   : > { %vm1363_vm3 = vcmp.eq.f32.partialorder %v2874_v37, inf  ;;  %v1366_v40 = vand.u32 2147483648, %v2874_v37  ;;  %1897 = vrcp.f32 %v2706_v18  ;;  %v1306_v4 = vmul.f32 %v1874_v42, %v2867_v32 }
  0xdf   : > { %v1880_v10 = vpop.eup %1879  ;;  %vm961_vm4 = vcmp.eq.f32.partialorder %v2877_v59, inf  ;;  %v964_v47 = vand.u32 2147483648, %v2877_v59  ;;  %vm1137_vm5 = vcmp.eq.f32.partialorder %v2879_v15, inf  ;;  %v955_v46 = vsel %vm954_vm10, %v2863_v49, %v953_v44 }
  0xe0   : > { %v1882_v41 = vpop.eup %1881  ;;  %v1009_v7 = vmul.f32 %v1876_v34, %v2870_v5  ;;  %v1140_v48 = vand.u32 2147483648, %v2879_v15  ;;  %v910_v18 = vmul.f32 %v1878_v12, %v2642_v20  ;;  %vm1188_vm6 = vcmp.eq.f32.partialorder %v2872_v28, 0.0 }
  0xe1   : > { %v1884_v56 = vpop.eup %1883  ;;  %vm1314_vm7 = vcmp.eq.f32.partialorder %v2881_v17, inf  ;;  %v1086_v52 = vmul.f32 %v1878_v12, %v2645_v21  ;;  %v1131_v34 = vsel %vm1130_vm12, %v2865_v57, %v1129_v31  ;;  %v1263_v44 = vmul.f32 %v1878_v12, %v2652_v26 }
  0xe2   : > { %v1886_v42 = vpop.eup %1885  ;;  %1899 = vrcp.f32 %v2721_v33  ;;  %v3064_v43 = vsel %vm956_vm11, %v957_v51, %v955_v46  ;;  %v1308_v21 = vsel %vm1307_vm14, %v2867_v32, %v1306_v4  ;;  %v1185_v31 = vmul.f32 %v1880_v10, %v2872_v28 }
  0xe3   : > { %v1888_v22 = vpop.eup %1887  ;;  %vm963_vm10 = vcmp.eq.f32.partialorder %v2877_v59, 0.0  ;;  %vm1139_vm12 = vcmp.eq.f32.partialorder %v2879_v15, 0.0  ;;  %vm1316_vm9 = vcmp.eq.f32.partialorder %v2881_v17, 0.0  ;;  %vm1193_vm8 = vcmp.eq.f32.partialorder %v2912_v60, inf }
  0xe4   : > { %v1890_v33 = vpop.eup %1889  ;;  %v1011_v49 = vsel %vm1010_vm0, %v2870_v5, %v1009_v7  ;;  %v1362_v51 = vmul.f32 %v1882_v41, %v2874_v37  ;;  %vm1370_vm11 = vcmp.eq.f32.partialorder %v3014_v1, inf  ;;  %v3080_v12 = vadd.f32 1e-05, %v910_v18 }
  0xe5   : > { %v918_v10 = vmul.f32 %v1884_v56, %v2655_v29  ;;  %v1892_v4 = vpop.eup %1891  ;;  %v3085_v46 = vsel %vm1132_vm13, %v1133_v27, %v1131_v34  ;;  %v960_v26 = vmul.f32 %v1886_v42, %v2877_v59  ;;  %vm1019_vm14 = vcmp.eq.f32.partialorder %v2886_v35, 0.0  ;;  %v3122_v42 = vld [vmem:[%s2486_s12 + $0xf8] sm:$0xff] }
  0xe6   : > { %v3089_v20 = vadd.f32 1e-05, %v1086_v52  ;;  %v1094_v41 = vmul.f32 %v1884_v56, %v2658_v30  ;;  %v1894_v7 = vpop.eup %1893  ;;  %v3094_v18 = vsel %vm1309_vm15, %v1310_v55, %v1308_v21  ;;  %v1136_v29 = vmul.f32 %v1888_v22, %v2879_v15  ;;  %v3112_v55 = vld [vmem:[%s2486_s12 + $0x78] sm:$0xff] }
  0xe7   : > { %vm1195_vm13 = vcmp.eq.f32.partialorder %v2912_v60, 0.0  ;;  %v3098_v57 = vadd.f32 1e-05, %v1263_v44  ;;  %1901 = vrcp.f32 %v2743_v19  ;;  %v1896_v27 = vpop.eup %1895  ;;  %v3103_v52 = vsel %vm1012_vm1, %v1013_v16, %v1011_v49 }
  0xe8   : > { %4014 = vst [vmem:[#allocation40_spill] sm:$0xff] %v3103_v52  ;;  %v1187_v30 = vsel %vm1186_vm2, %v2872_v28, %v1185_v31  ;;  %v1313_v32 = vmul.f32 %v1890_v33, %v2881_v17  ;;  %vm1372_vm15 = vcmp.eq.f32.partialorder %v3014_v1, 0.0  ;;  %1903 = vrcp.f32 %v2748_v24  ;;  %v1898_v22 = vpop.eup %1897 }
  0xe9   : > { %v1364_v19 = vsel %vm1363_vm3, %v2874_v37, %v1362_v51  ;;  %v3117_v5 = vadd.f32 1e-05, %v918_v10  ;;  %v1271_v16 = vmul.f32 %v1884_v56, %v2666_v39  ;;  %1905 = vrsqrt.f32 %v3080_v12 }
  0xea   : > { %v962_v34 = vsel %vm961_vm4, %v2877_v59, %v960_v26  ;;  %v1016_v24 = vmul.f32 %v1892_v4, %v2886_v35  ;;  %v3128_v44 = vadd.f32 1e-05, %v1094_v41  ;;  %1907 = vrsqrt.f32 %v3089_v20 }
  0xeb   : > { %v1138_v21 = vsel %vm1137_vm5, %v2879_v15, %v1136_v29  ;;  %v1192_v39 = vmul.f32 %v1894_v7, %v2912_v60  ;;  %1909 = vrsqrt.f32 %v3098_v57  ;;  %v376_v56 = vmul.f32 0.2126, %v3112_v55 }
  0xec   : > { %v1315_v31 = vsel %vm1314_vm7, %v2881_v17, %v1313_v32  ;;  %v1369_v26 = vmul.f32 %v1896_v27, %v3014_v1  ;;  %v911_v33 = vmul.f32 %v1898_v22, %v2680_v53  ;;  %v392_v49 = vmul.f32 0.7152, %v3122_v42  ;;  %v1900_v51 = vpop.eup %1899 }
  0xed   : > { %v3147_v10 = vsel %vm1188_vm6, %v1189_v25, %v1187_v30  ;;  %v3149_v4 = vadd.f32 1e-05, %v1271_v16  ;;  %1911 = vrsqrt.f32 %v3117_v5  ;;  %v1087_v41 = vmul.f32 %v1898_v22, %v2683_v54 }
  0xee   : > { %4015 = vst [vmem:[#allocation41_spill] sm:$0xff] %v3147_v10  ;;  %vm4016_vm0 = vcmp.eq.f32.partialorder %v2874_v37, 0.0  ;;  %vm4018_vm1 = vcmp.eq.f32.partialorder %v2886_v35, inf  ;;  %1913 = vrsqrt.f32 %v3128_v44  ;;  %v1264_v28 = vmul.f32 %v1898_v22, %v2697_v63 }
  0xef   : > { %v3157_v53 = vsel %vm4016_vm0, %v1366_v40, %v1364_v19  ;;  %v1018_v7 = vsel %vm4018_vm1, %v2886_v35, %v1016_v24  ;;  %v3168_v25 = vsel %vm963_vm10, %v964_v47, %v962_v34  ;;  %v3174_v54 = vsel %vm1139_vm12, %v1140_v48, %v1138_v21 }
  0xf0   : > { %4017 = vst [vmem:[#allocation42_spill] sm:$0xff] %v3157_v53  ;;  %4019 = vst [vmem:[#allocation43_spill] sm:$0xff] %v3168_v25  ;;  %v4021_v37 = vand.u32 2147483648, %v2881_v17  ;;  %v1194_v63 = vsel %vm1193_vm8, %v2912_v60, %v1192_v39  ;;  %v1371_v59 = vsel %vm1370_vm11, %v3014_v1, %v1369_v26  ;;  %v3188_v47 = vadd.f32 1e-05, %v911_v33 }
  0xf1   : > { %4020 = vst [vmem:[#allocation44_spill] sm:$0xff] %v3174_v54  ;;  %v919_v15 = vmul.f32 %v1900_v51, %v2686_v58  ;;  %v3191_v48 = vadd.f32 %v392_v49, %v376_v56  ;;  %v3193_v29 = vpop.eup %1901  ;;  %v4023_v17 = vand.u32 2147483648, %v2886_v35  ;;  %1915 = vrsqrt.f32 %v3149_v4 }
  0xf2   : > { %v3180_v40 = vsel %vm1316_vm9, %v4021_v37, %v1315_v31  ;;  %v3202_v30 = vadd.f32 1e-05, %v1087_v41  ;;  %v3205_v32 = vadd.f32 1e-05, %v3001_v13  ;;  %v3207_v22 = vpop.eup %1903  ;;  %v4025_v58 = vand.u32 2147483648, %v2912_v60 }
  0xf3   : > { %4022 = vst [vmem:[#allocation45_spill] sm:$0xff] %v3180_v40  ;;  %v3199_v27 = vsel %vm1019_vm14, %v4023_v17, %v1018_v7  ;;  %v3215_v16 = vadd.f32 1e-05, %v1264_v28  ;;  %v1095_v35 = vmul.f32 %v1900_v51, %v2691_v62  ;;  %1917 = vrcp.f32 %v3001_v13  ;;  %v1906_v34 = vpop.eup %1905 }
  0xf4   : > { %4024 = vst [vmem:[#allocation46_spill] sm:$0xff] %v3199_v27  ;;  %v3213_v19 = vsel %vm1195_vm13, %v4025_v58, %v1194_v63  ;;  %v4027_v24 = vand.u32 2147483648, %v3014_v1  ;;  %vm968_vm2 = vcmp.eq.f32.partialorder %v3080_v12, inf  ;;  %vm970_vm3 = vcmp.eq.f32.partialorder %v3080_v12, 0.0  ;;  %v1908_v39 = vpop.eup %1907 }
  0xf5   : > { %4026 = vst [vmem:[#allocation47_spill] sm:$0xff] %v3213_v19  ;;  %v971_v60 = vand.u32 2147483648, %v3080_v12  ;;  %vm1144_vm4 = vcmp.eq.f32.partialorder %v3089_v20, inf  ;;  %vm1146_vm5 = vcmp.eq.f32.partialorder %v3089_v20, 0.0  ;;  %v3230_v62 = vadd.f32 1e-05, %v919_v15  ;;  %v1910_v13 = vpop.eup %1909 }
  0xf6   : > { %v3223_v21 = vsel %vm1372_vm15, %v4027_v24, %v1371_v59  ;;  %1919 = vrsqrt.f32 %v3188_v47  ;;  %v1147_v1 = vand.u32 2147483648, %v3089_v20  ;;  %vm1321_vm6 = vcmp.eq.f32.partialorder %v3098_v57, inf  ;;  %v4029_v15 = vld [vmem:[#allocation18_spill] sm:$0xff]  ;;  %v3286_v59 = vld [vmem:[%s2486_s12 + $0x178] sm:$0xff] }
  0xf7   : > { %4028 = vst [vmem:[#allocation48_spill] sm:$0xff] %v3223_v21  ;;  %v1272_v56 = vmul.f32 %v1900_v51, %v2700_v0  ;;  %1921 = vrsqrt.f32 %v3202_v30  ;;  %vm1323_vm7 = vcmp.eq.f32.partialorder %v3098_v57, 0.0  ;;  %v1324_v31 = vand.u32 2147483648, %v3098_v57  ;;  %v1912_v33 = vpop.eup %1911  ;;  %v4031_v24 = vld [vmem:[#allocation22_spill] sm:$0xff] }
  0xf8   : > { %v3239_v26 = vadd.f32 1e-05, %v1095_v35  ;;  %1923 = vrsqrt.f32 %v3215_v16  ;;  %v967_v49 = vmul.f32 %v1906_v34, %v3080_v12  ;;  %vm1024_vm8 = vcmp.eq.f32.partialorder %v3117_v5, inf  ;;  %v1914_v0 = vpop.eup %1913 }
  0xf9   : > { %vm1026_vm9 = vcmp.eq.f32.partialorder %v3117_v5, 0.0  ;;  %v1027_v41 = vand.u32 2147483648, %v3117_v5  ;;  %v1143_v51 = vmul.f32 %v1908_v39, %v3089_v20  ;;  %v1320_v7 = vmul.f32 %v1910_v13, %v3098_v57 }
  0xfa   : > { %vm1200_vm10 = vcmp.eq.f32.partialorder %v3128_v44, inf  ;;  %1925 = vrsqrt.f32 %v3230_v62  ;;  %vm1202_vm12 = vcmp.eq.f32.partialorder %v3128_v44, 0.0  ;;  %v1203_v28 = vand.u32 2147483648, %v3128_v44 }
  0xfb   : > { %vm1377_vm11 = vcmp.eq.f32.partialorder %v3149_v4, inf  ;;  %v3253_v37 = vadd.f32 1e-05, %v1272_v56  ;;  %v1023_v63 = vmul.f32 %v1912_v33, %v3117_v5  ;;  %1927 = vrsqrt.f32 %v3239_v26  ;;  %v1916_v58 = vpop.eup %1915 }
  0xfc   : > { %v912_v17 = vmul.f32 %v3193_v29, %v4029_v15  ;;  %v969_v35 = vsel %vm968_vm2, %v3080_v12, %v967_v49  ;;  %v1199_v34 = vmul.f32 %v1914_v0, %v3128_v44  ;;  %vm1379_vm14 = vcmp.eq.f32.partialorder %v3149_v4, 0.0  ;;  %v4030_v49 = vld [vmem:[#allocation19_spill] sm:$0xff] }
  0xfd   : > { %vm975_vm13 = vcmp.eq.f32.partialorder %v3188_v47, inf  ;;  %v3268_v13 = vpop.eup %1917  ;;  %v1145_v56 = vsel %vm1144_vm4, %v3089_v20, %v1143_v51  ;;  %v1322_v33 = vsel %vm1321_vm6, %v3098_v57, %v1320_v7  ;;  %vm1151_vm15 = vcmp.eq.f32.partialorder %v3202_v30, inf }
  0xfe   : > { %vm1328_vm0 = vcmp.eq.f32.partialorder %v3215_v16, inf  ;;  %v1088_v0 = vmul.f32 %v3193_v29, %v4030_v49  ;;  %1929 = vrsqrt.f32 %v3253_v37  ;;  %v1265_v51 = vmul.f32 %v3193_v29, %v4031_v24 }
  0xff   : > { %v3290_v7 = vsel %vm970_vm3, %v971_v60, %v969_v35  ;;  %v1025_v49 = vsel %vm1024_vm8, %v3117_v5, %v1023_v63  ;;  %v1376_v15 = vmul.f32 %v1916_v58, %v3149_v4  ;;  %vm1031_vm1 = vcmp.eq.f32.partialorder %v3230_v62, inf  ;;  %v4035_v63 = vld [vmem:[#allocation20_spill] sm:$0xff] }
 0x100   : > { %v1920_v21 = vpop.eup %1919  ;;  %4032 = vst [vmem:[#allocation18_spill] sm:$0xff] %v3290_v7  ;;  %v3297_v39 = vadd.f32 1e-05, %v912_v17  ;;  %v3301_v24 = vsel %vm1146_vm5, %v1147_v1, %v1145_v56  ;;  %v3305_v12 = vsel %vm1323_vm7, %v1324_v31, %v1322_v33  ;;  %v1201_v60 = vsel %vm1200_vm10, %v3128_v44, %v1199_v34  ;;  %v4039_v44 = vld [vmem:[#allocation23_spill] sm:$0xff] }
 0x101   : > { %v1922_v29 = vpop.eup %1921  ;;  %4033 = vst [vmem:[#allocation19_spill] sm:$0xff] %v3301_v24  ;;  %4034 = vst [vmem:[#allocation22_spill] sm:$0xff] %v3305_v12  ;;  %vm977_vm2 = vcmp.eq.f32.partialorder %v3188_v47, 0.0  ;;  %vm1153_vm3 = vcmp.eq.f32.partialorder %v3202_v30, 0.0  ;;  %v920_v17 = vmul.f32 %v3207_v22, %v4035_v63  ;;  %vm1330_vm4 = vcmp.eq.f32.partialorder %v3215_v16, 0.0 }
 0x102   : > { %v1924_v58 = vpop.eup %1923  ;;  %vm1207_vm5 = vcmp.eq.f32.partialorder %v3239_v26, inf  ;;  %v3316_v20 = vadd.f32 1e-05, %v1088_v0  ;;  %v3320_v57 = vmul.f32 %v3268_v13, %v2950_v61  ;;  %v3324_v1 = vmul.f32 %v3268_v13, %v2964_v3  ;;  %v4037_v61 = vld [vmem:[#allocation21_spill] sm:$0xff] }
 0x103   : > { %v424_v31 = vmul.f32 0.0722, %v3286_v59  ;;  %v3331_v35 = vsel %vm1026_vm9, %v1027_v41, %v1025_v49  ;;  %vm1033_vm6 = vcmp.eq.f32.partialorder %v3230_v62, 0.0  ;;  %v3335_v56 = vadd.f32 1e-05, %v1265_v51 }
 0x104   : > { %4036 = vst [vmem:[#allocation20_spill] sm:$0xff] %v3331_v35  ;;  %v1096_v33 = vmul.f32 %v3207_v22, %v4037_v61  ;;  %v1926_v0 = vpop.eup %1925  ;;  %v3341_v3 = vsel %vm1202_vm12, %v1203_v28, %v1201_v60  ;;  %v1378_v5 = vsel %vm1377_vm11, %v3149_v4, %v1376_v15  ;;  %v974_v41 = vmul.f32 %v1920_v21, %v3188_v47  ;;  %v4040_v60 = vld [vmem:[#allocation24_spill] sm:$0xff] }
 0x105   : > { %4038 = vst [vmem:[#allocation21_spill] sm:$0xff] %v3341_v3  ;;  %1931 = vrsqrt.f32 %v3297_v39  ;;  %v1150_v63 = vmul.f32 %v1922_v29, %v3202_v30  ;;  %v1327_v61 = vmul.f32 %v1924_v58, %v3215_v16  ;;  %vm1209_vm7 = vcmp.eq.f32.partialorder %v3239_v26, 0.0  ;;  %v1928_v15 = vpop.eup %1927 }
 0x106   : > { %vm1384_vm8 = vcmp.eq.f32.partialorder %v3253_v37, inf  ;;  %v1273_v28 = vmul.f32 %v3207_v22, %v4039_v44  ;;  %v3359_v21 = vadd.f32 %v424_v31, %v3191_v48  ;;  %v3376_v31 = vadd.f32 1e-05, %v920_v17 }
 0x107   : > { %1933 = vrsqrt.f32 %v3316_v20  ;;  %v1030_v44 = vmul.f32 %v1926_v0, %v3230_v62  ;;  %v3380_v34 = vadd.f32 1e-05, %v1096_v33  ;;  %v4042_v3 = vand.u32 2147483648, %v3149_v4 }
 0x108   : > { %1935 = vrsqrt.f32 %v3335_v56  ;;  %456 = vst [vmem:[%s2523_s23 + $0x78] sm:$0xff] %v3359_v21  ;;  %v976_v33 = vsel %vm975_vm13, %v3188_v47, %v974_v41  ;;  %vm1386_vm9 = vcmp.eq.f32.partialorder %v3253_v37, 0.0 }
 0x109   : > { %v3391_v17 = vsel %vm1379_vm14, %v4042_v3, %v1378_v5 }
 0x10a   : > { %4043 = vst [vmem:[#allocation23_spill] sm:$0xff] %v3391_v17 }
 0x15d   : > { %v3348_v49 = vpop.f32.mrb[0].mxu0  ;;  %v3350_v51 = vpop.f32.mrb[0].mxu1 }
 0x15e   : > { %v714_v29 = vadd.f32 %v2796_v8, %v3348_v49  ;;  %v722_v58 = vadd.f32 %v4040_v60, %v3350_v51  ;;  %v3372_v22 = vpop.f32.mrb[1].mxu0  ;;  %v3374_v48 = vpop.f32.mrb[1].mxu1  ;;  %v4041_v8 = vld [vmem:[#allocation31_spill] sm:$0xff] }
 0x15f   : > { %v913_v60 = vmul.f32 %v3268_v13, %v4041_v8 }
 0x160   : > { %1937 = vrcp.f32 %v714_v29 }
 0x161   : > { %2154 = shalt.err (!%p2151_p4)
}
 0x162   : > { %s2155_s8 = scalar_lea.hbm %s3364_s22, 2048  ;;  %s2159_s25 = scalar_lea.hbm %s3953_s4, 4096 }
 0x163   : > { %p2156_p8 = scmp.ne.s32.totalorder %s3364_s22, %s2155_s8  ;;  %p2160_p10 = scmp.lt.u32.totalorder %s3364_s22, %s3953_s4 }
 0x164   : > { %p2161_p11 = scmp.lt.u32.totalorder %s2159_s25, %s2155_s8  ;;  %p2163_p13 = scmp.lt.u32.totalorder %s2155_s8, %s3364_s22 }
 0x165   : > { %p2157_p12 = pnand %p2156_p8, %p4044_p0 }
 0x166   : > { %p2162_p3 = por %p2161_p11, %p2160_p10 }
 0x167   : > { %p2158_p6 = pneg %p2157_p12 }
 0x168   : > { %p2164_p5 = por %p2163_p13, %p2162_p3 }
 0x16a   : > { %p2165_p9 = pnand %p2164_p5, %p2158_p6 }
 0x16c   : > { %2168 = shalt.err (!%p2165_p9)
}
 0x16d   : > { %s2272_s21 = smov 128   ;;  %s2273_s23 = smov 8   ;;  %v1930_v4 = vpop.eup %1929  ;;  %1939 = vrcp.f32 %v722_v58  ;;  %v3424_v13 = vpop.f32.mrb[2].mxu0  ;;  %v1152_v3 = vsel %vm1151_vm15, %v3202_v30, %v1150_v63  ;;  %v1329_v5 = vsel %vm1328_vm0, %v3215_v16, %v1327_v61  ;;  %v1206_v41 = vmul.f32 %v1928_v15, %v3239_v26  ;;  %v4045_v29 = vld [vmem:[#allocation25_spill] sm:$0xff]  ;;  %v4046_v17 = vld [vmem:[#allocation26_spill] sm:$0xff] }
 0x16e   : > { %1750 = dma.vmem_to_hbm [thread:$0]  (%p4044_p0), %s3366_s13, 2048, %s3364_s22, %s1442_s28, %s2272_s21, %s2272_s21, %s2273_s23   ;;  %v3426_v0 = vpop.f32.mrb[2].mxu1  ;;  %v715_v8 = vadd.f32 %v4045_v29, %v3424_v13  ;;  %v3439_v35 = vpop.f32.mrb[3].mxu0  ;;  %v3443_v24 = vadd.f32 1e-05, %v1273_v28  ;;  %1941 = vrsqrt.f32 %v3376_v31  ;;  %v1032_v63 = vsel %vm1031_vm1, %v3230_v62, %v1030_v44 }
 0x16f   : > { %v723_v58 = vadd.f32 %v4046_v17, %v3426_v0  ;;  %v3441_v12 = vpop.f32.mrb[3].mxu1  ;;  %v1387_v61 = vand.u32 2147483648, %v3253_v37  ;;  %1943 = vrsqrt.f32 %v3380_v34  ;;  %v3451_v15 = vadd.f32 1e-05, %v913_v60  ;;  %v3466_v19 = vpop.f32.mrb[4].mxu0  ;;  %s3708_s11 = scalar_lea.vmem [#allocation8], %s1739_s26 }
 0x170   : > { %4047 = vst [vmem:[#allocation24_spill] sm:$0xff] %v3443_v24  ;;  %1945 = vrcp.f32 %v715_v8  ;;  %v4048_v17 = vand.u32 2147483648, %v3188_v47  ;;  %v4050_v28 = vand.u32 2147483648, %v3202_v30  ;;  %v1383_v44 = vmul.f32 %v1930_v4, %v3253_v37  ;;  %v3468_v60 = vpop.f32.mrb[4].mxu1  ;;  %v1932_v30 = vpop.eup %1931  ;;  %v4054_v4 = vld [vmem:[#allocation27_spill] sm:$0xff]  ;;  %s1740_s26 = smul.u32 6144, %s2255_s18 }
 0x171   : > { %1947 = vrcp.f32 %v723_v58  ;;  %v4052_v8 = vand.u32 2147483648, %v3215_v16  ;;  %vm982_vm10 = vcmp.eq.f32.partialorder %v3297_v39, inf  ;;  %v4055_v58 = vld [vmem:[#allocation28_spill] sm:$0xff]  ;;  %v4056_v16 = vand.u32 2147483648, %v3230_v62  ;;  %s1457_s13 = sshll.u32 %s3708_s11, 4  ;;  %s1437_s22 = scalar_lea.sflag [#allocation4], %s2480_s6  ;;  %s3891_s13 = int_to_ptr.vmem [resolvable:$true] %s1457_s13 }
 0x172   : > { %v3457_v29 = vsel %vm977_vm2, %v4048_v17, %v976_v33  ;;  %v3463_v7 = vsel %vm1153_vm3, %v4050_v28, %v1152_v3  ;;  %v1208_v33 = vsel %vm1207_vm5, %v3239_v26, %v1206_v41  ;;  %v716_v3 = vadd.f32 %v4054_v4, %v3466_v19  ;;  %v3484_v28 = vpop.f32.mrb[5].mxu0  ;;  %v1934_v4 = vpop.eup %1933  ;;  %s3889_s9 = scalar_lea.hbm %s3952_s3, %s1740_s26  ;;  %s2169_s28 = scalar_lea.vmem %s3891_s13, 6144 }
 0x173   : > { %4049 = vst [vmem:[#allocation31_spill] sm:$0xff] %v3457_v29  ;;  %4051 = vst [vmem:[#allocation25_spill] sm:$0xff] %v3463_v7  ;;  %v3474_v47 = vsel %vm1330_vm4, %v4052_v8, %v1329_v5  ;;  %v724_v17 = vadd.f32 %v4055_v58, %v3468_v60  ;;  %v3486_v7 = vpop.f32.mrb[5].mxu1  ;;  %v3492_v5 = vsel %vm1033_vm6, %v4056_v16, %v1032_v63  ;;  %vm984_vm12 = vcmp.eq.f32.partialorder %v3297_v39, 0.0  ;;  %v3513_v41 = vpop.f32.mrb[6].mxu0  ;;  %p2170_p1 = scmp.ne.s32.totalorder %s3891_s13, %s2169_s28  ;;  %s2274_s2 = smov [#allocation8]  }
 0x174   : > { %4053 = vst [vmem:[#allocation26_spill] sm:$0xff] %v3474_v47  ;;  %4057 = vst [vmem:[#allocation27_spill] sm:$0xff] %v3492_v5  ;;  %1949 = vrsqrt.f32 %v3443_v24  ;;  %vm1158_vm11 = vcmp.eq.f32.partialorder %v3316_v20, inf  ;;  %v3499_v8 = vadd.f32 1e-05, %v3320_v57  ;;  %v4059_v58 = vand.u32 2147483648, %v3239_v26  ;;  %v1936_v57 = vpop.eup %1935 }
 0x175   : > { %1951 = vrsqrt.f32 %v3451_v15  ;;  %v1385_v63 = vsel %vm1384_vm8, %v3253_v37, %v1383_v44  ;;  %vm1160_vm14 = vcmp.eq.f32.partialorder %v3316_v20, 0.0  ;;  %v3515_v5 = vpop.f32.mrb[6].mxu1  ;;  %vm1335_vm13 = vcmp.eq.f32.partialorder %v3335_v56, inf  ;;  %v3524_v16 = vpop.f32.mrb[7].mxu0  ;;  %p2171_p2 = pnand %p2170_p1, %p4044_p0  ;;  %s2173_s27 = sshll.u32 %s2274_s2, 4  ;;  %s2174_s27 = int_to_ptr.vmem [resolvable:$false] %s2173_s27 }
 0x176   : > { %4058 = vst [vmem:[#allocation28_spill] sm:$0xff] %v3499_v8  ;;  %1953 = vrcp.f32 %v716_v3  ;;  %v3506_v62 = vsel %vm1209_vm7, %v4059_v58, %v1208_v33  ;;  %v981_v3 = vmul.f32 %v1932_v30, %v3297_v39  ;;  %v1938_v33 = vpop.eup %1937  ;;  %v4061_v58 = vld [vmem:[#allocation29_spill] sm:$0xff]  ;;  %v3529_v29 = vadd.f32 1e-05, %v3324_v1  ;;  %s2175_s7 = scalar_lea.vmem %s2174_s27, 12288  ;;  %p2176_p4 = scmp.lt.s32.totalorder %s3891_s13, %s2174_s27 }
 0x177   : > { %4060 = vst [vmem:[#allocation49_spill] sm:$0xff] %v3506_v62  ;;  %1955 = vrcp.f32 %v724_v17  ;;  %v717_v44 = vadd.f32 %v4061_v58, %v3513_v41  ;;  %v4062_v62 = vld [vmem:[#allocation30_spill] sm:$0xff]  ;;  %v3526_v17 = vpop.f32.mrb[7].mxu1  ;;  %v1940_v30 = vpop.eup %1939  ;;  %v746_v27 = vmul.f32 %v1938_v33, %v3348_v49  ;;  %v3535_v26 = vsel %vm1386_vm9, %v1387_v61, %v1385_v63  ;;  %v4065_v33 = vld [vmem:[#allocation32_spill] sm:$0xff]  ;;  %p2172_p7 = pneg %p2171_p2  ;;  %p2177_p8 = scmp.lt.s32.totalorder %s2175_s7, %s2169_s28 }
 0x178   : > { %v725_v47 = vadd.f32 %v4062_v62, %v3515_v5  ;;  %4063 = vst [vmem:[#allocation29_spill] sm:$0xff] %v3529_v29  ;;  %1957 = vrcp.f32 %v3359_v21  ;;  %4064 = vst [vmem:[#allocation30_spill] sm:$0xff] %v3535_v26  ;;  %v1942_v62 = vpop.eup %1941  ;;  %v754_v40 = vmul.f32 %v1940_v30, %v3350_v51  ;;  %v1157_v1 = vmul.f32 %v1934_v4, %v3316_v20  ;;  %v3542_v49 = vpop.f32.mrb[8].mxu0 }
 0x179   : > { %1959 = vrsqrt.f32 %v3499_v8  ;;  %v1944_v25 = vpop.eup %1943  ;;  %v778_v53 = vadd.f32 1e-05, %v746_v27  ;;  %v3544_v37 = vpop.f32.mrb[8].mxu1  ;;  %v983_v61 = vsel %vm982_vm10, %v3297_v39, %v981_v3  ;;  %vm1038_vm15 = vcmp.eq.f32.partialorder %v3376_v31, inf  ;;  %p2178_p12 = por %p2177_p8, %p2176_p4 }
 0x17a   : > { %1961 = vrcp.f32 %v717_v44  ;;  %vm1214_vm0 = vcmp.eq.f32.partialorder %v3380_v34, inf  ;;  %v1946_v4 = vpop.eup %1945  ;;  %v786_v63 = vadd.f32 1e-05, %v754_v40  ;;  %v718_v27 = vadd.f32 %v4065_v33, %v3542_v49  ;;  %v3556_v30 = vpop.f32.mrb[9].mxu0 }
 0x17b   : > { %1963 = vrcp.f32 %v725_v47  ;;  %v4066_v47 = vld [vmem:[#allocation33_spill] sm:$0xff]  ;;  %v3558_v54 = vpop.f32.mrb[9].mxu1  ;;  %vm1391_vm1 = vcmp.eq.f32.partialorder %v3443_v24, inf  ;;  %v1948_v3 = vpop.eup %1947  ;;  %v3563_v51 = vmul.f32 2.0, %v3372_v22  ;;  %v747_v40 = vmul.f32 %v1946_v4, %v3424_v13  ;;  %p2179_p6 = pnand %p2178_p12, %p2172_p7 }
 0x17c   : > { %v726_v44 = vadd.f32 %v4066_v47, %v3544_v37  ;;  %1965 = vrsqrt.f32 %v3529_v29  ;;  %v1334_v33 = vmul.f32 %v1936_v57, %v3335_v56  ;;  %v3568_v47 = vmul.f32 2.0, %v3374_v48  ;;  %v3576_v22 = vpop.f32.mrb[10].mxu0  ;;  %v3578_v13 = vpop.f32.mrb[10].mxu1 }
 0x17d   : > { %1967 = vlog2.f32 %v778_v53  ;;  %v755_v26 = vmul.f32 %v1948_v3, %v3426_v0  ;;  %v1159_v29 = vsel %vm1158_vm11, %v3316_v20, %v1157_v1  ;;  %v779_v53 = vadd.f32 1e-05, %v747_v40  ;;  %v4070_v1 = vld [vmem:[#allocation34_spill] sm:$0xff]  ;;  %v3593_v10 = vpop.f32.mrb[11].mxu1 }
 0x17e   : > { %v1950_v58 = vpop.eup %1949  ;;  %1969 = vlog2.f32 %v786_v63  ;;  %v4068_v57 = vand.u32 2147483648, %v3297_v39  ;;  %v713_v0 = vadd.f32 1e-05, %v3359_v21  ;;  %v719_v3 = vadd.f32 %v4070_v1, %v3576_v22 }
 0x17f   : > { %v3574_v8 = vpop.eup %1951  ;;  %1971 = vrcp.f32 %v718_v27  ;;  %v787_v63 = vadd.f32 1e-05, %v755_v26  ;;  %v4071_v27 = vld [vmem:[#allocation35_spill] sm:$0xff]  ;;  %v3605_v26 = vsel %vm1335_vm13, %v3335_v56, %v1334_v33  ;;  %v3619_v33 = vpop.f32.mrb[12].mxu1  ;;  %vm989_vm2 = vcmp.eq.f32.partialorder %v3451_v15, inf }
 0x180   : > { %4067 = vst [vmem:[#allocation32_spill] sm:$0xff] %v3574_v8  ;;  %v3584_v48 = vsel %vm984_vm12, %v4068_v57, %v983_v61  ;;  %v1954_v4 = vpop.eup %1953  ;;  %1973 = vrcp.f32 %v726_v44  ;;  %v727_v40 = vadd.f32 %v4071_v27, %v3578_v13  ;;  %v3591_v8 = vpop.f32.mrb[11].mxu0  ;;  %v4072_v61 = vand.u32 2147483648, %v3316_v20  ;;  %4074 = vst [vmem:[#allocation35_spill] sm:$0xff] %v3605_v26 }
 0x181   : > { %4069 = vst [vmem:[#allocation33_spill] sm:$0xff] %v3584_v48  ;;  %v1956_v52 = vpop.eup %1955  ;;  %1975 = vlog2.f32 %v779_v53  ;;  %v748_v39 = vmul.f32 %v1954_v4, %v3466_v19  ;;  %v1037_v53 = vmul.f32 %v1942_v62, %v3376_v31  ;;  %v1213_v19 = vmul.f32 %v1944_v25, %v3380_v34  ;;  %v3617_v1 = vpop.f32.mrb[12].mxu0  ;;  %v4077_v25 = vld [vmem:[#allocation37_spill] sm:$0xff] }
 0x182   : > { %v3600_v21 = vsel %vm1160_vm14, %v4072_v61, %v1159_v29  ;;  %v3607_v44 = vpop.eup %1957  ;;  %1977 = vlog2.f32 %v787_v63  ;;  %v756_v57 = vmul.f32 %v1956_v52, %v3468_v60  ;;  %v3615_v20 = vmul.f32 2.0, %v3439_v35  ;;  %v4076_v52 = vld [vmem:[#allocation36_spill] sm:$0xff]  ;;  %v3628_v35 = vpop.f32.mrb[13].mxu1 }
 0x183   : > { %4073 = vst [vmem:[#allocation34_spill] sm:$0xff] %v3600_v21  ;;  %v3612_v4 = vpop.eup %1959  ;;  %v780_v29 = vadd.f32 1e-05, %v748_v39  ;;  %1979 = vrcp.f32 %v719_v3  ;;  %v1390_v27 = vmul.f32 %v1950_v58, %v3443_v24  ;;  %v720_v60 = vadd.f32 %v4076_v52, %v3617_v1  ;;  %v3626_v21 = vpop.f32.mrb[13].mxu0 }
 0x184   : > { %4075 = vst [vmem:[#allocation50_spill] sm:$0xff] %v3612_v4  ;;  %v1962_v63 = vpop.eup %1961  ;;  %v788_v61 = vadd.f32 1e-05, %v756_v57  ;;  %1981 = vrcp.f32 %v727_v40  ;;  %v728_v62 = vadd.f32 %v4077_v25, %v3619_v33  ;;  %v771_v39 = vmul.f32 2.0, %v3441_v12 }
 0x185   : > { %v1964_v3 = vpop.eup %1963  ;;  %1983 = vlog2.f32 %v780_v29  ;;  %v749_v48 = vmul.f32 %v1962_v63, %v3513_v41  ;;  %v921_v58 = vmul.f32 %v3607_v44, %v3112_v55  ;;  %v3640_v52 = vsel %vm1038_vm15, %v3376_v31, %v1037_v53  ;;  %v3652_v63 = vpop.f32.mrb[14].mxu0 }
 0x186   : > { %v3634_v40 = vpop.eup %1965  ;;  %1985 = vlog2.f32 %v788_v61  ;;  %v757_v57 = vmul.f32 %v1964_v3, %v3515_v5  ;;  %4079 = vst [vmem:[#allocation37_spill] sm:$0xff] %v3640_v52  ;;  %v3645_v12 = vsel %vm1214_vm0, %v3380_v34, %v1213_v19  ;;  %v3650_v55 = vsel %vm1391_vm1, %v3443_v24, %v1390_v27  ;;  %v3654_v5 = vpop.f32.mrb[14].mxu1 }
 0x187   : > { %4078 = vst [vmem:[#allocation36_spill] sm:$0xff] %v3634_v40  ;;  %4080 = vst [vmem:[#allocation51_spill] sm:$0xff] %v3645_v12  ;;  %v1968_v29 = vpop.eup %1967  ;;  %v781_v41 = vadd.f32 1e-05, %v749_v48  ;;  %1987 = vrcp.f32 %v720_v60  ;;  %v721_v19 = vadd.f32 %v3205_v32, %v3652_v63  ;;  %v3659_v48 = vpop.f32.mrb[15].mxu0  ;;  %v772_v40 = vmul.f32 2.0, %v3486_v7 }
 0x188   : > { %4081 = vst [vmem:[#allocation52_spill] sm:$0xff] %v3650_v55  ;;  %v1970_v61 = vpop.eup %1969  ;;  %v795_v25 = vmul.f32 0.6931472, %v1968_v29  ;;  %v789_v3 = vadd.f32 1e-05, %v757_v57  ;;  %1989 = vrcp.f32 %v728_v62  ;;  %v3661_v60 = vpop.f32.mrb[15].mxu1  ;;  %v729_v55 = vadd.f32 %v713_v0, %v3654_v5 }
 0x189   : > { %v1972_v12 = vpop.eup %1971  ;;  %v811_v27 = vmul.f32 0.6931472, %v1970_v61  ;;  %1991 = vlog2.f32 %v781_v41  ;;  %v3664_v52 = vadd.f32 1e-05, %v921_v58  ;;  %v764_v57 = vmul.f32 2.0, %v3484_v28 }
 0x18a   : > { %v1974_v26 = vpop.eup %1973  ;;  %v826_v53 = vmul.f32 %v795_v25, %v3563_v51  ;;  %1993 = vlog2.f32 %v789_v3  ;;  %v750_v62 = vmul.f32 %v1972_v12, %v3542_v49  ;;  %v765_v7 = vmul.f32 2.0, %v3524_v16 }
 0x18b   : > { %v1976_v32 = vpop.eup %1975  ;;  %v834_v29 = vmul.f32 %v811_v27, %v3568_v47  ;;  %v758_v61 = vmul.f32 %v1974_v26, %v3544_v37  ;;  %1995 = vrcp.f32 %v721_v19  ;;  %vm1337_vm5 = vcmp.eq.f32.partialorder %v3335_v56, 0.0 }
 0x18c   : > { %v1978_v41 = vpop.eup %1977  ;;  %v842_v0 = vmul.f32 1.442695, %v826_v53  ;;  %v797_v58 = vmul.f32 0.6931472, %v1976_v32  ;;  %v782_v4 = vadd.f32 1e-05, %v750_v62  ;;  %1997 = vrcp.f32 %v729_v55 }
 0x18d   : > { %v1980_v24 = vpop.eup %1979  ;;  %v858_v51 = vmul.f32 1.442695, %v834_v29  ;;  %v813_v25 = vmul.f32 0.6931472, %v1978_v41  ;;  %v790_v28 = vadd.f32 1e-05, %v758_v61  ;;  %1999 = vrsqrt.f32 %v3664_v52 }
 0x18e   : > { %v1982_v49 = vpop.eup %1981  ;;  %2001 = vpow2.f32 %v842_v0  ;;  %v827_v47 = vmul.f32 %v797_v58, %v3615_v20  ;;  %v751_v37 = vmul.f32 %v1980_v24, %v3576_v22  ;;  %v773_v53 = vmul.f32 2.0, %v3526_v17 }
 0x18f   : > { %v1984_v26 = vpop.eup %1983  ;;  %2003 = vpow2.f32 %v858_v51  ;;  %v835_v12 = vmul.f32 %v813_v25, %v771_v39  ;;  %v759_v55 = vmul.f32 %v1982_v49, %v3578_v13  ;;  %v3679_v22 = vmul.f32 2.0, %v3556_v30 }
 0x190   : > { %v1986_v3 = vpop.eup %1985  ;;  %v844_v19 = vmul.f32 1.442695, %v827_v47  ;;  %v799_v27 = vmul.f32 0.6931472, %v1984_v26  ;;  %2005 = vlog2.f32 %v782_v4  ;;  %v783_v62 = vadd.f32 1e-05, %v751_v37 }
 0x191   : > { %v1988_v32 = vpop.eup %1987  ;;  %v860_v29 = vmul.f32 1.442695, %v835_v12  ;;  %v815_v61 = vmul.f32 0.6931472, %v1986_v3  ;;  %2007 = vlog2.f32 %v790_v28  ;;  %v791_v20 = vadd.f32 1e-05, %v759_v55 }
 0x192   : > { %v1990_v16 = vpop.eup %1989  ;;  %2009 = vpow2.f32 %v844_v19  ;;  %v828_v24 = vmul.f32 %v799_v27, %v764_v57  ;;  %v752_v17 = vmul.f32 %v1988_v32, %v3617_v1  ;;  %v1097_v4 = vmul.f32 %v3607_v44, %v3122_v42 }
 0x193   : > { %v1992_v39 = vpop.eup %1991  ;;  %2011 = vpow2.f32 %v860_v29  ;;  %v836_v13 = vmul.f32 %v815_v61, %v772_v40  ;;  %v760_v41 = vmul.f32 %v1990_v16, %v3619_v33  ;;  %v774_v40 = vmul.f32 2.0, %v3558_v54 }
 0x194   : > { %v1994_v0 = vpop.eup %1993  ;;  %v846_v58 = vmul.f32 1.442695, %v828_v24  ;;  %v801_v51 = vmul.f32 0.6931472, %v1992_v39  ;;  %2013 = vlog2.f32 %v783_v62  ;;  %v784_v25 = vadd.f32 1e-05, %v752_v17 }
 0x195   : > { %v1996_v28 = vpop.eup %1995  ;;  %v862_v57 = vmul.f32 1.442695, %v836_v13  ;;  %v817_v49 = vmul.f32 0.6931472, %v1994_v0  ;;  %2015 = vlog2.f32 %v791_v20  ;;  %v792_v30 = vadd.f32 1e-05, %v760_v41 }
 0x196   : > { %v1998_v47 = vpop.eup %1997  ;;  %2017 = vpow2.f32 %v846_v58  ;;  %v829_v1 = vmul.f32 %v801_v51, %v765_v7  ;;  %v753_v33 = vmul.f32 %v1996_v28, %v3652_v63  ;;  %v3690_v26 = vmul.f32 2.0, %v3591_v8  ;;  %v4082_v24 = vld [vmem:[#allocation38_spill] sm:$0xff]  ;;  %v4083_v39 = vld [vmem:[#allocation39_spill] sm:$0xff] }
 0x197   : > { %v3687_v37 = vpop.eup %1999  ;;  %2019 = vpow2.f32 %v862_v57  ;;  %v837_v42 = vmul.f32 %v817_v49, %v773_v53  ;;  %v761_v12 = vmul.f32 %v1998_v47, %v3654_v5  ;;  %v3694_v19 = vmul.f32 2.0, %v3593_v10 }
 0x198   : > { %v2002_v55 = vpop.eup %2001  ;;  %v848_v3 = vmul.f32 1.442695, %v829_v1  ;;  %2021 = vlog2.f32 %v784_v25  ;;  %v3696_v7 = vadd.f32 1e-05, %v1097_v4  ;;  %v785_v62 = vadd.f32 1e-05, %v753_v33 }
 0x199   : > { %v2004_v54 = vpop.eup %2003  ;;  %v874_v27 = vsub.f32 1.0, %v2002_v55  ;;  %v864_v63 = vmul.f32 1.442695, %v837_v42  ;;  %2023 = vlog2.f32 %v792_v30  ;;  %v793_v8 = vadd.f32 1e-05, %v761_v12 }
 0x19a   : > { %v2006_v32 = vpop.eup %2005  ;;  %v882_v53 = vsub.f32 1.0, %v2004_v54  ;;  %2025 = vpow2.f32 %v848_v3  ;;  %v1274_v5 = vmul.f32 %v3607_v44, %v3286_v59  ;;  %v3721_v58 = vmul.f32 2.0, %v3628_v35  ;;  %v4084_v54 = vld [vmem:[#allocation40_spill] sm:$0xff] }
 0x19b   : > { %v2008_v29 = vpop.eup %2007  ;;  %v1050_v10 = vmul.f32 %v2916_v36, %v874_v27  ;;  %v1226_v61 = vmul.f32 %v2920_v2, %v874_v27  ;;  %v1403_v20 = vmul.f32 %v2926_v11, %v874_v27  ;;  %2027 = vpow2.f32 %v864_v63  ;;  %v4085_v63 = vld [vmem:[#allocation41_spill] sm:$0xff] }
 0x19c   : > { %v2010_v16 = vpop.eup %2009  ;;  %v1058_v17 = vmul.f32 %v4082_v24, %v882_v53  ;;  %v1234_v13 = vmul.f32 %v4083_v39, %v882_v53  ;;  %v1411_v41 = vmul.f32 %v2981_v50, %v882_v53  ;;  %v803_v4 = vmul.f32 0.6931472, %v2006_v32  ;;  %v4086_v32 = vld [vmem:[#allocation42_spill] sm:$0xff] }
 0x19d   : > { %v2012_v0 = vpop.eup %2011  ;;  %1066 = vst [vmem:[%s3708_s11] sm:$0xff] %v1050_v10  ;;  %1695 = vst [vmem:[%s3708_s11 + $0x80] sm:$0xff] %v1226_v61  ;;  %v875_v36 = vsub.f32 1.0, %v2010_v16  ;;  %v819_v2 = vmul.f32 0.6931472, %v2008_v29  ;;  %v3714_v11 = vmul.f32 2.0, %v3626_v21  ;;  %2029 = vlog2.f32 %v785_v62 }
 0x19e   : > { %1711 = vst [vmem:[%s3708_s11 + $0x100] sm:$0xff] %v1403_v20  ;;  %v2014_v50 = vpop.eup %2013  ;;  %1074 = vst [vmem:[%s3708_s11 + $0x40] sm:$0xff] %v1058_v17  ;;  %v883_v59 = vsub.f32 1.0, %v2012_v0  ;;  %v830_v44 = vmul.f32 %v803_v4, %v3679_v22  ;;  %2031 = vlog2.f32 %v793_v8  ;;  %v769_v20 = vmul.f32 2.0, %v3659_v48  ;;  %v4089_v17 = vld [vmem:[#allocation44_spill] sm:$0xff]  ;;  %v4091_v48 = vld [vmem:[#allocation46_spill] sm:$0xff] }
 0x19f   : > { %1703 = vst [vmem:[%s3708_s11 + $0xc0] sm:$0xff] %v1234_v13  ;;  %1719 = vst [vmem:[%s3708_s11 + $0x140] sm:$0xff] %v1411_v41  ;;  %v2016_v51 = vpop.eup %2015  ;;  %v1051_v25 = vmul.f32 %v2985_v45, %v875_v36  ;;  %v1227_v21 = vmul.f32 %v2989_v38, %v875_v36  ;;  %v1404_v28 = vmul.f32 %v2994_v14, %v875_v36  ;;  %v805_v33 = vmul.f32 0.6931472, %v2014_v50  ;;  %v4090_v13 = vld [vmem:[#allocation45_spill] sm:$0xff] }
 0x1a0   : > { %v838_v57 = vmul.f32 %v819_v2, %v774_v40  ;;  %v2018_v49 = vpop.eup %2017  ;;  %v1059_v30 = vmul.f32 %v2998_v9, %v883_v59  ;;  %v1235_v22 = vmul.f32 %v3005_v23, %v883_v59  ;;  %v1412_v35 = vmul.f32 %v3007_v6, %v883_v59  ;;  %v4092_v2 = vld [vmem:[#allocation47_spill] sm:$0xff]  ;;  %v4093_v59 = vld [vmem:[#allocation48_spill] sm:$0xff] }
 0x1a1   : > { %v850_v47 = vmul.f32 1.442695, %v830_v44  ;;  %v2020_v1 = vpop.eup %2019  ;;  %1067 = vst [vmem:[%s3708_s11 + $0x8] sm:$0xff] %v1051_v25  ;;  %1696 = vst [vmem:[%s3708_s11 + $0x88] sm:$0xff] %v1227_v21  ;;  %v876_v45 = vsub.f32 1.0, %v2018_v49  ;;  %2033 = vrsqrt.f32 %v3696_v7  ;;  %v831_v8 = vmul.f32 %v805_v33, %v3690_v26  ;;  %v4087_v26 = vld [vmem:[#allocation28_spill] sm:$0xff] }
 0x1a2   : > { %1712 = vst [vmem:[%s3708_s11 + $0x108] sm:$0xff] %v1404_v28  ;;  %v866_v38 = vmul.f32 1.442695, %v838_v57  ;;  %v2022_v14 = vpop.eup %2021  ;;  %1075 = vst [vmem:[%s3708_s11 + $0x48] sm:$0xff] %v1059_v30  ;;  %v884_v9 = vsub.f32 1.0, %v2020_v1  ;;  %vm1165_vm3 = vcmp.eq.f32.partialorder %v4087_v26, inf }
 0x1a3   : > { %1704 = vst [vmem:[%s3708_s11 + $0xc8] sm:$0xff] %v1235_v22  ;;  %1720 = vst [vmem:[%s3708_s11 + $0x148] sm:$0xff] %v1412_v35  ;;  %2035 = vpow2.f32 %v850_v47  ;;  %v821_v23 = vmul.f32 0.6931472, %v2016_v51  ;;  %v3736_v6 = vadd.f32 1e-05, %v1274_v5  ;;  %v2024_v40 = vpop.eup %2023  ;;  %v1052_v42 = vmul.f32 %v3064_v43, %v876_v45 }
 0x1a4   : > { %v1228_v12 = vmul.f32 %v3085_v46, %v876_v45  ;;  %v1405_v55 = vmul.f32 %v3094_v18, %v876_v45  ;;  %2037 = vpow2.f32 %v866_v38  ;;  %v2026_v3 = vpop.eup %2025  ;;  %v1060_v27 = vmul.f32 %v4084_v54, %v884_v9  ;;  %v4094_v57 = vld [vmem:[#allocation29_spill] sm:$0xff]  ;;  %v4095_v45 = vld [vmem:[#allocation32_spill] sm:$0xff]  ;;  %v4097_v33 = vld [vmem:[#allocation50_spill] sm:$0xff] }
 0x1a5   : > { %v1236_v62 = vmul.f32 %v4085_v63, %v884_v9  ;;  %v1413_v53 = vmul.f32 %v4086_v32, %v884_v9  ;;  %v2028_v5 = vpop.eup %2027  ;;  %1068 = vst [vmem:[%s3708_s11 + $0x10] sm:$0xff] %v1052_v42  ;;  %v877_v43 = vsub.f32 1.0, %v2026_v3  ;;  %v839_v46 = vmul.f32 %v821_v23, %v3694_v19  ;;  %v4088_v19 = vld [vmem:[#allocation43_spill] sm:$0xff]  ;;  %v4099_v63 = vld [vmem:[#allocation18_spill] sm:$0xff] }
 0x1a6   : > { %1697 = vst [vmem:[%s3708_s11 + $0x90] sm:$0xff] %v1228_v12  ;;  %1713 = vst [vmem:[%s3708_s11 + $0x110] sm:$0xff] %v1405_v55  ;;  %v807_v18 = vmul.f32 0.6931472, %v2022_v14  ;;  %v823_v29 = vmul.f32 0.6931472, %v2024_v40  ;;  %2039 = vrsqrt.f32 %v3736_v6 }
 0x1a7   : > { %1076 = vst [vmem:[%s3708_s11 + $0x50] sm:$0xff] %v1060_v27  ;;  %1705 = vst [vmem:[%s3708_s11 + $0xd0] sm:$0xff] %v1236_v62  ;;  %v885_v10 = vsub.f32 1.0, %v2028_v5  ;;  %v852_v61 = vmul.f32 1.442695, %v831_v8  ;;  %v2030_v16 = vpop.eup %2029  ;;  %v1053_v24 = vmul.f32 %v4088_v19, %v877_v43  ;;  %v1229_v39 = vmul.f32 %v4089_v17, %v877_v43  ;;  %v4098_v14 = vld [vmem:[#allocation36_spill] sm:$0xff] }
 0x1a8   : > { %1721 = vst [vmem:[%s3708_s11 + $0x150] sm:$0xff] %v1413_v53  ;;  %v1406_v41 = vmul.f32 %v4090_v13, %v877_v43  ;;  %v868_v4 = vmul.f32 1.442695, %v839_v46  ;;  %v2032_v0 = vpop.eup %2031  ;;  %v832_v51 = vmul.f32 %v807_v18, %v3714_v11  ;;  %v840_v25 = vmul.f32 %v823_v29, %v3721_v58  ;;  %v4096_v58 = vld [vmem:[#allocation24_spill] sm:$0xff]  ;;  %v4100_v32 = vld [vmem:[#allocation19_spill] sm:$0xff]  ;;  %v4101_v8 = vld [vmem:[#allocation22_spill] sm:$0xff] }
 0x1a9   : > { %v1061_v36 = vmul.f32 %v4091_v48, %v885_v10  ;;  %v1237_v50 = vmul.f32 %v4092_v2, %v885_v10  ;;  %v1414_v44 = vmul.f32 %v4093_v59, %v885_v10  ;;  %2041 = vpow2.f32 %v852_v61  ;;  %1069 = vst [vmem:[%s3708_s11 + $0x18] sm:$0xff] %v1053_v24  ;;  %1698 = vst [vmem:[%s3708_s11 + $0x98] sm:$0xff] %v1229_v39  ;;  %v4102_v46 = vld [vmem:[#allocation20_spill] sm:$0xff]  ;;  %v4103_v29 = vld [vmem:[#allocation21_spill] sm:$0xff] }
 0x1aa   : > { %1714 = vst [vmem:[%s3708_s11 + $0x118] sm:$0xff] %v1406_v41  ;;  %2043 = vpow2.f32 %v868_v4  ;;  %v809_v21 = vmul.f32 0.6931472, %v2030_v16  ;;  %v1168_v28 = vand.u32 2147483648, %v4087_v26  ;;  %vm1342_vm4 = vcmp.eq.f32.partialorder %v4094_v57, inf  ;;  %v4104_v61 = vld [vmem:[#allocation23_spill] sm:$0xff] }
 0x1ab   : > { %1077 = vst [vmem:[%s3708_s11 + $0x58] sm:$0xff] %v1061_v36  ;;  %1706 = vst [vmem:[%s3708_s11 + $0xd8] sm:$0xff] %v1237_v50  ;;  %v777_v49 = vmul.f32 2.0, %v3661_v60  ;;  %v825_v30 = vmul.f32 0.6931472, %v2032_v0  ;;  %v2034_v22 = vpop.eup %2033  ;;  %v988_v11 = vmul.f32 %v4095_v45, %v3451_v15  ;;  %vm1040_vm6 = vcmp.eq.f32.partialorder %v3376_v31, 0.0 }
 0x1ac   : > { %1722 = vst [vmem:[%s3708_s11 + $0x158] sm:$0xff] %v1414_v44  ;;  %v854_v35 = vmul.f32 1.442695, %v832_v51  ;;  %v870_v47 = vmul.f32 1.442695, %v840_v25  ;;  %v833_v1 = vmul.f32 %v809_v21, %v769_v20  ;;  %vm1216_vm7 = vcmp.eq.f32.partialorder %v3380_v34, 0.0 }
 0x1ad   : > { %v2036_v38 = vpop.eup %2035  ;;  %vm1393_vm8 = vcmp.eq.f32.partialorder %v4096_v58, 0.0  ;;  %v1164_v60 = vmul.f32 %v4097_v33, %v4087_v26  ;;  %v1341_v9 = vmul.f32 %v4098_v14, %v4094_v57  ;;  %v1345_v23 = vand.u32 2147483648, %v4094_v57  ;;  %v4105_v50 = vld [vmem:[#allocation31_spill] sm:$0xff]  ;;  %v4106_v44 = vld [vmem:[#allocation25_spill] sm:$0xff]  ;;  %v4107_v25 = vld [vmem:[#allocation26_spill] sm:$0xff] }
 0x1ae   : > { %v841_v40 = vmul.f32 %v825_v30, %v777_v49  ;;  %v2038_v42 = vpop.eup %2037  ;;  %v878_v12 = vsub.f32 1.0, %v2036_v38  ;;  %2045 = vpow2.f32 %v854_v35  ;;  %v856_v55 = vmul.f32 1.442695, %v833_v1  ;;  %v4108_v30 = vld [vmem:[#allocation27_spill] sm:$0xff]  ;;  %v4109_v35 = vld [vmem:[#allocation49_spill] sm:$0xff]  ;;  %v4110_v1 = vld [vmem:[#allocation30_spill] sm:$0xff] }
 0x1af   : > { %vm991_vm9 = vcmp.eq.f32.partialorder %v3451_v15, 0.0  ;;  %vm1167_vm10 = vcmp.eq.f32.partialorder %v4087_v26, 0.0  ;;  %vm1344_vm12 = vcmp.eq.f32.partialorder %v4094_v57, 0.0  ;;  %vm1045_vm11 = vcmp.eq.f32.partialorder %v3664_v52, inf  ;;  %v4111_v33 = vld [vmem:[#allocation35_spill] sm:$0xff] }
 0x1b0   : > { %v886_v3 = vsub.f32 1.0, %v2038_v42  ;;  %2047 = vpow2.f32 %v870_v47  ;;  %v872_v54 = vmul.f32 1.442695, %v841_v40  ;;  %v1044_v27 = vmul.f32 %v3687_v37, %v3664_v52  ;;  %v2040_v43 = vpop.eup %2039 }
 0x1b1   : > { %v1054_v62 = vmul.f32 %v4099_v63, %v878_v12  ;;  %v1230_v53 = vmul.f32 %v4100_v32, %v878_v12  ;;  %v1407_v5 = vmul.f32 %v4101_v8, %v878_v12  ;;  %2049 = vpow2.f32 %v856_v55  ;;  %v4115_v12 = vld [vmem:[#allocation51_spill] sm:$0xff] }
 0x1b2   : > { %v1062_v18 = vmul.f32 %v4102_v46, %v886_v3  ;;  %v1238_v10 = vmul.f32 %v4103_v29, %v886_v3  ;;  %v1415_v20 = vmul.f32 %v4104_v61, %v886_v3  ;;  %2051 = vpow2.f32 %v872_v54  ;;  %v4117_v54 = vld [vmem:[#allocation52_spill] sm:$0xff] }
 0x1b3   : > { %1070 = vst [vmem:[%s3708_s11 + $0x20] sm:$0xff] %v1054_v62  ;;  %1699 = vst [vmem:[%s3708_s11 + $0xa0] sm:$0xff] %v1230_v53  ;;  %v990_v37 = vsel %vm989_vm2, %v3451_v15, %v988_v11  ;;  %v1166_v16 = vsel %vm1165_vm3, %v4087_v26, %v1164_v60  ;;  %v1343_v19 = vsel %vm1342_vm4, %v4094_v57, %v1341_v9  ;;  %v2042_v17 = vpop.eup %2041  ;;  %vm1047_vm14 = vcmp.eq.f32.partialorder %v3664_v52, 0.0  ;;  %v4113_v9 = vld [vmem:[#allocation37_spill] sm:$0xff] }
 0x1b4   : > { %1715 = vst [vmem:[%s3708_s11 + $0x120] sm:$0xff] %v1407_v5  ;;  %v1220_v24 = vmul.f32 %v2034_v22, %v3696_v7  ;;  %1078 = vst [vmem:[%s3708_s11 + $0x60] sm:$0xff] %v1062_v18  ;;  %v1048_v39 = vand.u32 2147483648, %v3664_v52  ;;  %vm1221_vm13 = vcmp.eq.f32.partialorder %v3696_v7, inf  ;;  %v1397_v13 = vmul.f32 %v2040_v43, %v3736_v6  ;;  %v2044_v41 = vpop.eup %2043  ;;  %v4120_v43 = vld [vmem:[#allocation33_spill] sm:$0xff] }
 0x1b5   : > { %1707 = vst [vmem:[%s3708_s11 + $0xe0] sm:$0xff] %v1238_v10  ;;  %1723 = vst [vmem:[%s3708_s11 + $0x160] sm:$0xff] %v1415_v20  ;;  %v879_v4 = vsub.f32 1.0, %v2042_v17  ;;  %v1046_v0 = vsel %vm1045_vm11, %v3664_v52, %v1044_v27  ;;  %vm1223_vm15 = vcmp.eq.f32.partialorder %v3696_v7, 0.0  ;;  %vm1398_vm0 = vcmp.eq.f32.partialorder %v3736_v6, inf }
 0x1b6   : > { %v887_v48 = vsub.f32 1.0, %v2044_v41  ;;  %v1224_v36 = vand.u32 2147483648, %v3696_v7  ;;  %vm1400_vm1 = vcmp.eq.f32.partialorder %v3736_v6, 0.0  ;;  %v1401_v2 = vand.u32 2147483648, %v3736_v6 }
 0x1b7   : > { %v1055_v59 = vmul.f32 %v4105_v50, %v879_v4  ;;  %v1231_v51 = vmul.f32 %v4106_v44, %v879_v4  ;;  %v1408_v21 = vmul.f32 %v4107_v25, %v879_v4  ;;  %v1222_v49 = vsel %vm1221_vm13, %v3696_v7, %v1220_v24 }
 0x1b8   : > { %v1063_v22 = vmul.f32 %v4108_v30, %v887_v48  ;;  %v1239_v47 = vmul.f32 %v4109_v35, %v887_v48  ;;  %v1416_v45 = vmul.f32 %v4110_v1, %v887_v48  ;;  %v1399_v11 = vsel %vm1398_vm0, %v3736_v6, %v1397_v13  ;;  %v2046_v38 = vpop.eup %2045 }
 0x1b9   : > { %1071 = vst [vmem:[%s3708_s11 + $0x28] sm:$0xff] %v1055_v59  ;;  %1700 = vst [vmem:[%s3708_s11 + $0xa8] sm:$0xff] %v1231_v51  ;;  %v4112_v60 = vand.u32 2147483648, %v3335_v56  ;;  %v4114_v40 = vand.u32 2147483648, %v3376_v31  ;;  %v4116_v55 = vand.u32 2147483648, %v3380_v34  ;;  %v4118_v27 = vand.u32 2147483648, %v4096_v58 }
 0x1ba   : > { %1716 = vst [vmem:[%s3708_s11 + $0x128] sm:$0xff] %v1408_v21  ;;  %v2048_v63 = vpop.eup %2047  ;;  %1079 = vst [vmem:[%s3708_s11 + $0x68] sm:$0xff] %v1063_v22  ;;  %v880_v31 = vsub.f32 1.0, %v2046_v38  ;;  %v4119_v62 = vand.u32 2147483648, %v3451_v15  ;;  %v1169_v34 = vsel %vm1167_vm10, %v1168_v28, %v1166_v16  ;;  %v1346_v58 = vsel %vm1344_vm12, %v1345_v23, %v1343_v19  ;;  %v4121_v23 = vld [vmem:[#allocation34_spill] sm:$0xff] }
 0x1bb   : > { %v1339_v14 = vsel %vm1337_vm5, %v4112_v60, %v4111_v33  ;;  %v1042_v42 = vsel %vm1040_vm6, %v4114_v40, %v4113_v9  ;;  %v1218_v3 = vsel %vm1216_vm7, %v4116_v55, %v4115_v12  ;;  %v1395_v56 = vsel %vm1393_vm8, %v4118_v27, %v4117_v54  ;;  %1708 = vst [vmem:[%s3708_s11 + $0xe8] sm:$0xff] %v1239_v47  ;;  %v2050_v53 = vpop.eup %2049 }
 0x1bc   : > { %1724 = vst [vmem:[%s3708_s11 + $0x168] sm:$0xff] %v1416_v45  ;;  %v993_v32 = vsel %vm991_vm9, %v4119_v62, %v990_v37  ;;  %v888_v8 = vsub.f32 1.0, %v2048_v63  ;;  %v1049_v5 = vsel %vm1047_vm14, %v1048_v39, %v1046_v0  ;;  %v1225_v15 = vsel %vm1223_vm15, %v1224_v36, %v1222_v49  ;;  %v2052_v28 = vpop.eup %2051 }
 0x1bd   : > { %v1402_v26 = vsel %vm1400_vm1, %v1401_v2, %v1399_v11  ;;  %v1056_v57 = vmul.f32 %v4120_v43, %v880_v31  ;;  %v1232_v46 = vmul.f32 %v4121_v23, %v880_v31  ;;  %v1409_v18 = vmul.f32 %v1339_v14, %v880_v31 }
 0x1be   : > { %v881_v52 = vsub.f32 1.0, %v2050_v53  ;;  %v1064_v29 = vmul.f32 %v1042_v42, %v888_v8  ;;  %v1240_v10 = vmul.f32 %v1218_v3, %v888_v8  ;;  %v1417_v7 = vmul.f32 %v1395_v56, %v888_v8 }
 0x1bf   : > { %v889_v61 = vsub.f32 1.0, %v2052_v28  ;;  %1072 = vst [vmem:[%s3708_s11 + $0x30] sm:$0xff] %v1056_v57  ;;  %1701 = vst [vmem:[%s3708_s11 + $0xb0] sm:$0xff] %v1232_v46 }
 0x1c0   : > { %1717 = vst [vmem:[%s3708_s11 + $0x130] sm:$0xff] %v1409_v18  ;;  %v1057_v6 = vmul.f32 %v993_v32, %v881_v52  ;;  %v1233_v20 = vmul.f32 %v1169_v34, %v881_v52  ;;  %v1410_v37 = vmul.f32 %v1346_v58, %v881_v52  ;;  %1080 = vst [vmem:[%s3708_s11 + $0x70] sm:$0xff] %v1064_v29 }
 0x1c1   : > { %1709 = vst [vmem:[%s3708_s11 + $0xf0] sm:$0xff] %v1240_v10  ;;  %1725 = vst [vmem:[%s3708_s11 + $0x170] sm:$0xff] %v1417_v7  ;;  %v1065_v16 = vmul.f32 %v1049_v5, %v889_v61  ;;  %v1241_v19 = vmul.f32 %v1225_v15, %v889_v61  ;;  %v1418_v24 = vmul.f32 %v1402_v26, %v889_v61 }
 0x1c2   : > { %1073 = vst [vmem:[%s3708_s11 + $0x38] sm:$0xff] %v1057_v6  ;;  %1702 = vst [vmem:[%s3708_s11 + $0xb8] sm:$0xff] %v1233_v20 }
 0x1c3   : > { %1718 = vst [vmem:[%s3708_s11 + $0x138] sm:$0xff] %v1410_v37  ;;  %1081 = vst [vmem:[%s3708_s11 + $0x78] sm:$0xff] %v1065_v16 }
 0x1c4   : > { %1710 = vst [vmem:[%s3708_s11 + $0xf8] sm:$0xff] %v1241_v19  ;;  %1726 = vst [vmem:[%s3708_s11 + $0x178] sm:$0xff] %v1418_v24 }
 0x1c5   : > { %2182 = shalt.err (!%p2179_p6)
}
 0x1c6   : > { %s2183_s14 = scalar_lea.hbm %s3889_s9, 6144  ;;  %s2187_s0 = scalar_lea.hbm %s3952_s3, 12288 }
 0x1c7   : > { %p2184_p10 = scmp.ne.s32.totalorder %s3889_s9, %s2183_s14  ;;  %p2188_p13 = scmp.lt.u32.totalorder %s3889_s9, %s3952_s3 }
 0x1c8   : > { %p2189_p5 = scmp.lt.u32.totalorder %s2187_s0, %s2183_s14  ;;  %p2191_p1 = scmp.lt.u32.totalorder %s2183_s14, %s3889_s9 }
 0x1c9   : > { %p2185_p11 = pnand %p2184_p10, %p4044_p0 }
 0x1ca   : > { %p2190_p9 = por %p2189_p5, %p2188_p13 }
 0x1cb   : > { %p2186_p3 = pneg %p2185_p11 }
 0x1cc   : > { %p2192_p2 = por %p2191_p1, %p2190_p9 }
 0x1ce   : > { %p2193_p7 = pnand %p2192_p2, %p2186_p3 }
 0x1d0   : > { %2196 = shalt.err (!%p2193_p7)
}
 0x1d1   : > { %1749 = dma.vmem_to_hbm [thread:$0]  (%p4044_p0), %s3891_s13, 6144, %s3889_s9, %s1437_s22, %s2272_s21, %s2272_s21, %s2273_s23  }
 0x1d2 PF: > { %s1490_s10 = sand.u32 1, %s2243_s15   ;;  %p4122_p4 = scmp.ne.s32.totalorder %s3976_s24, 0 }
 0x1d3   : > { %p4123_p8 = scmp.ge.s32.totalorder %s2263_s20, 2  ;;  %s1491_s11 = scalar_lea.sflag [#allocation4], %s1490_s10 }
 0x1d5   : > { %p1765_p12 = pnand %p4123_p8, %p4122_p4 }
 0x1d7   : > { %2234 = dma.done.wait (!%p1765_p12), %s1491_s11, 6144  }
 0x1d8   : > { %2236 = vsyncadd (!%p1765_p12), %s1491_s11, 4294961152  ;;  %s1500_s30 = scalar_lea.sflag [#allocation10], %s1490_s10 }
 0x1d9   : > { %2238 = dma.done.wait (!%p1765_p12), %s1500_s30, 2048  }
 0x1da   : > { %2240 = vsyncadd (!%p1765_p12), %s1500_s30, 4294965248  ;;  %s27_s20 = sadd.s32 1, %s2263_s20   ;;  %s4124_s6 = sld [smem:[#allocation17_spill]] }
 0x1db   : > { %p24_p6 = scmp.ge.s32.totalorder %s27_s20, 4   ;;  %s4125_s21 = sld [smem:[#allocation16_spill]] }
 0x1dc   : > { %s4126_s15 = smov %s2247_s16  ;;  %s4127_s16 = smov %s2251_s17 }
 0x1dd   : > { %s4129_s18 = smov %s2259_s19  ;;  %26 = sbr.rel (!%p24_p6) target bundleno = 13 (0xd), region = 116 }
 0x1e0   : > { %s4128_s17 = smov %s4124_s6 }
 0x1e1   : > { %s4130_s19 = smov %s4125_s21 }
 0x1e4   :  { %1505 = vsyncpa [#allocation3], 1 }
 0x1e5   :  { %1507 = vsyncpa [#allocation3 + $0x1], 1 }
 0x1e6   :  { %1508 = vsyncpa [#allocation6], 1 }
 0x1e7   :  { %1510 = vsyncpa [#allocation6 + $0x1], 1 }
 0x1e8   :  { %1511 = vsyncpa [#allocation4], 1 }
 0x1e9   :  { %1513 = vsyncpa [#allocation4 + $0x1], 1 }
 0x1ea   :  { %1514 = vsyncpa [#allocation10], 1 }
 0x1eb   :  { %1516 = vsyncpa [#allocation10 + $0x1], 1 }

// kernel: tmonet_forward.4
= control target key start
LH: loop header
LB: loop body
LE: loop exit
PB: predicated region body
PF: predicated region fallthrough
CT: control target
= control target key end

     0   :  { %13 = vsyncpa [#allocation5], 0  ;;  %s5418_s0 = inlined_call_operand.vmem [shape: f32[2,1,4], index: 0, kind: input, shape index: {}]   ;;  %s5419_s1 = inlined_call_operand.vmem [shape: f32[9,4], index: 1, kind: input, shape index: {}]   ;;  %s5420_s2 = inlined_call_operand.vmem [shape: f32[38,72], index: 2, kind: input, shape index: {}]   ;;  %s5421_s3 = inlined_call_operand.vmem [shape: f32[38,1], index: 3, kind: input, shape index: {}]   ;;  %s5422_s4 = inlined_call_operand.vmem [shape: f32[2,128], index: 4, kind: input, shape index: {}]   ;;  %s5423_s5 = inlined_call_operand.hbm [shape: f32[2,1,4], index: 5, kind: output, shape index: {0}]   ;;  %s5424_s6 = inlined_call_operand.hbm [shape: f32[2,1,4], index: 6, kind: output, shape index: {1}]   ;;  %s5425_s7 = inlined_call_operand.hbm [shape: f32[2,2,256], index: 7, kind: output, shape index: {2}]  }
   0x1   :  { %15 = vsyncpa [#allocation5 + $0x1], 0 }
   0x2   :  { %16 = vsyncpa [#allocation7], 0 }
   0x3   :  { %18 = vsyncpa [#allocation7 + $0x1], 0  ;;  %s4376_s24 = smov 0   ;;  %s4378_s25 = smov 0  }
   0x4   :  { %s4380_s26 = smov 0   ;;  %s4382_s27 = smov 0  }
   0x5 LB: > { %s4397_s28 = sadd.s32 4294967295, %s4321_s27   ;;  %s5426_s29 = sadd.s32 4294967294, %s4321_s27   ;;  %s4321_s27 = sphi %s4382_s27, %s5435_s27   ;;  %s4317_s26 = sphi %s4380_s26, %s5434_s26   ;;  %s4313_s25 = sphi %s4378_s25, %s5433_s25   ;;  %s4309_s24 = sphi %s4376_s24, %s5432_s24  }
   0x6   : > { %s4401_s30 = sadd.s32 1, %s4321_s27   ;;  %s141_s8 = sadd.s32 1, %s4317_s26 }
   0x7   : > { %s138_s9 = ssub.s32 %s4321_s27, %s4401_s30  ;;  %p151_p0 = scmp.ne.s32.totalorder %s4317_s26, %s4313_s25 }
   0x8   : > { %p139_p1 = scmp.eq.s32.totalorder %s138_s9, 0  ;;  %p152_p2 = scmp.eq.s32.totalorder %s4397_s28, 1 }
   0x9   : > { %p157_p3 = scmp.ne.s32.totalorder %s4313_s25, %s4309_s24  ;;  %p158_p4 = scmp.eq.s32.totalorder %s5426_s29, 1 }
   0xa   : > { %s4414_s10 = scalar_select %p139_p1, %s4317_s26, %s141_s8  }
   0xb   : > { %p4416_p5 = por %p152_p2, %p151_p0  ;;  %p4420_p6 = por %p158_p4, %p157_p3 }
   0xc   : > { %p3508_p7 = scmp.ge.s32.totalorder %s4321_s27, 1  ;;  %p246_p8 = scmp.lt.s32.totalorder %s4321_s27, 3 }
   0xe   : > { %p247_p9 = pnand %p3508_p7, %p246_p8 }
   0xf   : > { %v315_v0 = vld [vmem:[%s5419_s1] sm:$0x1] (!%p247_p9)  ;;  %s4323_s15 = smov (!%p247_p9), 125   ;;  %v353_v1 = vld [vmem:[%s5419_s1 + $0x2] sm:$0x1] (!%p247_p9)  ;;  %s4324_s20 = smov (!%p247_p9), 127  }
  0x10   : > { %250 = sbr.rel (%p247_p9) target bundleno = 4295 (0x10c7), region = 40  ;;  %317 = vrot.lane.b32.xlu0 (!%p247_p9), %v315_v0, %s4323_s15  ;;  %v334_v2 = vld [vmem:[%s5419_s1 + $0x1] sm:$0x1] (!%p247_p9)  ;;  %355 = vrot.lane.b32.xlu1 (!%p247_p9), %v353_v1, %s4324_s20  ;;  %v372_v3 = vld [vmem:[%s5419_s1 + $0x3] sm:$0x1] (!%p247_p9)  ;;  %p284_p10 = scmp.lt.s32.totalorder (!%p247_p9), %s4397_s28, 1 }
  0x11   : > { %v4325_v4 = vmov (!%p247_p9), 0.0   ;;  %vm288_vm0 = vcmask (!%p247_p9), 56320   ;;  %s4326_s23 = smov (!%p247_p9), 126   ;;  %v393_v5 = vld [vmem:[%s5419_s1 + $0x5] sm:$0x1] (!%p247_p9)  ;;  %vm311_vm1 = vcmask (!%p247_p9), 24576  }
  0x12   : > { %287 = vst [vmem:[#allocation2] sm:$0xff] (!%p247_p9), %v4325_v4  ;;  %289 = vst.msk [vmem:[#allocation2 + $0x8] sm:$0xff] (!%p247_p9), %vm288_vm0, %v4325_v4  ;;  %v405_v6 = vld [vmem:[%s5419_s1 + $0x6] sm:$0x1] (!%p247_p9)  ;;  %s4327_s21 = smov (!%p247_p9), 1   ;;  %s4328_s14 = smov (!%p247_p9), 2  }
  0x13   : > { %v417_v8 = vld [vmem:[%s5419_s1 + $0x7] sm:$0x1] (!%p247_p9)  ;;  %v429_v9 = vld [vmem:[%s5419_s1 + $0x8] sm:$0x1] (!%p247_p9)  ;;  %vm290_vm2 = vcmask (!%p247_p9), 31744   ;;  %v4330_v17 = vmov (!%p247_p9), 0.0|0.0  }
  0x14   : > { %336 = vrot.lane.b32.xlu0 (!%p247_p9), %v334_v2, %s4326_s23  ;;  %374 = vrot.lane.b32.xlu1 (!%p247_p9), %v372_v3, %s4324_s20  ;;  %291 = vst.msk [vmem:[#allocation3] sm:$0xff] (!%p247_p9), %vm290_vm2, %v4325_v4  ;;  %292 = vst.msk [vmem:[#allocation3 + $0x8] sm:$0xff] (!%p247_p9), %vm290_vm2, %v4325_v4  ;;  %v389_v18 = vld [vmem:[%s5419_s1 + $0x4] sm:$0x1] (!%p247_p9)  ;;  %vm4331_vm3 = vmmov (!%p247_p9), 0   ;;  %v4332_v37 = vmov (!%p247_p9), 0  }
  0x15   : > { %293 = vst.msk [vmem:[#allocation3 + $0x10] sm:$0xff] (!%p247_p9), %vm290_vm2, %v4325_v4  ;;  %294 = vst.msk [vmem:[#allocation3 + $0x18] sm:$0xff] (!%p247_p9), %vm290_vm2, %v4325_v4  ;;  %3996 = vmatprep.subr.bf16.mxu0 (!%p247_p9), %v4330_v17  ;;  %4008 = vmatprep.subr.bf16.mxu1 (!%p247_p9), %v4330_v17  ;;  %v305_v35 = vld [vmem:[%s5421_s3] sm:$0xff] (!%p247_p9)  ;;  %v4561_v44 = vld [vmem:[%s5419_s1 + $0x8] ss:$0 sm:$0xff] (!%p247_p9)  ;;  %vm328_vm4 = vcmask (!%p247_p9), 23552  }
  0x16   : > { %295 = vst.msk [vmem:[#allocation3 + $0x20] sm:$0xff] (!%p247_p9), %vm290_vm2, %v4325_v4  ;;  %296 = vst.msk [vmem:[#allocation3 + $0x28] sm:$0xff] (!%p247_p9), %vm290_vm2, %v4325_v4  ;;  %3763 = vmatprep.mubr.msk.f32.mxu0 (!%p247_p9), %vm4331_vm3, %v4325_v4  ;;  %3784 = vmatprep.mubr.msk.f32.mxu1 (!%p247_p9), %vm4331_vm3, %v4325_v4  ;;  %v4512_v36 = vld [vmem:[%s5419_s1] ss:$0 sm:$0xff] (!%p247_p9)  ;;  %v4519_v38 = vld [vmem:[%s5419_s1 + $0x1] ss:$0 sm:$0xff] (!%p247_p9) }
  0x17   : > { %s285_s8 = scalar_select %p284_p10, %s4397_s28, 1  ;;  %297 = vst.msk [vmem:[#allocation3 + $0x30] sm:$0xff] %vm290_vm2, %v4325_v4  ;;  %298 = vst.msk [vmem:[#allocation3 + $0x38] sm:$0xff] %vm290_vm2, %v4325_v4  ;;  %4187 = vset.pattern.permute.xlu0 %v4332_v37  ;;  %4188 = vset.pattern.permute.xlu1 %v4332_v37  ;;  %v4524_v39 = vld [vmem:[%s5419_s1 + $0x2] ss:$0 sm:$0xff]  ;;  %vm347_vm5 = vcmask 15360  }
  0x18   : > { %395 = vrot.lane.b32.xlu0 %v393_v5, %s4327_s21  ;;  %407 = vrot.lane.b32.xlu1 %v405_v6, %s4327_s21  ;;  %299 = vst.msk [vmem:[#allocation3 + $0x40] sm:$0xff] %vm290_vm2, %v4325_v4  ;;  %v4533_v40 = vld [vmem:[%s5419_s1 + $0x3] ss:$0 sm:$0xff]  ;;  %v4538_v41 = vld [vmem:[%s5419_s1 + $0x5] ss:$0 sm:$0xff]  ;;  %vm366_vm6 = vcmask 7168  }
  0x19   : > { %s286_s19 = scalar_lea.vmem %s5418_s0, %s285_s8  ;;  %s4329_s8 = smov 3   ;;  %v313_v10 = vld [vmem:[#allocation2] ss:$0 sm:$0xff]  ;;  %v4547_v42 = vld [vmem:[%s5419_s1 + $0x6] ss:$0 sm:$0xff]  ;;  %vm454_vm7 = vcmask 588800  }
  0x1a   : > { %v310_v7 = vld [vmem:[%s286_s19] sm:$0x1]  ;;  %v4552_v43 = vld [vmem:[%s5419_s1 + $0x7] ss:$0 sm:$0xff]  ;;  %vm529_vm8 = vcmask 27648   ;;  %vm1275_vm9 = vcmask 31748  }
  0x1b   : > { %312 = vst.msk [vmem:[#allocation2 + $0x8] sm:$0x1] %vm311_vm1, %v310_v7  ;;  %v531_v5 = vld [vmem:[#allocation2] sm:$0xf]  ;;  %s5087_s9 = sand.u32 1, %s4313_s25   ;;  %vm2452_vm10 = vcmask 1042432  }
  0x1c   : > { %419 = vrot.lane.b32.xlu0 %v417_v8, %s4328_s14  ;;  %431 = vrot.lane.b32.xlu1 %v429_v9, %s4329_s8  ;;  %s5427_s13 = scalar_lea.vmem [#allocation4], %s5087_s9  ;;  %vm3048_vm11 = vcmask 1041408   ;;  %s3509_s29 = sshll.u32 %s5087_s9, 2 }
  0x1d   : > { %s5255_s16 = scalar_lea.vmem [#allocation8], %s3509_s29 }
  0x22   : > { %v314_v11 = vld [vmem:[#allocation2 + $0x8] ss:$0 sm:$0xff] }
  0x23   : > { %v390_v21 = vmul.f32 %v389_v18, %v314_v11 }
  0x25   : > { %391 = vst.msk [vmem:[#allocation3 + $0x20] sm:$0x1] %vm311_vm1, %v390_v21 }
  0x2c   : > { %v444_v3 = vld [vmem:[#allocation3 + $0x20] sm:$0xff] }
  0x82   : > { %v318_v12 = vpop.permute.xlu0 %317  ;;  %v356_v15 = vpop.permute.xlu1 %355 }
  0x83   : > { %v320_v13 = vmul.f32 %v318_v12, %v313_v10  ;;  %v321_v14 = vmul.f32 %v318_v12, %v314_v11  ;;  %v358_v22 = vmul.f32 %v356_v15, %v313_v10  ;;  %v359_v23 = vmul.f32 %v356_v15, %v314_v11 }
  0x85   : > { %324 = vrot.lane.b32.xlu0 %v320_v13, %s4329_s8  ;;  %326 = vrot.lane.b32.xlu1 %v321_v14, %s4329_s8  ;;  %v4585_v14 = vld [vmem:[%s5420_s2] sm:$0xff] }
  0x86   : > { %v337_v16 = vpop.permute.xlu0 %336  ;;  %v375_v24 = vpop.permute.xlu1 %374 }
  0x87   : > { %v339_v19 = vmul.f32 %v337_v16, %v313_v10  ;;  %v340_v20 = vmul.f32 %v337_v16, %v314_v11  ;;  %v377_v26 = vmul.f32 %v375_v24, %v313_v10  ;;  %v378_v27 = vmul.f32 %v375_v24, %v314_v11  ;;  %v553_v16 = vld [vmem:[#allocation2] sm:$0xf] }
  0x89   : > { %343 = vrot.lane.b32.xlu0 %v339_v19, %s4328_s14  ;;  %345 = vrot.lane.b32.xlu1 %v340_v20, %s4328_s14  ;;  %v575_v20 = vld [vmem:[#allocation2] sm:$0xf] }
  0x8a   : > { %v396_v25 = vpop.permute.xlu0 %395  ;;  %v408_v28 = vpop.permute.xlu1 %407 }
  0x8b   : > { %v398_v29 = vmul.f32 %v396_v25, %v314_v11  ;;  %v410_v30 = vmul.f32 %v408_v28, %v314_v11 }
  0x8d   : > { %362 = vrot.lane.b32.xlu0 %v358_v22, %s4327_s21  ;;  %364 = vrot.lane.b32.xlu1 %v359_v23, %s4327_s21  ;;  %v597_v23 = vld [vmem:[#allocation2] sm:$0xf] }
  0x8e   : > { %v420_v31 = vpop.permute.xlu0 %419  ;;  %v432_v32 = vpop.permute.xlu1 %431 }
  0x8f   : > { %v422_v33 = vmul.f32 %v420_v31, %v314_v11  ;;  %v434_v34 = vmul.f32 %v432_v32, %v314_v11  ;;  %v4605_v31 = vld [vmem:[%s5419_s1 + $0x4] ss:$0 sm:$0xff] }
  0x91   : > { %381 = vrot.lane.b32.xlu0 %v377_v26, %s4327_s21  ;;  %383 = vrot.lane.b32.xlu1 %v378_v27, %s4327_s21 }
  0x95   : > { %400 = vrot.lane.b32.xlu0 %v398_v29, %s4324_s20  ;;  %412 = vrot.lane.b32.xlu1 %v410_v30, %s4324_s20 }
  0x99   : > { %424 = vrot.lane.b32.xlu0 %v422_v33, %s4326_s23  ;;  %436 = vrot.lane.b32.xlu1 %v434_v34, %s4323_s15 }
  0x9d   : > { %539 = vrot.lane.b32.xlu1 %v4512_v36, %s4323_s15  ;;  %451 = vperm.xlu0 %4187, %v305_v35  }
  0xa1   : > { %561 = vrot.lane.b32.xlu1 %v4519_v38, %s4326_s23  ;;  %583 = vrot.lane.b32.xlu0 %v4524_v39, %s4324_s20 }
  0xa5   : > { %605 = vrot.lane.b32.xlu1 %v4533_v40, %s4324_s20  ;;  %634 = vrot.lane.b32.xlu0 %v4538_v41, %s4327_s21 }
  0xa9   : > { %650 = vrot.lane.b32.xlu1 %v4547_v42, %s4327_s21  ;;  %666 = vrot.lane.b32.xlu0 %v4552_v43, %s4328_s14 }
  0xad   : > { %682 = vrot.lane.b32.xlu1 %v4561_v44, %s4329_s8 }
  0xf7   : > { %v325_v45 = vpop.permute.xlu0 %324  ;;  %v327_v46 = vpop.permute.xlu1 %326 }
  0xf8   : > { %v329_v47 = vsel %vm328_vm4, %v325_v45, %v327_v46 }
  0xf9   : > { %331 = vst.msk [vmem:[#allocation3] sm:$0x1] %vm311_vm1, %v329_v47 }
  0xfb   : > { %v344_v48 = vpop.permute.xlu0 %343  ;;  %v346_v49 = vpop.permute.xlu1 %345 }
  0xfc   : > { %v348_v50 = vsel %vm347_vm5, %v344_v48, %v346_v49 }
  0xfd   : > { %350 = vst.msk [vmem:[#allocation3 + $0x8] sm:$0x1] %vm311_vm1, %v348_v50 }
  0xff   : > { %v363_v51 = vpop.permute.xlu0 %362  ;;  %v365_v52 = vpop.permute.xlu1 %364 }
 0x100   : > { %v367_v53 = vsel %vm366_vm6, %v363_v51, %v365_v52  ;;  %v440_v57 = vld [vmem:[#allocation3] sm:$0xff] }
 0x101   : > { %369 = vst.msk [vmem:[#allocation3 + $0x10] sm:$0x1] %vm311_vm1, %v367_v53 }
 0x103   : > { %v382_v54 = vpop.permute.xlu0 %381  ;;  %v384_v55 = vpop.permute.xlu1 %383 }
 0x104   : > { %v385_v56 = vsel %vm366_vm6, %v382_v54, %v384_v55  ;;  %v441_v58 = vld [vmem:[#allocation3 + $0x8] sm:$0xff] }
 0x105   : > { %387 = vst.msk [vmem:[#allocation3 + $0x18] sm:$0x1] %vm311_vm1, %v385_v56  ;;  %v3997_v59 = vpack.c.bf16 %v441_v58, %v440_v57 }
 0x107   : > { %3998 = vmatpush3.bf16.msra.mxu0 %v3997_v59  ;;  %v401_v60 = vpop.permute.xlu0 %400  ;;  %v413_v61 = vpop.permute.xlu1 %412 }
 0x108   : > { %403 = vst.msk [vmem:[#allocation3 + $0x28] sm:$0x1] %vm311_vm1, %v401_v60  ;;  %415 = vst.msk [vmem:[#allocation3 + $0x30] sm:$0x1] %vm311_vm1, %v413_v61  ;;  %3999 = vmatprep.subr.bf16.mxu0 %v4330_v17  ;;  %v442_v0 = vld [vmem:[#allocation3 + $0x10] sm:$0xff] }
 0x10b   : > { %v425_v62 = vpop.permute.xlu0 %424  ;;  %v437_v63 = vpop.permute.xlu1 %436 }
 0x10c   : > { %427 = vst.msk [vmem:[#allocation3 + $0x38] sm:$0x1] %vm311_vm1, %v425_v62  ;;  %v443_v1 = vld [vmem:[#allocation3 + $0x18] sm:$0xff]  ;;  %439 = vst.msk [vmem:[#allocation3 + $0x40] sm:$0x1] %vm311_vm1, %v437_v63 }
 0x10d   : > { %v4000_v2 = vpack.c.bf16 %v443_v1, %v442_v0 }
 0x10f   : > { %4001 = vmatpush3.bf16.msra.mxu0 %v4000_v2  ;;  %v445_v6 = vld [vmem:[#allocation3 + $0x28] sm:$0xff]  ;;  %v540_v7 = vpop.permute.xlu1 %539  ;;  %v446_v10 = vld [vmem:[#allocation3 + $0x30] sm:$0xff] }
 0x110   : > { %4002 = vmatprep.subr.bf16.mxu0 %v4330_v17  ;;  %v4003_v8 = vpack.c.bf16 %v445_v6, %v444_v3  ;;  %v542_v9 = vmul.f32 %v540_v7, %v531_v5 }
 0x112   : > { %546 = vrot.lane.b32.xlu0 %v542_v9, %s4329_s8 }
 0x113   : > { %4004 = vmatpush3.bf16.msra.mxu0 %v4003_v8  ;;  %v447_v11 = vld [vmem:[#allocation3 + $0x38] sm:$0xff]  ;;  %v448_v13 = vld [vmem:[#allocation3 + $0x40] sm:$0xff]  ;;  %v562_v18 = vpop.permute.xlu1 %561  ;;  %v777_v8 = vld [vmem:[#allocation2] sm:$0xf] }
 0x114   : > { %4005 = vmatprep.subr.bf16.mxu0 %v4330_v17  ;;  %v4006_v12 = vpack.c.bf16 %v447_v11, %v446_v10  ;;  %v564_v19 = vmul.f32 %v562_v18, %v553_v16 }
 0x116   : > { %568 = vrot.lane.b32.xlu0 %v564_v19, %s4328_s14 }
 0x117   : > { %4007 = vmatpush3.bf16.msra.mxu0 %v4006_v12  ;;  %v606_v24 = vpop.permute.xlu1 %605 }
 0x118   : > { %3761 = vmatprep.subr.mxu0 %v4325_v4  ;;  %v608_v25 = vmul.f32 %v606_v24, %v597_v23 }
 0x11b   : > { %3762 = vmatpush3.msra.mxu0 %v448_v13  ;;  %v651_v54 = vpop.permute.xlu1 %650 }
 0x11c   : > { %3764 = vmatmul.mubr.msk.f32.vlgmr.msra.gmra.mrb[0].mxu0 %vm454_vm7, %v4585_v14  ;;  %4020 = vmatprep.subr.bf16.mxu0 %v4330_v17  ;;  %v4592_v15 = vpop.permute.xlu0 %451 }
 0x11d   : > { %3805 = vmatprep.mubr.msk.f32.mxu0 %vm4331_vm3, %v4325_v4 }
 0x11f   : > { %v683_v59 = vpop.permute.xlu1 %682 }
 0x120   : > { %v584_v21 = vpop.permute.xlu0 %583 }
 0x121   : > { %v586_v22 = vmul.f32 %v584_v21, %v575_v20 }
 0x123   : > { %590 = vrot.lane.b32.xlu0 %v586_v22, %s4327_s21 }
 0x124   : > { %v635_v30 = vpop.permute.xlu0 %634 }
 0x127   : > { %612 = vrot.lane.b32.xlu0 %v608_v25, %s4327_s21 }
 0x128   : > { %v667_v37 = vpop.permute.xlu0 %666 }
 0x184   : > { %v547_v61 = vpop.permute.xlu0 %546 }
 0x188   : > { %v569_v62 = vpop.permute.xlu0 %568 }
 0x195   : > { %v591_v63 = vpop.permute.xlu0 %590 }
 0x199   : > { %v613_v0 = vpop.permute.xlu0 %612 }
 0x1ef   : > { %v524_v26 = vpop.f32.mrb[0].mxu0 }
 0x1f0   : > { %v525_v27 = vadd.f32 %v524_v26, %v4592_v15  ;;  %v3765_v28 = vpop.f32.mrb[1].mxu0 }
 0x1f2   : > { %v4598_v29 = vmax.f32 %v525_v27, 0.0 }
 0x1f4   : > { %530 = vst.msk [vmem:[#allocation2 + $0x8] sm:$0xf] %vm529_vm8, %v4598_v29 }
 0x1fb   : > { %v627_v32 = vld [vmem:[#allocation2 + $0x8] sm:$0xf] }
 0x1fc   : > { %v637_v33 = vmul.f32 %v635_v30, %v627_v32  ;;  %v532_v34 = vld [vmem:[#allocation2 + $0x8] sm:$0xf] }
 0x1fd   : > { %v619_v35 = vld [vmem:[#allocation2 + $0x8] sm:$0xf]  ;;  %v543_v46 = vmul.f32 %v540_v7, %v532_v34  ;;  %v700_v34 = vrot.slane %v4585_v14, 4  ;;  %v843_v14 = vld [vmem:[#allocation2] sm:$0xf] }
 0x1fe   : > { %v659_v45 = vld [vmem:[#allocation2 + $0x8] sm:$0xf]  ;;  %v625_v47 = vmul.f32 %v4605_v31, %v619_v35  ;;  %639 = vrot.lane.b32.xlu0 %v637_v33, %s4324_s20 }
 0x1ff   : > { %v554_v48 = vld [vmem:[#allocation2 + $0x8] sm:$0xf]  ;;  %548 = vrot.lane.b32.xlu1 %v543_v46, %s4329_s8  ;;  %v669_v49 = vmul.f32 %v667_v37, %v659_v45  ;;  %v799_v37 = vld [vmem:[#allocation2] sm:$0xf] }
 0x200   : > { %626 = vst.msk [vmem:[#allocation3 + $0x20] sm:$0xf] %vm529_vm8, %v625_v47  ;;  %v565_v50 = vmul.f32 %v562_v18, %v554_v48  ;;  %v576_v51 = vld [vmem:[#allocation2 + $0x8] sm:$0xf]  ;;  %v821_v47 = vld [vmem:[#allocation2] sm:$0xf] }
 0x201   : > { %v587_v52 = vmul.f32 %v584_v21, %v576_v51  ;;  %v598_v53 = vld [vmem:[#allocation2 + $0x8] sm:$0xf] }
 0x202   : > { %671 = vrot.lane.b32.xlu0 %v669_v49, %s4326_s23  ;;  %v609_v55 = vmul.f32 %v606_v24, %v598_v53  ;;  %v643_v56 = vld [vmem:[#allocation2 + $0x8] sm:$0xf] }
 0x203   : > { %570 = vrot.lane.b32.xlu1 %v565_v50, %s4328_s14  ;;  %v653_v57 = vmul.f32 %v651_v54, %v643_v56  ;;  %v675_v58 = vld [vmem:[#allocation2 + $0x8] sm:$0xf] }
 0x204   : > { %v685_v60 = vmul.f32 %v683_v59, %v675_v58 }
 0x206   : > { %785 = vrot.lane.b32.xlu0 %v4512_v36, %s4323_s15 }
 0x207   : > { %592 = vrot.lane.b32.xlu1 %v587_v52, %s4327_s21  ;;  %v695_v27 = vld [vmem:[#allocation3 + $0x20] sm:$0xff]  ;;  %v701_v52 = vrot.slane %v4592_v15, 4 }
 0x20a   : > { %829 = vrot.lane.b32.xlu0 %v4524_v39, %s4324_s20 }
 0x20b   : > { %614 = vrot.lane.b32.xlu1 %v609_v55, %s4327_s21 }
 0x20e   : > { %880 = vrot.lane.b32.xlu0 %v4538_v41, %s4327_s21 }
 0x20f   : > { %655 = vrot.lane.b32.xlu1 %v653_v57, %s4324_s20 }
 0x212   : > { %912 = vrot.lane.b32.xlu0 %v4552_v43, %s4328_s14 }
 0x213   : > { %687 = vrot.lane.b32.xlu1 %v685_v60, %s4323_s15 }
 0x217   : > { %807 = vrot.lane.b32.xlu1 %v4519_v38, %s4326_s23 }
 0x21b   : > { %851 = vrot.lane.b32.xlu1 %v4533_v40, %s4324_s20 }
 0x21f   : > { %896 = vrot.lane.b32.xlu1 %v4547_v42, %s4327_s21 }
 0x223   : > { %928 = vrot.lane.b32.xlu1 %v4561_v44, %s4329_s8 }
 0x270   : > { %v640_v1 = vpop.permute.xlu0 %639 }
 0x271   : > { %642 = vst.msk [vmem:[#allocation3 + $0x28] sm:$0xf] %vm529_vm8, %v640_v1  ;;  %v549_v2 = vpop.permute.xlu1 %548 }
 0x272   : > { %v550_v3 = vsel %vm328_vm4, %v547_v61, %v549_v2 }
 0x273   : > { %552 = vst.msk [vmem:[#allocation3] sm:$0xf] %vm529_vm8, %v550_v3 }
 0x274   : > { %v672_v5 = vpop.permute.xlu0 %671 }
 0x275   : > { %674 = vst.msk [vmem:[#allocation3 + $0x38] sm:$0xf] %vm529_vm8, %v672_v5  ;;  %v571_v6 = vpop.permute.xlu1 %570 }
 0x276   : > { %v572_v7 = vsel %vm347_vm5, %v569_v62, %v571_v6  ;;  %v306_v6 = vld [vmem:[%s5421_s3 + $0x8] sm:$0xff] }
 0x277   : > { %574 = vst.msk [vmem:[#allocation3 + $0x8] sm:$0xf] %vm529_vm8, %v572_v7 }
 0x278   : > { %v4639_v9 = vpop.permute.xlu0 %785  ;;  %v696_v26 = vld [vmem:[#allocation3 + $0x28] sm:$0xff] }
 0x279   : > { %v593_v10 = vpop.permute.xlu1 %592  ;;  %v788_v11 = vmul.f32 %v4639_v9, %v777_v8  ;;  %v4015_v28 = vpack.c.bf16 %v696_v26, %v695_v27 }
 0x27a   : > { %v594_v12 = vsel %vm366_vm6, %v591_v63, %v593_v10  ;;  %v691_v18 = vld [vmem:[#allocation3] sm:$0xff] }
 0x27b   : > { %596 = vst.msk [vmem:[#allocation3 + $0x10] sm:$0xf] %vm529_vm8, %v594_v12  ;;  %792 = vrot.lane.b32.xlu0 %v788_v11, %s4329_s8 }
 0x27c   : > { %v698_v32 = vld [vmem:[#allocation3 + $0x38] sm:$0xff]  ;;  %v830_v48 = vpop.permute.xlu0 %829 }
 0x27d   : > { %v615_v13 = vpop.permute.xlu1 %614  ;;  %v832_v49 = vmul.f32 %v830_v48, %v821_v47 }
 0x27e   : > { %v616_v16 = vsel %vm366_vm6, %v613_v0, %v615_v13  ;;  %v692_v19 = vld [vmem:[#allocation3 + $0x8] sm:$0xff] }
 0x27f   : > { %618 = vst.msk [vmem:[#allocation3 + $0x18] sm:$0xf] %vm529_vm8, %v616_v16  ;;  %v4009_v20 = vpack.c.bf16 %v692_v19, %v691_v18 }
 0x280   : > { %v881_v57 = vpop.permute.xlu0 %880 }
 0x281   : > { %4010 = vmatpush3.bf16.msra.mxu1 %v4009_v20  ;;  %v656_v21 = vpop.permute.xlu1 %655 }
 0x282   : > { %658 = vst.msk [vmem:[#allocation3 + $0x30] sm:$0xf] %vm529_vm8, %v656_v21  ;;  %4011 = vmatprep.subr.bf16.mxu1 %v4330_v17  ;;  %v693_v23 = vld [vmem:[#allocation3 + $0x10] sm:$0xff] }
 0x284   : > { %v913_v62 = vpop.permute.xlu0 %912 }
 0x285   : > { %v688_v22 = vpop.permute.xlu1 %687 }
 0x286   : > { %690 = vst.msk [vmem:[#allocation3 + $0x40] sm:$0xf] %vm529_vm8, %v688_v22  ;;  %v694_v24 = vld [vmem:[#allocation3 + $0x18] sm:$0xff] }
 0x287   : > { %v4012_v25 = vpack.c.bf16 %v694_v24, %v693_v23 }
 0x289   : > { %4013 = vmatpush3.bf16.msra.mxu1 %v4012_v25  ;;  %v697_v30 = vld [vmem:[#allocation3 + $0x30] sm:$0xff]  ;;  %v808_v45 = vpop.permute.xlu1 %807 }
 0x28a   : > { %4014 = vmatprep.subr.bf16.mxu1 %v4330_v17  ;;  %v4018_v33 = vpack.c.bf16 %v698_v32, %v697_v30  ;;  %v810_v46 = vmul.f32 %v808_v45, %v799_v37 }
 0x28c   : > { %814 = vrot.lane.b32.xlu0 %v810_v46, %s4328_s14 }
 0x28d   : > { %4016 = vmatpush3.bf16.msra.mxu1 %v4015_v28  ;;  %v699_v35 = vld [vmem:[#allocation3 + $0x40] sm:$0xff]  ;;  %v852_v50 = vpop.permute.xlu1 %851 }
 0x28e   : > { %4017 = vmatprep.subr.bf16.mxu1 %v4330_v17  ;;  %v854_v51 = vmul.f32 %v852_v50, %v843_v14 }
 0x290   : > { %836 = vrot.lane.b32.xlu0 %v832_v49, %s4327_s21 }
 0x291   : > { %4019 = vmatpush3.bf16.msra.mxu1 %v4018_v33 }
 0x292   : > { %3782 = vmatprep.subr.mxu1 %v4325_v4 }
 0x294   : > { %858 = vrot.lane.b32.xlu0 %v854_v51, %s4327_s21  ;;  %v1026_v51 = vld [vmem:[#allocation2] sm:$0xf] }
 0x295   : > { %3783 = vmatpush3.msra.mxu1 %v699_v35 }
 0x296   : > { %3785 = vmatmul.mubr.msk.f32.vlgmr.msra.gmra.mrb[0].mxu1 %vm454_vm7, %v700_v34  ;;  %4032 = vmatprep.subr.bf16.mxu1 %v4330_v17 }
 0x297   : > { %3826 = vmatprep.mubr.msk.f32.mxu1 %vm4331_vm3, %v4325_v4 }
 0x2ed   : > { %v793_v19 = vpop.permute.xlu0 %792 }
 0x2fe   : > { %v815_v20 = vpop.permute.xlu0 %814 }
 0x302   : > { %v837_v21 = vpop.permute.xlu0 %836 }
 0x306   : > { %v859_v22 = vpop.permute.xlu0 %858 }
 0x369   : > { %v771_v53 = vpop.f32.mrb[0].mxu1 }
 0x36a   : > { %v772_v54 = vadd.f32 %v771_v53, %v701_v52  ;;  %v3786_v55 = vpop.f32.mrb[1].mxu1 }
 0x36c   : > { %v4662_v56 = vmax.f32 %v772_v54, 0.0  ;;  %v1048_v54 = vld [vmem:[#allocation2] sm:$0xf] }
 0x36e   : > { %776 = vst.msk [vmem:[#allocation2 + $0x8] sm:$0xf] %vm529_vm8, %v4662_v56 }
 0x375   : > { %v873_v58 = vld [vmem:[#allocation2 + $0x8] sm:$0xf] }
 0x376   : > { %v883_v59 = vmul.f32 %v881_v57, %v873_v58  ;;  %v778_v60 = vld [vmem:[#allocation2 + $0x8] sm:$0xf] }
 0x377   : > { %v865_v61 = vld [vmem:[#allocation2 + $0x8] sm:$0xf]  ;;  %v789_v0 = vmul.f32 %v4639_v9, %v778_v60  ;;  %v897_v9 = vpop.permute.xlu1 %896 }
 0x378   : > { %v905_v63 = vld [vmem:[#allocation2 + $0x8] sm:$0xf]  ;;  %v871_v1 = vmul.f32 %v4605_v31, %v865_v61  ;;  %885 = vrot.lane.b32.xlu0 %v883_v59, %s4324_s20 }
 0x379   : > { %v800_v15 = vld [vmem:[#allocation2 + $0x8] sm:$0xf]  ;;  %794 = vrot.lane.b32.xlu1 %v789_v0, %s4329_s8  ;;  %v915_v2 = vmul.f32 %v913_v62, %v905_v63 }
 0x37a   : > { %872 = vst.msk [vmem:[#allocation3 + $0x20] sm:$0xf] %vm529_vm8, %v871_v1  ;;  %v811_v3 = vmul.f32 %v808_v45, %v800_v15  ;;  %v822_v5 = vld [vmem:[#allocation2 + $0x8] sm:$0xf]  ;;  %v1070_v15 = vld [vmem:[#allocation2] sm:$0xf] }
 0x37b   : > { %v833_v7 = vmul.f32 %v830_v48, %v822_v5  ;;  %v844_v8 = vld [vmem:[#allocation2 + $0x8] sm:$0xf]  ;;  %v929_v16 = vpop.permute.xlu1 %928  ;;  %v1092_v5 = vld [vmem:[#allocation2] sm:$0xf] }
 0x37c   : > { %917 = vrot.lane.b32.xlu0 %v915_v2, %s4326_s23  ;;  %v855_v10 = vmul.f32 %v852_v50, %v844_v8  ;;  %v889_v11 = vld [vmem:[#allocation2 + $0x8] sm:$0xf] }
 0x37d   : > { %816 = vrot.lane.b32.xlu1 %v811_v3, %s4328_s14  ;;  %v899_v12 = vmul.f32 %v897_v9, %v889_v11  ;;  %v921_v13 = vld [vmem:[#allocation2 + $0x8] sm:$0xf] }
 0x37e   : > { %v931_v18 = vmul.f32 %v929_v16, %v921_v13  ;;  %v4719_v0 = vld [vmem:[%s5420_s2 + $0x8] sm:$0xff] }
 0x380   : > { %948 = vperm.xlu0 %4187, %v306_v6  }
 0x381   : > { %838 = vrot.lane.b32.xlu1 %v833_v7, %s4327_s21  ;;  %v941_v57 = vld [vmem:[#allocation3 + $0x20] sm:$0xff] }
 0x384   : > { %1056 = vrot.lane.b32.xlu0 %v4519_v38, %s4326_s23 }
 0x385   : > { %860 = vrot.lane.b32.xlu1 %v855_v10, %s4327_s21 }
 0x388   : > { %1100 = vrot.lane.b32.xlu0 %v4533_v40, %s4324_s20 }
 0x389   : > { %901 = vrot.lane.b32.xlu1 %v899_v12, %s4324_s20 }
 0x38c   : > { %1145 = vrot.lane.b32.xlu0 %v4547_v42, %s4327_s21 }
 0x38d   : > { %933 = vrot.lane.b32.xlu1 %v931_v18, %s4323_s15 }
 0x390   : > { %1177 = vrot.lane.b32.xlu0 %v4561_v44, %s4329_s8 }
 0x391   : > { %1034 = vrot.lane.b32.xlu1 %v4512_v36, %s4323_s15 }
 0x395   : > { %1078 = vrot.lane.b32.xlu1 %v4524_v39, %s4324_s20 }
 0x399   : > { %1129 = vrot.lane.b32.xlu1 %v4538_v41, %s4327_s21 }
 0x39d   : > { %1161 = vrot.lane.b32.xlu1 %v4552_v43, %s4328_s14 }
 0x3ea   : > { %v886_v23 = vpop.permute.xlu0 %885 }
 0x3eb   : > { %888 = vst.msk [vmem:[#allocation3 + $0x28] sm:$0xf] %vm529_vm8, %v886_v23  ;;  %v795_v24 = vpop.permute.xlu1 %794 }
 0x3ec   : > { %v796_v25 = vsel %vm328_vm4, %v793_v19, %v795_v24 }
 0x3ed   : > { %798 = vst.msk [vmem:[#allocation3] sm:$0xf] %vm529_vm8, %v796_v25 }
 0x3ee   : > { %v918_v26 = vpop.permute.xlu0 %917 }
 0x3ef   : > { %920 = vst.msk [vmem:[#allocation3 + $0x38] sm:$0xf] %vm529_vm8, %v918_v26  ;;  %v817_v27 = vpop.permute.xlu1 %816 }
 0x3f0   : > { %v818_v28 = vsel %vm347_vm5, %v815_v20, %v817_v27 }
 0x3f1   : > { %820 = vst.msk [vmem:[#allocation3 + $0x8] sm:$0xf] %vm529_vm8, %v818_v28 }
 0x3f2   : > { %v942_v52 = vld [vmem:[#allocation3 + $0x28] sm:$0xff] }
 0x3f3   : > { %v839_v30 = vpop.permute.xlu1 %838  ;;  %v4027_v59 = vpack.c.bf16 %v942_v52, %v941_v57 }
 0x3f4   : > { %v840_v32 = vsel %vm366_vm6, %v837_v21, %v839_v30  ;;  %v937_v35 = vld [vmem:[#allocation3] sm:$0xff] }
 0x3f5   : > { %842 = vst.msk [vmem:[#allocation3 + $0x10] sm:$0xf] %vm529_vm8, %v840_v32 }
 0x3f6   : > { %v944_v62 = vld [vmem:[#allocation3 + $0x38] sm:$0xff] }
 0x3f7   : > { %v861_v33 = vpop.permute.xlu1 %860 }
 0x3f8   : > { %v862_v34 = vsel %vm366_vm6, %v859_v22, %v861_v33  ;;  %v938_v37 = vld [vmem:[#allocation3 + $0x8] sm:$0xff] }
 0x3f9   : > { %864 = vst.msk [vmem:[#allocation3 + $0x18] sm:$0xf] %vm529_vm8, %v862_v34  ;;  %v4021_v45 = vpack.c.bf16 %v938_v37, %v937_v35 }
 0x3fb   : > { %4022 = vmatpush3.bf16.msra.mxu0 %v4021_v45  ;;  %v902_v46 = vpop.permute.xlu1 %901 }
 0x3fc   : > { %904 = vst.msk [vmem:[#allocation3 + $0x30] sm:$0xf] %vm529_vm8, %v902_v46  ;;  %4023 = vmatprep.subr.bf16.mxu0 %v4330_v17  ;;  %v939_v49 = vld [vmem:[#allocation3 + $0x10] sm:$0xff] }
 0x3ff   : > { %v934_v47 = vpop.permute.xlu1 %933  ;;  %v4708_v48 = vpop.permute.xlu0 %948 }
 0x400   : > { %936 = vst.msk [vmem:[#allocation3 + $0x40] sm:$0xf] %vm529_vm8, %v934_v47  ;;  %v940_v14 = vld [vmem:[#allocation3 + $0x18] sm:$0xff] }
 0x401   : > { %v4024_v50 = vpack.c.bf16 %v940_v14, %v939_v49 }
 0x403   : > { %4025 = vmatpush3.bf16.msra.mxu0 %v4024_v50  ;;  %v1035_v53 = vpop.permute.xlu1 %1034  ;;  %v1057_v55 = vpop.permute.xlu0 %1056  ;;  %v943_v60 = vld [vmem:[#allocation3 + $0x30] sm:$0xff] }
 0x404   : > { %4026 = vmatprep.subr.bf16.mxu0 %v4330_v17  ;;  %v1037_v58 = vmul.f32 %v1035_v53, %v1026_v51  ;;  %v1059_v61 = vmul.f32 %v1057_v55, %v1048_v54  ;;  %v4030_v63 = vpack.c.bf16 %v944_v62, %v943_v60 }
 0x406   : > { %1041 = vrot.lane.b32.xlu1 %v1037_v58, %s4329_s8 }
 0x407   : > { %4028 = vmatpush3.bf16.msra.mxu0 %v4027_v59  ;;  %v945_v1 = vld [vmem:[#allocation3 + $0x40] sm:$0xff]  ;;  %v1079_v2 = vpop.permute.xlu1 %1078  ;;  %v1101_v6 = vpop.permute.xlu0 %1100 }
 0x408   : > { %4029 = vmatprep.subr.bf16.mxu0 %v4330_v17  ;;  %v1081_v3 = vmul.f32 %v1079_v2, %v1070_v15  ;;  %v1103_v7 = vmul.f32 %v1101_v6, %v1092_v5 }
 0x40a   : > { %1063 = vrot.lane.b32.xlu1 %v1059_v61, %s4328_s14 }
 0x40b   : > { %4031 = vmatpush3.bf16.msra.mxu0 %v4030_v63  ;;  %v1130_v12 = vpop.permute.xlu1 %1129  ;;  %v1146_v34 = vpop.permute.xlu0 %1145 }
 0x40c   : > { %3803 = vmatprep.subr.mxu0 %v4325_v4 }
 0x40e   : > { %1085 = vrot.lane.b32.xlu1 %v1081_v3, %s4327_s21 }
 0x40f   : > { %3804 = vmatpush3.msra.mxu0 %v945_v1  ;;  %v1162_v26 = vpop.permute.xlu1 %1161  ;;  %v1178_v45 = vpop.permute.xlu0 %1177 }
 0x410   : > { %3806 = vmatmul.mubr.msk.f32.vlgmr.msra.gmra.mrb[2].mxu0 %vm454_vm7, %v4719_v0  ;;  %4044 = vmatprep.subr.bf16.mxu0 %v4330_v17 }
 0x411   : > { %3847 = vmatprep.mubr.msk.f32.mxu0 %vm4331_vm3, %v4325_v4 }
 0x412   : > { %1107 = vrot.lane.b32.xlu1 %v1103_v7, %s4327_s21 }
 0x478   : > { %v1042_v47 = vpop.permute.xlu1 %1041 }
 0x47c   : > { %v1064_v49 = vpop.permute.xlu1 %1063 }
 0x480   : > { %v1086_v14 = vpop.permute.xlu1 %1085 }
 0x484   : > { %v1108_v50 = vpop.permute.xlu1 %1107 }
 0x4e3   : > { %v1020_v8 = vpop.f32.mrb[2].mxu0 }
 0x4e4   : > { %v1021_v9 = vadd.f32 %v1020_v8, %v4708_v48  ;;  %v3807_v10 = vpop.f32.mrb[3].mxu0 }
 0x4e6   : > { %v4729_v11 = vmax.f32 %v1021_v9, 0.0 }
 0x4e8   : > { %1025 = vst.msk [vmem:[#allocation2 + $0x8] sm:$0xf] %vm529_vm8, %v4729_v11 }
 0x4ef   : > { %v1093_v13 = vld [vmem:[#allocation2 + $0x8] sm:$0xf] }
 0x4f0   : > { %v1071_v16 = vld [vmem:[#allocation2 + $0x8] sm:$0xf]  ;;  %v1104_v35 = vmul.f32 %v1101_v6, %v1093_v13 }
 0x4f1   : > { %v1138_v18 = vld [vmem:[#allocation2 + $0x8] sm:$0xf]  ;;  %v1082_v33 = vmul.f32 %v1079_v2, %v1071_v16 }
 0x4f2   : > { %v1122_v19 = vld [vmem:[#allocation2 + $0x8] sm:$0xf]  ;;  %v1148_v37 = vmul.f32 %v1146_v34, %v1138_v18 }
 0x4f3   : > { %v1170_v20 = vld [vmem:[#allocation2 + $0x8] sm:$0xf]  ;;  %v1132_v22 = vmul.f32 %v1130_v12, %v1122_v19  ;;  %v1195_v19 = vrot.slane %v4719_v0, 4 }
 0x4f4   : > { %v1154_v21 = vld [vmem:[#allocation2 + $0x8] sm:$0xf]  ;;  %v1180_v46 = vmul.f32 %v1178_v45, %v1170_v20 }
 0x4f5   : > { %v1027_v23 = vld [vmem:[#allocation2 + $0x8] sm:$0xf]  ;;  %1134 = vrot.lane.b32.xlu1 %v1132_v22, %s4324_s20  ;;  %v1164_v30 = vmul.f32 %v1162_v26, %v1154_v21  ;;  %v1196_v26 = vrot.slane %v4708_v48, 4 }
 0x4f6   : > { %v1049_v24 = vld [vmem:[#allocation2 + $0x8] sm:$0xf]  ;;  %v1038_v27 = vmul.f32 %v1035_v53, %v1027_v23 }
 0x4f7   : > { %v1114_v25 = vld [vmem:[#allocation2 + $0x8] sm:$0xf]  ;;  %v1060_v32 = vmul.f32 %v1057_v55, %v1049_v24 }
 0x4f8   : > { %v1120_v28 = vmul.f32 %v4605_v31, %v1114_v25  ;;  %1271 = vst.msk [vmem:[#allocation2 + $0x8] sm:$0xf] %vm529_vm8, %v4729_v11  ;;  %1043 = vrot.lane.b32.xlu0 %v1038_v27, %s4329_s8 }
 0x4f9   : > { %1166 = vrot.lane.b32.xlu1 %v1164_v30, %s4326_s23 }
 0x4fa   : > { %1121 = vst.msk [vmem:[#allocation3 + $0x20] sm:$0xf] %vm529_vm8, %v1120_v28 }
 0x4fc   : > { %1065 = vrot.lane.b32.xlu0 %v1060_v32, %s4328_s14 }
 0x4fd   : > { %1285 = vrot.lane.b32.xlu1 %v4512_v36, %s4323_s15 }
 0x500   : > { %1087 = vrot.lane.b32.xlu0 %v1082_v33, %s4327_s21 }
 0x501   : > { %1329 = vrot.lane.b32.xlu1 %v4524_v39, %s4324_s20  ;;  %v1190_v10 = vld [vmem:[#allocation3 + $0x20] sm:$0xff] }
 0x504   : > { %1109 = vrot.lane.b32.xlu0 %v1104_v35, %s4327_s21 }
 0x505   : > { %1380 = vrot.lane.b32.xlu1 %v4538_v41, %s4327_s21 }
 0x508   : > { %1150 = vrot.lane.b32.xlu0 %v1148_v37, %s4324_s20 }
 0x509   : > { %1412 = vrot.lane.b32.xlu1 %v4552_v43, %s4328_s14 }
 0x50c   : > { %1182 = vrot.lane.b32.xlu0 %v1180_v46, %s4323_s15 }
 0x510   : > { %1307 = vrot.lane.b32.xlu0 %v4519_v38, %s4326_s23 }
 0x514   : > { %1351 = vrot.lane.b32.xlu0 %v4533_v40, %s4324_s20 }
 0x518   : > { %1396 = vrot.lane.b32.xlu0 %v4547_v42, %s4327_s21 }
 0x51c   : > { %1428 = vrot.lane.b32.xlu0 %v4561_v44, %s4329_s8 }
 0x567   : > { %v1135_v51 = vpop.permute.xlu1 %1134 }
 0x568   : > { %1137 = vst.msk [vmem:[#allocation3 + $0x28] sm:$0xf] %vm529_vm8, %v1135_v51 }
 0x56a   : > { %v1044_v52 = vpop.permute.xlu0 %1043 }
 0x56b   : > { %v1045_v53 = vsel %vm328_vm4, %v1042_v47, %v1044_v52  ;;  %v1167_v54 = vpop.permute.xlu1 %1166 }
 0x56c   : > { %1047 = vst.msk [vmem:[#allocation3] sm:$0xf] %vm529_vm8, %v1045_v53  ;;  %1169 = vst.msk [vmem:[#allocation3 + $0x38] sm:$0xf] %vm529_vm8, %v1167_v54  ;;  %v307_v54 = vld [vmem:[%s5421_s3 + $0x10] sm:$0xff] }
 0x56e   : > { %v1066_v55 = vpop.permute.xlu0 %1065 }
 0x56f   : > { %v1067_v57 = vsel %vm347_vm5, %v1064_v49, %v1066_v55  ;;  %v1286_v58 = vpop.permute.xlu1 %1285  ;;  %v1191_v9 = vld [vmem:[#allocation3 + $0x28] sm:$0xff] }
 0x570   : > { %1069 = vst.msk [vmem:[#allocation3 + $0x8] sm:$0xf] %vm529_vm8, %v1067_v57  ;;  %v1288_v60 = vmul.f32 0.0, %v1286_v58  ;;  %v4039_v12 = vpack.c.bf16 %v1191_v9, %v1190_v10  ;;  %v4833_v10 = vld [vmem:[#allocation2] sm:$0xff] }
 0x572   : > { %v1088_v59 = vpop.permute.xlu0 %1087  ;;  %1292 = vrot.lane.b32.xlu1 %v1288_v60, %s4329_s8 }
 0x573   : > { %v1089_v61 = vsel %vm366_vm6, %v1086_v14, %v1088_v59  ;;  %v1186_v1 = vld [vmem:[#allocation3] sm:$0xff]  ;;  %v1193_v16 = vld [vmem:[#allocation3 + $0x38] sm:$0xff]  ;;  %v1330_v23 = vpop.permute.xlu1 %1329 }
 0x574   : > { %1091 = vst.msk [vmem:[#allocation3 + $0x10] sm:$0xf] %vm529_vm8, %v1089_v61  ;;  %v1332_v24 = vmul.f32 0.0, %v1330_v23 }
 0x576   : > { %v1110_v62 = vpop.permute.xlu0 %1109 }
 0x577   : > { %v1111_v63 = vsel %vm366_vm6, %v1108_v50, %v1110_v62  ;;  %v1187_v15 = vld [vmem:[#allocation3 + $0x8] sm:$0xff]  ;;  %v1381_v33 = vpop.permute.xlu1 %1380 }
 0x578   : > { %1113 = vst.msk [vmem:[#allocation3 + $0x18] sm:$0xf] %vm529_vm8, %v1111_v63  ;;  %v4033_v2 = vpack.c.bf16 %v1187_v15, %v1186_v1 }
 0x57a   : > { %v1151_v3 = vpop.permute.xlu0 %1150  ;;  %4034 = vmatpush3.bf16.msra.mxu1 %v4033_v2 }
 0x57b   : > { %1153 = vst.msk [vmem:[#allocation3 + $0x30] sm:$0xf] %vm529_vm8, %v1151_v3  ;;  %4035 = vmatprep.subr.bf16.mxu1 %v4330_v17  ;;  %v1188_v6 = vld [vmem:[#allocation3 + $0x10] sm:$0xff]  ;;  %v1413_v45 = vpop.permute.xlu1 %1412 }
 0x57e   : > { %v1183_v5 = vpop.permute.xlu0 %1182 }
 0x57f   : > { %1185 = vst.msk [vmem:[#allocation3 + $0x40] sm:$0xf] %vm529_vm8, %v1183_v5  ;;  %v1189_v7 = vld [vmem:[#allocation3 + $0x18] sm:$0xff] }
 0x580   : > { %v4036_v8 = vpack.c.bf16 %v1189_v7, %v1188_v6 }
 0x582   : > { %4037 = vmatpush3.bf16.msra.mxu1 %v4036_v8  ;;  %v1192_v13 = vld [vmem:[#allocation3 + $0x30] sm:$0xff]  ;;  %v1308_v21 = vpop.permute.xlu0 %1307 }
 0x583   : > { %4038 = vmatprep.subr.bf16.mxu1 %v4330_v17  ;;  %v4042_v18 = vpack.c.bf16 %v1193_v16, %v1192_v13  ;;  %v1310_v22 = vmul.f32 0.0, %v1308_v21 }
 0x585   : > { %1314 = vrot.lane.b32.xlu1 %v1310_v22, %s4328_s14 }
 0x586   : > { %4040 = vmatpush3.bf16.msra.mxu1 %v4039_v12  ;;  %v1194_v20 = vld [vmem:[#allocation3 + $0x40] sm:$0xff]  ;;  %v1352_v0 = vpop.permute.xlu0 %1351 }
 0x587   : > { %4041 = vmatprep.subr.bf16.mxu1 %v4330_v17  ;;  %v1354_v25 = vmul.f32 0.0, %v1352_v0 }
 0x589   : > { %1336 = vrot.lane.b32.xlu1 %v1332_v24, %s4327_s21 }
 0x58a   : > { %4043 = vmatpush3.bf16.msra.mxu1 %v4042_v18  ;;  %v1397_v14 = vpop.permute.xlu0 %1396 }
 0x58b   : > { %3824 = vmatprep.subr.mxu1 %v4325_v4 }
 0x58d   : > { %1358 = vrot.lane.b32.xlu1 %v1354_v25, %s4327_s21 }
 0x58e   : > { %3825 = vmatpush3.msra.mxu1 %v1194_v20  ;;  %v1429_v52 = vpop.permute.xlu0 %1428  ;;  %v4842_v20 = vld [vmem:[%s5420_s2 + $0x10] sm:$0xff] }
 0x58f   : > { %3827 = vmatmul.mubr.msk.f32.vlgmr.msra.gmra.mrb[2].mxu1 %vm454_vm7, %v1195_v19  ;;  %4056 = vmatprep.subr.bf16.mxu1 %v4330_v17 }
 0x590   : > { %3868 = vmatprep.mubr.msk.f32.mxu1 %vm4331_vm3, %v4325_v4 }
 0x662   : > { %v1266_v27 = vpop.f32.mrb[2].mxu1 }
 0x663   : > { %v1267_v28 = vadd.f32 %v1266_v27, %v1196_v26  ;;  %v3828_v30 = vpop.f32.mrb[3].mxu1 }
 0x665   : > { %v1270_v32 = vmax.f32 %v1267_v28, 0.0 }
 0x667   : > { %v1273_v4 = vrot.slane %v1270_v32, 4 }
 0x669   : > { %1276 = vst.msk [vmem:[#allocation2 + $0x8] sm:$0xf0] %vm1275_vm9, %v1273_v4 }
 0x670   : > { %v1278_v34 = vld [vmem:[#allocation2 + $0x8] sm:$0xff] }
 0x671   : > { %1525 = vst.msk [vmem:[#allocation2 + $0x8] sm:$0xf] %vm529_vm8, %v4662_v56  ;;  %v1383_v35 = vmul.f32 %v1381_v33, %v1278_v34  ;;  %v1289_v37 = vmul.f32 %v1286_v58, %v1278_v34  ;;  %v1371_v46 = vmul.f32 %v4605_v31, %v1278_v34  ;;  %v1311_v48 = vmul.f32 %v1308_v21, %v1278_v34 }
 0x672   : > { %v1415_v47 = vmul.f32 %v1413_v45, %v1278_v34  ;;  %v1333_v49 = vmul.f32 %v1330_v23, %v1278_v34  ;;  %v1355_v50 = vmul.f32 %v1352_v0, %v1278_v34  ;;  %v1399_v51 = vmul.f32 %v1397_v14, %v1278_v34 }
 0x673   : > { %1294 = vrot.lane.b32.xlu0 %v1289_v37, %s4329_s8  ;;  %1385 = vrot.lane.b32.xlu1 %v1383_v35, %s4324_s20  ;;  %1372 = vst.msk [vmem:[#allocation3 + $0x20] sm:$0xff] %vm290_vm2, %v1371_v46  ;;  %v1431_v53 = vmul.f32 %v1429_v52, %v1278_v34 }
 0x677   : > { %1316 = vrot.lane.b32.xlu0 %v1311_v48, %s4328_s14  ;;  %1417 = vrot.lane.b32.xlu1 %v1415_v47, %s4326_s23 }
 0x67a   : > { %v1441_v9 = vld [vmem:[#allocation3 + $0x20] sm:$0xff] }
 0x67b   : > { %1338 = vrot.lane.b32.xlu0 %v1333_v49, %s4327_s21  ;;  %1448 = vperm.xlu1 %4188, %v307_v54   ;;  %v4874_v54 = vld [vmem:[%s5419_s1] ss:$0 sm:$0xff] }
 0x67f   : > { %1360 = vrot.lane.b32.xlu0 %v1355_v50, %s4327_s21  ;;  %1560 = vrot.lane.b32.xlu1 %v4519_v38, %s4326_s23 }
 0x683   : > { %1401 = vrot.lane.b32.xlu0 %v1399_v51, %s4324_s20  ;;  %1604 = vrot.lane.b32.xlu1 %v4533_v40, %s4324_s20 }
 0x687   : > { %1433 = vrot.lane.b32.xlu0 %v1431_v53, %s4323_s15  ;;  %1649 = vrot.lane.b32.xlu1 %v4547_v42, %s4327_s21 }
 0x68b   : > { %1538 = vrot.lane.b32.xlu0 %v4512_v36, %s4323_s15  ;;  %1681 = vrot.lane.b32.xlu1 %v4561_v44, %s4329_s8  ;;  %v1293_v36 = vpop.permute.xlu1 %1292 }
 0x68f   : > { %1582 = vrot.lane.b32.xlu0 %v4524_v39, %s4324_s20  ;;  %v1315_v38 = vpop.permute.xlu1 %1314 }
 0x693   : > { %1633 = vrot.lane.b32.xlu0 %v4538_v41, %s4327_s21  ;;  %v1337_v55 = vpop.permute.xlu1 %1336 }
 0x697   : > { %1665 = vrot.lane.b32.xlu0 %v4552_v43, %s4328_s14  ;;  %v1359_v57 = vpop.permute.xlu1 %1358 }
 0x6e5   : > { %v1295_v39 = vpop.permute.xlu0 %1294  ;;  %v1386_v58 = vpop.permute.xlu1 %1385 }
 0x6e6   : > { %v1296_v40 = vsel %vm328_vm4, %v1293_v36, %v1295_v39  ;;  %1388 = vst.msk [vmem:[#allocation3 + $0x28] sm:$0xff] %vm290_vm2, %v1386_v58  ;;  %v4879_v36 = vld [vmem:[%s5419_s1 + $0x1] ss:$0 sm:$0xff]  ;;  %v4915_v39 = vld [vmem:[%s5419_s1 + $0x6] ss:$0 sm:$0xff] }
 0x6e7   : > { %1298 = vst.msk [vmem:[#allocation3] sm:$0xff] %vm290_vm2, %v1296_v40  ;;  %v4924_v58 = vld [vmem:[%s5419_s1 + $0x7] ss:$0 sm:$0xff]  ;;  %v4933_v40 = vld [vmem:[%s5419_s1 + $0x8] ss:$0 sm:$0xff] }
 0x6e9   : > { %v1317_v41 = vpop.permute.xlu0 %1316  ;;  %v1418_v42 = vpop.permute.xlu1 %1417 }
 0x6ea   : > { %v1318_v59 = vsel %vm347_vm5, %v1315_v38, %v1317_v41  ;;  %1420 = vst.msk [vmem:[#allocation3 + $0x38] sm:$0xff] %vm290_vm2, %v1418_v42  ;;  %v4888_v38 = vld [vmem:[%s5419_s1 + $0x2] ss:$0 sm:$0xff] }
 0x6eb   : > { %1320 = vst.msk [vmem:[#allocation3 + $0x8] sm:$0xff] %vm290_vm2, %v1318_v59 }
 0x6ed   : > { %v1339_v43 = vpop.permute.xlu0 %1338  ;;  %v1442_v7 = vld [vmem:[#allocation3 + $0x28] sm:$0xff] }
 0x6ee   : > { %v1340_v44 = vsel %vm366_vm6, %v1337_v55, %v1339_v43  ;;  %v1437_v62 = vld [vmem:[#allocation3] sm:$0xff]  ;;  %v4051_v13 = vpack.c.bf16 %v1442_v7, %v1441_v9  ;;  %v4893_v55 = vld [vmem:[%s5419_s1 + $0x3] ss:$0 sm:$0xff] }
 0x6ef   : > { %1342 = vst.msk [vmem:[#allocation3 + $0x10] sm:$0xff] %vm290_vm2, %v1340_v44 }
 0x6f1   : > { %v1361_v60 = vpop.permute.xlu0 %1360  ;;  %v1444_v18 = vld [vmem:[#allocation3 + $0x38] sm:$0xff] }
 0x6f2   : > { %v1362_v61 = vsel %vm366_vm6, %v1359_v57, %v1361_v60  ;;  %v1438_v63 = vld [vmem:[#allocation3 + $0x8] sm:$0xff]  ;;  %v4906_v57 = vld [vmem:[%s5419_s1 + $0x5] ss:$0 sm:$0xff] }
 0x6f3   : > { %1364 = vst.msk [vmem:[#allocation3 + $0x18] sm:$0xff] %vm290_vm2, %v1362_v61  ;;  %v4045_v1 = vpack.c.bf16 %v1438_v63, %v1437_v62 }
 0x6f5   : > { %v1402_v15 = vpop.permute.xlu0 %1401  ;;  %4046 = vmatpush3.bf16.msra.mxu0 %v4045_v1 }
 0x6f6   : > { %1404 = vst.msk [vmem:[#allocation3 + $0x30] sm:$0xff] %vm290_vm2, %v1402_v15  ;;  %4047 = vmatprep.subr.bf16.mxu0 %v4330_v17  ;;  %v1439_v3 = vld [vmem:[#allocation3 + $0x10] sm:$0xff] }
 0x6f9   : > { %v1434_v2 = vpop.permute.xlu0 %1433 }
 0x6fa   : > { %1436 = vst.msk [vmem:[#allocation3 + $0x40] sm:$0xff] %vm290_vm2, %v1434_v2  ;;  %v1440_v5 = vld [vmem:[#allocation3 + $0x18] sm:$0xff]  ;;  %v4849_v22 = vpop.permute.xlu1 %1448 }
 0x6fb   : > { %v4048_v6 = vpack.c.bf16 %v1440_v5, %v1439_v3 }
 0x6fd   : > { %4049 = vmatpush3.bf16.msra.mxu0 %v4048_v6  ;;  %v1539_v8 = vpop.permute.xlu0 %1538  ;;  %v1443_v16 = vld [vmem:[#allocation3 + $0x30] sm:$0xff] }
 0x6fe   : > { %4050 = vmatprep.subr.bf16.mxu0 %v4330_v17  ;;  %v1541_v12 = vmul.f32 %v4833_v10, %v1539_v8  ;;  %v4054_v19 = vpack.c.bf16 %v1444_v18, %v1443_v16  ;;  %v1561_v23 = vpop.permute.xlu1 %1560 }
 0x6ff   : > { %v1563_v24 = vmul.f32 %v4833_v10, %v1561_v23 }
 0x700   : > { %1545 = vrot.lane.b32.xlu0 %v1541_v12, %s4329_s8 }
 0x701   : > { %4052 = vmatpush3.bf16.msra.mxu0 %v4051_v13  ;;  %v1445_v21 = vld [vmem:[#allocation3 + $0x40] sm:$0xff]  ;;  %v1583_v0 = vpop.permute.xlu0 %1582 }
 0x702   : > { %4053 = vmatprep.subr.bf16.mxu0 %v4330_v17  ;;  %v1585_v25 = vmul.f32 %v4833_v10, %v1583_v0  ;;  %v1605_v26 = vpop.permute.xlu1 %1604 }
 0x703   : > { %v1607_v27 = vmul.f32 %v4833_v10, %v1605_v26 }
 0x704   : > { %1567 = vrot.lane.b32.xlu0 %v1563_v24, %s4328_s14 }
 0x705   : > { %4055 = vmatpush3.bf16.msra.mxu0 %v4054_v19  ;;  %v1634_v34 = vpop.permute.xlu0 %1633 }
 0x706   : > { %3845 = vmatprep.subr.mxu0 %v4833_v10  ;;  %v1650_v50 = vpop.permute.xlu1 %1649 }
 0x708   : > { %1589 = vrot.lane.b32.xlu0 %v1585_v25, %s4327_s21 }
 0x709   : > { %3846 = vmatpush3.msra.mxu0 %v1445_v21  ;;  %v1666_v45 = vpop.permute.xlu0 %1665 }
 0x70a   : > { %3848 = vmatmul.mubr.msk.f32.vlgmr.msra.gmra.mrb[4].mxu0 %vm454_vm7, %v4842_v20  ;;  %4068 = vmatprep.subr.bf16.mxu0 %v4330_v17  ;;  %v1682_v53 = vpop.permute.xlu1 %1681 }
 0x70b   : > { %3889 = vmatprep.mubr.msk.f32.mxu0 %vm4331_vm3, %v4833_v10 }
 0x70c   : > { %1611 = vrot.lane.b32.xlu0 %v1607_v27, %s4327_s21 }
 0x772   : > { %v1546_v41 = vpop.permute.xlu0 %1545 }
 0x776   : > { %v1568_v42 = vpop.permute.xlu0 %1567 }
 0x77a   : > { %v1590_v59 = vpop.permute.xlu0 %1589 }
 0x77e   : > { %v1612_v43 = vpop.permute.xlu0 %1611 }
 0x7dd   : > { %v1520_v28 = vpop.f32.mrb[4].mxu0 }
 0x7de   : > { %v1521_v30 = vadd.f32 %v1520_v28, %v4849_v22  ;;  %v3849_v32 = vpop.f32.mrb[5].mxu0 }
 0x7e0   : > { %v1524_v4 = vmax.f32 %v1521_v30, 0.0 }
 0x7e2   : > { %v1527_v33 = vrot.slane %v1524_v4, 4 }
 0x7e4   : > { %1529 = vst.msk [vmem:[#allocation2 + $0x8] sm:$0xf0] %vm1275_vm9, %v1527_v33 }
 0x7eb   : > { %v1553_v35 = vld [vmem:[#allocation2 + $0x8] sm:$0xff] }
 0x7ec   : > { %v1636_v37 = vmul.f32 %v1634_v34, %v1553_v35  ;;  %1775 = vst.msk [vmem:[#allocation2 + $0x8] sm:$0xf] %vm529_vm8, %v4598_v29  ;;  %v1542_v46 = vmul.f32 %v1553_v35, %v1539_v8  ;;  %v1624_v48 = vmul.f32 %v4605_v31, %v1553_v35  ;;  %v1668_v47 = vmul.f32 %v1666_v45, %v1553_v35  ;;  %v2028_v45 = vld [vmem:[#allocation2] sm:$0xf] }
 0x7ed   : > { %v1564_v49 = vmul.f32 %v1561_v23, %v1553_v35  ;;  %v1586_v14 = vmul.f32 %v1583_v0, %v1553_v35  ;;  %v1608_v51 = vmul.f32 %v1605_v26, %v1553_v35  ;;  %v1652_v52 = vmul.f32 %v1650_v50, %v1553_v35 }
 0x7ee   : > { %1638 = vrot.lane.b32.xlu0 %v1636_v37, %s4324_s20  ;;  %1547 = vrot.lane.b32.xlu1 %v1542_v46, %s4329_s8  ;;  %1625 = vst.msk [vmem:[#allocation3 + $0x20] sm:$0xff] %vm290_vm2, %v1624_v48  ;;  %v1684_v31 = vmul.f32 %v1682_v53, %v1553_v35  ;;  %v1699_v34 = vrot.slane %v4842_v20, 4 }
 0x7f2   : > { %1670 = vrot.lane.b32.xlu0 %v1668_v47, %s4326_s23  ;;  %1569 = vrot.lane.b32.xlu1 %v1564_v49, %s4328_s14  ;;  %v2050_v47 = vld [vmem:[#allocation2] sm:$0xf] }
 0x7f5   : > { %v1694_v24 = vld [vmem:[#allocation3 + $0x20] sm:$0xff] }
 0x7f6   : > { %1591 = vrot.lane.b32.xlu1 %v1586_v14, %s4327_s21  ;;  %1788 = vrot.lane.b32.xlu0 %v4874_v54, %s4323_s15  ;;  %v2072_v14 = vld [vmem:[#allocation2] sm:$0xf] }
 0x7fa   : > { %1613 = vrot.lane.b32.xlu1 %v1608_v51, %s4327_s21  ;;  %1832 = vrot.lane.b32.xlu0 %v4888_v38, %s4324_s20 }
 0x7fe   : > { %1654 = vrot.lane.b32.xlu1 %v1652_v52, %s4324_s20  ;;  %2036 = vrot.lane.b32.xlu0 %v4874_v54, %s4323_s15  ;;  %v1700_v52 = vrot.slane %v4849_v22, 4 }
 0x802   : > { %1686 = vrot.lane.b32.xlu1 %v1684_v31, %s4323_s15  ;;  %1883 = vrot.lane.b32.xlu0 %v4906_v57, %s4327_s21 }
 0x806   : > { %1810 = vrot.lane.b32.xlu1 %v4879_v36, %s4326_s23  ;;  %2102 = vrot.lane.b32.xlu0 %v4893_v55, %s4324_s20 }
 0x80a   : > { %1854 = vrot.lane.b32.xlu1 %v4893_v55, %s4324_s20  ;;  %1915 = vrot.lane.b32.xlu0 %v4924_v58, %s4328_s14 }
 0x80e   : > { %2058 = vrot.lane.b32.xlu1 %v4879_v36, %s4326_s23  ;;  %1931 = vrot.lane.b32.xlu0 %v4933_v40, %s4329_s8 }
 0x812   : > { %2080 = vrot.lane.b32.xlu1 %v4888_v38, %s4324_s20  ;;  %2163 = vrot.lane.b32.xlu0 %v4924_v58, %s4328_s14 }
 0x816   : > { %1899 = vrot.lane.b32.xlu1 %v4915_v39, %s4327_s21 }
 0x81a   : > { %2131 = vrot.lane.b32.xlu1 %v4906_v57, %s4327_s21 }
 0x81e   : > { %2147 = vrot.lane.b32.xlu1 %v4915_v39, %s4327_s21 }
 0x822   : > { %2179 = vrot.lane.b32.xlu1 %v4933_v40, %s4329_s8 }
 0x860   : > { %v1639_v44 = vpop.permute.xlu0 %1638  ;;  %v1548_v60 = vpop.permute.xlu1 %1547 }
 0x861   : > { %1641 = vst.msk [vmem:[#allocation3 + $0x28] sm:$0xff] %vm290_vm2, %v1639_v44  ;;  %v1549_v61 = vsel %vm328_vm4, %v1546_v41, %v1548_v60  ;;  %v4980_v60 = vld [vmem:[%s5419_s1 + $0x4] ss:$0 sm:$0xff] }
 0x862   : > { %1551 = vst.msk [vmem:[#allocation3] sm:$0xff] %vm290_vm2, %v1549_v61 }
 0x864   : > { %v1671_v62 = vpop.permute.xlu0 %1670  ;;  %v1570_v63 = vpop.permute.xlu1 %1569 }
 0x865   : > { %1673 = vst.msk [vmem:[#allocation3 + $0x38] sm:$0xff] %vm290_vm2, %v1671_v62  ;;  %v1571_v1 = vsel %vm347_vm5, %v1568_v42, %v1570_v63 }
 0x866   : > { %1573 = vst.msk [vmem:[#allocation3 + $0x8] sm:$0xff] %vm290_vm2, %v1571_v1 }
 0x868   : > { %v1592_v15 = vpop.permute.xlu1 %1591  ;;  %v1695_v19 = vld [vmem:[#allocation3 + $0x28] sm:$0xff]  ;;  %v1789_v21 = vpop.permute.xlu0 %1788 }
 0x869   : > { %v1593_v2 = vsel %vm366_vm6, %v1590_v59, %v1592_v15  ;;  %v1690_v6 = vld [vmem:[#allocation3] sm:$0xff]  ;;  %v1791_v0 = vmul.f32 %v4833_v10, %v1789_v21  ;;  %v4063_v25 = vpack.c.bf16 %v1695_v19, %v1694_v24 }
 0x86a   : > { %1595 = vst.msk [vmem:[#allocation3 + $0x10] sm:$0xff] %vm290_vm2, %v1593_v2 }
 0x86b   : > { %1795 = vrot.lane.b32.xlu0 %v1791_v0, %s4329_s8 }
 0x86c   : > { %v1614_v3 = vpop.permute.xlu1 %1613  ;;  %v1833_v28 = vpop.permute.xlu0 %1832  ;;  %v1697_v30 = vld [vmem:[#allocation3 + $0x38] sm:$0xff] }
 0x86d   : > { %v1615_v5 = vsel %vm366_vm6, %v1612_v43, %v1614_v3  ;;  %v1691_v7 = vld [vmem:[#allocation3 + $0x8] sm:$0xff]  ;;  %v1835_v4 = vmul.f32 %v4833_v10, %v1833_v28 }
 0x86e   : > { %1617 = vst.msk [vmem:[#allocation3 + $0x18] sm:$0xff] %vm290_vm2, %v1615_v5  ;;  %v4057_v8 = vpack.c.bf16 %v1691_v7, %v1690_v6 }
 0x870   : > { %4058 = vmatpush3.bf16.msra.mxu1 %v4057_v8  ;;  %v1655_v9 = vpop.permute.xlu1 %1654  ;;  %v2037_v46 = vpop.permute.xlu0 %2036 }
 0x871   : > { %1657 = vst.msk [vmem:[#allocation3 + $0x30] sm:$0xff] %vm290_vm2, %v1655_v9  ;;  %4059 = vmatprep.subr.bf16.mxu1 %v4330_v17  ;;  %v1692_v13 = vld [vmem:[#allocation3 + $0x10] sm:$0xff]  ;;  %v2039_v48 = vmul.f32 %v2037_v46, %v2028_v45 }
 0x874   : > { %v1687_v12 = vpop.permute.xlu1 %1686  ;;  %v1884_v44 = vpop.permute.xlu0 %1883 }
 0x875   : > { %1689 = vst.msk [vmem:[#allocation3 + $0x40] sm:$0xff] %vm290_vm2, %v1687_v12  ;;  %v1693_v16 = vld [vmem:[#allocation3 + $0x18] sm:$0xff] }
 0x876   : > { %v4060_v18 = vpack.c.bf16 %v1693_v16, %v1692_v13 }
 0x878   : > { %4061 = vmatpush3.bf16.msra.mxu1 %v4060_v18  ;;  %v1811_v23 = vpop.permute.xlu1 %1810  ;;  %v1696_v26 = vld [vmem:[#allocation3 + $0x30] sm:$0xff]  ;;  %v2103_v63 = vpop.permute.xlu0 %2102 }
 0x879   : > { %4062 = vmatprep.subr.bf16.mxu1 %v4330_v17  ;;  %v1813_v27 = vmul.f32 %v4833_v10, %v1811_v23  ;;  %v4066_v32 = vpack.c.bf16 %v1697_v30, %v1696_v26 }
 0x87b   : > { %1817 = vrot.lane.b32.xlu0 %v1813_v27, %s4328_s14 }
 0x87c   : > { %4064 = vmatpush3.bf16.msra.mxu1 %v4063_v25  ;;  %v1855_v33 = vpop.permute.xlu1 %1854  ;;  %v1698_v35 = vld [vmem:[#allocation3 + $0x40] sm:$0xff]  ;;  %v1916_v19 = vpop.permute.xlu0 %1915 }
 0x87d   : > { %4065 = vmatprep.subr.bf16.mxu1 %v4330_v17  ;;  %v1857_v37 = vmul.f32 %v4833_v10, %v1855_v33 }
 0x87f   : > { %1839 = vrot.lane.b32.xlu0 %v1835_v4, %s4327_s21 }
 0x880   : > { %4067 = vmatpush3.bf16.msra.mxu1 %v4066_v32  ;;  %v2059_v20 = vpop.permute.xlu1 %2058  ;;  %v1932_v25 = vpop.permute.xlu0 %1931 }
 0x881   : > { %3866 = vmatprep.subr.mxu1 %v4833_v10  ;;  %v2061_v49 = vmul.f32 %v2059_v20, %v2050_v47 }
 0x883   : > { %1861 = vrot.lane.b32.xlu0 %v1857_v37, %s4327_s21 }
 0x884   : > { %3867 = vmatpush3.msra.mxu1 %v1698_v35  ;;  %v2081_v50 = vpop.permute.xlu1 %2080  ;;  %v2164_v32 = vpop.permute.xlu0 %2163  ;;  %v308_v35 = vld [vmem:[%s5421_s3 + $0x18] sm:$0xff] }
 0x885   : > { %3869 = vmatmul.mubr.msk.f32.vlgmr.msra.gmra.mrb[4].mxu1 %vm454_vm7, %v1699_v34  ;;  %4080 = vmatprep.subr.bf16.mxu1 %v4330_v17  ;;  %v2083_v51 = vmul.f32 %v2081_v50, %v2072_v14 }
 0x886   : > { %3910 = vmatprep.mubr.msk.f32.mxu1 %vm4331_vm3, %v4833_v10 }
 0x887   : > { %2043 = vrot.lane.b32.xlu0 %v2039_v48, %s4329_s8  ;;  %2087 = vrot.lane.b32.xlu1 %v2083_v51, %s4327_s21 }
 0x888   : > { %v1900_v27 = vpop.permute.xlu1 %1899 }
 0x88b   : > { %2065 = vrot.lane.b32.xlu0 %v2061_v49, %s4328_s14 }
 0x88c   : > { %v2132_v34 = vpop.permute.xlu1 %2131 }
 0x890   : > { %v2148_v45 = vpop.permute.xlu1 %2147 }
 0x8dd   : > { %v1796_v49 = vpop.permute.xlu0 %1795 }
 0x8ed   : > { %v1818_v14 = vpop.permute.xlu0 %1817 }
 0x958   : > { %v1770_v53 = vpop.f32.mrb[4].mxu1 }
 0x959   : > { %v1771_v31 = vadd.f32 %v1770_v53, %v1700_v52  ;;  %v3870_v41 = vpop.f32.mrb[5].mxu1 }
 0x95b   : > { %v1774_v42 = vmax.f32 %v1771_v31, 0.0 }
 0x95d   : > { %v1777_v59 = vrot.slane %v1774_v42, 4 }
 0x95f   : > { %1779 = vst.msk [vmem:[#allocation2 + $0x8] sm:$0xf0] %vm1275_vm9, %v1777_v59 }
 0x966   : > { %v1825_v43 = vld [vmem:[#allocation2 + $0x8] sm:$0xff] }
 0x967   : > { %v1886_v61 = vmul.f32 %v1884_v44, %v1825_v43  ;;  %2027 = vst.msk [vmem:[#allocation2 + $0x8] sm:$0xf] %vm529_vm8, %v4729_v11  ;;  %v1792_v62 = vmul.f32 %v1825_v43, %v1789_v21  ;;  %v1874_v22 = vmul.f32 %v4980_v60, %v1825_v43  ;;  %v1814_v1 = vmul.f32 %v1825_v43, %v1811_v23 }
 0x968   : > { %v1836_v12 = vmul.f32 %v1833_v28, %v1825_v43  ;;  %v1858_v24 = vmul.f32 %v1855_v33, %v1825_v43  ;;  %v1918_v0 = vmul.f32 %v1916_v19, %v1825_v43  ;;  %v1934_v28 = vmul.f32 %v1932_v25, %v1825_v43 }
 0x969   : > { %1888 = vrot.lane.b32.xlu0 %v1886_v61, %s4324_s20  ;;  %1797 = vrot.lane.b32.xlu1 %v1792_v62, %s4329_s8  ;;  %1875 = vst.msk [vmem:[#allocation3 + $0x20] sm:$0xff] %vm290_vm2, %v1874_v22  ;;  %v1902_v37 = vmul.f32 %v1900_v27, %v1825_v43 }
 0x96d   : > { %1819 = vrot.lane.b32.xlu1 %v1814_v1, %s4328_s14 }
 0x96e   : > { %v2051_v15 = vld [vmem:[#allocation2 + $0x8] sm:$0xf] }
 0x96f   : > { %v2095_v2 = vld [vmem:[#allocation2 + $0x8] sm:$0xf]  ;;  %v2062_v30 = vmul.f32 %v2059_v20, %v2051_v15  ;;  %v2180_v20 = vpop.permute.xlu1 %2179 }
 0x970   : > { %v2073_v3 = vld [vmem:[#allocation2 + $0x8] sm:$0xf]  ;;  %v4994_v21 = vld [vmem:[#allocation3 + $0x20] sm:$0xff]  ;;  %v2106_v23 = vmul.f32 %v2103_v63, %v2095_v2 }
 0x971   : > { %v2084_v5 = vmul.f32 %v2081_v50, %v2073_v3  ;;  %v2124_v6 = vld [vmem:[#allocation2 + $0x8] sm:$0xf]  ;;  %1841 = vrot.lane.b32.xlu1 %v1836_v12, %s4327_s21  ;;  %v1840_v50 = vpop.permute.xlu0 %1839 }
 0x972   : > { %v2140_v7 = vld [vmem:[#allocation2 + $0x8] sm:$0xf] }
 0x973   : > { %v2156_v8 = vld [vmem:[#allocation2 + $0x8] sm:$0xf]  ;;  %2089 = vrot.lane.b32.xlu0 %v2084_v5, %s4327_s21  ;;  %v2150_v48 = vmul.f32 %v2148_v45, %v2140_v7  ;;  %v2088_v53 = vpop.permute.xlu1 %2087 }
 0x974   : > { %v2172_v9 = vld [vmem:[#allocation2 + $0x8] sm:$0xf]  ;;  %v2166_v33 = vmul.f32 %v2164_v32, %v2156_v8 }
 0x975   : > { %v2029_v13 = vld [vmem:[#allocation2 + $0x8] sm:$0xf]  ;;  %1863 = vrot.lane.b32.xlu1 %v1858_v24, %s4327_s21  ;;  %v2182_v47 = vmul.f32 %v2180_v20, %v2172_v9  ;;  %v1862_v51 = vpop.permute.xlu0 %1861 }
 0x976   : > { %v2116_v16 = vld [vmem:[#allocation2 + $0x8] sm:$0xf]  ;;  %v2040_v26 = vmul.f32 %v2037_v46, %v2029_v13  ;;  %v2134_v46 = vmul.f32 %v2132_v34, %v2124_v6 }
 0x977   : > { %v2122_v18 = vmul.f32 %v4980_v60, %v2116_v16  ;;  %2273 = vst.msk [vmem:[#allocation2 + $0x8] sm:$0xf] %vm529_vm8, %v4729_v11  ;;  %2111 = vrot.lane.b32.xlu0 %v2106_v23, %s4327_s21  ;;  %v2094_v11 = vld [vmem:[#allocation2] sm:$0xf] }
 0x978   : > { %v2105_v4 = vmul.f32 %v2103_v63, %v2094_v11 }
 0x979   : > { %2123 = vst.msk [vmem:[#allocation3 + $0x20] sm:$0xf] %vm529_vm8, %v2122_v18  ;;  %2045 = vrot.lane.b32.xlu1 %v2040_v26, %s4329_s8  ;;  %v2044_v52 = vpop.permute.xlu0 %2043 }
 0x97b   : > { %1920 = vrot.lane.b32.xlu0 %v1918_v0, %s4326_s23 }
 0x97d   : > { %2067 = vrot.lane.b32.xlu1 %v2062_v30, %s4328_s14  ;;  %v2066_v31 = vpop.permute.xlu0 %2065 }
 0x97f   : > { %1936 = vrot.lane.b32.xlu0 %v1934_v28, %s4323_s15 }
 0x981   : > { %2109 = vrot.lane.b32.xlu1 %v2105_v4, %s4327_s21 }
 0x983   : > { %2168 = vrot.lane.b32.xlu0 %v2166_v33, %s4326_s23 }
 0x985   : > { %1904 = vrot.lane.b32.xlu1 %v1902_v37, %s4324_s20 }
 0x987   : > { %1951 = vperm.xlu0 %4187, %v308_v35  }
 0x989   : > { %2136 = vrot.lane.b32.xlu1 %v2134_v46, %s4324_s20 }
 0x98b   : > { %2308 = vrot.lane.b32.xlu0 %v4879_v36, %s4326_s23 }
 0x98d   : > { %2152 = vrot.lane.b32.xlu1 %v2150_v48, %s4324_s20 }
 0x98f   : > { %2352 = vrot.lane.b32.xlu0 %v4893_v55, %s4324_s20 }
 0x991   : > { %2184 = vrot.lane.b32.xlu1 %v2182_v47, %s4323_s15  ;;  %v2192_v47 = vld [vmem:[#allocation3 + $0x20] sm:$0xff] }
 0x993   : > { %2397 = vrot.lane.b32.xlu0 %v4915_v39, %s4327_s21 }
 0x995   : > { %2286 = vrot.lane.b32.xlu1 %v4874_v54, %s4323_s15 }
 0x997   : > { %2429 = vrot.lane.b32.xlu0 %v4933_v40, %s4329_s8 }
 0x999   : > { %2330 = vrot.lane.b32.xlu1 %v4888_v38, %s4324_s20 }
 0x99d   : > { %2381 = vrot.lane.b32.xlu1 %v4906_v57, %s4327_s21 }
 0x9a1   : > { %2413 = vrot.lane.b32.xlu1 %v4924_v58, %s4328_s14 }
 0x9db   : > { %v1889_v41 = vpop.permute.xlu0 %1888  ;;  %v1798_v42 = vpop.permute.xlu1 %1797 }
 0x9dc   : > { %1891 = vst.msk [vmem:[#allocation3 + $0x28] sm:$0xff] %vm290_vm2, %v1889_v41  ;;  %v1799_v59 = vsel %vm328_vm4, %v1796_v49, %v1798_v42 }
 0x9dd   : > { %1801 = vst.msk [vmem:[#allocation3] sm:$0xff] %vm290_vm2, %v1799_v59 }
 0x9df   : > { %v1820_v43 = vpop.permute.xlu1 %1819 }
 0x9e0   : > { %v1821_v44 = vsel %vm347_vm5, %v1818_v14, %v1820_v43 }
 0x9e1   : > { %1823 = vst.msk [vmem:[#allocation3 + $0x8] sm:$0xff] %vm290_vm2, %v1821_v44 }
 0x9e3   : > { %v1842_v62 = vpop.permute.xlu1 %1841  ;;  %v1945_v25 = vld [vmem:[#allocation3 + $0x28] sm:$0xff] }
 0x9e4   : > { %v1843_v22 = vsel %vm366_vm6, %v1840_v50, %v1842_v62  ;;  %v1940_v2 = vld [vmem:[#allocation3] sm:$0xff]  ;;  %v4075_v27 = vpack.c.bf16 %v1945_v25, %v4994_v21  ;;  %v5062_v50 = vld [vmem:[%s5420_s2 + $0x18] sm:$0xff] }
 0x9e5   : > { %v2090_v61 = vpop.permute.xlu0 %2089  ;;  %1845 = vst.msk [vmem:[#allocation3 + $0x10] sm:$0xff] %vm290_vm2, %v1843_v22 }
 0x9e6   : > { %v2091_v8 = vsel %vm366_vm6, %v2088_v53, %v2090_v61 }
 0x9e7   : > { %v1864_v1 = vpop.permute.xlu1 %1863 }
 0x9e8   : > { %v1865_v15 = vsel %vm366_vm6, %v1862_v51, %v1864_v1  ;;  %v1941_v3 = vld [vmem:[#allocation3 + $0x8] sm:$0xff] }
 0x9e9   : > { %v2112_v63 = vpop.permute.xlu0 %2111  ;;  %1867 = vst.msk [vmem:[#allocation3 + $0x18] sm:$0xff] %vm290_vm2, %v1865_v15  ;;  %v4069_v5 = vpack.c.bf16 %v1941_v3, %v1940_v2 }
 0x9eb   : > { %4070 = vmatpush3.bf16.msra.mxu0 %v4069_v5  ;;  %v2046_v7 = vpop.permute.xlu1 %2045 }
 0x9ec   : > { %v1942_v9 = vld [vmem:[#allocation3 + $0x10] sm:$0xff]  ;;  %v2047_v12 = vsel %vm328_vm4, %v2044_v52, %v2046_v7  ;;  %4071 = vmatprep.subr.bf16.mxu0 %v4330_v17 }
 0x9ed   : > { %v1921_v6 = vpop.permute.xlu0 %1920  ;;  %2093 = vst.msk [vmem:[#allocation3 + $0x10] sm:$0xf] %vm529_vm8, %v2091_v8  ;;  %2049 = vst.msk [vmem:[#allocation3] sm:$0xf] %vm529_vm8, %v2047_v12 }
 0x9ee   : > { %1923 = vst.msk [vmem:[#allocation3 + $0x38] sm:$0xff] %vm290_vm2, %v1921_v6 }
 0x9ef   : > { %v2068_v16 = vpop.permute.xlu1 %2067 }
 0x9f0   : > { %v2069_v18 = vsel %vm347_vm5, %v2066_v31, %v2068_v16  ;;  %v1943_v19 = vld [vmem:[#allocation3 + $0x18] sm:$0xff]  ;;  %v2197_v31 = vrot.slane %v5062_v50, 1 }
 0x9f1   : > { %v1937_v13 = vpop.permute.xlu0 %1936  ;;  %2071 = vst.msk [vmem:[#allocation3 + $0x8] sm:$0xf] %vm529_vm8, %v2069_v18  ;;  %v4072_v23 = vpack.c.bf16 %v1943_v19, %v1942_v9 }
 0x9f2   : > { %1939 = vst.msk [vmem:[#allocation3 + $0x40] sm:$0xff] %vm290_vm2, %v1937_v13 }
 0x9f3   : > { %4073 = vmatpush3.bf16.msra.mxu0 %v4072_v23  ;;  %v2110_v26 = vpop.permute.xlu1 %2109 }
 0x9f4   : > { %v2113_v11 = vsel %vm366_vm6, %v2110_v26, %v2112_v63  ;;  %4074 = vmatprep.subr.bf16.mxu0 %v4330_v17  ;;  %v2188_v30 = vld [vmem:[#allocation3] sm:$0xff]  ;;  %v2190_v34 = vld [vmem:[#allocation3 + $0x10] sm:$0xff] }
 0x9f5   : > { %v1947_v24 = vld [vmem:[#allocation3 + $0x38] sm:$0xff]  ;;  %v2169_v0 = vpop.permute.xlu0 %2168  ;;  %2115 = vst.msk [vmem:[#allocation3 + $0x18] sm:$0xf] %vm529_vm8, %v2113_v11 }
 0x9f6   : > { %2171 = vst.msk [vmem:[#allocation3 + $0x38] sm:$0xf] %vm529_vm8, %v2169_v0 }
 0x9f7   : > { %4076 = vmatpush3.bf16.msra.mxu0 %v4075_v27  ;;  %v1905_v28 = vpop.permute.xlu1 %1904 }
 0x9f8   : > { %1907 = vst.msk [vmem:[#allocation3 + $0x30] sm:$0xff] %vm290_vm2, %v1905_v28  ;;  %v2189_v32 = vld [vmem:[#allocation3 + $0x8] sm:$0xff]  ;;  %4077 = vmatprep.subr.bf16.mxu0 %v4330_v17 }
 0x9f9   : > { %v4081_v4 = vpack.c.bf16 %v2189_v32, %v2188_v30  ;;  %v1948_v48 = vld [vmem:[#allocation3 + $0x40] sm:$0xff] }
 0x9fb   : > { %4082 = vmatpush3.bf16.msra.mxu1 %v4081_v4  ;;  %v2137_v33 = vpop.permute.xlu1 %2136 }
 0x9fc   : > { %2139 = vst.msk [vmem:[#allocation3 + $0x28] sm:$0xf] %vm529_vm8, %v2137_v33  ;;  %4083 = vmatprep.subr.bf16.mxu1 %v4330_v17  ;;  %v2191_v35 = vld [vmem:[#allocation3 + $0x18] sm:$0xff] }
 0x9fd   : > { %v4084_v37 = vpack.c.bf16 %v2191_v35, %v2190_v34  ;;  %v2195_v52 = vld [vmem:[#allocation3 + $0x38] sm:$0xff] }
 0x9ff   : > { %4085 = vmatpush3.bf16.msra.mxu1 %v4084_v37  ;;  %v1946_v21 = vld [vmem:[#allocation3 + $0x30] sm:$0xff]  ;;  %v2153_v45 = vpop.permute.xlu1 %2152 }
 0xa00   : > { %2155 = vst.msk [vmem:[#allocation3 + $0x30] sm:$0xf] %vm529_vm8, %v2153_v45  ;;  %v4078_v46 = vpack.c.bf16 %v1947_v24, %v1946_v21  ;;  %4086 = vmatprep.subr.bf16.mxu1 %v4330_v17 }
 0xa02   : > { %4079 = vmatpush3.bf16.msra.mxu0 %v4078_v46 }
 0xa03   : > { %v2185_v20 = vpop.permute.xlu1 %2184  ;;  %3887 = vmatprep.subr.mxu0 %v4833_v10  ;;  %v2193_v49 = vld [vmem:[#allocation3 + $0x28] sm:$0xff] }
 0xa04   : > { %2187 = vst.msk [vmem:[#allocation3 + $0x40] sm:$0xf] %vm529_vm8, %v2185_v20  ;;  %v4087_v14 = vpack.c.bf16 %v2193_v49, %v2192_v47 }
 0xa06   : > { %3888 = vmatpush3.msra.mxu0 %v1948_v48  ;;  %4088 = vmatpush3.bf16.msra.mxu1 %v4087_v14  ;;  %v5076_v42 = vpop.permute.xlu0 %1951 }
 0xa07   : > { %3890 = vmatmul.mubr.msk.f32.vlgmr.msra.gmra.mrb[6].mxu0 %vm454_vm7, %v5062_v50  ;;  %4089 = vmatprep.subr.bf16.mxu1 %v4330_v17  ;;  %v2194_v51 = vld [vmem:[#allocation3 + $0x30] sm:$0xff]  ;;  %v2287_v59 = vpop.permute.xlu1 %2286  ;;  %v2198_v5 = vrot.slane %v5076_v42, 1 }
 0xa08   : > { %v4090_v53 = vpack.c.bf16 %v2195_v52, %v2194_v51  ;;  %4092 = vmatprep.subr.bf16.mxu0 %v4330_v17  ;;  %3931 = vmatprep.mubr.msk.f32.mxu0 %vm4331_vm3, %v4833_v10  ;;  %v2289_v43 = vmul.f32 %v4833_v10, %v2287_v59 }
 0xa0a   : > { %4091 = vmatpush3.bf16.msra.mxu1 %v4090_v53  ;;  %2293 = vrot.lane.b32.xlu1 %v2289_v43, %s4329_s8  ;;  %v2309_v44 = vpop.permute.xlu0 %2308 }
 0xa0b   : > { %3908 = vmatprep.subr.mxu1 %v4833_v10  ;;  %v2196_v41 = vld [vmem:[#allocation3 + $0x40] sm:$0xff]  ;;  %v2311_v61 = vmul.f32 %v4833_v10, %v2309_v44  ;;  %v2331_v62 = vpop.permute.xlu1 %2330 }
 0xa0c   : > { %v2333_v22 = vmul.f32 %v4833_v10, %v2331_v62 }
 0xa0e   : > { %3909 = vmatpush3.msra.mxu1 %v2196_v41  ;;  %2315 = vrot.lane.b32.xlu1 %v2311_v61, %s4328_s14  ;;  %v2353_v63 = vpop.permute.xlu0 %2352 }
 0xa0f   : > { %3911 = vmatmul.mubr.msk.f32.vlgmr.msra.gmra.mrb[6].mxu1 %vm454_vm7, %v2197_v31  ;;  %4104 = vmatprep.subr.bf16.mxu1 %v4330_v17  ;;  %v2355_v1 = vmul.f32 %v4833_v10, %v2353_v63  ;;  %v2382_v13 = vpop.permute.xlu1 %2381 }
 0xa10   : > { %3952 = vmatprep.mubr.msk.f32.mxu1 %vm4331_vm3, %v4833_v10 }
 0xa12   : > { %2337 = vrot.lane.b32.xlu1 %v2333_v22, %s4327_s21  ;;  %v2398_v11 = vpop.permute.xlu0 %2397 }
 0xa13   : > { %v2414_v23 = vpop.permute.xlu1 %2413 }
 0xa16   : > { %2359 = vrot.lane.b32.xlu1 %v2355_v1, %s4327_s21  ;;  %v2430_v30 = vpop.permute.xlu0 %2429 }
 0xa7c   : > { %v2294_v4 = vpop.permute.xlu1 %2293 }
 0xa80   : > { %v2316_v33 = vpop.permute.xlu1 %2315 }
 0xa84   : > { %v2338_v34 = vpop.permute.xlu1 %2337 }
 0xa88   : > { %v2360_v35 = vpop.permute.xlu1 %2359 }
 0xada   : > { %v2023_v15 = vpop.f32.mrb[6].mxu0 }
 0xadb   : > { %v5090_v2 = vadd.f32 %v2023_v15, %v5076_v42  ;;  %v3891_v3 = vpop.f32.mrb[7].mxu0 }
 0xadd   : > { %3030 = vst.msk [vmem:[%s5427_s13] sm:$0x1] %vm311_vm1, %v5090_v2 }
 0xae2   : > { %v2268_v6 = vpop.f32.mrb[6].mxu1 }
 0xae3   : > { %v2269_v7 = vadd.f32 %v2268_v6, %v2198_v5  ;;  %v3912_v8 = vpop.f32.mrb[7].mxu1  ;;  %v5148_v5 = vld [vmem:[%s5420_s2 + $0x20] sm:$0x3f] }
 0xae5   : > { %v2272_v9 = vmax.f32 %v2269_v7, 0.0  ;;  %v2453_v7 = vrot.slane %v5062_v50, 5 }
 0xae7   : > { %v2275_v12 = vrot.slane %v2272_v9, 4  ;;  %v2454_v9 = vrot.slane %v5148_v5, 5 }
 0xae9   : > { %2277 = vst.msk [vmem:[#allocation2 + $0x8] sm:$0xf0] %vm1275_vm9, %v2275_v12  ;;  %v2455_v12 = vsel %vm2452_vm10, %v2453_v7, %v2454_v9 }
 0xaf0   : > { %v2301_v16 = vld [vmem:[#allocation2 + $0x8] sm:$0xff] }
 0xaf1   : > { %2533 = vst.msk [vmem:[#allocation2 + $0x8] sm:$0xf] %vm529_vm8, %v4662_v56  ;;  %v2384_v18 = vmul.f32 %v2382_v13, %v2301_v16  ;;  %v2290_v19 = vmul.f32 %v2301_v16, %v2287_v59  ;;  %v2372_v24 = vmul.f32 %v4980_v60, %v2301_v16  ;;  %v2312_v0 = vmul.f32 %v2309_v44, %v2301_v16  ;;  %v309_v56 = vld [vmem:[%s5421_s3 + $0x20] sm:$0x3f] }
 0xaf2   : > { %v2416_v25 = vmul.f32 %v2414_v23, %v2301_v16  ;;  %v2334_v26 = vmul.f32 %v2331_v62, %v2301_v16  ;;  %v2356_v27 = vmul.f32 %v2353_v63, %v2301_v16  ;;  %v2400_v28 = vmul.f32 %v2398_v11, %v2301_v16 }
 0xaf3   : > { %2295 = vrot.lane.b32.xlu0 %v2290_v19, %s4329_s8  ;;  %2386 = vrot.lane.b32.xlu1 %v2384_v18, %s4324_s20  ;;  %2373 = vst.msk [vmem:[#allocation3 + $0x20] sm:$0xff] %vm290_vm2, %v2372_v24  ;;  %v2432_v32 = vmul.f32 %v2430_v30, %v2301_v16 }
 0xaf7   : > { %2317 = vrot.lane.b32.xlu0 %v2312_v0, %s4328_s14  ;;  %2418 = vrot.lane.b32.xlu1 %v2416_v25, %s4326_s23 }
 0xafa   : > { %v2442_v63 = vld [vmem:[#allocation3 + $0x20] sm:$0xff] }
 0xafb   : > { %2339 = vrot.lane.b32.xlu0 %v2334_v26, %s4327_s21  ;;  %2449 = vperm.xlu1 %4188, %v309_v56   ;;  %v2456_v56 = vrot.slane %v5076_v42, 5 }
 0xaff   : > { %2361 = vrot.lane.b32.xlu0 %v2356_v27, %s4327_s21  ;;  %2568 = vrot.lane.b32.xlu1 %v4879_v36, %s4326_s23 }
 0xb03   : > { %2402 = vrot.lane.b32.xlu0 %v2400_v28, %s4324_s20  ;;  %2612 = vrot.lane.b32.xlu1 %v4893_v55, %s4324_s20 }
 0xb07   : > { %2434 = vrot.lane.b32.xlu0 %v2432_v32, %s4323_s15  ;;  %2657 = vrot.lane.b32.xlu1 %v4915_v39, %s4327_s21 }
 0xb0b   : > { %2546 = vrot.lane.b32.xlu0 %v4874_v54, %s4323_s15  ;;  %2689 = vrot.lane.b32.xlu1 %v4933_v40, %s4329_s8 }
 0xb0f   : > { %2590 = vrot.lane.b32.xlu0 %v4888_v38, %s4324_s20 }
 0xb13   : > { %2641 = vrot.lane.b32.xlu0 %v4906_v57, %s4327_s21 }
 0xb17   : > { %2673 = vrot.lane.b32.xlu0 %v4924_v58, %s4328_s14 }
 0xb65   : > { %v2296_v37 = vpop.permute.xlu0 %2295  ;;  %v2387_v21 = vpop.permute.xlu1 %2386 }
 0xb66   : > { %v2297_v45 = vsel %vm328_vm4, %v2294_v4, %v2296_v37  ;;  %2389 = vst.msk [vmem:[#allocation3 + $0x28] sm:$0xff] %vm290_vm2, %v2387_v21 }
 0xb67   : > { %2299 = vst.msk [vmem:[#allocation3] sm:$0xff] %vm290_vm2, %v2297_v45 }
 0xb69   : > { %v2318_v46 = vpop.permute.xlu0 %2317  ;;  %v2419_v48 = vpop.permute.xlu1 %2418 }
 0xb6a   : > { %v2319_v20 = vsel %vm347_vm5, %v2316_v33, %v2318_v46  ;;  %2421 = vst.msk [vmem:[#allocation3 + $0x38] sm:$0xff] %vm290_vm2, %v2419_v48 }
 0xb6b   : > { %2321 = vst.msk [vmem:[#allocation3 + $0x8] sm:$0xff] %vm290_vm2, %v2319_v20 }
 0xb6d   : > { %v2340_v47 = vpop.permute.xlu0 %2339  ;;  %v2443_v62 = vld [vmem:[#allocation3 + $0x28] sm:$0xff] }
 0xb6e   : > { %v2341_v49 = vsel %vm366_vm6, %v2338_v34, %v2340_v47  ;;  %v2438_v52 = vld [vmem:[#allocation3] sm:$0xff]  ;;  %v4099_v15 = vpack.c.bf16 %v2443_v62, %v2442_v63 }
 0xb6f   : > { %2343 = vst.msk [vmem:[#allocation3 + $0x10] sm:$0xff] %vm290_vm2, %v2341_v49 }
 0xb71   : > { %v2362_v14 = vpop.permute.xlu0 %2361  ;;  %v2445_v6 = vld [vmem:[#allocation3 + $0x38] sm:$0xff] }
 0xb72   : > { %v2363_v51 = vsel %vm366_vm6, %v2360_v35, %v2362_v14  ;;  %v2439_v53 = vld [vmem:[#allocation3 + $0x8] sm:$0xff] }
 0xb73   : > { %2365 = vst.msk [vmem:[#allocation3 + $0x18] sm:$0xff] %vm290_vm2, %v2363_v51  ;;  %v4093_v31 = vpack.c.bf16 %v2439_v53, %v2438_v52 }
 0xb75   : > { %v2403_v41 = vpop.permute.xlu0 %2402  ;;  %4094 = vmatpush3.bf16.msra.mxu0 %v4093_v31  ;;  %v5213_v31 = vld [vmem:[#allocation2] sm:$0xff] }
 0xb76   : > { %2405 = vst.msk [vmem:[#allocation3 + $0x30] sm:$0xff] %vm290_vm2, %v2403_v41  ;;  %4095 = vmatprep.subr.bf16.mxu0 %v4330_v17  ;;  %v2440_v43 = vld [vmem:[#allocation3 + $0x10] sm:$0xff] }
 0xb79   : > { %v2435_v59 = vpop.permute.xlu0 %2434 }
 0xb7a   : > { %2437 = vst.msk [vmem:[#allocation3 + $0x40] sm:$0xff] %vm290_vm2, %v2435_v59  ;;  %v2441_v44 = vld [vmem:[#allocation3 + $0x18] sm:$0xff]  ;;  %v5162_v50 = vpop.permute.xlu1 %2449 }
 0xb7b   : > { %v4096_v61 = vpack.c.bf16 %v2441_v44, %v2440_v43  ;;  %v2457_v25 = vrot.slane %v5162_v50, 5 }
 0xb7d   : > { %4097 = vmatpush3.bf16.msra.mxu0 %v4096_v61  ;;  %v2547_v22 = vpop.permute.xlu0 %2546  ;;  %v2444_v3 = vld [vmem:[#allocation3 + $0x30] sm:$0xff]  ;;  %v2458_v26 = vsel %vm2452_vm10, %v2456_v56, %v2457_v25 }
 0xb7e   : > { %4098 = vmatprep.subr.bf16.mxu0 %v4330_v17  ;;  %v2549_v1 = vmul.f32 %v4833_v10, %v2547_v22  ;;  %v4102_v8 = vpack.c.bf16 %v2445_v6, %v2444_v3  ;;  %v2569_v16 = vpop.permute.xlu1 %2568  ;;  %v5232_v56 = vld [vmem:[%s5422_s4] sm:$0x3] }
 0xb7f   : > { %v2571_v18 = vmul.f32 %v4833_v10, %v2569_v16 }
 0xb80   : > { %2553 = vrot.lane.b32.xlu0 %v2549_v1, %s4329_s8 }
 0xb81   : > { %4100 = vmatpush3.bf16.msra.mxu0 %v4099_v15  ;;  %v2446_v13 = vld [vmem:[#allocation3 + $0x40] sm:$0xff]  ;;  %v2591_v19 = vpop.permute.xlu0 %2590 }
 0xb82   : > { %4101 = vmatprep.subr.bf16.mxu0 %v4330_v17  ;;  %v2593_v23 = vmul.f32 %v4833_v10, %v2591_v19  ;;  %v2613_v24 = vpop.permute.xlu1 %2612 }
 0xb83   : > { %v2615_v0 = vmul.f32 %v4833_v10, %v2613_v24 }
 0xb84   : > { %2575 = vrot.lane.b32.xlu0 %v2571_v18, %s4328_s14 }
 0xb85   : > { %4103 = vmatpush3.bf16.msra.mxu0 %v4102_v8  ;;  %v2642_v4 = vpop.permute.xlu0 %2641 }
 0xb86   : > { %3929 = vmatprep.subr.mxu0 %v4833_v10 }
 0xb88   : > { %2597 = vrot.lane.b32.xlu0 %v2593_v23, %s4327_s21 }
 0xb89   : > { %3930 = vmatpush3.msra.mxu0 %v2446_v13  ;;  %v2674_v34 = vpop.permute.xlu0 %2673 }
 0xb8a   : > { %3932 = vmatmul.mubr.msk.f32.vlgmr.msra.gmra.mrb[8].mxu0 %vm454_vm7, %v2455_v12  ;;  %4116 = vmatprep.subr.bf16.mxu0 %v4330_v17 }
 0xb8b   : > { %3973 = vmatprep.mubr.msk.f32.mxu0 %vm4331_vm3, %v4833_v10 }
 0xb8c   : > { %2619 = vrot.lane.b32.xlu0 %v2615_v0, %s4327_s21 }
 0xc5d   : > { %v2528_v11 = vpop.f32.mrb[8].mxu0 }
 0xc5e   : > { %v2529_v27 = vadd.f32 %v2528_v11, %v2458_v26  ;;  %v3933_v28 = vpop.f32.mrb[9].mxu0 }
 0xc60   : > { %v2532_v30 = vmax.f32 %v2529_v27, 0.0 }
 0xc62   : > { %v2535_v32 = vrot.slane %v2532_v30, 4 }
 0xc64   : > { %2537 = vst.msk [vmem:[#allocation2 + $0x8] sm:$0xf0] %vm1275_vm9, %v2535_v32 }
 0xc6b   : > { %v2561_v33 = vld [vmem:[#allocation2 + $0x8] sm:$0xff] }
 0xc6c   : > { %v2644_v10 = vmul.f32 %v2642_v4, %v2561_v33  ;;  %2783 = vst.msk [vmem:[#allocation2 + $0x8] sm:$0xf] %vm529_vm8, %v4598_v29  ;;  %v2550_v35 = vmul.f32 %v2561_v33, %v2547_v22  ;;  %v2632_v42 = vmul.f32 %v4980_v60, %v2561_v33  ;;  %v2676_v37 = vmul.f32 %v2674_v34, %v2561_v33  ;;  %v2658_v29 = vpop.permute.xlu1 %2657 }
 0xc6d   : > { %v2572_v21 = vmul.f32 %v2569_v16, %v2561_v33  ;;  %v2594_v45 = vmul.f32 %v2591_v19, %v2561_v33  ;;  %v2616_v46 = vmul.f32 %v2613_v24, %v2561_v33  ;;  %v2660_v48 = vmul.f32 %v2658_v29, %v2561_v33 }
 0xc6e   : > { %2646 = vrot.lane.b32.xlu0 %v2644_v10, %s4324_s20  ;;  %2555 = vrot.lane.b32.xlu1 %v2550_v35, %s4329_s8  ;;  %2633 = vst.msk [vmem:[#allocation3 + $0x20] sm:$0xff] %vm290_vm2, %v2632_v42  ;;  %v2707_v24 = vrot.slane %v5148_v5, 1 }
 0xc70   : > { %v2690_v20 = vpop.permute.xlu1 %2689 }
 0xc71   : > { %v2692_v47 = vmul.f32 %v2690_v20, %v2561_v33  ;;  %v2708_v33 = vrot.slane %v5162_v50, 1 }
 0xc72   : > { %2678 = vrot.lane.b32.xlu0 %v2676_v37, %s4326_s23  ;;  %2577 = vrot.lane.b32.xlu1 %v2572_v21, %s4328_s14 }
 0xc75   : > { %v2702_v12 = vld [vmem:[#allocation3 + $0x20] sm:$0xff] }
 0xc76   : > { %2796 = vrot.lane.b32.xlu0 %v4874_v54, %s4323_s15  ;;  %2599 = vrot.lane.b32.xlu1 %v2594_v45, %s4327_s21  ;;  %v2554_v54 = vpop.permute.xlu0 %2553 }
 0xc7a   : > { %2840 = vrot.lane.b32.xlu0 %v4888_v38, %s4324_s20  ;;  %2621 = vrot.lane.b32.xlu1 %v2616_v46, %s4327_s21  ;;  %v2576_v38 = vpop.permute.xlu0 %2575 }
 0xc7e   : > { %2891 = vrot.lane.b32.xlu0 %v4906_v57, %s4327_s21  ;;  %2662 = vrot.lane.b32.xlu1 %v2660_v48, %s4324_s20  ;;  %v2598_v57 = vpop.permute.xlu0 %2597 }
 0xc82   : > { %2923 = vrot.lane.b32.xlu0 %v4924_v58, %s4328_s14  ;;  %2694 = vrot.lane.b32.xlu1 %v2692_v47, %s4323_s15  ;;  %v2620_v49 = vpop.permute.xlu0 %2619 }
 0xc86   : > { %2818 = vrot.lane.b32.xlu1 %v4879_v36, %s4326_s23 }
 0xc8a   : > { %2862 = vrot.lane.b32.xlu1 %v4893_v55, %s4324_s20 }
 0xc8e   : > { %2907 = vrot.lane.b32.xlu1 %v4915_v39, %s4327_s21  ;;  %v3032_v39 = vsub.f32 0.0, %v5090_v2 }
 0xc90   : > { %v3033_v59 = vmul.f32 1.442695, %v3032_v39 }
 0xc92   : > { %2939 = vrot.lane.b32.xlu1 %v4933_v40, %s4329_s8  ;;  %4189 = vpow2.f32 %v3033_v59 }
 0xc9c   : > { %v4190_v7 = vpop.eup %4189 }
 0xc9d   : > { %v3035_v13 = vadd.f32 1.0, %v4190_v7 }
 0xc9f   : > { %4191 = vrcp.f32 %v3035_v13 }
 0xca9   : > { %v4192_v26 = vpop.eup %4191 }
 0xce0   : > { %v2647_v14 = vpop.permute.xlu0 %2646  ;;  %v2556_v58 = vpop.permute.xlu1 %2555 }
 0xce1   : > { %2649 = vst.msk [vmem:[#allocation3 + $0x28] sm:$0xff] %vm290_vm2, %v2647_v14  ;;  %v2557_v51 = vsel %vm328_vm4, %v2554_v54, %v2556_v58 }
 0xce2   : > { %2559 = vst.msk [vmem:[#allocation3] sm:$0xff] %vm290_vm2, %v2557_v51 }
 0xce4   : > { %v2679_v36 = vpop.permute.xlu0 %2678  ;;  %v2578_v55 = vpop.permute.xlu1 %2577 }
 0xce5   : > { %2681 = vst.msk [vmem:[#allocation3 + $0x38] sm:$0xff] %vm290_vm2, %v2679_v36  ;;  %v2579_v40 = vsel %vm347_vm5, %v2576_v38, %v2578_v55 }
 0xce6   : > { %2581 = vst.msk [vmem:[#allocation3 + $0x8] sm:$0xff] %vm290_vm2, %v2579_v40 }
 0xce8   : > { %v5211_v52 = vpop.permute.xlu0 %2796  ;;  %v2600_v53 = vpop.permute.xlu1 %2599  ;;  %v2703_v8 = vld [vmem:[#allocation3 + $0x28] sm:$0xff] }
 0xce9   : > { %v2799_v41 = vmul.f32 %v5213_v31, %v5211_v52  ;;  %v2601_v43 = vsel %vm366_vm6, %v2598_v57, %v2600_v53  ;;  %v2698_v61 = vld [vmem:[#allocation3] sm:$0xff]  ;;  %v4111_v16 = vpack.c.bf16 %v2703_v8, %v2702_v12 }
 0xcea   : > { %2603 = vst.msk [vmem:[#allocation3 + $0x10] sm:$0xff] %vm290_vm2, %v2601_v43 }
 0xceb   : > { %2803 = vrot.lane.b32.xlu0 %v2799_v41, %s4329_s8 }
 0xcec   : > { %v2622_v2 = vpop.permute.xlu1 %2621  ;;  %v2705_v19 = vld [vmem:[#allocation3 + $0x38] sm:$0xff]  ;;  %v2841_v28 = vpop.permute.xlu0 %2840 }
 0xced   : > { %v2623_v44 = vsel %vm366_vm6, %v2620_v49, %v2622_v2  ;;  %v2699_v62 = vld [vmem:[#allocation3 + $0x8] sm:$0xff]  ;;  %v2843_v30 = vmul.f32 %v5213_v31, %v2841_v28 }
 0xcee   : > { %2625 = vst.msk [vmem:[#allocation3 + $0x18] sm:$0xff] %vm290_vm2, %v2623_v44  ;;  %v4105_v22 = vpack.c.bf16 %v2699_v62, %v2698_v61 }
 0xcf0   : > { %4106 = vmatpush3.bf16.msra.mxu1 %v4105_v22  ;;  %v2663_v63 = vpop.permute.xlu1 %2662  ;;  %v2892_v29 = vpop.permute.xlu0 %2891 }
 0xcf1   : > { %2665 = vst.msk [vmem:[#allocation3 + $0x30] sm:$0xff] %vm290_vm2, %v2663_v63  ;;  %4107 = vmatprep.subr.bf16.mxu1 %v4330_v17  ;;  %v2700_v15 = vld [vmem:[#allocation3 + $0x10] sm:$0xff] }
 0xcf4   : > { %v2695_v1 = vpop.permute.xlu1 %2694  ;;  %v2924_v20 = vpop.permute.xlu0 %2923 }
 0xcf5   : > { %2697 = vst.msk [vmem:[#allocation3 + $0x40] sm:$0xff] %vm290_vm2, %v2695_v1  ;;  %v2701_v3 = vld [vmem:[#allocation3 + $0x18] sm:$0xff] }
 0xcf6   : > { %v4108_v6 = vpack.c.bf16 %v2701_v3, %v2700_v15 }
 0xcf8   : > { %4109 = vmatpush3.bf16.msra.mxu1 %v4108_v6  ;;  %v2704_v18 = vld [vmem:[#allocation3 + $0x30] sm:$0xff]  ;;  %v2819_v11 = vpop.permute.xlu1 %2818 }
 0xcf9   : > { %4110 = vmatprep.subr.bf16.mxu1 %v4330_v17  ;;  %v4114_v23 = vpack.c.bf16 %v2705_v19, %v2704_v18  ;;  %v2821_v27 = vmul.f32 %v5213_v31, %v2819_v11 }
 0xcfb   : > { %2825 = vrot.lane.b32.xlu0 %v2821_v27, %s4328_s14 }
 0xcfc   : > { %4112 = vmatpush3.bf16.msra.mxu1 %v4111_v16  ;;  %v2706_v0 = vld [vmem:[#allocation3 + $0x40] sm:$0xff]  ;;  %v2863_v32 = vpop.permute.xlu1 %2862 }
 0xcfd   : > { %4113 = vmatprep.subr.bf16.mxu1 %v4330_v17  ;;  %v2865_v4 = vmul.f32 %v5213_v31, %v2863_v32 }
 0xcff   : > { %2847 = vrot.lane.b32.xlu0 %v2843_v30, %s4327_s21 }
 0xd00   : > { %4115 = vmatpush3.bf16.msra.mxu1 %v4114_v23  ;;  %v2908_v14 = vpop.permute.xlu1 %2907 }
 0xd01   : > { %3950 = vmatprep.subr.mxu1 %v5213_v31 }
 0xd03   : > { %2869 = vrot.lane.b32.xlu0 %v2865_v4, %s4327_s21 }
 0xd04   : > { %3951 = vmatpush3.msra.mxu1 %v2706_v0  ;;  %v2940_v51 = vpop.permute.xlu1 %2939 }
 0xd05   : > { %3953 = vmatmul.mubr.msk.f32.vlgmr.msra.gmra.mrb[8].mxu1 %vm454_vm7, %v2707_v24  ;;  %3976 = vmatprep.subr.mxu1 %v5213_v31 }
 0xd06   : > { %3977 = vmatpush3.msk.msra.mxu1 %vm3048_vm11, %v5232_v56  ;;  %3978 = vmatprep.mubr.msk.f32.mxu1 %vm4331_vm3, %v5213_v31 }
 0xd07   : > { %3981 = vmatprep.subr.mxu1 %v5213_v31 }
 0xd09   : > { %3979 = vmatmul.mubr.msk.f32.vlgmr.msra.gmra.mrb[10].mxu1 %vm347_vm5, %v4192_v26 }
 0xd0a   : > { %3982 = vmatpush3.msk.msra.mxu1 %vm3048_vm11, %v5232_v56  ;;  %3983 = vmatprep.mubr.msk.f32.mxu1 %vm4331_vm3, %v5213_v31 }
 0xd0b   : > { %3986 = vmatprep.subr.mxu1 %v5213_v31 }
 0xd5d   : > { %v2804_v55 = vpop.permute.xlu0 %2803 }
 0xd6d   : > { %v2826_v39 = vpop.permute.xlu0 %2825 }
 0xd71   : > { %v2848_v40 = vpop.permute.xlu0 %2847 }
 0xdd8   : > { %v2778_v10 = vpop.f32.mrb[8].mxu1 }
 0xdd9   : > { %v2779_v34 = vadd.f32 %v2778_v10, %v2708_v33  ;;  %v3954_v35 = vpop.f32.mrb[9].mxu1 }
 0xddb   : > { %v2782_v42 = vmax.f32 %v2779_v34, 0.0 }
 0xddc   : > { %v3118_v37 = vpop.f32.mrb[10].mxu1 }
 0xddd   : > { %v2785_v21 = vrot.slane %v2782_v42, 4  ;;  %3122 = vst [vmem:[%s5255_s16] sm:$0x1] %v3118_v37  ;;  %v3980_v45 = vpop.f32.mrb[11].mxu1 }
 0xddf   : > { %2787 = vst.msk [vmem:[#allocation2 + $0x8] sm:$0xf0] %vm1275_vm9, %v2785_v21 }
 0xde6   : > { %v2811_v46 = vld [vmem:[#allocation2 + $0x8] sm:$0xff] }
 0xde7   : > { %v2894_v48 = vmul.f32 %v2892_v29, %v2811_v46  ;;  %v2800_v47 = vmul.f32 %v2811_v46, %v5211_v52  ;;  %v2882_v54 = vmul.f32 %v4980_v60, %v2811_v46  ;;  %v2926_v38 = vmul.f32 %v2924_v20, %v2811_v46  ;;  %v2870_v52 = vpop.permute.xlu0 %2869 }
 0xde8   : > { %v2822_v57 = vmul.f32 %v2819_v11, %v2811_v46  ;;  %v2844_v49 = vmul.f32 %v2841_v28, %v2811_v46  ;;  %v2866_v58 = vmul.f32 %v2863_v32, %v2811_v46  ;;  %v2910_v60 = vmul.f32 %v2908_v14, %v2811_v46 }
 0xde9   : > { %2896 = vrot.lane.b32.xlu0 %v2894_v48, %s4324_s20  ;;  %2805 = vrot.lane.b32.xlu1 %v2800_v47, %s4329_s8  ;;  %2883 = vst.msk [vmem:[#allocation3 + $0x20] sm:$0xff] %vm290_vm2, %v2882_v54  ;;  %v2942_v36 = vmul.f32 %v2940_v51, %v2811_v46 }
 0xded   : > { %2928 = vrot.lane.b32.xlu0 %v2926_v38, %s4326_s23  ;;  %2827 = vrot.lane.b32.xlu1 %v2822_v57, %s4328_s14 }
 0xdf0   : > { %v2952_v18 = vld [vmem:[#allocation3 + $0x20] sm:$0xff] }
 0xdf1   : > { %3197 = vrot.lane.b32.xlu0 %v4192_v26, %s4326_s23  ;;  %2849 = vrot.lane.b32.xlu1 %v2844_v49, %s4327_s21 }
 0xdf5   : > { %2871 = vrot.lane.b32.xlu1 %v2866_v58, %s4327_s21  ;;  %s4333_s21 = smov [#allocation6]  }
 0xdf6   : > { %s4203_s14 = sshll.u32 %s4333_s21, 4  ;;  %s4204_s14 = int_to_ptr.vmem [resolvable:$false] %s4203_s14 }
 0xdf9   : > { %2912 = vrot.lane.b32.xlu1 %v2910_v60, %s4324_s20  ;;  %s3351_s20 = sand.u32 1, %s4397_s28  }
 0xdfa   : > { %s5321_s29 = scalar_lea.sflag [#allocation7], %s3351_s20 }
 0xdfd   : > { %2944 = vrot.lane.b32.xlu1 %v2942_v36, %s4323_s15  ;;  %s276_s15 = scalar_lea.vmem [#allocation6], %s5087_s9 }
 0xdfe   : > { %s3382_s17 = sshll.u32 %s276_s15, 4  ;;  %s5314_s17 = int_to_ptr.vmem [resolvable:$true] %s3382_s17 }
 0xdff   : > { %s4199_s13 = scalar_lea.vmem %s5314_s17, 16  ;;  %p4206_p0 = scmp.lt.s32.totalorder %s5314_s17, %s4204_s14 }
 0xe00   : > { %p4200_p11 = scmp.ne.s32.totalorder %s5314_s17, %s4199_s13 }
 0xe02   : > { %p4201_p12 = pnand %p4200_p11, %p4416_p5 }
 0xe04   : > { %p4202_p13 = pneg %p4201_p12 }
 0xe5b   : > { %v2897_v53 = vpop.permute.xlu0 %2896  ;;  %v2806_v41 = vpop.permute.xlu1 %2805 }
 0xe5c   : > { %2899 = vst.msk [vmem:[#allocation3 + $0x28] sm:$0xff] %vm290_vm2, %v2897_v53  ;;  %v2807_v59 = vsel %vm328_vm4, %v2804_v55, %v2806_v41 }
 0xe5d   : > { %2809 = vst.msk [vmem:[#allocation3] sm:$0xff] %vm290_vm2, %v2807_v59 }
 0xe5f   : > { %v2929_v43 = vpop.permute.xlu0 %2928  ;;  %v2828_v2 = vpop.permute.xlu1 %2827 }
 0xe60   : > { %2931 = vst.msk [vmem:[#allocation3 + $0x38] sm:$0xff] %vm290_vm2, %v2929_v43  ;;  %v2829_v44 = vsel %vm347_vm5, %v2826_v39, %v2828_v2 }
 0xe61   : > { %2831 = vst.msk [vmem:[#allocation3 + $0x8] sm:$0xff] %vm290_vm2, %v2829_v44 }
 0xe63   : > { %v2850_v61 = vpop.permute.xlu1 %2849  ;;  %v2953_v16 = vld [vmem:[#allocation3 + $0x28] sm:$0xff]  ;;  %v3198_v5 = vpop.permute.xlu0 %3197 }
 0xe64   : > { %v2851_v62 = vsel %vm366_vm6, %v2848_v40, %v2850_v61  ;;  %v2948_v1 = vld [vmem:[#allocation3] sm:$0xff]  ;;  %v4123_v19 = vpack.c.bf16 %v2953_v16, %v2952_v18 }
 0xe65   : > { %2853 = vst.msk [vmem:[#allocation3 + $0x10] sm:$0xff] %vm290_vm2, %v2851_v62 }
 0xe67   : > { %v2872_v22 = vpop.permute.xlu1 %2871  ;;  %v2955_v24 = vld [vmem:[#allocation3 + $0x38] sm:$0xff] }
 0xe68   : > { %v2873_v63 = vsel %vm366_vm6, %v2870_v52, %v2872_v22  ;;  %v2949_v15 = vld [vmem:[#allocation3 + $0x8] sm:$0xff] }
 0xe69   : > { %2875 = vst.msk [vmem:[#allocation3 + $0x18] sm:$0xff] %vm290_vm2, %v2873_v63  ;;  %v4117_v3 = vpack.c.bf16 %v2949_v15, %v2948_v1 }
 0xe6b   : > { %4118 = vmatpush3.bf16.msra.mxu0 %v4117_v3  ;;  %v2913_v6 = vpop.permute.xlu1 %2912 }
 0xe6c   : > { %2915 = vst.msk [vmem:[#allocation3 + $0x30] sm:$0xff] %vm290_vm2, %v2913_v6  ;;  %4119 = vmatprep.subr.bf16.mxu0 %v4330_v17  ;;  %v2950_v8 = vld [vmem:[#allocation3 + $0x10] sm:$0xff] }
 0xe6f   : > { %v2945_v7 = vpop.permute.xlu1 %2944 }
 0xe70   : > { %2947 = vst.msk [vmem:[#allocation3 + $0x40] sm:$0xff] %vm290_vm2, %v2945_v7  ;;  %v2951_v12 = vld [vmem:[#allocation3 + $0x18] sm:$0xff] }
 0xe71   : > { %v4120_v13 = vpack.c.bf16 %v2951_v12, %v2950_v8 }
 0xe73   : > { %4121 = vmatpush3.bf16.msra.mxu0 %v4120_v13  ;;  %v2954_v23 = vld [vmem:[#allocation3 + $0x30] sm:$0xff] }
 0xe74   : > { %4122 = vmatprep.subr.bf16.mxu0 %v4330_v17  ;;  %v4126_v0 = vpack.c.bf16 %v2955_v24, %v2954_v23 }
 0xe77   : > { %4124 = vmatpush3.bf16.msra.mxu0 %v4123_v19  ;;  %v2956_v26 = vld [vmem:[#allocation3 + $0x40] sm:$0xff] }
 0xe78   : > { %4125 = vmatprep.subr.bf16.mxu0 %v4330_v17 }
 0xe7b   : > { %4127 = vmatpush3.bf16.msra.mxu0 %v4126_v0 }
 0xe7c   : > { %3971 = vmatprep.subr.mxu0 %v5213_v31 }
 0xe7f   : > { %3972 = vmatpush3.msra.mxu0 %v2956_v26 }
 0xe80   : > { %3974 = vmatmul.mubr.msk.f32.vlgmr.msra.gmra.mrb[10].mxu0 %vm454_vm7, %v2454_v9 }
 0xf53   : > { %v3026_v11 = vpop.f32.mrb[10].mxu0 }
 0xf54   : > { %v3027_v27 = vadd.f32 %v3026_v11, %v2457_v25  ;;  %v3975_v28 = vpop.f32.mrb[11].mxu0 }
 0xf56   : > { %v3038_v30 = vsub.f32 0.0, %v3027_v27  ;;  %3031 = vst.msk [vmem:[%s276_s15] sm:$0x1] %vm311_vm1, %v3027_v27  ;;  %s4205_s15 = scalar_lea.vmem %s4204_s14, 32 }
 0xf57   : > { %p4207_p1 = scmp.lt.s32.totalorder %s4205_s15, %s4199_s13 }
 0xf58   : > { %v3039_v17 = vmul.f32 1.442695, %v3038_v30 }
 0xf59   : > { %p4208_p2 = por %p4207_p1, %p4206_p0 }
 0xf5a   : > { %4193 = vpow2.f32 %v3039_v17 }
 0xf5b   : > { %p4209_p3 = pnand %p4208_p2, %p4202_p13 }
 0xf64   : > { %v4194_v32 = vpop.eup %4193 }
 0xf65   : > { %v3041_v4 = vadd.f32 1.0, %v4194_v32 }
 0xf67   : > { %4195 = vrcp.f32 %v3041_v4 }
 0xf71   : > { %v4196_v33 = vpop.eup %4195 }
 0xf72   : > { %3272 = vrot.lane.b32.xlu1 %v4196_v33, %s4326_s23  ;;  %3984 = vmatmul.mubr.msk.f32.vlgmr.msra.gmra.mrb[12].mxu1 %vm347_vm5, %v4196_v33  ;;  %s3620_s23 = sshll.u32 %s4397_s28, 4 }
 0xf73   : > { %3987 = vmatpush3.msk.msra.mxu1 %vm3048_vm11, %v5232_v56  ;;  %3988 = vmatprep.mubr.msk.f32.mxu1 %vm4331_vm3, %v5213_v31  ;;  %s5312_s8 = scalar_lea.hbm %s5424_s6, %s3620_s23  ;;  %s5319_s22 = scalar_lea.hbm %s5423_s5, %s3620_s23 }
 0xf74   : > { %3991 = vmatprep.subr.mxu1 %v5213_v31 }
 0xf76   : > { %3989 = vmatmul.mubr.msk.f32.vlgmr.msra.gmra.mrb[14].mxu1 %vm347_vm5, %v3198_v5 }
 0xf77   : > { %3992 = vmatpush3.msk.msra.mxu1 %vm3048_vm11, %v5232_v56  ;;  %3993 = vmatprep.mubr.msk.f32.mxu1 %vm4331_vm3, %v5213_v31 }
 0xfe4   : > { %v3273_v9 = vpop.permute.xlu1 %3272 }
 0xfe5   : > { %3994 = vmatmul.mubr.msk.f32.vlgmr.msra.gmra.mrb[16].mxu1 %vm347_vm5, %v3273_v9 }
 0xfe6   : > { %4212 = shalt.err (!%p4209_p3)
}
 0xfe7   : > { %s4213_s20 = scalar_lea.hbm %s5312_s8, 16  ;;  %s4217_s19 = scalar_lea.hbm %s5424_s6, 32 }
 0xfe8   : > { %p4214_p4 = scmp.ne.s32.totalorder %s5312_s8, %s4213_s20  ;;  %p4218_p9 = scmp.lt.u32.totalorder %s5312_s8, %s5424_s6 }
 0xfe9   : > { %p4219_p10 = scmp.lt.u32.totalorder %s4217_s19, %s4213_s20  ;;  %p4221_p12 = scmp.lt.u32.totalorder %s4213_s20, %s5312_s8 }
 0xfea   : > { %p4215_p7 = pnand %p4214_p4, %p4416_p5 }
 0xfeb   : > { %p4220_p11 = por %p4219_p10, %p4218_p9 }
 0xfec   : > { %p4216_p8 = pneg %p4215_p7 }
 0xfed   : > { %p4222_p13 = por %p4221_p12, %p4220_p11 }
 0xfef   : > { %p4223_p0 = pnand %p4222_p13, %p4216_p8 }
 0xff1   : > { %4226 = shalt.err (!%p4223_p0)
}
 0xff2   : > { %4129 = dma.vmem_to_hbm [thread:$0]  (%p4416_p5), %s5314_s17, 16, %s5312_s8, %s5321_s29  }
 0xff3   : > { %s5430_s13 = scalar_lea.vmem [#allocation4], %s5087_s9  ;;  %s3348_s23 = scalar_lea.sflag [#allocation5], %s5087_s9 }
 0xff4   : > { %s3369_s15 = sshll.u32 %s5430_s13, 4  ;;  %s4334_s20 = smov [#allocation4]   ;;  %s3370_s15 = int_to_ptr.vmem [resolvable:$true] %s3369_s15 }
 0xff5   : > { %s4227_s18 = scalar_lea.vmem %s3370_s15, 16  ;;  %s4231_s19 = sshll.u32 %s4334_s20, 4  ;;  %s4232_s19 = int_to_ptr.vmem [resolvable:$false] %s4231_s19 }
 0xff6   : > { %p4228_p1 = scmp.ne.s32.totalorder %s3370_s15, %s4227_s18  ;;  %s4233_s21 = scalar_lea.vmem %s4232_s19, 32 }
 0xff7   : > { %p4234_p4 = scmp.lt.s32.totalorder %s3370_s15, %s4232_s19  ;;  %p4235_p7 = scmp.lt.s32.totalorder %s4233_s21, %s4227_s18 }
 0xff8   : > { %p4229_p2 = pnand %p4228_p1, %p4416_p5 }
 0xff9   : > { %p4236_p8 = por %p4235_p7, %p4234_p4 }
 0xffa   : > { %p4230_p3 = pneg %p4229_p2 }
 0xffc   : > { %p4237_p9 = pnand %p4236_p8, %p4230_p3 }
 0xffe   : > { %4240 = shalt.err (!%p4237_p9)
}
 0xfff   : > { %s4241_s9 = scalar_lea.hbm %s5319_s22, 16  ;;  %s4245_s14 = scalar_lea.hbm %s5423_s5, 32 }
0x1000   : > { %p4242_p10 = scmp.ne.s32.totalorder %s5319_s22, %s4241_s9  ;;  %p4246_p13 = scmp.lt.u32.totalorder %s5319_s22, %s5423_s5 }
0x1001   : > { %p4247_p0 = scmp.lt.u32.totalorder %s4245_s14, %s4241_s9  ;;  %p4249_p2 = scmp.lt.u32.totalorder %s4241_s9, %s5319_s22 }
0x1002   : > { %p4243_p11 = pnand %p4242_p10, %p4416_p5 }
0x1003   : > { %p4248_p1 = por %p4247_p0, %p4246_p13 }
0x1004   : > { %p4244_p12 = pneg %p4243_p11 }
0x1005   : > { %p4250_p3 = por %p4249_p2, %p4248_p1 }
0x1007   : > { %p4251_p4 = pnand %p4250_p3, %p4244_p12 }
0x1009   : > { %4254 = shalt.err (!%p4251_p4)
}
0x100a   : > { %4128 = dma.vmem_to_hbm [thread:$0]  (%p4416_p5), %s3370_s15, 16, %s5319_s22, %s3348_s23  }
0x100b   : > { %s3396_s18 = sshll.u32 %s5255_s16, 4  ;;  %s3626_s19 = sshll.u32 %s4397_s28, 6  ;;  %s5369_s18 = int_to_ptr.vmem [resolvable:$true] %s3396_s18 }
0x100c   : > { %s5374_s8 = scalar_lea.hbm %s5425_s7, %s3626_s19  ;;  %s4255_s22 = scalar_lea.vmem %s5369_s18, 64 }
0x100d   : > { %p4256_p7 = scmp.ne.s32.totalorder %s5369_s18, %s4255_s22  ;;  %s4335_s15 = smov [#allocation8]  }
0x100e   : > { %s4259_s28 = sshll.u32 %s4335_s15, 4  ;;  %s4260_s28 = int_to_ptr.vmem [resolvable:$false] %s4259_s28 }
0x100f   : > { %p4257_p8 = pnand %p4256_p7, %p4416_p5  ;;  %s4261_s23 = scalar_lea.vmem %s4260_s28, 128 }
0x1010   : > { %p4262_p10 = scmp.lt.s32.totalorder %s5369_s18, %s4260_s28  ;;  %p4263_p11 = scmp.lt.s32.totalorder %s4261_s23, %s4255_s22 }
0x1011   : > { %p4258_p9 = pneg %p4257_p8 }
0x1012   : > { %p4264_p12 = por %p4263_p11, %p4262_p10 }
0x1014   : > { %p4265_p13 = pnand %p4264_p12, %p4258_p9 }
0x1045   : > { %v3192_v50 = vpop.f32.mrb[12].mxu1 }
0x1046   : > { %3196 = vst [vmem:[%s5255_s16 + $0x2] sm:$0x1] %v3192_v50  ;;  %v3985_v25 = vpop.f32.mrb[13].mxu1 }
0x1049   : > { %v3267_v31 = vpop.f32.mrb[14].mxu1 }
0x104a   : > { %3271 = vst [vmem:[%s5255_s16 + $0x1] sm:$0x1] %v3267_v31  ;;  %v3990_v56 = vpop.f32.mrb[15].mxu1 }
0x10b8   : > { %v3342_v10 = vpop.f32.mrb[16].mxu1 }
0x10b9   : > { %3346 = vst [vmem:[%s5255_s16 + $0x3] sm:$0x1] %v3342_v10  ;;  %v3995_v34 = vpop.f32.mrb[17].mxu1 }
0x10ba   : > { %4268 = shalt.err (!%p4265_p13)
}
0x10bb   : > { %s4269_s16 = scalar_lea.hbm %s5374_s8, 64  ;;  %s4273_s13 = scalar_lea.hbm %s5425_s7, 128 }
0x10bc   : > { %p4270_p0 = scmp.ne.s32.totalorder %s5374_s8, %s4269_s16  ;;  %p4274_p3 = scmp.lt.u32.totalorder %s5374_s8, %s5425_s7 }
0x10bd   : > { %p4275_p4 = scmp.lt.u32.totalorder %s4273_s13, %s4269_s16  ;;  %p4277_p8 = scmp.lt.u32.totalorder %s4269_s16, %s5374_s8 }
0x10be   : > { %p4271_p1 = pnand %p4270_p0, %p4416_p5 }
0x10bf   : > { %p4276_p7 = por %p4275_p4, %p4274_p3 }
0x10c0   : > { %p4272_p2 = pneg %p4271_p1 }
0x10c1   : > { %p4278_p9 = por %p4277_p8, %p4276_p7 }
0x10c3   : > { %p4279_p10 = pnand %p4278_p9, %p4272_p2 }
0x10c5   : > { %4282 = shalt.err (!%p4279_p10)
}
0x10c6   : > { %4130 = dma.vmem_to_hbm [thread:$0]  (%p4416_p5), %s5369_s18, 64, %s5374_s8, %s5321_s29  }
0x10c7 PF: > { %p4144_p11 = scmp.ge.s32.totalorder %s4321_s27, 2  ;;  %s3408_s21 = sand.u32 1, %s4309_s24  }
0x10c8   : > { %s3409_s9 = scalar_lea.sflag [#allocation5], %s3408_s21 }
0x10c9   : > { %p4135_p12 = pnand %p4144_p11, %p4420_p6 }
0x10cb   : > { %4300 = dma.done.wait (!%p4135_p12), %s3409_s9, 16  }
0x10cc   : > { %4302 = vsyncadd (!%p4135_p12), %s3409_s9, 4294967280  ;;  %s5431_s22 = sadd.s32 4294967294, %s4321_s27  }
0x10cd   : > { %s3416_s15 = sand.u32 1, %s5431_s22  }
0x10ce   : > { %s3417_s28 = scalar_lea.sflag [#allocation7], %s3416_s15 }
0x10cf   : > { %4304 = dma.done.wait (!%p4135_p12), %s3417_s28, 80  }
0x10d0   : > { %4306 = vsyncadd (!%p4135_p12), %s3417_s28, 4294967216  ;;  %p21_p5 = scmp.ge.s32.totalorder %s4401_s30, 4   ;;  %s5432_s24 = smov %s4313_s25 }
0x10d1   : > { %s5433_s25 = smov %s4317_s26  ;;  %s5434_s26 = smov %s4414_s10 }
0x10d2   : > { %s5435_s27 = smov %s4401_s30  ;;  %23 = sbr.rel (!%p21_p5) target bundleno = 5 (0x5), region = 107 }
0x10d9   :  { %3430 = vsyncpa [#allocation5], 1 }
0x10da   :  { %3432 = vsyncpa [#allocation5 + $0x1], 1 }
0x10db   :  { %3433 = vsyncpa [#allocation7], 1 }
0x10dc   :  { %3435 = vsyncpa [#allocation7 + $0x1], 1 }

</bundles_post_ra>
